<compile_context>
chip_gen: v7x
topology: tpu7x:2x2x1
jax: 0.10.0
libtpu: 0.0.40
codegen_flags: <defaults>
</compile_context>

<pallas_src>
import jax
import jax.numpy as jnp
from jax.experimental import pallas as pl
from jax.experimental.pallas import tpu as pltpu

EPS = 1e-5
H1, H2 = 2048, 512


def _permutation_kernel(
    x_ref,    # (B, tk)      f32   K-tiled input slice
    w1_ref,   # (tk, 2048)   bf16  K-tiled weight slice
    p1_ref,   # (2, 2048)    f32   rows: [gamma1, beta1]
    w2_ref,   # (2048, 512)  bf16  resident across grid
    p2_ref,   # (2, 512)     f32   rows: [gamma2, beta2]
    w3_ref,   # (512, Npad)  bf16  resident across grid
    b3_ref,   # (1, Npad)    f32
    out_ref,  # (B, Npad)    f32   resident across grid
    acc_ref,  # (B, 2048)    f32   scratch: layer-1 accumulator
):
    k = pl.program_id(0)

    @pl.when(k == 0)
    def _():
        acc_ref[...] = jnp.zeros_like(acc_ref)

    # ---- Linear 1 (K-tiled, bf16 MXU, f32 accumulation). Bias omitted: it
    # cancels exactly under the batch-mean subtraction of train-mode BN. ----
    acc_ref[...] += jnp.dot(
        x_ref[...].astype(jnp.bfloat16), w1_ref[...],
        preferred_element_type=jnp.float32)

    @pl.when(k == pl.num_programs(0) - 1)
    def _():
        # ---- BatchNorm1d(2048) (train-mode batch stats, fused) + ReLU ----
        h1 = acc_ref[...]
        mean1 = jnp.mean(h1, axis=0, keepdims=True)
        var1 = jnp.maximum(
            jnp.mean(h1 * h1, axis=0, keepdims=True) - mean1 * mean1, 0.0)
        scale1 = p1_ref[0:1, :] * jax.lax.rsqrt(var1 + EPS)   # EUP rsqrt
        shift1 = p1_ref[1:2, :] - mean1 * scale1
        h1 = jnp.maximum(h1 * scale1 + shift1, 0.0)

        # ---- Linear 2 (bias cancels) + BatchNorm1d(512) + ReLU ----
        h2 = jnp.dot(h1.astype(jnp.bfloat16), w2_ref[...],
                     preferred_element_type=jnp.float32)
        mean2 = jnp.mean(h2, axis=0, keepdims=True)
        var2 = jnp.maximum(
            jnp.mean(h2 * h2, axis=0, keepdims=True) - mean2 * mean2, 0.0)
        scale2 = p2_ref[0:1, :] * jax.lax.rsqrt(var2 + EPS)
        shift2 = p2_ref[1:2, :] - mean2 * scale2
        h2 = jnp.maximum(h2 * scale2 + shift2, 0.0)

        # ---- Linear 3 (classifier head, lane-padded output) ----
        out = jnp.dot(h2.astype(jnp.bfloat16), w3_ref[...],
                      preferred_element_type=jnp.float32) + b3_ref[...]
        out_ref[...] = out.astype(out_ref.dtype)


def pack_params(params, classes):
    """One-time repack of the f32 master params into the kernel's HBM layout:
    bf16 weights, packed (gamma, beta) per layer, 128-lane-padded head."""
    n_pad = max(128, ((classes + 127) // 128) * 128)
    w3p = jnp.zeros((H2, n_pad), jnp.float32).at[:, :classes].set(params["w3"])
    b3p = jnp.zeros((1, n_pad), jnp.float32).at[:, :classes].set(params["b3"])
    return dict(
        w1=params["w1"].astype(jnp.bfloat16),
        p1=jnp.concatenate([params["g1"], params["be1"]], axis=0),   # (2, 2048)
        w2=params["w2"].astype(jnp.bfloat16),
        p2=jnp.concatenate([params["g2"], params["be2"]], axis=0),   # (2, 512)
        w3=w3p.astype(jnp.bfloat16),
        b3=b3p,
        n_pad=n_pad,
        classes=classes,
    )


def permutation_forward(x, kp):
    """x: (B, num_image*512) float32. kp: output of pack_params. -> (B, classes)."""
    B, K = x.shape
    n_pad = kp["n_pad"]
    tk = 512 if K % 512 == 0 else K      # K is num_image*512 per the module
    n_k = K // tk

    def _rows(r):  # sublane padding for VMEM footprint estimate
        return ((r + 7) // 8) * 8

    # Conservative VMEM budget: double-buffered blocks + the f32 accumulator.
    block_bytes = (
        _rows(B) * tk * 4          # x tile (f32)
        + tk * H1 * 2              # w1 tile (bf16)
        + 8 * H1 * 4               # (gamma1, beta1)
        + H1 * H2 * 2              # w2 (bf16)
        + 8 * H2 * 4               # (gamma2, beta2)
        + H2 * n_pad * 2           # w3 (bf16)
        + 8 * n_pad * 4            # b3
        + _rows(B) * n_pad * 4     # out
    )
    vmem_limit = min(2 * block_bytes + _rows(B) * H1 * 4 + (4 << 20),
                     60 * 1024 * 1024)        # stay under v7x's 64 MiB physical

    cost = pl.CostEstimate(
        flops=2 * B * (K * H1 + H1 * H2 + H2 * n_pad),
        transcendentals=H1 + H2,              # one rsqrt per BN feature
        bytes_accessed=int(
            x.size * 4 + kp["w1"].size * 2 + kp["p1"].size * 4
            + kp["w2"].size * 2 + kp["p2"].size * 4
            + kp["w3"].size * 2 + kp["b3"].size * 4 + B * n_pad * 4),
    )

    grid_spec = pltpu.PrefetchScalarGridSpec(
        num_scalar_prefetch=0,
        grid=(n_k,),
        in_specs=[
            pl.BlockSpec((B, tk), lambda k: (0, k)),       # x: K-tiled
            pl.BlockSpec((tk, H1), lambda k: (k, 0)),      # w1: K-tiled
            pl.BlockSpec((2, H1), lambda k: (0, 0)),       # (gamma1, beta1)
            pl.BlockSpec((H1, H2), lambda k: (0, 0)),      # w2 resident
            pl.BlockSpec((2, H2), lambda k: (0, 0)),       # (gamma2, beta2)
            pl.BlockSpec((H2, n_pad), lambda k: (0, 0)),   # w3 resident
            pl.BlockSpec((1, n_pad), lambda k: (0, 0)),    # b3
        ],
        out_specs=pl.BlockSpec((B, n_pad), lambda k: (0, 0)),
        scratch_shapes=[pltpu.VMEM((B, H1), jnp.float32)],
    )

    out = pl.pallas_call(
        _permutation_kernel,
        out_shape=jax.ShapeDtypeStruct((B, n_pad), jnp.float32),
        grid_spec=grid_spec,
        compiler_params=pltpu.CompilerParams(
            dimension_semantics=("arbitrary",),   # K is a reduction axis
            vmem_limit_bytes=int(vmem_limit),
        ),
        cost_estimate=cost,
    )(x, kp["w1"], kp["p1"], kp["w2"], kp["p2"], kp["w3"], kp["b3"])

    return out[:, :kp["classes"]]


def init_params(key, num_image, classes):
    """Deterministic synthetic init matching the PyTorch module's shapes.
    Linear weights: xavier_normal; biases: 0.1. BN gamma=1, beta=0."""
    in_dim = num_image * 512
    dims = [(in_dim, H1), (H1, H2), (H2, classes)]
    keys = jax.random.split(key, len(dims))
    params = {}
    for idx, ((fan_in, fan_out), k) in enumerate(zip(dims, keys), start=1):
        std = (2.0 / (fan_in + fan_out)) ** 0.5
        params[f"w{idx}"] = std * jax.random.normal(k, (fan_in, fan_out), jnp.float32)
        params[f"b{idx}"] = jnp.full((1, fan_out), 0.1, jnp.float32)
    params["g1"] = jnp.ones((1, H1), jnp.float32)
    params["be1"] = jnp.zeros((1, H1), jnp.float32)
    params["g2"] = jnp.ones((1, H2), jnp.float32)
    params["be2"] = jnp.zeros((1, H2), jnp.float32)
    return params


def reference_forward(x, params):
    """Pure-JAX reference with the module's train-mode semantics, applying the
    same bf16 rounding the kernel applies at the MXU inputs. Note it KEEPS the
    Linear-1/2 biases (spec form) — they cancel under the BN mean subtraction,
    which is exactly why the kernel drops them."""
    bf = lambda a: a.astype(jnp.bfloat16).astype(jnp.float32)
    h = bf(x) @ bf(params["w1"]) + params["b1"]
    m, v = jnp.mean(h, 0, keepdims=True), jnp.var(h, 0, keepdims=True)
    h = jnp.maximum((h - m) * jax.lax.rsqrt(v + EPS) * params["g1"] + params["be1"], 0.0)
    h = bf(h) @ bf(params["w2"]) + params["b2"]
    m, v = jnp.mean(h, 0, keepdims=True), jnp.var(h, 0, keepdims=True)
    h = jnp.maximum((h - m) * jax.lax.rsqrt(v + EPS) * params["g2"] + params["be2"], 0.0)
    return bf(h) @ bf(params["w3"]) + params["b3"]


if __name__ == "__main__":
    key = jax.random.PRNGKey(0)
    k_param, k_x = jax.random.split(key)

    num_image = 2     # input features = num_image * 512 = 1024
    classes = 10
    batch = 8         # NOTE: PyTorch train-mode BatchNorm rejects batch == 1

    params = init_params(k_param, num_image, classes)
    kparams = pack_params(params, classes)
    x = jax.random.normal(k_x, (batch, num_image * 512), jnp.float32)

    out = jax.block_until_ready(permutation_forward(x, kparams))
    ref = reference_forward(x, params)

    assert out.shape == (batch, classes)
    # bf16 weight/activation rounding widens the tolerance vs the f32 reference.
    assert jnp.allclose(out, ref, atol=1e-2, rtol=1e-2), "mismatch vs JAX reference"

    print("KERNEL_OK")
</pallas_src>

<mosaic_0001>
module attributes {stable_mosaic.version = 11 : i64} {
  func.func @_permutation_kernel(%arg0: i32, %arg1: memref<8x512xf32, #tpu.memory_space<vmem>>, %arg2: memref<512x2048xbf16, #tpu.memory_space<vmem>>, %arg3: memref<2x2048xf32, #tpu.memory_space<vmem>>, %arg4: memref<2048x512xbf16, #tpu.memory_space<vmem>>, %arg5: memref<2x512xf32, #tpu.memory_space<vmem>>, %arg6: memref<512x128xbf16, #tpu.memory_space<vmem>>, %arg7: memref<1x128xf32, #tpu.memory_space<vmem>>, %arg8: memref<8x128xf32, #tpu.memory_space<vmem>>, %arg9: memref<8x2048xf32, #tpu.memory_space<vmem>>) attributes {dimension_semantics = [#tpu.dimension_semantics<arbitrary>], iteration_bounds = array<i64: 2>, scalar_prefetch = 0 : i64, scratch_operands = 1 : i64, tpu.core_type = #tpu.core_type<tc>, window_params = [{transform_indices = @transform_0, window_bounds = array<i64: 8, 512>}, {transform_indices = @transform_1, window_bounds = array<i64: 512, 2048>}, {pipeline_mode = #tpu.pipeline_mode<synchronous>, transform_indices = @transform_2, window_bounds = array<i64: 2, 2048>}, {pipeline_mode = #tpu.pipeline_mode<synchronous>, transform_indices = @transform_3, window_bounds = array<i64: 2048, 512>}, {pipeline_mode = #tpu.pipeline_mode<synchronous>, transform_indices = @transform_4, window_bounds = array<i64: 2, 512>}, {pipeline_mode = #tpu.pipeline_mode<synchronous>, transform_indices = @transform_5, window_bounds = array<i64: 512, 128>}, {pipeline_mode = #tpu.pipeline_mode<synchronous>, transform_indices = @transform_6, window_bounds = array<i64: 1, 128>}, {pipeline_mode = #tpu.pipeline_mode<synchronous>, transform_indices = @transform_7, window_bounds = array<i64: 8, 128>}]} {
    %c0_i32 = arith.constant 0 : i32
    %0 = arith.cmpi eq, %arg0, %c0_i32 : i32
    %1 = arith.extui %0 : i1 to i32
    %c0_i32_0 = arith.constant 0 : i32
    %2 = arith.cmpi ne, %1, %c0_i32_0 : i32
    scf.if %2 {
      %cst_9 = arith.constant 0.000000e+00 : f32
      %13 = vector.broadcast %cst_9 : f32 to vector<8x2048xf32>
      %c0_10 = arith.constant 0 : index
      %c0_11 = arith.constant 0 : index
      %14 = vector.load %arg9[%c0_10, %c0_11] : memref<8x2048xf32, #tpu.memory_space<vmem>>, vector<8x2048xf32>
      tpu.vector_store %arg9[%c0_10, %c0_11], %13 {strides = array<i32>} : memref<8x2048xf32, #tpu.memory_space<vmem>>, vector<8x2048xf32>,
    } else {
    }
    %c0 = arith.constant 0 : index
    %c0_1 = arith.constant 0 : index
    %3 = vector.load %arg9[%c0, %c0_1] : memref<8x2048xf32, #tpu.memory_space<vmem>>, vector<8x2048xf32>
    %c0_2 = arith.constant 0 : index
    %c0_3 = arith.constant 0 : index
    %4 = vector.load %arg1[%c0_2, %c0_3] : memref<8x512xf32, #tpu.memory_space<vmem>>, vector<8x512xf32>
    %5 = arith.truncf %4 : vector<8x512xf32> to vector<8x512xbf16>
    %c0_4 = arith.constant 0 : index
    %c0_5 = arith.constant 0 : index
    %6 = vector.load %arg2[%c0_4, %c0_5] : memref<512x2048xbf16, #tpu.memory_space<vmem>>, vector<512x2048xbf16>
    %cst = arith.constant dense<0.000000e+00> : vector<8x2048xf32>
    %7 = tpu.matmul %5, %6, %cst {dimension_numbers = #tpu.dot_dimension_numbers<[1], [0], [0], [1], [0, 0, 1, 1], [], []>} : vector<8x512xbf16>, vector<512x2048xbf16>, vector<8x2048xf32> -> vector<8x2048xf32>
    %8 = arith.addf %3, %7 : vector<8x2048xf32>
    %c0_6 = arith.constant 0 : index
    %c0_7 = arith.constant 0 : index
    %9 = vector.load %arg9[%c0_6, %c0_7] : memref<8x2048xf32, #tpu.memory_space<vmem>>, vector<8x2048xf32>
    tpu.vector_store %arg9[%c0_6, %c0_7], %8 {strides = array<i32>} : memref<8x2048xf32, #tpu.memory_space<vmem>>, vector<8x2048xf32>,
    %c1_i32 = arith.constant 1 : i32
    %10 = arith.cmpi eq, %arg0, %c1_i32 : i32
    %11 = arith.extui %10 : i1 to i32
    %c0_i32_8 = arith.constant 0 : i32
    %12 = arith.cmpi ne, %11, %c0_i32_8 : i32
    scf.if %12 {
      %c0_9 = arith.constant 0 : index
      %c0_10 = arith.constant 0 : index
      %13 = vector.load %arg9[%c0_9, %c0_10] : memref<8x2048xf32, #tpu.memory_space<vmem>>, vector<8x2048xf32>
      %cst_11 = arith.constant dense<0.000000e+00> : vector<2048xf32>
      %14 = vector.multi_reduction <add>, %13, %cst_11 [0] : vector<8x2048xf32> to vector<2048xf32>
      %15 = vector.shape_cast %14 : vector<2048xf32> to vector<1x2048xf32>
      %cst_12 = arith.constant 8.000000e+00 : f32
      %16 = vector.broadcast %cst_12 : f32 to vector<1x2048xf32>
      %17 = arith.divf %15, %16 : vector<1x2048xf32>
      %18 = arith.mulf %13, %13 : vector<8x2048xf32>
      %cst_13 = arith.constant dense<0.000000e+00> : vector<2048xf32>
      %19 = vector.multi_reduction <add>, %18, %cst_13 [0] : vector<8x2048xf32> to vector<2048xf32>
      %20 = vector.shape_cast %19 : vector<2048xf32> to vector<1x2048xf32>
      %cst_14 = arith.constant 8.000000e+00 : f32
      %21 = vector.broadcast %cst_14 : f32 to vector<1x2048xf32>
      %22 = arith.divf %20, %21 : vector<1x2048xf32>
      %23 = arith.mulf %17, %17 : vector<1x2048xf32>
      %24 = arith.subf %22, %23 : vector<1x2048xf32>
      %cst_15 = arith.constant 0.000000e+00 : f32
      %25 = vector.broadcast %cst_15 : f32 to vector<1x2048xf32>
      %26 = arith.maximumf %24, %25 : vector<1x2048xf32>
      %c0_16 = arith.constant 0 : index
      %c0_17 = arith.constant 0 : index
      %27 = vector.load %arg3[%c0_16, %c0_17] : memref<2x2048xf32, #tpu.memory_space<vmem>>, vector<1x2048xf32>
      %cst_18 = arith.constant 9.99999974E-6 : f32
      %28 = vector.broadcast %cst_18 : f32 to vector<1x2048xf32>
      %29 = arith.addf %26, %28 : vector<1x2048xf32>
      %30 = math.rsqrt %29 : vector<1x2048xf32>
      %31 = arith.mulf %27, %30 : vector<1x2048xf32>
      %c1 = arith.constant 1 : index
      %c0_19 = arith.constant 0 : index
      %32 = vector.load %arg3[%c1, %c0_19] : memref<2x2048xf32, #tpu.memory_space<vmem>>, vector<1x2048xf32>
      %33 = arith.mulf %17, %31 : vector<1x2048xf32>
      %34 = arith.subf %32, %33 : vector<1x2048xf32>
      %35 = vector.broadcast %31 : vector<1x2048xf32> to vector<8x2048xf32>
      %36 = arith.mulf %13, %35 : vector<8x2048xf32>
      %37 = vector.broadcast %34 : vector<1x2048xf32> to vector<8x2048xf32>
      %38 = arith.addf %36, %37 : vector<8x2048xf32>
      %cst_20 = arith.constant 0.000000e+00 : f32
      %39 = vector.broadcast %cst_20 : f32 to vector<8x2048xf32>
      %40 = arith.maximumf %38, %39 : vector<8x2048xf32>
      %41 = arith.truncf %40 : vector<8x2048xf32> to vector<8x2048xbf16>
      %c0_21 = arith.constant 0 : index
      %c0_22 = arith.constant 0 : index
      %42 = vector.load %arg4[%c0_21, %c0_22] : memref<2048x512xbf16, #tpu.memory_space<vmem>>, vector<2048x512xbf16>
      %cst_23 = arith.constant dense<0.000000e+00> : vector<8x512xf32>
      %43 = tpu.matmul %41, %42, %cst_23 {dimension_numbers = #tpu.dot_dimension_numbers<[1], [0], [0], [1], [0, 0, 1, 1], [], []>} : vector<8x2048xbf16>, vector<2048x512xbf16>, vector<8x512xf32> -> vector<8x512xf32>
      %cst_24 = arith.constant dense<0.000000e+00> : vector<512xf32>
      %44 = vector.multi_reduction <add>, %43, %cst_24 [0] : vector<8x512xf32> to vector<512xf32>
      %45 = vector.shape_cast %44 : vector<512xf32> to vector<1x512xf32>
      %cst_25 = arith.constant 8.000000e+00 : f32
      %46 = vector.broadcast %cst_25 : f32 to vector<1x512xf32>
      %47 = arith.divf %45, %46 : vector<1x512xf32>
      %48 = arith.mulf %43, %43 : vector<8x512xf32>
      %cst_26 = arith.constant dense<0.000000e+00> : vector<512xf32>
      %49 = vector.multi_reduction <add>, %48, %cst_26 [0] : vector<8x512xf32> to vector<512xf32>
      %50 = vector.shape_cast %49 : vector<512xf32> to vector<1x512xf32>
      %cst_27 = arith.constant 8.000000e+00 : f32
      %51 = vector.broadcast %cst_27 : f32 to vector<1x512xf32>
      %52 = arith.divf %50, %51 : vector<1x512xf32>
      %53 = arith.mulf %47, %47 : vector<1x512xf32>
      %54 = arith.subf %52, %53 : vector<1x512xf32>
      %cst_28 = arith.constant 0.000000e+00 : f32
      %55 = vector.broadcast %cst_28 : f32 to vector<1x512xf32>
      %56 = arith.maximumf %54, %55 : vector<1x512xf32>
      %c0_29 = arith.constant 0 : index
      %c0_30 = arith.constant 0 : index
      %57 = vector.load %arg5[%c0_29, %c0_30] : memref<2x512xf32, #tpu.memory_space<vmem>>, vector<1x512xf32>
      %cst_31 = arith.constant 9.99999974E-6 : f32
      %58 = vector.broadcast %cst_31 : f32 to vector<1x512xf32>
      %59 = arith.addf %56, %58 : vector<1x512xf32>
      %60 = math.rsqrt %59 : vector<1x512xf32>
      %61 = arith.mulf %57, %60 : vector<1x512xf32>
      %c1_32 = arith.constant 1 : index
      %c0_33 = arith.constant 0 : index
      %62 = vector.load %arg5[%c1_32, %c0_33] : memref<2x512xf32, #tpu.memory_space<vmem>>, vector<1x512xf32>
      %63 = arith.mulf %47, %61 : vector<1x512xf32>
      %64 = arith.subf %62, %63 : vector<1x512xf32>
      %65 = vector.broadcast %61 : vector<1x512xf32> to vector<8x512xf32>
      %66 = arith.mulf %43, %65 : vector<8x512xf32>
      %67 = vector.broadcast %64 : vector<1x512xf32> to vector<8x512xf32>
      %68 = arith.addf %66, %67 : vector<8x512xf32>
      %cst_34 = arith.constant 0.000000e+00 : f32
      %69 = vector.broadcast %cst_34 : f32 to vector<8x512xf32>
      %70 = arith.maximumf %68, %69 : vector<8x512xf32>
      %71 = arith.truncf %70 : vector<8x512xf32> to vector<8x512xbf16>
      %c0_35 = arith.constant 0 : index
      %c0_36 = arith.constant 0 : index
      %72 = vector.load %arg6[%c0_35, %c0_36] : memref<512x128xbf16, #tpu.memory_space<vmem>>, vector<512x128xbf16>
      %cst_37 = arith.constant dense<0.000000e+00> : vector<8x128xf32>
      %73 = tpu.matmul %71, %72, %cst_37 {dimension_numbers = #tpu.dot_dimension_numbers<[1], [0], [0], [1], [0, 0, 1, 1], [], []>} : vector<8x512xbf16>, vector<512x128xbf16>, vector<8x128xf32> -> vector<8x128xf32>
      %c0_38 = arith.constant 0 : index
      %c0_39 = arith.constant 0 : index
      %74 = vector.load %arg7[%c0_38, %c0_39] : memref<1x128xf32, #tpu.memory_space<vmem>>, vector<1x128xf32>
      %75 = vector.broadcast %74 : vector<1x128xf32> to vector<8x128xf32>
      %76 = arith.addf %73, %75 : vector<8x128xf32>
      %c0_40 = arith.constant 0 : index
      %c0_41 = arith.constant 0 : index
      %77 = vector.load %arg8[%c0_40, %c0_41] : memref<8x128xf32, #tpu.memory_space<vmem>>, vector<8x128xf32>
      tpu.vector_store %arg8[%c0_40, %c0_41], %76 {strides = array<i32>} : memref<8x128xf32, #tpu.memory_space<vmem>>, vector<8x128xf32>,
    } else {
    }
    return
  }
  func.func @transform_0(%arg0: i32) -> (i32, i32) {
    %c0_i32 = arith.constant 0 : i32
    %c0_i32_0 = arith.constant 0 : i32
    return %c0_i32, %arg0 : i32, i32
  }
  func.func @transform_1(%arg0: i32) -> (i32, i32) {
    %c0_i32 = arith.constant 0 : i32
    %c0_i32_0 = arith.constant 0 : i32
    return %arg0, %c0_i32 : i32, i32
  }
  func.func @transform_2(%arg0: i32) -> (i32, i32) {
    %c0_i32 = arith.constant 0 : i32
    %c0_i32_0 = arith.constant 0 : i32
    %c0_i32_1 = arith.constant 0 : i32
    return %c0_i32, %c0_i32_0 : i32, i32
  }
  func.func @transform_3(%arg0: i32) -> (i32, i32) {
    %c0_i32 = arith.constant 0 : i32
    %c0_i32_0 = arith.constant 0 : i32
    %c0_i32_1 = arith.constant 0 : i32
    return %c0_i32, %c0_i32_0 : i32, i32
  }
  func.func @transform_4(%arg0: i32) -> (i32, i32) {
    %c0_i32 = arith.constant 0 : i32
    %c0_i32_0 = arith.constant 0 : i32
    %c0_i32_1 = arith.constant 0 : i32
    return %c0_i32, %c0_i32_0 : i32, i32
  }
  func.func @transform_5(%arg0: i32) -> (i32, i32) {
    %c0_i32 = arith.constant 0 : i32
    %c0_i32_0 = arith.constant 0 : i32
    %c0_i32_1 = arith.constant 0 : i32
    return %c0_i32, %c0_i32_0 : i32, i32
  }
  func.func @transform_6(%arg0: i32) -> (i32, i32) {
    %c0_i32 = arith.constant 0 : i32
    %c0_i32_0 = arith.constant 0 : i32
    %c0_i32_1 = arith.constant 0 : i32
    return %c0_i32, %c0_i32_0 : i32, i32
  }
  func.func @transform_7(%arg0: i32) -> (i32, i32) {
    %c0_i32 = arith.constant 0 : i32
    %c0_i32_0 = arith.constant 0 : i32
    %c0_i32_1 = arith.constant 0 : i32
    return %c0_i32, %c0_i32_0 : i32, i32
  }
}

</mosaic_0001>

<bundles_post_ra>
// kernel: tpu_custom_call.1
= control target key start
LH: loop header
LB: loop body
LE: loop exit
PB: predicated region body
PF: predicated region fallthrough
CT: control target
= control target key end

     0   :  { %s13168_s0 = inlined_call_operand.hbm [shape: f32[8,1024], index: 0, kind: input, shape index: {}]   ;;  %s13169_s1 = inlined_call_operand.hbm [shape: bf16[1024,2048], index: 1, kind: input, shape index: {}]   ;;  %s13170_s2 = inlined_call_operand.hbm [shape: f32[2,2048], index: 2, kind: input, shape index: {}]   ;;  %s13171_s3 = inlined_call_operand.hbm [shape: bf16[2048,512], index: 3, kind: input, shape index: {}]   ;;  %s13172_s4 = inlined_call_operand.hbm [shape: f32[2,512], index: 4, kind: input, shape index: {}]   ;;  %s13173_s5 = inlined_call_operand.hbm [shape: bf16[512,128], index: 5, kind: input, shape index: {}]   ;;  %s13174_s6 = inlined_call_operand.hbm [shape: f32[1,128], index: 6, kind: input, shape index: {}]   ;;  %s13175_s7 = inlined_call_operand.hbm [shape: f32[8,128], index: 7, kind: output, shape index: {}]  }
   0x1   :  { %13178 = sst [smem:[#allocation22_spill]] %s13170_s2 }
   0x2   :  { %12 = vsyncpa [#allocation4], 0 }
   0x3   :  { %14 = vsyncpa [#allocation4 + $0x1], 0 }
   0x4   :  { %15 = vsyncpa [#allocation7], 0 }
   0x5   :  { %17 = vsyncpa [#allocation7 + $0x1], 0 }
   0x6   :  { %18 = vsyncpa [#allocation10], 0 }
   0x7   :  { %19 = vsyncpa [#allocation13], 0 }
   0x8   :  { %20 = vsyncpa [#allocation5], 0  ;;  %s11917_s24 = smov 0   ;;  %s11919_s25 = smov 0  }
   0x9   :  { %s11921_s26 = smov 0   ;;  %s11923_s27 = smov 0  }
   0xa LB: > { %s11862_s28 = smov [#allocation8]   ;;  %s11938_s30 = sadd.s32 4294967295, %s11860_s27   ;;  %s11860_s27 = sphi %s11923_s27, %s13197_s27   ;;  %s11856_s26 = sphi %s11921_s26, %s13196_s26   ;;  %s11852_s25 = sphi %s11919_s25, %s13195_s25   ;;  %s11848_s24 = sphi %s11917_s24, %s13194_s24  }
   0xb   : > { %s222_s29 = sshll.u32 %s11862_s28, 4  ;;  %p9430_p0 = scmp.ge.s32.totalorder %s11860_s27, 1  ;;  %s223_s29 = int_to_ptr.vmem [resolvable:$true] %s222_s29 }
   0xc   : > { %p13176_p1 = scmp.eq.s32.totalorder %s11938_s30, 0  ;;  %p209_p2 = scmp.lt.s32.totalorder %s11860_s27, 3 }
   0xd   : > { %s11863_s9 = smov [#allocation9]   ;;  %s11864_s12 = smov [#allocation12]  }
   0xe   : > { %p11944_p4 = pnand %p9430_p0, %p209_p2  ;;  %s232_s10 = sshll.u32 %s11863_s9, 4  ;;  %s11950_s10 = int_to_ptr.vmem [resolvable:$true] %s232_s10 }
   0xf   : > { %s256_s13 = sshll.u32 %s11864_s12, 4  ;;  %s13181_s2 = sld [smem:[#allocation22_spill]]  ;;  %s11958_s13 = int_to_ptr.vmem [resolvable:$true] %s256_s13 }
  0x10   : > { %s13179_s8 = scalar_select %p11944_p4, 1, 0 }
  0x11   : > { %p10646_p5 = pneg %p11944_p4 }
  0x13   : > { %p11954_p6 = pnand %p10646_p5, %p13176_p1 }
  0x15   : > { %s11580_s16 = scalar_lea.hbm %s13181_s2, 512  ;;  %p11968_p8 = pneg %p11954_p6 }
  0x16   : > { %p11581_p7 = scmp.ne.s32.totalorder %s13181_s2, %s11580_s16  ;;  %p11587_p11 = scmp.lt.u32.totalorder %s11580_s16, %s13181_s2 }
  0x18   : > { %p11583_p9 = pnand %p11968_p8, %p11581_p7 }
  0x1a   : > { %p11584_p10 = pneg %p11583_p9 }
  0x1c   : > { %p11589_p12 = pnand %p11587_p11, %p11584_p10 }
  0x1e   : > { %11592 = shalt.err (!%p11589_p12)
}
  0x1f   : > { %s11593_s22 = scalar_lea.vmem %s223_s29, 512  ;;  %p11601_p5 = scmp.lt.s32.totalorder %s223_s29, %s223_s29 }
  0x20   : > { %p11594_p13 = scmp.ne.s32.totalorder %s223_s29, %s11593_s22  ;;  %p11602_p3 = scmp.lt.s32.totalorder %s11593_s22, %s11593_s22 }
  0x22   : > { %p11596_p0 = pnand %p11594_p13, %p11968_p8  ;;  %p11603_p1 = por %p11602_p3, %p11601_p5 }
  0x24   : > { %p11597_p2 = pneg %p11596_p0 }
  0x26   : > { %p11604_p4 = pnand %p11603_p1, %p11597_p2 }
  0x28   : > { %11607 = shalt.err (!%p11604_p4)
}
  0x29   : > { %10649 = dma.hbm_to_vmem [thread:$0]  (!%p11954_p6), %s13181_s2, 512, %s223_s29, [#allocation7]  }
  0x2a   : > { %s11608_s14 = scalar_lea.hbm %s13171_s3, 65536 }
  0x2b   : > { %p11609_p7 = scmp.ne.s32.totalorder %s13171_s3, %s11608_s14  ;;  %p11615_p1 = scmp.lt.u32.totalorder %s11608_s14, %s13171_s3 }
  0x2d   : > { %p11611_p9 = pnand %p11609_p7, %p11968_p8 }
  0x2f   : > { %p11612_p3 = pneg %p11611_p9 }
  0x31   : > { %p11617_p4 = pnand %p11615_p1, %p11612_p3 }
  0x33   : > { %11620 = shalt.err (!%p11617_p4)
}
  0x34   : > { %s11621_s29 = scalar_lea.vmem %s11950_s10, 65536  ;;  %p11629_p13 = scmp.lt.s32.totalorder %s11950_s10, %s11950_s10 }
  0x35   : > { %p11622_p10 = scmp.ne.s32.totalorder %s11950_s10, %s11621_s29  ;;  %p11630_p0 = scmp.lt.s32.totalorder %s11621_s29, %s11621_s29 }
  0x37   : > { %p11624_p11 = pnand %p11622_p10, %p11968_p8  ;;  %p11631_p2 = por %p11630_p0, %p11629_p13 }
  0x39   : > { %p11625_p12 = pneg %p11624_p11 }
  0x3b   : > { %p11632_p5 = pnand %p11631_p2, %p11625_p12 }
  0x3d   : > { %11635 = shalt.err (!%p11632_p5)
}
  0x3e   : > { %s11865_s20 = smov 256   ;;  %s11866_s21 = smov 16  }
  0x3f   : > { %10652 = dma.hbm_to_vmem [thread:$0]  (!%p11954_p6), %s13171_s3, 65536, %s11950_s10, [#allocation10], %s11865_s20, %s11865_s20, %s11866_s21  }
  0x40   : > { %s11636_s12 = scalar_lea.hbm %s13173_s5, 4096 }
  0x41   : > { %p11637_p7 = scmp.ne.s32.totalorder %s13173_s5, %s11636_s12  ;;  %p11643_p1 = scmp.lt.u32.totalorder %s11636_s12, %s13173_s5 }
  0x43   : > { %p11639_p9 = pnand %p11637_p7, %p11968_p8 }
  0x45   : > { %p11640_p3 = pneg %p11639_p9 }
  0x47   : > { %p11645_p4 = pnand %p11643_p1, %p11640_p3 }
  0x49   : > { %11648 = shalt.err (!%p11645_p4)
}
  0x4a   : > { %s11649_s10 = scalar_lea.vmem %s11958_s13, 4096  ;;  %p11657_p13 = scmp.lt.s32.totalorder %s11958_s13, %s11958_s13 }
  0x4b   : > { %p11650_p10 = scmp.ne.s32.totalorder %s11958_s13, %s11649_s10  ;;  %p11658_p0 = scmp.lt.s32.totalorder %s11649_s10, %s11649_s10 }
  0x4d   : > { %p11652_p11 = pnand %p11650_p10, %p11968_p8  ;;  %p11659_p2 = por %p11658_p0, %p11657_p13 }
  0x4f   : > { %p11653_p12 = pneg %p11652_p11 }
  0x51   : > { %p11660_p5 = pnand %p11659_p2, %p11653_p12 }
  0x53   : > { %11663 = shalt.err (!%p11660_p5)
}
  0x54   : > { %s11867_s18 = smov 64   ;;  %s11868_s29 = smov 4  }
  0x55   : > { %10658 = dma.hbm_to_vmem [thread:$0]  (!%p11954_p6), %s13173_s5, 4096, %s11958_s13, [#allocation13], %s11867_s18, %s11867_s18, %s11868_s29  }
  0x56   : > { %s11869_s22 = smov [#allocation11]   ;;  %s11870_s28 = smov [#allocation14]  }
  0x57   : > { %s246_s23 = sshll.u32 %s11869_s22, 4  ;;  %s270_s9 = sshll.u32 %s11870_s28, 4  ;;  %s247_s23 = int_to_ptr.vmem [resolvable:$true] %s246_s23  ;;  %s271_s9 = int_to_ptr.vmem [resolvable:$true] %s270_s9 }
  0x58   : > { %s11664_s15 = scalar_lea.hbm %s13172_s4, 128 }
  0x59   : > { %p11665_p7 = scmp.ne.s32.totalorder %s13172_s4, %s11664_s15  ;;  %p11671_p1 = scmp.lt.u32.totalorder %s11664_s15, %s13172_s4 }
  0x5b   : > { %p11667_p9 = pnand %p11665_p7, %p11968_p8 }
  0x5d   : > { %p11668_p3 = pneg %p11667_p9 }
  0x5f   : > { %p11673_p4 = pnand %p11671_p1, %p11668_p3 }
  0x61   : > { %11676 = shalt.err (!%p11673_p4)
}
  0x62   : > { %s11677_s13 = scalar_lea.vmem %s247_s23, 128  ;;  %p11685_p13 = scmp.lt.s32.totalorder %s247_s23, %s247_s23 }
  0x63   : > { %p11678_p10 = scmp.ne.s32.totalorder %s247_s23, %s11677_s13  ;;  %p11686_p0 = scmp.lt.s32.totalorder %s11677_s13, %s11677_s13 }
  0x65   : > { %p11680_p11 = pnand %p11678_p10, %p11968_p8  ;;  %p11687_p2 = por %p11686_p0, %p11685_p13 }
  0x67   : > { %p11681_p12 = pneg %p11680_p11 }
  0x69   : > { %p11688_p5 = pnand %p11687_p2, %p11681_p12 }
  0x6b   : > { %11691 = shalt.err (!%p11688_p5)
}
  0x6c   : > { %10655 = dma.hbm_to_vmem [thread:$0]  (!%p11954_p6), %s13172_s4, 128, %s247_s23, [#allocation10]  }
  0x6d   : > { %s11692_s22 = scalar_lea.hbm %s13174_s6, 16 }
  0x6e   : > { %p11693_p7 = scmp.ne.s32.totalorder %s13174_s6, %s11692_s22  ;;  %p11699_p1 = scmp.lt.u32.totalorder %s11692_s22, %s13174_s6 }
  0x70   : > { %p11695_p9 = pnand %p11693_p7, %p11968_p8 }
  0x72   : > { %p11696_p3 = pneg %p11695_p9 }
  0x74   : > { %p11701_p4 = pnand %p11699_p1, %p11696_p3 }
  0x76   : > { %11704 = shalt.err (!%p11701_p4)
}
  0x77   : > { %s11705_s16 = scalar_lea.vmem %s271_s9, 16  ;;  %s11712_s23 = scalar_lea.vmem %s271_s9, 32 }
  0x78   : > { %p11706_p10 = scmp.ne.s32.totalorder %s271_s9, %s11705_s16  ;;  %p11713_p13 = scmp.lt.s32.totalorder %s271_s9, %s271_s9 }
  0x79   : > { %p11714_p0 = scmp.lt.s32.totalorder %s11712_s23, %s11705_s16 }
  0x7a   : > { %p11708_p11 = pnand %p11706_p10, %p11968_p8 }
  0x7b   : > { %p11715_p2 = por %p11714_p0, %p11713_p13 }
  0x7c   : > { %p11709_p12 = pneg %p11708_p11 }
  0x7e   : > { %p11716_p5 = pnand %p11715_p2, %p11709_p12 }
  0x80   : > { %11719 = shalt.err (!%p11716_p5)
}
  0x81   : > { %10661 = dma.hbm_to_vmem [thread:$0]  (!%p11954_p6), %s13174_s6, 16, %s271_s9, [#allocation13]  }
  0x82   : > { %s12069_s19 = sadd.s32 1, %s11860_s27   ;;  %s33_s13 = sadd.s32 1, %s11856_s26 }
  0x83   : > { %s30_s11 = ssub.s32 %s11860_s27, %s12069_s19  ;;  %p40_p7 = scmp.ne.s32.totalorder %s11856_s26, %s11852_s25 }
  0x84   : > { %p31_p8 = scmp.eq.s32.totalorder %s30_s11, 0  ;;  %p41_p9 = scmp.eq.s32.totalorder %s11860_s27, 0 }
  0x85   : > { %p46_p3 = scmp.ne.s32.totalorder %s11852_s25, %s11848_s24  ;;  %p13183_p4 = scmp.eq.s32.totalorder %s11938_s30, 0 }
  0x86   : > { %s12080_s29 = scalar_select %p31_p8, %s11856_s26, %s33_s13  }
  0x87   : > { %p42_p1 = por %p41_p9, %p40_p7  ;;  %p12084_p10 = por %p13183_p4, %p46_p3 }
  0x88   : > { %p10674_p11 = scmp.lt.s32.totalorder %s11860_s27, 2  ;;  %s12090_s9 = sand.u32 1, %s11856_s26  }
  0x89   : > { %s9437_s2 = sshll.u32 %s12090_s9, 5  ;;  %s10515_s21 = sshll.u32 %s11860_s27, 9 }
  0x8a   : > { %s12097_s24 = scalar_lea.hbm %s13168_s0, %s10515_s21  ;;  %s285_s12 = scalar_lea.vmem [#allocation3], %s9437_s2 }
  0x8b   : > { %s293_s14 = sshll.u32 %s285_s12, 4  ;;  %p12101_p6 = pnand %p10674_p11, %p42_p1  ;;  %s12099_s14 = int_to_ptr.vmem [resolvable:$true] %s293_s14 }
  0x8c   : > { %s9440_s16 = sshll.u32 %s12090_s9, 12  ;;  %s300_s23 = sand.u32 1, %s11860_s27  }
  0x8d   : > { %s282_s17 = scalar_lea.sflag [#allocation4], %s12090_s9  ;;  %s11720_s10 = scalar_lea.hbm %s12097_s24, 512 }
  0x8e   : > { %p11721_p12 = scmp.ne.s32.totalorder %s12097_s24, %s11720_s10  ;;  %p11722_p13 = pneg %p12101_p6 }
  0x8f   : > { %s11725_s2 = scalar_lea.hbm %s13168_s0, 1024  ;;  %p11726_p5 = scmp.lt.u32.totalorder %s12097_s24, %s13168_s0 }
  0x90   : > { %p11723_p0 = pnand %p11722_p13, %p11721_p12  ;;  %p11727_p8 = scmp.lt.u32.totalorder %s11725_s2, %s11720_s10 }
  0x91   : > { %p11729_p9 = scmp.lt.u32.totalorder %s11720_s10, %s12097_s24 }
  0x92   : > { %p11724_p2 = pneg %p11723_p0  ;;  %p11728_p7 = por %p11727_p8, %p11726_p5 }
  0x94   : > { %p11730_p3 = por %p11729_p9, %p11728_p7 }
  0x96   : > { %p11731_p1 = pnand %p11730_p3, %p11724_p2 }
  0x98   : > { %11734 = shalt.err (!%p11731_p1)
}
  0x99   : > { %s11735_s28 = scalar_lea.vmem %s12099_s14, 512  ;;  %s11871_s12 = smov [#allocation3]  }
  0x9a   : > { %p11736_p4 = scmp.ne.s32.totalorder %s12099_s14, %s11735_s28  ;;  %s11740_s11 = sshll.u32 %s11871_s12, 4  ;;  %s11741_s11 = int_to_ptr.vmem [resolvable:$false] %s11740_s11 }
  0x9b   : > { %s11742_s13 = scalar_lea.vmem %s11741_s11, 1024  ;;  %p11743_p0 = scmp.lt.s32.totalorder %s12099_s14, %s11741_s11 }
  0x9c   : > { %p11738_p11 = pnand %p11736_p4, %p11722_p13  ;;  %p11744_p5 = scmp.lt.s32.totalorder %s11742_s13, %s11735_s28 }
  0x9e   : > { %p11739_p12 = pneg %p11738_p11  ;;  %p11745_p8 = por %p11744_p5, %p11743_p0 }
  0xa0   : > { %p11746_p7 = pnand %p11745_p8, %p11739_p12 }
  0xa2   : > { %11749 = shalt.err (!%p11746_p7)
}
  0xa3   : > { %10665 = dma.hbm_to_vmem [thread:$0]  (!%p12101_p6), %s12097_s24, 512, %s12099_s14, %s282_s17  }
  0xa4   : > { %s304_s10 = scalar_lea.vmem [#allocation6], %s9440_s16  ;;  %s10517_s21 = sshll.u32 %s11860_s27, 16 }
  0xa5   : > { %s312_s2 = sshll.u32 %s304_s10, 4  ;;  %s12141_s12 = scalar_lea.hbm %s13169_s1, %s10517_s21  ;;  %s12135_s2 = int_to_ptr.vmem [resolvable:$true] %s312_s2 }
  0xa6   : > { %s12145_s11 = scalar_lea.sflag [#allocation7], %s300_s23  ;;  %s11750_s13 = scalar_lea.hbm %s12141_s12, 65536 }
  0xa7   : > { %p11751_p2 = scmp.ne.s32.totalorder %s12141_s12, %s11750_s13  ;;  %s11755_s14 = scalar_lea.hbm %s13169_s1, 131072 }
  0xa8   : > { %p11756_p1 = scmp.lt.u32.totalorder %s12141_s12, %s13169_s1  ;;  %p11757_p4 = scmp.lt.u32.totalorder %s11755_s14, %s11750_s13 }
  0xa9   : > { %p11753_p9 = pnand %p11751_p2, %p11722_p13  ;;  %p11759_p12 = scmp.lt.u32.totalorder %s11750_s13, %s12141_s12 }
  0xaa   : > { %p11758_p11 = por %p11757_p4, %p11756_p1 }
  0xab   : > { %p11754_p3 = pneg %p11753_p9 }
  0xac   : > { %p11760_p0 = por %p11759_p12, %p11758_p11 }
  0xae   : > { %p11761_p5 = pnand %p11760_p0, %p11754_p3 }
  0xb0   : > { %11764 = shalt.err (!%p11761_p5)
}
  0xb1   : > { %s11765_s27 = scalar_lea.vmem %s12135_s2, 65536  ;;  %s11872_s23 = smov [#allocation6]  }
  0xb2   : > { %p11766_p8 = scmp.ne.s32.totalorder %s12135_s2, %s11765_s27  ;;  %s11770_s10 = sshll.u32 %s11872_s23, 4  ;;  %s11771_s10 = int_to_ptr.vmem [resolvable:$false] %s11770_s10 }
  0xb3   : > { %s11772_s21 = scalar_lea.vmem %s11771_s10, 131072  ;;  %p11773_p9 = scmp.lt.s32.totalorder %s12135_s2, %s11771_s10 }
  0xb4   : > { %p11768_p7 = pnand %p11766_p8, %p11722_p13  ;;  %p11774_p1 = scmp.lt.s32.totalorder %s11772_s21, %s11765_s27 }
  0xb6   : > { %p11769_p2 = pneg %p11768_p7  ;;  %p11775_p4 = por %p11774_p1, %p11773_p9 }
  0xb8   : > { %p11776_p11 = pnand %p11775_p4, %p11769_p2 }
  0xba   : > { %11779 = shalt.err (!%p11776_p11)
}
  0xbb   : > { %s11873_s22 = smov 1024   ;;  %p13186_p13 = scmp.ne.s32.totalorder %s13179_s8, 0 }
  0xbc   : > { %10668 = dma.hbm_to_vmem [thread:$0]  (!%p12101_p6), %s12141_s12, 65536, %s12135_s2, %s12145_s11, %s11873_s22, %s11873_s22, %s11867_s18  }
  0xbd   : > { %324 = sbr.rel (%p13186_p13) target bundleno = 2020 (0x7e4), region = 48  ;;  %s326_s28 = sand.u32 (!%p13186_p13), 1, %s11852_s25  }
  0xbe   : > { %s9445_s13 = sshll.u32 (!%p13186_p13), %s326_s28, 5  ;;  %s327_s9 = scalar_lea.sflag (!%p13186_p13), [#allocation4], %s326_s28 }
  0xbf   : > { %s12175_s24 = scalar_lea.vmem (!%p13186_p13), [#allocation3], %s9445_s13 }
  0xc4   : > { %11823 = dma.done.wait (%p12084_p10), %s327_s9, 512  }
  0xc5   : > { %11825 = vsyncadd (%p12084_p10), %s327_s9, 4294966784  ;;  %s335_s15 = sand.u32 1, %s11938_s30   ;;  %s9446_s14 = sshll.u32 %s326_s28, 12 }
  0xc6   : > { %s336_s18 = scalar_lea.sflag [#allocation7], %s335_s15  ;;  %s12182_s2 = scalar_lea.vmem [#allocation6], %s9446_s14 }
  0xc7   : > { %11827 = dma.done.wait (%p12084_p10), %s336_s18, 65536  }
  0xc8   : > { %11829 = vsyncadd (%p12084_p10), %s336_s18, 4294901760  ;;  %p13187_p6 = scmp.eq.s32.totalorder %s11938_s30, 0 }
  0xca   : > { %11831 = dma.done.wait (%p13187_p6), [#allocation7], 512   ;;  %p13188_p3 = pmov %p13187_p6 }
  0xcc   : > { %11833 = vsyncadd (%p13188_p3), [#allocation7], 4294966784  ;;  %p13189_p12 = pmov %p13188_p3 }
  0xcd   : > { %p13190_p0 = pmov %p13188_p3 }
  0xce   : > { %11835 = dma.done.wait (%p13189_p12), [#allocation10], 65664  }
  0xcf   : > { %11837 = vsyncadd (%p13190_p0), [#allocation10], 4294901632  ;;  %p13191_p5 = pmov %p13190_p0 }
  0xd0   : > { %p13192_p8 = pmov %p13190_p0 }
  0xd1   : > { %11839 = dma.done.wait (%p13191_p5), [#allocation13], 4112  }
  0xd2   : > { %11841 = vsyncadd (%p13192_p8), [#allocation13], 4294963184  ;;  %p13193_p10 = scmp.ne.s32.totalorder %s11938_s30, 0 }
  0xd3   : > { %v11874_v0 = vmov (!%p13193_p10), 0.0  }
  0xd4   : > { %396 = sbr.rel (%p13193_p10) target bundleno = 220 (0xdc), region = 80  ;;  %397 = vst [vmem:[#allocation2] sm:$0xff] (!%p13193_p10), %v11874_v0  ;;  %398 = vst [vmem:[#allocation2 + $0x8] sm:$0xff] (!%p13193_p10), %v11874_v0 }
  0xd5   : > { %399 = vst [vmem:[#allocation2 + $0x10] sm:$0xff] (!%p13193_p10), %v11874_v0  ;;  %400 = vst [vmem:[#allocation2 + $0x18] sm:$0xff] (!%p13193_p10), %v11874_v0 }
  0xd6   : > { %401 = vst [vmem:[#allocation2 + $0x20] sm:$0xff] (!%p13193_p10), %v11874_v0  ;;  %402 = vst [vmem:[#allocation2 + $0x28] sm:$0xff] (!%p13193_p10), %v11874_v0 }
  0xd7   : > { %403 = vst [vmem:[#allocation2 + $0x30] sm:$0xff] (!%p13193_p10), %v11874_v0  ;;  %404 = vst [vmem:[#allocation2 + $0x38] sm:$0xff] (!%p13193_p10), %v11874_v0 }
  0xd8   : > { %405 = vst [vmem:[#allocation2 + $0x40] sm:$0xff] (!%p13193_p10), %v11874_v0  ;;  %406 = vst [vmem:[#allocation2 + $0x48] sm:$0xff] (!%p13193_p10), %v11874_v0 }
  0xd9   : > { %407 = vst [vmem:[#allocation2 + $0x50] sm:$0xff] (!%p13193_p10), %v11874_v0  ;;  %408 = vst [vmem:[#allocation2 + $0x58] sm:$0xff] (!%p13193_p10), %v11874_v0 }
  0xda   : > { %409 = vst [vmem:[#allocation2 + $0x60] sm:$0xff] (!%p13193_p10), %v11874_v0  ;;  %410 = vst [vmem:[#allocation2 + $0x68] sm:$0xff] (!%p13193_p10), %v11874_v0 }
  0xdb   : > { %411 = vst [vmem:[#allocation2 + $0x70] sm:$0xff] %v11874_v0  ;;  %412 = vst [vmem:[#allocation2 + $0x78] sm:$0xff] %v11874_v0 }
  0xdc PF: > { %v437_v1 = vld [vmem:[%s12182_s2] sm:$0xff]  ;;  %v430_v54 = vld [vmem:[%s12175_s24 + $0x8] sm:$0xff]  ;;  %v432_v55 = vld [vmem:[%s12175_s24 + $0x18] sm:$0xff]  ;;  %p9965_p7 = scmp.ne.s32.totalorder %s11938_s30, 1 }
  0xdd   : > { %v445_v2 = vld [vmem:[%s12182_s2 + $0x40] sm:$0xff]  ;;  %v12234_v59 = vpack.c.bf16 %v430_v54, %v430_v54  ;;  %v12236_v60 = vpack.c.bf16 %v432_v55, %v432_v55 }
  0xde   : > { %v693_v3 = vld [vmem:[%s12182_s2 + $0x800] sm:$0xff]  ;;  %v9454_v4 = vcombine.high %v437_v1, %v445_v2  ;;  %v9453_v6 = vcombine.low %v437_v1, %v445_v2 }
  0xdf   : > { %v701_v5 = vld [vmem:[%s12182_s2 + $0x840] sm:$0xff]  ;;  %3541 = vmatprep.mubr.bf16.mxu0 %v12234_v59  ;;  %3582 = vmatprep.mubr.bf16.mxu1 %v12236_v60 }
  0xe0   : > { %v453_v7 = vld [vmem:[%s12182_s2 + $0x80] sm:$0xff]  ;;  %v9710_v9 = vcombine.high %v693_v3, %v701_v5  ;;  %v9709_v10 = vcombine.low %v693_v3, %v701_v5  ;;  %3509 = vmatprep.subr.bf16.mxu0 %v9454_v4 }
  0xe1   : > { %v461_v8 = vld [vmem:[%s12182_s2 + $0xc0] sm:$0xff]  ;;  %3510 = vmatpush1.bf16.msra.mxu0 %v9453_v6 }
  0xe2   : > { %v9470_v11 = vcombine.high %v453_v7, %v461_v8  ;;  %v709_v12 = vld [vmem:[%s12182_s2 + $0x880] sm:$0xff]  ;;  %3550 = vmatprep.subr.bf16.mxu1 %v9710_v9  ;;  %v9469_v19 = vcombine.low %v453_v7, %v461_v8 }
  0xe3   : > { %v717_v13 = vld [vmem:[%s12182_s2 + $0x8c0] sm:$0xff]  ;;  %3551 = vmatpush1.bf16.msra.mxu1 %v9709_v10 }
  0xe4   : > { %v469_v14 = vld [vmem:[%s12182_s2 + $0x100] sm:$0xff]  ;;  %v9726_v15 = vcombine.high %v709_v12, %v717_v13  ;;  %3511 = vmatprep.subr.bf16.mxu0 %v9470_v11  ;;  %v9725_v20 = vcombine.low %v709_v12, %v717_v13 }
  0xe5   : > { %v477_v16 = vld [vmem:[%s12182_s2 + $0x140] sm:$0xff]  ;;  %3512 = vmatpush1.bf16.msra.mxu0 %v9469_v19 }
  0xe6   : > { %v725_v17 = vld [vmem:[%s12182_s2 + $0x900] sm:$0xff]  ;;  %v9486_v21 = vcombine.high %v469_v14, %v477_v16  ;;  %3552 = vmatprep.subr.bf16.mxu1 %v9726_v15  ;;  %v9485_v27 = vcombine.low %v469_v14, %v477_v16 }
  0xe7   : > { %v733_v18 = vld [vmem:[%s12182_s2 + $0x940] sm:$0xff]  ;;  %3553 = vmatpush1.bf16.msra.mxu1 %v9725_v20 }
  0xe8   : > { %v9742_v22 = vcombine.high %v725_v17, %v733_v18  ;;  %v485_v23 = vld [vmem:[%s12182_s2 + $0x180] sm:$0xff]  ;;  %3513 = vmatprep.subr.bf16.mxu0 %v9486_v21  ;;  %v9741_v28 = vcombine.low %v725_v17, %v733_v18 }
  0xe9   : > { %v493_v24 = vld [vmem:[%s12182_s2 + $0x1c0] sm:$0xff]  ;;  %3514 = vmatpush1.bf16.msra.mxu0 %v9485_v27 }
  0xea   : > { %v741_v25 = vld [vmem:[%s12182_s2 + $0x980] sm:$0xff]  ;;  %v9502_v29 = vcombine.high %v485_v23, %v493_v24  ;;  %3554 = vmatprep.subr.bf16.mxu1 %v9742_v22  ;;  %v9501_v35 = vcombine.low %v485_v23, %v493_v24 }
  0xeb   : > { %v749_v26 = vld [vmem:[%s12182_s2 + $0x9c0] sm:$0xff]  ;;  %3555 = vmatpush1.bf16.msra.mxu1 %v9741_v28 }
  0xec   : > { %v9758_v30 = vcombine.high %v741_v25, %v749_v26  ;;  %v501_v31 = vld [vmem:[%s12182_s2 + $0x200] sm:$0xff]  ;;  %3515 = vmatprep.subr.bf16.mxu0 %v9502_v29  ;;  %v9757_v36 = vcombine.low %v741_v25, %v749_v26 }
  0xed   : > { %v509_v32 = vld [vmem:[%s12182_s2 + $0x240] sm:$0xff]  ;;  %3516 = vmatpush1.bf16.msra.mxu0 %v9501_v35 }
  0xee   : > { %v757_v33 = vld [vmem:[%s12182_s2 + $0xa00] sm:$0xff]  ;;  %v9518_v37 = vcombine.high %v501_v31, %v509_v32  ;;  %3556 = vmatprep.subr.bf16.mxu1 %v9758_v30  ;;  %v9517_v43 = vcombine.low %v501_v31, %v509_v32 }
  0xef   : > { %v765_v34 = vld [vmem:[%s12182_s2 + $0xa40] sm:$0xff]  ;;  %3557 = vmatpush1.bf16.msra.mxu1 %v9757_v36 }
  0xf0   : > { %v9774_v38 = vcombine.high %v757_v33, %v765_v34  ;;  %v517_v39 = vld [vmem:[%s12182_s2 + $0x280] sm:$0xff]  ;;  %3517 = vmatprep.subr.bf16.mxu0 %v9518_v37  ;;  %v9773_v44 = vcombine.low %v757_v33, %v765_v34 }
  0xf1   : > { %v525_v40 = vld [vmem:[%s12182_s2 + $0x2c0] sm:$0xff]  ;;  %3518 = vmatpush1.bf16.msra.mxu0 %v9517_v43 }
  0xf2   : > { %v773_v41 = vld [vmem:[%s12182_s2 + $0xa80] sm:$0xff]  ;;  %v9534_v45 = vcombine.high %v517_v39, %v525_v40  ;;  %3558 = vmatprep.subr.bf16.mxu1 %v9774_v38  ;;  %v9533_v51 = vcombine.low %v517_v39, %v525_v40 }
  0xf3   : > { %v781_v42 = vld [vmem:[%s12182_s2 + $0xac0] sm:$0xff]  ;;  %3559 = vmatpush1.bf16.msra.mxu1 %v9773_v44 }
  0xf4   : > { %v9790_v46 = vcombine.high %v773_v41, %v781_v42  ;;  %v533_v47 = vld [vmem:[%s12182_s2 + $0x300] sm:$0xff]  ;;  %3519 = vmatprep.subr.bf16.mxu0 %v9534_v45  ;;  %v9789_v52 = vcombine.low %v773_v41, %v781_v42 }
  0xf5   : > { %v541_v48 = vld [vmem:[%s12182_s2 + $0x340] sm:$0xff]  ;;  %3520 = vmatpush1.bf16.msra.mxu0 %v9533_v51 }
  0xf6   : > { %v789_v49 = vld [vmem:[%s12182_s2 + $0xb00] sm:$0xff]  ;;  %v9550_v53 = vcombine.high %v533_v47, %v541_v48  ;;  %3560 = vmatprep.subr.bf16.mxu1 %v9790_v46  ;;  %v9549_v63 = vcombine.low %v533_v47, %v541_v48 }
  0xf7   : > { %v797_v50 = vld [vmem:[%s12182_s2 + $0xb40] sm:$0xff]  ;;  %3561 = vmatpush1.bf16.msra.mxu1 %v9789_v52 }
  0xf8   : > { %v9806_v56 = vcombine.high %v789_v49, %v797_v50  ;;  %v549_v57 = vld [vmem:[%s12182_s2 + $0x380] sm:$0xff]  ;;  %3521 = vmatprep.subr.bf16.mxu0 %v9550_v53  ;;  %v9805_v0 = vcombine.low %v789_v49, %v797_v50 }
  0xf9   : > { %v557_v58 = vld [vmem:[%s12182_s2 + $0x3c0] sm:$0xff]  ;;  %3522 = vmatpush1.bf16.msra.mxu0 %v9549_v63 }
  0xfa   : > { %v805_v61 = vld [vmem:[%s12182_s2 + $0xb80] sm:$0xff]  ;;  %v9566_v1 = vcombine.high %v549_v57, %v557_v58  ;;  %3562 = vmatprep.subr.bf16.mxu1 %v9806_v56  ;;  %v9565_v7 = vcombine.low %v549_v57, %v557_v58 }
  0xfb   : > { %v813_v62 = vld [vmem:[%s12182_s2 + $0xbc0] sm:$0xff]  ;;  %3563 = vmatpush1.bf16.msra.mxu1 %v9805_v0 }
  0xfc   : > { %v9822_v2 = vcombine.high %v805_v61, %v813_v62  ;;  %v565_v3 = vld [vmem:[%s12182_s2 + $0x400] sm:$0xff]  ;;  %3523 = vmatprep.subr.bf16.mxu0 %v9566_v1  ;;  %v9821_v8 = vcombine.low %v805_v61, %v813_v62 }
  0xfd   : > { %v573_v4 = vld [vmem:[%s12182_s2 + $0x440] sm:$0xff]  ;;  %3524 = vmatpush1.bf16.msra.mxu0 %v9565_v7  ;;  %v694_v7 = vld [vmem:[%s12182_s2 + $0x808] sm:$0xff] }
  0xfe   : > { %v821_v5 = vld [vmem:[%s12182_s2 + $0xc00] sm:$0xff]  ;;  %v9582_v9 = vcombine.high %v565_v3, %v573_v4  ;;  %3564 = vmatprep.subr.bf16.mxu1 %v9822_v2  ;;  %v9581_v15 = vcombine.low %v565_v3, %v573_v4 }
  0xff   : > { %v829_v6 = vld [vmem:[%s12182_s2 + $0xc40] sm:$0xff]  ;;  %3565 = vmatpush1.bf16.msra.mxu1 %v9821_v8  ;;  %v702_v8 = vld [vmem:[%s12182_s2 + $0x848] sm:$0xff] }
 0x100   : > { %v9838_v10 = vcombine.high %v821_v5, %v829_v6  ;;  %v581_v11 = vld [vmem:[%s12182_s2 + $0x480] sm:$0xff]  ;;  %3525 = vmatprep.subr.bf16.mxu0 %v9582_v9  ;;  %v9837_v16 = vcombine.low %v821_v5, %v829_v6  ;;  %v438_v5 = vld [vmem:[%s12182_s2 + $0x8] sm:$0xff] }
 0x101   : > { %v589_v12 = vld [vmem:[%s12182_s2 + $0x4c0] sm:$0xff]  ;;  %3526 = vmatpush1.bf16.msra.mxu0 %v9581_v15  ;;  %v446_v6 = vld [vmem:[%s12182_s2 + $0x48] sm:$0xff] }
 0x102   : > { %v837_v13 = vld [vmem:[%s12182_s2 + $0xc80] sm:$0xff]  ;;  %v9598_v17 = vcombine.high %v581_v11, %v589_v12  ;;  %3566 = vmatprep.subr.bf16.mxu1 %v9838_v10  ;;  %v9597_v23 = vcombine.low %v581_v11, %v589_v12  ;;  %v431_v12 = vld [vmem:[%s12175_s24 + $0x10] sm:$0xff]  ;;  %v454_v15 = vld [vmem:[%s12182_s2 + $0x88] sm:$0xff] }
 0x103   : > { %v845_v14 = vld [vmem:[%s12182_s2 + $0xcc0] sm:$0xff]  ;;  %3567 = vmatpush1.bf16.msra.mxu1 %v9837_v16  ;;  %v462_v16 = vld [vmem:[%s12182_s2 + $0xc8] sm:$0xff] }
 0x104   : > { %v9854_v18 = vcombine.high %v837_v13, %v845_v14  ;;  %v597_v19 = vld [vmem:[%s12182_s2 + $0x500] sm:$0xff]  ;;  %3527 = vmatprep.subr.bf16.mxu0 %v9598_v17  ;;  %v9853_v24 = vcombine.low %v837_v13, %v845_v14  ;;  %v9456_v13 = vcombine.high %v438_v5, %v446_v6  ;;  %v9712_v14 = vcombine.high %v694_v7, %v702_v8 }
 0x105   : > { %v605_v20 = vld [vmem:[%s12182_s2 + $0x540] sm:$0xff]  ;;  %3528 = vmatpush1.bf16.msra.mxu0 %v9597_v23  ;;  %v9472_v23 = vcombine.high %v454_v15, %v462_v16 }
 0x106   : > { %v853_v21 = vld [vmem:[%s12182_s2 + $0xd00] sm:$0xff]  ;;  %v9614_v25 = vcombine.high %v597_v19, %v605_v20  ;;  %3568 = vmatprep.subr.bf16.mxu1 %v9854_v18  ;;  %v9613_v31 = vcombine.low %v597_v19, %v605_v20  ;;  %v710_v18 = vld [vmem:[%s12182_s2 + $0x888] sm:$0xff]  ;;  %v12286_v20 = vpack.c.bf16 %v431_v12, %v431_v12 }
 0x107   : > { %v861_v22 = vld [vmem:[%s12182_s2 + $0xd40] sm:$0xff]  ;;  %3569 = vmatpush1.bf16.msra.mxu1 %v9853_v24  ;;  %v718_v19 = vld [vmem:[%s12182_s2 + $0x8c8] sm:$0xff] }
 0x108   : > { %v9870_v26 = vcombine.high %v853_v21, %v861_v22  ;;  %v613_v27 = vld [vmem:[%s12182_s2 + $0x580] sm:$0xff]  ;;  %3529 = vmatprep.subr.bf16.mxu0 %v9614_v25  ;;  %v9869_v32 = vcombine.low %v853_v21, %v861_v22  ;;  %v9455_v21 = vcombine.low %v438_v5, %v446_v6  ;;  %v9711_v22 = vcombine.low %v694_v7, %v702_v8  ;;  %v470_v25 = vld [vmem:[%s12182_s2 + $0x108] sm:$0xff] }
 0x109   : > { %v621_v28 = vld [vmem:[%s12182_s2 + $0x5c0] sm:$0xff]  ;;  %3530 = vmatpush1.bf16.msra.mxu0 %v9613_v31  ;;  %v9728_v24 = vcombine.high %v710_v18, %v718_v19  ;;  %v806_v5 = vld [vmem:[%s12182_s2 + $0xb88] sm:$0xff] }
 0x10a   : > { %v869_v29 = vld [vmem:[%s12182_s2 + $0xd80] sm:$0xff]  ;;  %v9630_v33 = vcombine.high %v613_v27, %v621_v28  ;;  %3570 = vmatprep.subr.bf16.mxu1 %v9870_v26  ;;  %v9629_v39 = vcombine.low %v613_v27, %v621_v28  ;;  %v478_v26 = vld [vmem:[%s12182_s2 + $0x148] sm:$0xff] }
 0x10b   : > { %v877_v30 = vld [vmem:[%s12182_s2 + $0xdc0] sm:$0xff]  ;;  %3571 = vmatpush1.bf16.msra.mxu1 %v9869_v32  ;;  %v726_v27 = vld [vmem:[%s12182_s2 + $0x908] sm:$0xff]  ;;  %v9488_v31 = vcombine.high %v470_v25, %v478_v26 }
 0x10c   : > { %v9886_v34 = vcombine.high %v869_v29, %v877_v30  ;;  %v629_v35 = vld [vmem:[%s12182_s2 + $0x600] sm:$0xff]  ;;  %3531 = vmatprep.subr.bf16.mxu0 %v9630_v33  ;;  %v9885_v40 = vcombine.low %v869_v29, %v877_v30  ;;  %v734_v28 = vld [vmem:[%s12182_s2 + $0x948] sm:$0xff]  ;;  %v9471_v29 = vcombine.low %v454_v15, %v462_v16  ;;  %v9727_v30 = vcombine.low %v710_v18, %v718_v19 }
 0x10d   : > { %v637_v36 = vld [vmem:[%s12182_s2 + $0x640] sm:$0xff]  ;;  %3532 = vmatpush1.bf16.msra.mxu0 %v9629_v39  ;;  %v9744_v32 = vcombine.high %v726_v27, %v734_v28  ;;  %v486_v33 = vld [vmem:[%s12182_s2 + $0x188] sm:$0xff] }
 0x10e   : > { %v885_v37 = vld [vmem:[%s12182_s2 + $0xe00] sm:$0xff]  ;;  %v9646_v41 = vcombine.high %v629_v35, %v637_v36  ;;  %3572 = vmatprep.subr.bf16.mxu1 %v9886_v34  ;;  %v9645_v47 = vcombine.low %v629_v35, %v637_v36  ;;  %v494_v34 = vld [vmem:[%s12182_s2 + $0x1c8] sm:$0xff] }
 0x10f   : > { %v893_v38 = vld [vmem:[%s12182_s2 + $0xe40] sm:$0xff]  ;;  %3573 = vmatpush1.bf16.msra.mxu1 %v9885_v40  ;;  %v742_v35 = vld [vmem:[%s12182_s2 + $0x988] sm:$0xff]  ;;  %v9504_v39 = vcombine.high %v486_v33, %v494_v34 }
 0x110   : > { %v9902_v42 = vcombine.high %v885_v37, %v893_v38  ;;  %v645_v43 = vld [vmem:[%s12182_s2 + $0x680] sm:$0xff]  ;;  %3533 = vmatprep.subr.bf16.mxu0 %v9646_v41  ;;  %v9901_v48 = vcombine.low %v885_v37, %v893_v38  ;;  %v750_v36 = vld [vmem:[%s12182_s2 + $0x9c8] sm:$0xff]  ;;  %v9487_v37 = vcombine.low %v470_v25, %v478_v26  ;;  %v9743_v38 = vcombine.low %v726_v27, %v734_v28 }
 0x111   : > { %v653_v44 = vld [vmem:[%s12182_s2 + $0x6c0] sm:$0xff]  ;;  %3534 = vmatpush1.bf16.msra.mxu0 %v9645_v47  ;;  %v9760_v40 = vcombine.high %v742_v35, %v750_v36  ;;  %v502_v41 = vld [vmem:[%s12182_s2 + $0x208] sm:$0xff] }
 0x112   : > { %v901_v45 = vld [vmem:[%s12182_s2 + $0xe80] sm:$0xff]  ;;  %v9662_v49 = vcombine.high %v645_v43, %v653_v44  ;;  %3574 = vmatprep.subr.bf16.mxu1 %v9902_v42  ;;  %v9661_v55 = vcombine.low %v645_v43, %v653_v44  ;;  %v510_v42 = vld [vmem:[%s12182_s2 + $0x248] sm:$0xff] }
 0x113   : > { %v909_v46 = vld [vmem:[%s12182_s2 + $0xec0] sm:$0xff]  ;;  %3575 = vmatpush1.bf16.msra.mxu1 %v9901_v48  ;;  %v758_v43 = vld [vmem:[%s12182_s2 + $0xa08] sm:$0xff]  ;;  %v9520_v47 = vcombine.high %v502_v41, %v510_v42 }
 0x114   : > { %v9918_v50 = vcombine.high %v901_v45, %v909_v46  ;;  %v661_v51 = vld [vmem:[%s12182_s2 + $0x700] sm:$0xff]  ;;  %3535 = vmatprep.subr.bf16.mxu0 %v9662_v49  ;;  %v9917_v56 = vcombine.low %v901_v45, %v909_v46  ;;  %v766_v44 = vld [vmem:[%s12182_s2 + $0xa48] sm:$0xff]  ;;  %v9503_v45 = vcombine.low %v486_v33, %v494_v34  ;;  %v9759_v46 = vcombine.low %v742_v35, %v750_v36 }
 0x115   : > { %v669_v52 = vld [vmem:[%s12182_s2 + $0x740] sm:$0xff]  ;;  %3536 = vmatpush1.bf16.msra.mxu0 %v9661_v55  ;;  %v9776_v48 = vcombine.high %v758_v43, %v766_v44  ;;  %v518_v49 = vld [vmem:[%s12182_s2 + $0x288] sm:$0xff] }
 0x116   : > { %v917_v53 = vld [vmem:[%s12182_s2 + $0xf00] sm:$0xff]  ;;  %v9678_v57 = vcombine.high %v661_v51, %v669_v52  ;;  %3576 = vmatprep.subr.bf16.mxu1 %v9918_v50  ;;  %v9677_v1 = vcombine.low %v661_v51, %v669_v52  ;;  %v526_v50 = vld [vmem:[%s12182_s2 + $0x2c8] sm:$0xff] }
 0x117   : > { %v925_v54 = vld [vmem:[%s12182_s2 + $0xf40] sm:$0xff]  ;;  %3577 = vmatpush1.bf16.msra.mxu1 %v9917_v56  ;;  %v774_v51 = vld [vmem:[%s12182_s2 + $0xa88] sm:$0xff]  ;;  %v9536_v55 = vcombine.high %v518_v49, %v526_v50 }
 0x118   : > { %v9934_v58 = vcombine.high %v917_v53, %v925_v54  ;;  %v677_v61 = vld [vmem:[%s12182_s2 + $0x780] sm:$0xff]  ;;  %3537 = vmatprep.subr.bf16.mxu0 %v9678_v57  ;;  %v9933_v2 = vcombine.low %v917_v53, %v925_v54  ;;  %v782_v52 = vld [vmem:[%s12182_s2 + $0xac8] sm:$0xff]  ;;  %v9519_v53 = vcombine.low %v502_v41, %v510_v42  ;;  %v9775_v54 = vcombine.low %v758_v43, %v766_v44 }
 0x119   : > { %v685_v62 = vld [vmem:[%s12182_s2 + $0x7c0] sm:$0xff]  ;;  %3538 = vmatpush1.bf16.msra.mxu0 %v9677_v1  ;;  %v9792_v56 = vcombine.high %v774_v51, %v782_v52  ;;  %v534_v57 = vld [vmem:[%s12182_s2 + $0x308] sm:$0xff] }
 0x11a   : > { %v933_v63 = vld [vmem:[%s12182_s2 + $0xf80] sm:$0xff]  ;;  %v9694_v3 = vcombine.high %v677_v61, %v685_v62  ;;  %3578 = vmatprep.subr.bf16.mxu1 %v9934_v58  ;;  %v9693_v9 = vcombine.low %v677_v61, %v685_v62  ;;  %v542_v58 = vld [vmem:[%s12182_s2 + $0x348] sm:$0xff] }
 0x11b   : > { %v941_v0 = vld [vmem:[%s12182_s2 + $0xfc0] sm:$0xff]  ;;  %3579 = vmatpush1.bf16.msra.mxu1 %v9933_v2  ;;  %v790_v61 = vld [vmem:[%s12182_s2 + $0xb08] sm:$0xff]  ;;  %v9552_v1 = vcombine.high %v534_v57, %v542_v58  ;;  %v9551_v7 = vcombine.low %v534_v57, %v542_v58 }
 0x11c   : > { %v9950_v4 = vcombine.high %v933_v63, %v941_v0  ;;  %v429_v10 = vld [vmem:[%s12175_s24] sm:$0xff]  ;;  %3539 = vmatprep.subr.bf16.mxu0 %v9694_v3  ;;  %v9949_v11 = vcombine.low %v933_v63, %v941_v0  ;;  %v798_v62 = vld [vmem:[%s12182_s2 + $0xb48] sm:$0xff]  ;;  %v9535_v63 = vcombine.low %v518_v49, %v526_v50  ;;  %v9791_v0 = vcombine.low %v774_v51, %v782_v52 }
 0x11d   : > { %v12282_v17 = vpack.c.bf16 %v429_v10, %v429_v10  ;;  %3540 = vmatpush1.bf16.msra.mxu0 %v9693_v9  ;;  %v9808_v2 = vcombine.high %v790_v61, %v798_v62  ;;  %v550_v3 = vld [vmem:[%s12182_s2 + $0x388] sm:$0xff]  ;;  %v9807_v8 = vcombine.low %v790_v61, %v798_v62 }
 0x11e   : > { %3580 = vmatprep.subr.bf16.mxu1 %v9950_v4  ;;  %3591 = vmatprep.subr.bf16.mxu0 %v9456_v13  ;;  %v558_v4 = vld [vmem:[%s12182_s2 + $0x3c8] sm:$0xff] }
 0x11f   : > { %3581 = vmatpush1.bf16.msra.mxu1 %v9949_v11  ;;  %v814_v6 = vld [vmem:[%s12182_s2 + $0xbc8] sm:$0xff]  ;;  %v9568_v9 = vcombine.high %v550_v3, %v558_v4  ;;  %v9567_v15 = vcombine.low %v550_v3, %v558_v4 }
 0x120   : > { %3632 = vmatprep.subr.bf16.mxu1 %v9712_v14  ;;  %3542 = vmatmul.mubr.bf16.vlgmr.msra.gmra.mrb[0].mxu0 %v12282_v17  ;;  %v9824_v10 = vcombine.high %v806_v5, %v814_v6  ;;  %v566_v11 = vld [vmem:[%s12182_s2 + $0x408] sm:$0xff]  ;;  %v9823_v16 = vcombine.low %v806_v5, %v814_v6 }
 0x121   : > { %3592 = vmatpush1.bf16.msra.mxu0 %v9455_v21  ;;  %3623 = vmatprep.mubr.bf16.mxu0 %v12234_v59  ;;  %v574_v12 = vld [vmem:[%s12182_s2 + $0x448] sm:$0xff] }
 0x122   : > { %3583 = vmatmul.mubr.bf16.vlgmr.msra.gmra.mrb[0].mxu1 %v12286_v20  ;;  %3593 = vmatprep.subr.bf16.mxu0 %v9472_v23  ;;  %v822_v13 = vld [vmem:[%s12182_s2 + $0xc08] sm:$0xff]  ;;  %v9584_v18 = vcombine.high %v566_v11, %v574_v12  ;;  %v9583_v25 = vcombine.low %v566_v11, %v574_v12 }
 0x123   : > { %3633 = vmatpush1.bf16.msra.mxu1 %v9711_v22  ;;  %3664 = vmatprep.mubr.bf16.mxu1 %v12236_v60  ;;  %v830_v14 = vld [vmem:[%s12182_s2 + $0xc48] sm:$0xff] }
 0x124   : > { %3634 = vmatprep.subr.bf16.mxu1 %v9728_v24  ;;  %v9840_v19 = vcombine.high %v822_v13, %v830_v14  ;;  %v582_v21 = vld [vmem:[%s12182_s2 + $0x488] sm:$0xff]  ;;  %v9839_v26 = vcombine.low %v822_v13, %v830_v14 }
 0x125   : > { %3594 = vmatpush1.bf16.msra.mxu0 %v9471_v29  ;;  %v590_v22 = vld [vmem:[%s12182_s2 + $0x4c8] sm:$0xff] }
 0x126   : > { %3595 = vmatprep.subr.bf16.mxu0 %v9488_v31  ;;  %v838_v23 = vld [vmem:[%s12182_s2 + $0xc88] sm:$0xff]  ;;  %v9600_v27 = vcombine.high %v582_v21, %v590_v22  ;;  %v9599_v33 = vcombine.low %v582_v21, %v590_v22 }
 0x127   : > { %3635 = vmatpush1.bf16.msra.mxu1 %v9727_v30  ;;  %v846_v24 = vld [vmem:[%s12182_s2 + $0xcc8] sm:$0xff] }
 0x128   : > { %3636 = vmatprep.subr.bf16.mxu1 %v9744_v32  ;;  %v9856_v28 = vcombine.high %v838_v23, %v846_v24  ;;  %v598_v29 = vld [vmem:[%s12182_s2 + $0x508] sm:$0xff]  ;;  %v9855_v34 = vcombine.low %v838_v23, %v846_v24 }
 0x129   : > { %3596 = vmatpush1.bf16.msra.mxu0 %v9487_v37  ;;  %v606_v30 = vld [vmem:[%s12182_s2 + $0x548] sm:$0xff] }
 0x12a   : > { %3597 = vmatprep.subr.bf16.mxu0 %v9504_v39  ;;  %v854_v31 = vld [vmem:[%s12182_s2 + $0xd08] sm:$0xff]  ;;  %v9616_v35 = vcombine.high %v598_v29, %v606_v30  ;;  %v9615_v41 = vcombine.low %v598_v29, %v606_v30 }
 0x12b   : > { %3637 = vmatpush1.bf16.msra.mxu1 %v9743_v38  ;;  %v862_v32 = vld [vmem:[%s12182_s2 + $0xd48] sm:$0xff] }
 0x12c   : > { %3638 = vmatprep.subr.bf16.mxu1 %v9760_v40  ;;  %v9872_v36 = vcombine.high %v854_v31, %v862_v32  ;;  %v614_v37 = vld [vmem:[%s12182_s2 + $0x588] sm:$0xff]  ;;  %v9871_v42 = vcombine.low %v854_v31, %v862_v32 }
 0x12d   : > { %3598 = vmatpush1.bf16.msra.mxu0 %v9503_v45  ;;  %v622_v38 = vld [vmem:[%s12182_s2 + $0x5c8] sm:$0xff] }
 0x12e   : > { %3599 = vmatprep.subr.bf16.mxu0 %v9520_v47  ;;  %v870_v39 = vld [vmem:[%s12182_s2 + $0xd88] sm:$0xff]  ;;  %v9632_v43 = vcombine.high %v614_v37, %v622_v38  ;;  %v9631_v49 = vcombine.low %v614_v37, %v622_v38 }
 0x12f   : > { %3639 = vmatpush1.bf16.msra.mxu1 %v9759_v46  ;;  %v878_v40 = vld [vmem:[%s12182_s2 + $0xdc8] sm:$0xff] }
 0x130   : > { %3640 = vmatprep.subr.bf16.mxu1 %v9776_v48  ;;  %v9888_v44 = vcombine.high %v870_v39, %v878_v40  ;;  %v630_v45 = vld [vmem:[%s12182_s2 + $0x608] sm:$0xff]  ;;  %v9887_v50 = vcombine.low %v870_v39, %v878_v40 }
 0x131   : > { %3600 = vmatpush1.bf16.msra.mxu0 %v9519_v53  ;;  %v638_v46 = vld [vmem:[%s12182_s2 + $0x648] sm:$0xff] }
 0x132   : > { %3601 = vmatprep.subr.bf16.mxu0 %v9536_v55  ;;  %v886_v47 = vld [vmem:[%s12182_s2 + $0xe08] sm:$0xff]  ;;  %v9648_v51 = vcombine.high %v630_v45, %v638_v46  ;;  %v9647_v57 = vcombine.low %v630_v45, %v638_v46 }
 0x133   : > { %3641 = vmatpush1.bf16.msra.mxu1 %v9775_v54  ;;  %v894_v48 = vld [vmem:[%s12182_s2 + $0xe48] sm:$0xff] }
 0x134   : > { %3642 = vmatprep.subr.bf16.mxu1 %v9792_v56  ;;  %v9904_v52 = vcombine.high %v886_v47, %v894_v48  ;;  %v646_v53 = vld [vmem:[%s12182_s2 + $0x688] sm:$0xff]  ;;  %v9903_v58 = vcombine.low %v886_v47, %v894_v48 }
 0x135   : > { %3602 = vmatpush1.bf16.msra.mxu0 %v9535_v63  ;;  %v654_v54 = vld [vmem:[%s12182_s2 + $0x6c8] sm:$0xff] }
 0x136   : > { %3603 = vmatprep.subr.bf16.mxu0 %v9552_v1  ;;  %v902_v55 = vld [vmem:[%s12182_s2 + $0xe88] sm:$0xff]  ;;  %v9664_v61 = vcombine.high %v646_v53, %v654_v54  ;;  %v9663_v3 = vcombine.low %v646_v53, %v654_v54 }
 0x137   : > { %3643 = vmatpush1.bf16.msra.mxu1 %v9791_v0  ;;  %v910_v56 = vld [vmem:[%s12182_s2 + $0xec8] sm:$0xff] }
 0x138   : > { %3644 = vmatprep.subr.bf16.mxu1 %v9808_v2  ;;  %v9920_v62 = vcombine.high %v902_v55, %v910_v56  ;;  %v662_v63 = vld [vmem:[%s12182_s2 + $0x708] sm:$0xff]  ;;  %v9919_v4 = vcombine.low %v902_v55, %v910_v56 }
 0x139   : > { %3604 = vmatpush1.bf16.msra.mxu0 %v9551_v7  ;;  %v670_v0 = vld [vmem:[%s12182_s2 + $0x748] sm:$0xff] }
 0x13a   : > { %3605 = vmatprep.subr.bf16.mxu0 %v9568_v9  ;;  %v918_v1 = vld [vmem:[%s12182_s2 + $0xf08] sm:$0xff]  ;;  %v9680_v5 = vcombine.high %v662_v63, %v670_v0  ;;  %v9679_v11 = vcombine.low %v662_v63, %v670_v0 }
 0x13b   : > { %3645 = vmatpush1.bf16.msra.mxu1 %v9807_v8  ;;  %v926_v2 = vld [vmem:[%s12182_s2 + $0xf48] sm:$0xff] }
 0x13c   : > { %3646 = vmatprep.subr.bf16.mxu1 %v9824_v10  ;;  %v9936_v6 = vcombine.high %v918_v1, %v926_v2  ;;  %v678_v7 = vld [vmem:[%s12182_s2 + $0x788] sm:$0xff]  ;;  %v9935_v12 = vcombine.low %v918_v1, %v926_v2 }
 0x13d   : > { %3606 = vmatpush1.bf16.msra.mxu0 %v9567_v15  ;;  %v686_v8 = vld [vmem:[%s12182_s2 + $0x7c8] sm:$0xff]  ;;  %v439_v15 = vld [vmem:[%s12182_s2 + $0x10] sm:$0xff] }
 0x13e   : > { %3607 = vmatprep.subr.bf16.mxu0 %v9584_v18  ;;  %v934_v9 = vld [vmem:[%s12182_s2 + $0xf88] sm:$0xff]  ;;  %v9696_v13 = vcombine.high %v678_v7, %v686_v8  ;;  %v695_v18 = vld [vmem:[%s12182_s2 + $0x810] sm:$0xff]  ;;  %v9695_v21 = vcombine.low %v678_v7, %v686_v8 }
 0x13f   : > { %3647 = vmatpush1.bf16.msra.mxu1 %v9823_v16  ;;  %v942_v10 = vld [vmem:[%s12182_s2 + $0xfc8] sm:$0xff]  ;;  %v447_v16 = vld [vmem:[%s12182_s2 + $0x50] sm:$0xff] }
 0x140   : > { %3648 = vmatprep.subr.bf16.mxu1 %v9840_v19  ;;  %v9952_v14 = vcombine.high %v934_v9, %v942_v10  ;;  %v703_v19 = vld [vmem:[%s12182_s2 + $0x850] sm:$0xff]  ;;  %v9951_v22 = vcombine.low %v934_v9, %v942_v10  ;;  %v9458_v23 = vcombine.high %v439_v15, %v447_v16  ;;  %v9457_v29 = vcombine.low %v439_v15, %v447_v16 }
 0x141   : > { %3608 = vmatpush1.bf16.msra.mxu0 %v9583_v25  ;;  %v9714_v24 = vcombine.high %v695_v18, %v703_v19  ;;  %v455_v25 = vld [vmem:[%s12182_s2 + $0x90] sm:$0xff]  ;;  %v9713_v30 = vcombine.low %v695_v18, %v703_v19 }
 0x142   : > { %3609 = vmatprep.subr.bf16.mxu0 %v9600_v27  ;;  %v711_v27 = vld [vmem:[%s12182_s2 + $0x890] sm:$0xff] }
 0x143   : > { %3649 = vmatpush1.bf16.msra.mxu1 %v9839_v26  ;;  %v463_v26 = vld [vmem:[%s12182_s2 + $0xd0] sm:$0xff] }
 0x144   : > { %3650 = vmatprep.subr.bf16.mxu1 %v9856_v28  ;;  %v719_v28 = vld [vmem:[%s12182_s2 + $0x8d0] sm:$0xff]  ;;  %v9474_v31 = vcombine.high %v455_v25, %v463_v26  ;;  %v9473_v37 = vcombine.low %v455_v25, %v463_v26 }
 0x145   : > { %3610 = vmatpush1.bf16.msra.mxu0 %v9599_v33  ;;  %v9730_v32 = vcombine.high %v711_v27, %v719_v28  ;;  %v471_v33 = vld [vmem:[%s12182_s2 + $0x110] sm:$0xff]  ;;  %v9729_v38 = vcombine.low %v711_v27, %v719_v28 }
 0x146   : > { %3611 = vmatprep.subr.bf16.mxu0 %v9616_v35  ;;  %v727_v35 = vld [vmem:[%s12182_s2 + $0x910] sm:$0xff] }
 0x147   : > { %3651 = vmatpush1.bf16.msra.mxu1 %v9855_v34  ;;  %v479_v34 = vld [vmem:[%s12182_s2 + $0x150] sm:$0xff] }
 0x148   : > { %3652 = vmatprep.subr.bf16.mxu1 %v9872_v36  ;;  %v735_v36 = vld [vmem:[%s12182_s2 + $0x950] sm:$0xff]  ;;  %v9490_v39 = vcombine.high %v471_v33, %v479_v34  ;;  %v9489_v45 = vcombine.low %v471_v33, %v479_v34 }
 0x149   : > { %3612 = vmatpush1.bf16.msra.mxu0 %v9615_v41  ;;  %v9746_v40 = vcombine.high %v727_v35, %v735_v36  ;;  %v487_v41 = vld [vmem:[%s12182_s2 + $0x190] sm:$0xff]  ;;  %v9745_v46 = vcombine.low %v727_v35, %v735_v36 }
 0x14a   : > { %3613 = vmatprep.subr.bf16.mxu0 %v9632_v43  ;;  %v743_v43 = vld [vmem:[%s12182_s2 + $0x990] sm:$0xff] }
 0x14b   : > { %3653 = vmatpush1.bf16.msra.mxu1 %v9871_v42  ;;  %v495_v42 = vld [vmem:[%s12182_s2 + $0x1d0] sm:$0xff] }
 0x14c   : > { %3654 = vmatprep.subr.bf16.mxu1 %v9888_v44  ;;  %v751_v44 = vld [vmem:[%s12182_s2 + $0x9d0] sm:$0xff]  ;;  %v9506_v47 = vcombine.high %v487_v41, %v495_v42  ;;  %v9505_v53 = vcombine.low %v487_v41, %v495_v42 }
 0x14d   : > { %3614 = vmatpush1.bf16.msra.mxu0 %v9631_v49  ;;  %v9762_v48 = vcombine.high %v743_v43, %v751_v44  ;;  %v503_v49 = vld [vmem:[%s12182_s2 + $0x210] sm:$0xff]  ;;  %v9761_v54 = vcombine.low %v743_v43, %v751_v44 }
 0x14e   : > { %3615 = vmatprep.subr.bf16.mxu0 %v9648_v51  ;;  %v759_v51 = vld [vmem:[%s12182_s2 + $0xa10] sm:$0xff] }
 0x14f   : > { %3655 = vmatpush1.bf16.msra.mxu1 %v9887_v50  ;;  %v511_v50 = vld [vmem:[%s12182_s2 + $0x250] sm:$0xff] }
 0x150   : > { %3656 = vmatprep.subr.bf16.mxu1 %v9904_v52  ;;  %v767_v52 = vld [vmem:[%s12182_s2 + $0xa50] sm:$0xff]  ;;  %v9522_v55 = vcombine.high %v503_v49, %v511_v50  ;;  %v9521_v63 = vcombine.low %v503_v49, %v511_v50 }
 0x151   : > { %3616 = vmatpush1.bf16.msra.mxu0 %v9647_v57  ;;  %v9778_v56 = vcombine.high %v759_v51, %v767_v52  ;;  %v519_v57 = vld [vmem:[%s12182_s2 + $0x290] sm:$0xff]  ;;  %v9777_v0 = vcombine.low %v759_v51, %v767_v52 }
 0x152   : > { %3617 = vmatprep.subr.bf16.mxu0 %v9664_v61  ;;  %v775_v61 = vld [vmem:[%s12182_s2 + $0xa90] sm:$0xff] }
 0x153   : > { %3657 = vmatpush1.bf16.msra.mxu1 %v9903_v58  ;;  %v527_v58 = vld [vmem:[%s12182_s2 + $0x2d0] sm:$0xff] }
 0x154   : > { %3658 = vmatprep.subr.bf16.mxu1 %v9920_v62  ;;  %v783_v62 = vld [vmem:[%s12182_s2 + $0xad0] sm:$0xff]  ;;  %v9538_v1 = vcombine.high %v519_v57, %v527_v58  ;;  %v9537_v7 = vcombine.low %v519_v57, %v527_v58 }
 0x155   : > { %3618 = vmatpush1.bf16.msra.mxu0 %v9663_v3  ;;  %v9794_v2 = vcombine.high %v775_v61, %v783_v62  ;;  %v535_v3 = vld [vmem:[%s12182_s2 + $0x310] sm:$0xff]  ;;  %v9793_v8 = vcombine.low %v775_v61, %v783_v62 }
 0x156   : > { %3619 = vmatprep.subr.bf16.mxu0 %v9680_v5  ;;  %v791_v5 = vld [vmem:[%s12182_s2 + $0xb10] sm:$0xff] }
 0x157   : > { %3659 = vmatpush1.bf16.msra.mxu1 %v9919_v4  ;;  %v543_v4 = vld [vmem:[%s12182_s2 + $0x350] sm:$0xff] }
 0x158   : > { %3660 = vmatprep.subr.bf16.mxu1 %v9936_v6  ;;  %v799_v6 = vld [vmem:[%s12182_s2 + $0xb50] sm:$0xff]  ;;  %v9554_v9 = vcombine.high %v535_v3, %v543_v4  ;;  %v9553_v15 = vcombine.low %v535_v3, %v543_v4 }
 0x159   : > { %3620 = vmatpush1.bf16.msra.mxu0 %v9679_v11  ;;  %v9810_v10 = vcombine.high %v791_v5, %v799_v6  ;;  %v551_v11 = vld [vmem:[%s12182_s2 + $0x390] sm:$0xff]  ;;  %v9809_v16 = vcombine.low %v791_v5, %v799_v6 }
 0x15a   : > { %3621 = vmatprep.subr.bf16.mxu0 %v9696_v13  ;;  %v807_v13 = vld [vmem:[%s12182_s2 + $0xb90] sm:$0xff] }
 0x15b   : > { %3661 = vmatpush1.bf16.msra.mxu1 %v9935_v12  ;;  %v559_v12 = vld [vmem:[%s12182_s2 + $0x3d0] sm:$0xff] }
 0x15c   : > { %3662 = vmatprep.subr.bf16.mxu1 %v9952_v14  ;;  %v815_v14 = vld [vmem:[%s12182_s2 + $0xbd0] sm:$0xff]  ;;  %v9570_v18 = vcombine.high %v551_v11, %v559_v12  ;;  %v9569_v25 = vcombine.low %v551_v11, %v559_v12 }
 0x15d   : > { %3622 = vmatpush1.bf16.msra.mxu0 %v9695_v21  ;;  %v9826_v19 = vcombine.high %v807_v13, %v815_v14  ;;  %v567_v21 = vld [vmem:[%s12182_s2 + $0x410] sm:$0xff]  ;;  %v9825_v26 = vcombine.low %v807_v13, %v815_v14 }
 0x15e   : > { %3673 = vmatprep.subr.bf16.mxu0 %v9458_v23  ;;  %v823_v23 = vld [vmem:[%s12182_s2 + $0xc10] sm:$0xff] }
 0x15f   : > { %3663 = vmatpush1.bf16.msra.mxu1 %v9951_v22  ;;  %v575_v22 = vld [vmem:[%s12182_s2 + $0x450] sm:$0xff] }
 0x160   : > { %3714 = vmatprep.subr.bf16.mxu1 %v9714_v24  ;;  %3624 = vmatmul.mubr.bf16.vlgmr.msra.gmra.mrb[4].mxu0 %v12282_v17  ;;  %v831_v24 = vld [vmem:[%s12182_s2 + $0xc50] sm:$0xff]  ;;  %v9586_v27 = vcombine.high %v567_v21, %v575_v22  ;;  %v9585_v33 = vcombine.low %v567_v21, %v575_v22 }
 0x161   : > { %3674 = vmatpush1.bf16.msra.mxu0 %v9457_v29  ;;  %3705 = vmatprep.mubr.bf16.mxu0 %v12234_v59  ;;  %v9842_v28 = vcombine.high %v823_v23, %v831_v24  ;;  %v583_v29 = vld [vmem:[%s12182_s2 + $0x490] sm:$0xff]  ;;  %v9841_v34 = vcombine.low %v823_v23, %v831_v24 }
 0x162   : > { %3665 = vmatmul.mubr.bf16.vlgmr.msra.gmra.mrb[4].mxu1 %v12286_v20  ;;  %3675 = vmatprep.subr.bf16.mxu0 %v9474_v31  ;;  %v839_v31 = vld [vmem:[%s12182_s2 + $0xc90] sm:$0xff] }
 0x163   : > { %3715 = vmatpush1.bf16.msra.mxu1 %v9713_v30  ;;  %3746 = vmatprep.mubr.bf16.mxu1 %v12236_v60  ;;  %v591_v30 = vld [vmem:[%s12182_s2 + $0x4d0] sm:$0xff] }
 0x164   : > { %3716 = vmatprep.subr.bf16.mxu1 %v9730_v32  ;;  %v847_v32 = vld [vmem:[%s12182_s2 + $0xcd0] sm:$0xff]  ;;  %v9602_v35 = vcombine.high %v583_v29, %v591_v30  ;;  %v9601_v41 = vcombine.low %v583_v29, %v591_v30 }
 0x165   : > { %3676 = vmatpush1.bf16.msra.mxu0 %v9473_v37  ;;  %v9858_v36 = vcombine.high %v839_v31, %v847_v32  ;;  %v599_v37 = vld [vmem:[%s12182_s2 + $0x510] sm:$0xff]  ;;  %v9857_v42 = vcombine.low %v839_v31, %v847_v32 }
 0x166   : > { %3677 = vmatprep.subr.bf16.mxu0 %v9490_v39  ;;  %v855_v39 = vld [vmem:[%s12182_s2 + $0xd10] sm:$0xff] }
 0x167   : > { %3717 = vmatpush1.bf16.msra.mxu1 %v9729_v38  ;;  %v607_v38 = vld [vmem:[%s12182_s2 + $0x550] sm:$0xff] }
 0x168   : > { %3718 = vmatprep.subr.bf16.mxu1 %v9746_v40  ;;  %v863_v40 = vld [vmem:[%s12182_s2 + $0xd50] sm:$0xff]  ;;  %v9618_v43 = vcombine.high %v599_v37, %v607_v38  ;;  %v9617_v49 = vcombine.low %v599_v37, %v607_v38 }
 0x169   : > { %3678 = vmatpush1.bf16.msra.mxu0 %v9489_v45  ;;  %v9874_v44 = vcombine.high %v855_v39, %v863_v40  ;;  %v615_v45 = vld [vmem:[%s12182_s2 + $0x590] sm:$0xff]  ;;  %v9873_v50 = vcombine.low %v855_v39, %v863_v40 }
 0x16a   : > { %3679 = vmatprep.subr.bf16.mxu0 %v9506_v47  ;;  %v871_v47 = vld [vmem:[%s12182_s2 + $0xd90] sm:$0xff] }
 0x16b   : > { %3719 = vmatpush1.bf16.msra.mxu1 %v9745_v46  ;;  %v623_v46 = vld [vmem:[%s12182_s2 + $0x5d0] sm:$0xff] }
 0x16c   : > { %3720 = vmatprep.subr.bf16.mxu1 %v9762_v48  ;;  %v879_v48 = vld [vmem:[%s12182_s2 + $0xdd0] sm:$0xff]  ;;  %v9634_v51 = vcombine.high %v615_v45, %v623_v46  ;;  %v9633_v57 = vcombine.low %v615_v45, %v623_v46 }
 0x16d   : > { %3680 = vmatpush1.bf16.msra.mxu0 %v9505_v53  ;;  %v9890_v52 = vcombine.high %v871_v47, %v879_v48  ;;  %v631_v53 = vld [vmem:[%s12182_s2 + $0x610] sm:$0xff]  ;;  %v9889_v58 = vcombine.low %v871_v47, %v879_v48 }
 0x16e   : > { %3681 = vmatprep.subr.bf16.mxu0 %v9522_v55  ;;  %v887_v55 = vld [vmem:[%s12182_s2 + $0xe10] sm:$0xff] }
 0x16f   : > { %3721 = vmatpush1.bf16.msra.mxu1 %v9761_v54  ;;  %v639_v54 = vld [vmem:[%s12182_s2 + $0x650] sm:$0xff] }
 0x170   : > { %3722 = vmatprep.subr.bf16.mxu1 %v9778_v56  ;;  %v895_v56 = vld [vmem:[%s12182_s2 + $0xe50] sm:$0xff]  ;;  %v9650_v61 = vcombine.high %v631_v53, %v639_v54  ;;  %v9649_v3 = vcombine.low %v631_v53, %v639_v54 }
 0x171   : > { %3682 = vmatpush1.bf16.msra.mxu0 %v9521_v63  ;;  %v9906_v62 = vcombine.high %v887_v55, %v895_v56  ;;  %v647_v63 = vld [vmem:[%s12182_s2 + $0x690] sm:$0xff]  ;;  %v9905_v4 = vcombine.low %v887_v55, %v895_v56 }
 0x172   : > { %3683 = vmatprep.subr.bf16.mxu0 %v9538_v1  ;;  %v903_v1 = vld [vmem:[%s12182_s2 + $0xe90] sm:$0xff] }
 0x173   : > { %3723 = vmatpush1.bf16.msra.mxu1 %v9777_v0  ;;  %v655_v0 = vld [vmem:[%s12182_s2 + $0x6d0] sm:$0xff] }
 0x174   : > { %3724 = vmatprep.subr.bf16.mxu1 %v9794_v2  ;;  %v911_v2 = vld [vmem:[%s12182_s2 + $0xed0] sm:$0xff]  ;;  %v9666_v5 = vcombine.high %v647_v63, %v655_v0  ;;  %v9665_v11 = vcombine.low %v647_v63, %v655_v0 }
 0x175   : > { %3684 = vmatpush1.bf16.msra.mxu0 %v9537_v7  ;;  %v9922_v6 = vcombine.high %v903_v1, %v911_v2  ;;  %v663_v7 = vld [vmem:[%s12182_s2 + $0x710] sm:$0xff]  ;;  %v9921_v12 = vcombine.low %v903_v1, %v911_v2 }
 0x176   : > { %3685 = vmatprep.subr.bf16.mxu0 %v9554_v9  ;;  %v919_v9 = vld [vmem:[%s12182_s2 + $0xf10] sm:$0xff] }
 0x177   : > { %3725 = vmatpush1.bf16.msra.mxu1 %v9793_v8  ;;  %v671_v8 = vld [vmem:[%s12182_s2 + $0x750] sm:$0xff] }
 0x178   : > { %3726 = vmatprep.subr.bf16.mxu1 %v9810_v10  ;;  %v927_v10 = vld [vmem:[%s12182_s2 + $0xf50] sm:$0xff]  ;;  %v9682_v13 = vcombine.high %v663_v7, %v671_v8  ;;  %v9681_v21 = vcombine.low %v663_v7, %v671_v8 }
 0x179   : > { %3686 = vmatpush1.bf16.msra.mxu0 %v9553_v15  ;;  %v9938_v14 = vcombine.high %v919_v9, %v927_v10  ;;  %v679_v15 = vld [vmem:[%s12182_s2 + $0x790] sm:$0xff]  ;;  %v9937_v22 = vcombine.low %v919_v9, %v927_v10 }
 0x17a   : > { %3687 = vmatprep.subr.bf16.mxu0 %v9570_v18  ;;  %v935_v18 = vld [vmem:[%s12182_s2 + $0xf90] sm:$0xff] }
 0x17b   : > { %3727 = vmatpush1.bf16.msra.mxu1 %v9809_v16  ;;  %v687_v16 = vld [vmem:[%s12182_s2 + $0x7d0] sm:$0xff] }
 0x17c   : > { %3728 = vmatprep.subr.bf16.mxu1 %v9826_v19  ;;  %v943_v19 = vld [vmem:[%s12182_s2 + $0xfd0] sm:$0xff]  ;;  %v9698_v23 = vcombine.high %v679_v15, %v687_v16  ;;  %v9697_v29 = vcombine.low %v679_v15, %v687_v16 }
 0x17d   : > { %3688 = vmatpush1.bf16.msra.mxu0 %v9569_v25  ;;  %v9954_v24 = vcombine.high %v935_v18, %v943_v19  ;;  %v440_v25 = vld [vmem:[%s12182_s2 + $0x18] sm:$0xff]  ;;  %v9953_v30 = vcombine.low %v935_v18, %v943_v19 }
 0x17e   : > { %3689 = vmatprep.subr.bf16.mxu0 %v9586_v27  ;;  %v696_v27 = vld [vmem:[%s12182_s2 + $0x818] sm:$0xff] }
 0x17f   : > { %3729 = vmatpush1.bf16.msra.mxu1 %v9825_v26  ;;  %v448_v26 = vld [vmem:[%s12182_s2 + $0x58] sm:$0xff] }
 0x180   : > { %3730 = vmatprep.subr.bf16.mxu1 %v9842_v28  ;;  %v704_v28 = vld [vmem:[%s12182_s2 + $0x858] sm:$0xff]  ;;  %v9460_v31 = vcombine.high %v440_v25, %v448_v26  ;;  %v9459_v37 = vcombine.low %v440_v25, %v448_v26 }
 0x181   : > { %3690 = vmatpush1.bf16.msra.mxu0 %v9585_v33  ;;  %v9716_v32 = vcombine.high %v696_v27, %v704_v28  ;;  %v456_v33 = vld [vmem:[%s12182_s2 + $0x98] sm:$0xff]  ;;  %v9715_v38 = vcombine.low %v696_v27, %v704_v28 }
 0x182   : > { %3691 = vmatprep.subr.bf16.mxu0 %v9602_v35  ;;  %v712_v35 = vld [vmem:[%s12182_s2 + $0x898] sm:$0xff] }
 0x183   : > { %3731 = vmatpush1.bf16.msra.mxu1 %v9841_v34  ;;  %v464_v34 = vld [vmem:[%s12182_s2 + $0xd8] sm:$0xff] }
 0x184   : > { %3732 = vmatprep.subr.bf16.mxu1 %v9858_v36  ;;  %v720_v36 = vld [vmem:[%s12182_s2 + $0x8d8] sm:$0xff]  ;;  %v9476_v39 = vcombine.high %v456_v33, %v464_v34  ;;  %v9475_v45 = vcombine.low %v456_v33, %v464_v34 }
 0x185   : > { %3692 = vmatpush1.bf16.msra.mxu0 %v9601_v41  ;;  %v9732_v40 = vcombine.high %v712_v35, %v720_v36  ;;  %v472_v41 = vld [vmem:[%s12182_s2 + $0x118] sm:$0xff]  ;;  %v9731_v46 = vcombine.low %v712_v35, %v720_v36 }
 0x186   : > { %3693 = vmatprep.subr.bf16.mxu0 %v9618_v43  ;;  %v728_v43 = vld [vmem:[%s12182_s2 + $0x918] sm:$0xff] }
 0x187   : > { %3733 = vmatpush1.bf16.msra.mxu1 %v9857_v42  ;;  %v480_v42 = vld [vmem:[%s12182_s2 + $0x158] sm:$0xff] }
 0x188   : > { %3734 = vmatprep.subr.bf16.mxu1 %v9874_v44  ;;  %v736_v44 = vld [vmem:[%s12182_s2 + $0x958] sm:$0xff]  ;;  %v9492_v47 = vcombine.high %v472_v41, %v480_v42  ;;  %v9491_v53 = vcombine.low %v472_v41, %v480_v42 }
 0x189   : > { %3694 = vmatpush1.bf16.msra.mxu0 %v9617_v49  ;;  %v9748_v48 = vcombine.high %v728_v43, %v736_v44  ;;  %v488_v49 = vld [vmem:[%s12182_s2 + $0x198] sm:$0xff]  ;;  %v9747_v54 = vcombine.low %v728_v43, %v736_v44 }
 0x18a   : > { %3695 = vmatprep.subr.bf16.mxu0 %v9634_v51  ;;  %v744_v51 = vld [vmem:[%s12182_s2 + $0x998] sm:$0xff] }
 0x18b   : > { %3735 = vmatpush1.bf16.msra.mxu1 %v9873_v50  ;;  %v496_v50 = vld [vmem:[%s12182_s2 + $0x1d8] sm:$0xff] }
 0x18c   : > { %3736 = vmatprep.subr.bf16.mxu1 %v9890_v52  ;;  %v752_v52 = vld [vmem:[%s12182_s2 + $0x9d8] sm:$0xff]  ;;  %v9508_v55 = vcombine.high %v488_v49, %v496_v50  ;;  %v9507_v63 = vcombine.low %v488_v49, %v496_v50 }
 0x18d   : > { %3696 = vmatpush1.bf16.msra.mxu0 %v9633_v57  ;;  %v9764_v56 = vcombine.high %v744_v51, %v752_v52  ;;  %v504_v57 = vld [vmem:[%s12182_s2 + $0x218] sm:$0xff]  ;;  %v9763_v0 = vcombine.low %v744_v51, %v752_v52 }
 0x18e   : > { %3697 = vmatprep.subr.bf16.mxu0 %v9650_v61  ;;  %v760_v61 = vld [vmem:[%s12182_s2 + $0xa18] sm:$0xff] }
 0x18f   : > { %3737 = vmatpush1.bf16.msra.mxu1 %v9889_v58  ;;  %v512_v58 = vld [vmem:[%s12182_s2 + $0x258] sm:$0xff] }
 0x190   : > { %3738 = vmatprep.subr.bf16.mxu1 %v9906_v62  ;;  %v768_v62 = vld [vmem:[%s12182_s2 + $0xa58] sm:$0xff]  ;;  %v9524_v1 = vcombine.high %v504_v57, %v512_v58  ;;  %v9523_v7 = vcombine.low %v504_v57, %v512_v58 }
 0x191   : > { %3698 = vmatpush1.bf16.msra.mxu0 %v9649_v3  ;;  %v9780_v2 = vcombine.high %v760_v61, %v768_v62  ;;  %v520_v3 = vld [vmem:[%s12182_s2 + $0x298] sm:$0xff]  ;;  %v9779_v8 = vcombine.low %v760_v61, %v768_v62 }
 0x192   : > { %3699 = vmatprep.subr.bf16.mxu0 %v9666_v5  ;;  %v776_v5 = vld [vmem:[%s12182_s2 + $0xa98] sm:$0xff] }
 0x193   : > { %3739 = vmatpush1.bf16.msra.mxu1 %v9905_v4  ;;  %v528_v4 = vld [vmem:[%s12182_s2 + $0x2d8] sm:$0xff] }
 0x194   : > { %3740 = vmatprep.subr.bf16.mxu1 %v9922_v6  ;;  %v784_v6 = vld [vmem:[%s12182_s2 + $0xad8] sm:$0xff]  ;;  %v9540_v9 = vcombine.high %v520_v3, %v528_v4  ;;  %v9539_v15 = vcombine.low %v520_v3, %v528_v4 }
 0x195   : > { %3700 = vmatpush1.bf16.msra.mxu0 %v9665_v11  ;;  %v9796_v10 = vcombine.high %v776_v5, %v784_v6  ;;  %v536_v11 = vld [vmem:[%s12182_s2 + $0x318] sm:$0xff]  ;;  %v9795_v16 = vcombine.low %v776_v5, %v784_v6 }
 0x196   : > { %3701 = vmatprep.subr.bf16.mxu0 %v9682_v13  ;;  %v792_v13 = vld [vmem:[%s12182_s2 + $0xb18] sm:$0xff] }
 0x197   : > { %3741 = vmatpush1.bf16.msra.mxu1 %v9921_v12  ;;  %v544_v12 = vld [vmem:[%s12182_s2 + $0x358] sm:$0xff] }
 0x198   : > { %3742 = vmatprep.subr.bf16.mxu1 %v9938_v14  ;;  %v800_v14 = vld [vmem:[%s12182_s2 + $0xb58] sm:$0xff]  ;;  %v9556_v18 = vcombine.high %v536_v11, %v544_v12  ;;  %v9555_v25 = vcombine.low %v536_v11, %v544_v12 }
 0x199   : > { %3702 = vmatpush1.bf16.msra.mxu0 %v9681_v21  ;;  %v9812_v19 = vcombine.high %v792_v13, %v800_v14  ;;  %v552_v21 = vld [vmem:[%s12182_s2 + $0x398] sm:$0xff]  ;;  %v9811_v26 = vcombine.low %v792_v13, %v800_v14 }
 0x19a   : > { %3703 = vmatprep.subr.bf16.mxu0 %v9698_v23  ;;  %v808_v23 = vld [vmem:[%s12182_s2 + $0xb98] sm:$0xff] }
 0x19b   : > { %3743 = vmatpush1.bf16.msra.mxu1 %v9937_v22  ;;  %v560_v22 = vld [vmem:[%s12182_s2 + $0x3d8] sm:$0xff] }
 0x19c   : > { %3744 = vmatprep.subr.bf16.mxu1 %v9954_v24  ;;  %v816_v24 = vld [vmem:[%s12182_s2 + $0xbd8] sm:$0xff]  ;;  %v9572_v27 = vcombine.high %v552_v21, %v560_v22  ;;  %v9571_v33 = vcombine.low %v552_v21, %v560_v22 }
 0x19d   : > { %3704 = vmatpush1.bf16.msra.mxu0 %v9697_v29  ;;  %v9828_v28 = vcombine.high %v808_v23, %v816_v24  ;;  %v568_v29 = vld [vmem:[%s12182_s2 + $0x418] sm:$0xff]  ;;  %v9827_v34 = vcombine.low %v808_v23, %v816_v24 }
 0x19e   : > { %3755 = vmatprep.subr.bf16.mxu0 %v9460_v31  ;;  %v824_v31 = vld [vmem:[%s12182_s2 + $0xc18] sm:$0xff] }
 0x19f   : > { %3745 = vmatpush1.bf16.msra.mxu1 %v9953_v30  ;;  %v576_v30 = vld [vmem:[%s12182_s2 + $0x458] sm:$0xff] }
 0x1a0   : > { %3796 = vmatprep.subr.bf16.mxu1 %v9716_v32  ;;  %3706 = vmatmul.mubr.bf16.vlgmr.msra.gmra.mrb[8].mxu0 %v12282_v17  ;;  %v832_v32 = vld [vmem:[%s12182_s2 + $0xc58] sm:$0xff]  ;;  %v9588_v35 = vcombine.high %v568_v29, %v576_v30  ;;  %v9587_v41 = vcombine.low %v568_v29, %v576_v30 }
 0x1a1   : > { %3756 = vmatpush1.bf16.msra.mxu0 %v9459_v37  ;;  %3787 = vmatprep.mubr.bf16.mxu0 %v12234_v59  ;;  %v9844_v36 = vcombine.high %v824_v31, %v832_v32  ;;  %v584_v37 = vld [vmem:[%s12182_s2 + $0x498] sm:$0xff]  ;;  %v9843_v42 = vcombine.low %v824_v31, %v832_v32 }
 0x1a2   : > { %3747 = vmatmul.mubr.bf16.vlgmr.msra.gmra.mrb[8].mxu1 %v12286_v20  ;;  %3757 = vmatprep.subr.bf16.mxu0 %v9476_v39  ;;  %v840_v39 = vld [vmem:[%s12182_s2 + $0xc98] sm:$0xff] }
 0x1a3   : > { %3797 = vmatpush1.bf16.msra.mxu1 %v9715_v38  ;;  %3828 = vmatprep.mubr.bf16.mxu1 %v12236_v60  ;;  %v592_v38 = vld [vmem:[%s12182_s2 + $0x4d8] sm:$0xff] }
 0x1a4   : > { %3798 = vmatprep.subr.bf16.mxu1 %v9732_v40  ;;  %v848_v40 = vld [vmem:[%s12182_s2 + $0xcd8] sm:$0xff]  ;;  %v9604_v43 = vcombine.high %v584_v37, %v592_v38  ;;  %v9603_v49 = vcombine.low %v584_v37, %v592_v38 }
 0x1a5   : > { %3758 = vmatpush1.bf16.msra.mxu0 %v9475_v45  ;;  %v9860_v44 = vcombine.high %v840_v39, %v848_v40  ;;  %v600_v45 = vld [vmem:[%s12182_s2 + $0x518] sm:$0xff]  ;;  %v9859_v50 = vcombine.low %v840_v39, %v848_v40 }
 0x1a6   : > { %3759 = vmatprep.subr.bf16.mxu0 %v9492_v47  ;;  %v856_v47 = vld [vmem:[%s12182_s2 + $0xd18] sm:$0xff] }
 0x1a7   : > { %3799 = vmatpush1.bf16.msra.mxu1 %v9731_v46  ;;  %v608_v46 = vld [vmem:[%s12182_s2 + $0x558] sm:$0xff] }
 0x1a8   : > { %3800 = vmatprep.subr.bf16.mxu1 %v9748_v48  ;;  %v864_v48 = vld [vmem:[%s12182_s2 + $0xd58] sm:$0xff]  ;;  %v9620_v51 = vcombine.high %v600_v45, %v608_v46  ;;  %v9619_v57 = vcombine.low %v600_v45, %v608_v46 }
 0x1a9   : > { %3760 = vmatpush1.bf16.msra.mxu0 %v9491_v53  ;;  %v9876_v52 = vcombine.high %v856_v47, %v864_v48  ;;  %v616_v53 = vld [vmem:[%s12182_s2 + $0x598] sm:$0xff]  ;;  %v9875_v58 = vcombine.low %v856_v47, %v864_v48 }
 0x1aa   : > { %3761 = vmatprep.subr.bf16.mxu0 %v9508_v55  ;;  %v872_v55 = vld [vmem:[%s12182_s2 + $0xd98] sm:$0xff] }
 0x1ab   : > { %3801 = vmatpush1.bf16.msra.mxu1 %v9747_v54  ;;  %v624_v54 = vld [vmem:[%s12182_s2 + $0x5d8] sm:$0xff] }
 0x1ac   : > { %3802 = vmatprep.subr.bf16.mxu1 %v9764_v56  ;;  %v880_v56 = vld [vmem:[%s12182_s2 + $0xdd8] sm:$0xff]  ;;  %v9636_v61 = vcombine.high %v616_v53, %v624_v54  ;;  %v9635_v3 = vcombine.low %v616_v53, %v624_v54 }
 0x1ad   : > { %3762 = vmatpush1.bf16.msra.mxu0 %v9507_v63  ;;  %v9892_v62 = vcombine.high %v872_v55, %v880_v56  ;;  %v632_v63 = vld [vmem:[%s12182_s2 + $0x618] sm:$0xff]  ;;  %v9891_v4 = vcombine.low %v872_v55, %v880_v56 }
 0x1ae   : > { %3763 = vmatprep.subr.bf16.mxu0 %v9524_v1  ;;  %v888_v1 = vld [vmem:[%s12182_s2 + $0xe18] sm:$0xff] }
 0x1af   : > { %3803 = vmatpush1.bf16.msra.mxu1 %v9763_v0  ;;  %v640_v0 = vld [vmem:[%s12182_s2 + $0x658] sm:$0xff] }
 0x1b0   : > { %3804 = vmatprep.subr.bf16.mxu1 %v9780_v2  ;;  %v896_v2 = vld [vmem:[%s12182_s2 + $0xe58] sm:$0xff]  ;;  %v9652_v5 = vcombine.high %v632_v63, %v640_v0  ;;  %v9651_v11 = vcombine.low %v632_v63, %v640_v0 }
 0x1b1   : > { %3764 = vmatpush1.bf16.msra.mxu0 %v9523_v7  ;;  %v9908_v6 = vcombine.high %v888_v1, %v896_v2  ;;  %v648_v7 = vld [vmem:[%s12182_s2 + $0x698] sm:$0xff]  ;;  %v9907_v12 = vcombine.low %v888_v1, %v896_v2 }
 0x1b2   : > { %3765 = vmatprep.subr.bf16.mxu0 %v9540_v9  ;;  %v904_v9 = vld [vmem:[%s12182_s2 + $0xe98] sm:$0xff] }
 0x1b3   : > { %3805 = vmatpush1.bf16.msra.mxu1 %v9779_v8  ;;  %v656_v8 = vld [vmem:[%s12182_s2 + $0x6d8] sm:$0xff] }
 0x1b4   : > { %3806 = vmatprep.subr.bf16.mxu1 %v9796_v10  ;;  %v912_v10 = vld [vmem:[%s12182_s2 + $0xed8] sm:$0xff]  ;;  %v9668_v13 = vcombine.high %v648_v7, %v656_v8  ;;  %v9667_v21 = vcombine.low %v648_v7, %v656_v8 }
 0x1b5   : > { %3766 = vmatpush1.bf16.msra.mxu0 %v9539_v15  ;;  %v9924_v14 = vcombine.high %v904_v9, %v912_v10  ;;  %v664_v15 = vld [vmem:[%s12182_s2 + $0x718] sm:$0xff]  ;;  %v9923_v22 = vcombine.low %v904_v9, %v912_v10 }
 0x1b6   : > { %3767 = vmatprep.subr.bf16.mxu0 %v9556_v18  ;;  %v920_v18 = vld [vmem:[%s12182_s2 + $0xf18] sm:$0xff] }
 0x1b7   : > { %3807 = vmatpush1.bf16.msra.mxu1 %v9795_v16  ;;  %v672_v16 = vld [vmem:[%s12182_s2 + $0x758] sm:$0xff] }
 0x1b8   : > { %3808 = vmatprep.subr.bf16.mxu1 %v9812_v19  ;;  %v928_v19 = vld [vmem:[%s12182_s2 + $0xf58] sm:$0xff]  ;;  %v9684_v23 = vcombine.high %v664_v15, %v672_v16  ;;  %v9683_v29 = vcombine.low %v664_v15, %v672_v16 }
 0x1b9   : > { %3768 = vmatpush1.bf16.msra.mxu0 %v9555_v25  ;;  %v9940_v24 = vcombine.high %v920_v18, %v928_v19  ;;  %v680_v25 = vld [vmem:[%s12182_s2 + $0x798] sm:$0xff]  ;;  %v9939_v30 = vcombine.low %v920_v18, %v928_v19 }
 0x1ba   : > { %3769 = vmatprep.subr.bf16.mxu0 %v9572_v27  ;;  %v936_v27 = vld [vmem:[%s12182_s2 + $0xf98] sm:$0xff] }
 0x1bb   : > { %3809 = vmatpush1.bf16.msra.mxu1 %v9811_v26  ;;  %v688_v26 = vld [vmem:[%s12182_s2 + $0x7d8] sm:$0xff] }
 0x1bc   : > { %3810 = vmatprep.subr.bf16.mxu1 %v9828_v28  ;;  %v944_v28 = vld [vmem:[%s12182_s2 + $0xfd8] sm:$0xff]  ;;  %v9700_v31 = vcombine.high %v680_v25, %v688_v26  ;;  %v9699_v37 = vcombine.low %v680_v25, %v688_v26 }
 0x1bd   : > { %3770 = vmatpush1.bf16.msra.mxu0 %v9571_v33  ;;  %v9956_v32 = vcombine.high %v936_v27, %v944_v28  ;;  %v441_v33 = vld [vmem:[%s12182_s2 + $0x20] sm:$0xff]  ;;  %v9955_v38 = vcombine.low %v936_v27, %v944_v28 }
 0x1be   : > { %3771 = vmatprep.subr.bf16.mxu0 %v9588_v35  ;;  %v697_v35 = vld [vmem:[%s12182_s2 + $0x820] sm:$0xff] }
 0x1bf   : > { %3811 = vmatpush1.bf16.msra.mxu1 %v9827_v34  ;;  %v449_v34 = vld [vmem:[%s12182_s2 + $0x60] sm:$0xff] }
 0x1c0   : > { %3812 = vmatprep.subr.bf16.mxu1 %v9844_v36  ;;  %v705_v36 = vld [vmem:[%s12182_s2 + $0x860] sm:$0xff]  ;;  %v9462_v39 = vcombine.high %v441_v33, %v449_v34  ;;  %v9461_v45 = vcombine.low %v441_v33, %v449_v34 }
 0x1c1   : > { %3772 = vmatpush1.bf16.msra.mxu0 %v9587_v41  ;;  %v9718_v40 = vcombine.high %v697_v35, %v705_v36  ;;  %v457_v41 = vld [vmem:[%s12182_s2 + $0xa0] sm:$0xff]  ;;  %v9717_v46 = vcombine.low %v697_v35, %v705_v36 }
 0x1c2   : > { %3773 = vmatprep.subr.bf16.mxu0 %v9604_v43  ;;  %v713_v43 = vld [vmem:[%s12182_s2 + $0x8a0] sm:$0xff] }
 0x1c3   : > { %3813 = vmatpush1.bf16.msra.mxu1 %v9843_v42  ;;  %v465_v42 = vld [vmem:[%s12182_s2 + $0xe0] sm:$0xff] }
 0x1c4   : > { %3814 = vmatprep.subr.bf16.mxu1 %v9860_v44  ;;  %v721_v44 = vld [vmem:[%s12182_s2 + $0x8e0] sm:$0xff]  ;;  %v9478_v47 = vcombine.high %v457_v41, %v465_v42  ;;  %v9477_v53 = vcombine.low %v457_v41, %v465_v42 }
 0x1c5   : > { %3774 = vmatpush1.bf16.msra.mxu0 %v9603_v49  ;;  %v9734_v48 = vcombine.high %v713_v43, %v721_v44  ;;  %v473_v49 = vld [vmem:[%s12182_s2 + $0x120] sm:$0xff]  ;;  %v9733_v54 = vcombine.low %v713_v43, %v721_v44 }
 0x1c6   : > { %3775 = vmatprep.subr.bf16.mxu0 %v9620_v51  ;;  %v729_v51 = vld [vmem:[%s12182_s2 + $0x920] sm:$0xff] }
 0x1c7   : > { %3815 = vmatpush1.bf16.msra.mxu1 %v9859_v50  ;;  %v481_v50 = vld [vmem:[%s12182_s2 + $0x160] sm:$0xff] }
 0x1c8   : > { %3816 = vmatprep.subr.bf16.mxu1 %v9876_v52  ;;  %v737_v52 = vld [vmem:[%s12182_s2 + $0x960] sm:$0xff]  ;;  %v9494_v55 = vcombine.high %v473_v49, %v481_v50  ;;  %v9493_v63 = vcombine.low %v473_v49, %v481_v50 }
 0x1c9   : > { %3776 = vmatpush1.bf16.msra.mxu0 %v9619_v57  ;;  %v9750_v56 = vcombine.high %v729_v51, %v737_v52  ;;  %v489_v57 = vld [vmem:[%s12182_s2 + $0x1a0] sm:$0xff]  ;;  %v9749_v0 = vcombine.low %v729_v51, %v737_v52 }
 0x1ca   : > { %3777 = vmatprep.subr.bf16.mxu0 %v9636_v61  ;;  %v745_v61 = vld [vmem:[%s12182_s2 + $0x9a0] sm:$0xff] }
 0x1cb   : > { %3817 = vmatpush1.bf16.msra.mxu1 %v9875_v58  ;;  %v497_v58 = vld [vmem:[%s12182_s2 + $0x1e0] sm:$0xff] }
 0x1cc   : > { %3818 = vmatprep.subr.bf16.mxu1 %v9892_v62  ;;  %v753_v62 = vld [vmem:[%s12182_s2 + $0x9e0] sm:$0xff]  ;;  %v9510_v1 = vcombine.high %v489_v57, %v497_v58  ;;  %v9509_v7 = vcombine.low %v489_v57, %v497_v58 }
 0x1cd   : > { %3778 = vmatpush1.bf16.msra.mxu0 %v9635_v3  ;;  %v9766_v2 = vcombine.high %v745_v61, %v753_v62  ;;  %v505_v3 = vld [vmem:[%s12182_s2 + $0x220] sm:$0xff]  ;;  %v9765_v8 = vcombine.low %v745_v61, %v753_v62 }
 0x1ce   : > { %3779 = vmatprep.subr.bf16.mxu0 %v9652_v5  ;;  %v761_v5 = vld [vmem:[%s12182_s2 + $0xa20] sm:$0xff] }
 0x1cf   : > { %3819 = vmatpush1.bf16.msra.mxu1 %v9891_v4  ;;  %v513_v4 = vld [vmem:[%s12182_s2 + $0x260] sm:$0xff] }
 0x1d0   : > { %3820 = vmatprep.subr.bf16.mxu1 %v9908_v6  ;;  %v769_v6 = vld [vmem:[%s12182_s2 + $0xa60] sm:$0xff]  ;;  %v9526_v9 = vcombine.high %v505_v3, %v513_v4  ;;  %v9525_v15 = vcombine.low %v505_v3, %v513_v4 }
 0x1d1   : > { %3780 = vmatpush1.bf16.msra.mxu0 %v9651_v11  ;;  %v9782_v10 = vcombine.high %v761_v5, %v769_v6  ;;  %v521_v11 = vld [vmem:[%s12182_s2 + $0x2a0] sm:$0xff]  ;;  %v9781_v16 = vcombine.low %v761_v5, %v769_v6 }
 0x1d2   : > { %3781 = vmatprep.subr.bf16.mxu0 %v9668_v13  ;;  %v777_v13 = vld [vmem:[%s12182_s2 + $0xaa0] sm:$0xff] }
 0x1d3   : > { %3821 = vmatpush1.bf16.msra.mxu1 %v9907_v12  ;;  %v529_v12 = vld [vmem:[%s12182_s2 + $0x2e0] sm:$0xff] }
 0x1d4   : > { %3822 = vmatprep.subr.bf16.mxu1 %v9924_v14  ;;  %v785_v14 = vld [vmem:[%s12182_s2 + $0xae0] sm:$0xff]  ;;  %v9542_v18 = vcombine.high %v521_v11, %v529_v12  ;;  %v9541_v25 = vcombine.low %v521_v11, %v529_v12 }
 0x1d5   : > { %3782 = vmatpush1.bf16.msra.mxu0 %v9667_v21  ;;  %v9798_v19 = vcombine.high %v777_v13, %v785_v14  ;;  %v537_v21 = vld [vmem:[%s12182_s2 + $0x320] sm:$0xff]  ;;  %v9797_v26 = vcombine.low %v777_v13, %v785_v14 }
 0x1d6   : > { %3783 = vmatprep.subr.bf16.mxu0 %v9684_v23  ;;  %v793_v23 = vld [vmem:[%s12182_s2 + $0xb20] sm:$0xff] }
 0x1d7   : > { %3823 = vmatpush1.bf16.msra.mxu1 %v9923_v22  ;;  %v545_v22 = vld [vmem:[%s12182_s2 + $0x360] sm:$0xff] }
 0x1d8   : > { %3824 = vmatprep.subr.bf16.mxu1 %v9940_v24  ;;  %v801_v24 = vld [vmem:[%s12182_s2 + $0xb60] sm:$0xff]  ;;  %v9558_v27 = vcombine.high %v537_v21, %v545_v22  ;;  %v9557_v41 = vcombine.low %v537_v21, %v545_v22 }
 0x1d9   : > { %3784 = vmatpush1.bf16.msra.mxu0 %v9683_v29  ;;  %v9814_v29 = vcombine.high %v793_v23, %v801_v24  ;;  %v809_v35 = vld [vmem:[%s12182_s2 + $0xba0] sm:$0xff] }
 0x1da   : > { %3785 = vmatprep.subr.bf16.mxu0 %v9700_v31  ;;  %v561_v31 = vld [vmem:[%s12182_s2 + $0x3e0] sm:$0xff] }
 0x1db   : > { %3825 = vmatpush1.bf16.msra.mxu1 %v9939_v30  ;;  %v553_v30 = vld [vmem:[%s12182_s2 + $0x3a0] sm:$0xff] }
 0x1dc   : > { %3826 = vmatprep.subr.bf16.mxu1 %v9956_v32  ;;  %v413_v32 = vld [vmem:[#allocation2] sm:$0xff] }
 0x1dd   : > { %3786 = vmatpush1.bf16.msra.mxu0 %v9699_v37  ;;  %v817_v36 = vld [vmem:[%s12182_s2 + $0xbe0] sm:$0xff] }
 0x1de   : > { %3837 = vmatprep.subr.bf16.mxu0 %v9462_v39  ;;  %v9830_v49 = vcombine.high %v809_v35, %v817_v36  ;;  %v569_v50 = vld [vmem:[%s12182_s2 + $0x420] sm:$0xff] }
 0x1df   : > { %3827 = vmatpush1.bf16.msra.mxu1 %v9955_v38  ;;  %v414_v38 = vld [vmem:[#allocation2 + $0x8] sm:$0xff]  ;;  %v577_v51 = vld [vmem:[%s12182_s2 + $0x460] sm:$0xff] }
 0x1e0   : > { %3878 = vmatprep.subr.bf16.mxu1 %v9718_v40  ;;  %3788 = vmatmul.mubr.bf16.vlgmr.msra.gmra.mrb[12].mxu0 %v12282_v17  ;;  %v9590_v57 = vcombine.high %v569_v50, %v577_v51  ;;  %v585_v61 = vld [vmem:[%s12182_s2 + $0x4a0] sm:$0xff] }
 0x1e1   : > { %3838 = vmatpush1.bf16.msra.mxu0 %v9461_v45  ;;  %3869 = vmatprep.mubr.bf16.mxu0 %v12234_v59  ;;  %v9813_v45 = vcombine.low %v793_v23, %v801_v24  ;;  %v593_v62 = vld [vmem:[%s12182_s2 + $0x4e0] sm:$0xff] }
 0x1e2   : > { %3829 = vmatmul.mubr.bf16.vlgmr.msra.gmra.mrb[12].mxu1 %v12286_v20  ;;  %3839 = vmatprep.subr.bf16.mxu0 %v9478_v47  ;;  %v9606_v3 = vcombine.high %v585_v61, %v593_v62  ;;  %v601_v5 = vld [vmem:[%s12182_s2 + $0x520] sm:$0xff] }
 0x1e3   : > { %3879 = vmatpush1.bf16.msra.mxu1 %v9717_v46  ;;  %3910 = vmatprep.mubr.bf16.mxu1 %v12236_v60  ;;  %v9574_v46 = vcombine.high %v553_v30, %v561_v31  ;;  %v609_v6 = vld [vmem:[%s12182_s2 + $0x560] sm:$0xff] }
 0x1e4   : > { %3880 = vmatprep.subr.bf16.mxu1 %v9734_v48  ;;  %v9622_v11 = vcombine.high %v601_v5, %v609_v6  ;;  %v617_v13 = vld [vmem:[%s12182_s2 + $0x5a0] sm:$0xff] }
 0x1e5   : > { %3840 = vmatpush1.bf16.msra.mxu0 %v9477_v53  ;;  %v825_v53 = vld [vmem:[%s12182_s2 + $0xc20] sm:$0xff] }
 0x1e6   : > { %3841 = vmatprep.subr.bf16.mxu0 %v9494_v55  ;;  %v9573_v55 = vcombine.low %v553_v30, %v561_v31  ;;  %v625_v14 = vld [vmem:[%s12182_s2 + $0x5e0] sm:$0xff] }
 0x1e7   : > { %3881 = vmatpush1.bf16.msra.mxu1 %v9733_v54  ;;  %v833_v54 = vld [vmem:[%s12182_s2 + $0xc60] sm:$0xff]  ;;  %v9638_v21 = vcombine.high %v617_v13, %v625_v14 }
 0x1e8   : > { %3882 = vmatprep.subr.bf16.mxu1 %v9750_v56  ;;  %v9829_v56 = vcombine.low %v809_v35, %v817_v36  ;;  %v9846_v58 = vcombine.high %v825_v53, %v833_v54  ;;  %v633_v23 = vld [vmem:[%s12182_s2 + $0x620] sm:$0xff] }
 0x1e9   : > { %3842 = vmatpush1.bf16.msra.mxu0 %v9493_v63  ;;  %v841_v63 = vld [vmem:[%s12182_s2 + $0xca0] sm:$0xff] }
 0x1ea   : > { %3843 = vmatprep.subr.bf16.mxu0 %v9510_v1  ;;  %v9589_v1 = vcombine.low %v569_v50, %v577_v51  ;;  %v641_v24 = vld [vmem:[%s12182_s2 + $0x660] sm:$0xff] }
 0x1eb   : > { %3883 = vmatpush1.bf16.msra.mxu1 %v9749_v0  ;;  %v849_v0 = vld [vmem:[%s12182_s2 + $0xce0] sm:$0xff]  ;;  %v9653_v35 = vcombine.low %v633_v23, %v641_v24 }
 0x1ec   : > { %3884 = vmatprep.subr.bf16.mxu1 %v9766_v2  ;;  %v9845_v2 = vcombine.low %v825_v53, %v833_v54  ;;  %v9862_v4 = vcombine.high %v841_v63, %v849_v0  ;;  %v649_v31 = vld [vmem:[%s12182_s2 + $0x6a0] sm:$0xff] }
 0x1ed   : > { %3844 = vmatpush1.bf16.msra.mxu0 %v9509_v7  ;;  %v857_v7 = vld [vmem:[%s12182_s2 + $0xd20] sm:$0xff] }
 0x1ee   : > { %3845 = vmatprep.subr.bf16.mxu0 %v9526_v9  ;;  %v9605_v9 = vcombine.low %v585_v61, %v593_v62  ;;  %v945_v50 = vld [vmem:[%s12182_s2 + $0xfe0] sm:$0xff] }
 0x1ef   : > { %3885 = vmatpush1.bf16.msra.mxu1 %v9765_v8  ;;  %v865_v8 = vld [vmem:[%s12182_s2 + $0xd60] sm:$0xff] }
 0x1f0   : > { %3886 = vmatprep.subr.bf16.mxu1 %v9782_v10  ;;  %v9861_v10 = vcombine.low %v841_v63, %v849_v0  ;;  %v9878_v12 = vcombine.high %v857_v7, %v865_v8 }
 0x1f1   : > { %3846 = vmatpush1.bf16.msra.mxu0 %v9525_v15  ;;  %v873_v15 = vld [vmem:[%s12182_s2 + $0xda0] sm:$0xff] }
 0x1f2   : > { %3847 = vmatprep.subr.bf16.mxu0 %v9542_v18  ;;  %v9621_v18 = vcombine.low %v601_v5, %v609_v6 }
 0x1f3   : > { %3887 = vmatpush1.bf16.msra.mxu1 %v9781_v16  ;;  %v3543_v28 = vpop.f32.mrb[0].mxu0  ;;  %v881_v16 = vld [vmem:[%s12182_s2 + $0xde0] sm:$0xff] }
 0x1f4   : > { %3888 = vmatprep.subr.bf16.mxu1 %v9798_v19  ;;  %v3545_v34 = vpop.f32.mrb[1].mxu0  ;;  %v9877_v19 = vcombine.low %v857_v7, %v865_v8  ;;  %v9894_v22 = vcombine.high %v873_v15, %v881_v16 }
 0x1f5   : > { %v3584_v33 = vpop.f32.mrb[0].mxu1  ;;  %v3547_v40 = vpop.f32.mrb[2].mxu0  ;;  %3848 = vmatpush1.bf16.msra.mxu0 %v9541_v25  ;;  %v889_v25 = vld [vmem:[%s12182_s2 + $0xe20] sm:$0xff] }
 0x1f6   : > { %v3585_v37 = vadd.f32 %v3584_v33, %v3543_v28  ;;  %v3586_v39 = vpop.f32.mrb[1].mxu1  ;;  %v3548_v44 = vpop.f32.mrb[3].mxu0  ;;  %3849 = vmatprep.subr.bf16.mxu0 %v9558_v27  ;;  %v9637_v27 = vcombine.low %v617_v13, %v625_v14  ;;  %v9893_v28 = vcombine.low %v873_v15, %v881_v16  ;;  %v905_v33 = vld [vmem:[%s12182_s2 + $0xea0] sm:$0xff] }
 0x1f7   : > { %v3587_v42 = vadd.f32 %v3586_v39, %v3545_v34  ;;  %v3588_v43 = vpop.f32.mrb[2].mxu1  ;;  %3889 = vmatpush1.bf16.msra.mxu1 %v9797_v26  ;;  %v897_v26 = vld [vmem:[%s12182_s2 + $0xe60] sm:$0xff] }
 0x1f8   : > { %v4165_v47 = vadd.f32 %v3585_v37, %v413_v32  ;;  %v3589_v48 = vpop.f32.mrb[3].mxu1  ;;  %3890 = vmatprep.subr.bf16.mxu1 %v9814_v29  ;;  %v9654_v29 = vcombine.high %v633_v23, %v641_v24  ;;  %v9910_v30 = vcombine.high %v889_v25, %v897_v26  ;;  %v657_v32 = vld [vmem:[%s12182_s2 + $0x6e0] sm:$0xff]  ;;  %v9909_v36 = vcombine.low %v889_v25, %v897_v26 }
 0x1f9   : > { %v4166_v52 = vadd.f32 %v3587_v42, %v414_v38  ;;  %3850 = vmatpush1.bf16.msra.mxu0 %v9557_v41  ;;  %v913_v34 = vld [vmem:[%s12182_s2 + $0xee0] sm:$0xff]  ;;  %v9670_v37 = vcombine.high %v649_v31, %v657_v32  ;;  %v9669_v43 = vcombine.low %v649_v31, %v657_v32 }
 0x1fa   : > { %4181 = vst [vmem:[#allocation2] sm:$0xff] %v4165_v47  ;;  %3851 = vmatprep.subr.bf16.mxu0 %v9574_v46  ;;  %v9926_v38 = vcombine.high %v905_v33, %v913_v34  ;;  %v665_v39 = vld [vmem:[%s12182_s2 + $0x720] sm:$0xff]  ;;  %v9925_v44 = vcombine.low %v905_v33, %v913_v34 }
 0x1fb   : > { %4182 = vst [vmem:[#allocation2 + $0x8] sm:$0xff] %v4166_v52  ;;  %3891 = vmatpush1.bf16.msra.mxu1 %v9813_v45  ;;  %v673_v40 = vld [vmem:[%s12182_s2 + $0x760] sm:$0xff] }
 0x1fc   : > { %3892 = vmatprep.subr.bf16.mxu1 %v9830_v49  ;;  %v921_v41 = vld [vmem:[%s12182_s2 + $0xf20] sm:$0xff]  ;;  %v9686_v45 = vcombine.high %v665_v39, %v673_v40  ;;  %v9685_v51 = vcombine.low %v665_v39, %v673_v40 }
 0x1fd   : > { %3852 = vmatpush1.bf16.msra.mxu0 %v9573_v55  ;;  %v929_v42 = vld [vmem:[%s12182_s2 + $0xf60] sm:$0xff]  ;;  %v442_v55 = vld [vmem:[%s12182_s2 + $0x28] sm:$0xff] }
 0x1fe   : > { %3853 = vmatprep.subr.bf16.mxu0 %v9590_v57  ;;  %v9942_v46 = vcombine.high %v921_v41, %v929_v42  ;;  %v681_v47 = vld [vmem:[%s12182_s2 + $0x7a0] sm:$0xff]  ;;  %v9941_v52 = vcombine.low %v921_v41, %v929_v42  ;;  %v698_v57 = vld [vmem:[%s12182_s2 + $0x828] sm:$0xff] }
 0x1ff   : > { %3893 = vmatpush1.bf16.msra.mxu1 %v9829_v56  ;;  %v689_v48 = vld [vmem:[%s12182_s2 + $0x7e0] sm:$0xff]  ;;  %v450_v56 = vld [vmem:[%s12182_s2 + $0x68] sm:$0xff] }
 0x200   : > { %3894 = vmatprep.subr.bf16.mxu1 %v9846_v58  ;;  %v937_v49 = vld [vmem:[%s12182_s2 + $0xfa0] sm:$0xff]  ;;  %v9702_v53 = vcombine.high %v681_v47, %v689_v48  ;;  %v706_v58 = vld [vmem:[%s12182_s2 + $0x868] sm:$0xff]  ;;  %v9701_v61 = vcombine.low %v681_v47, %v689_v48  ;;  %v9464_v63 = vcombine.high %v442_v55, %v450_v56  ;;  %v9463_v5 = vcombine.low %v442_v55, %v450_v56 }
 0x201   : > { %3854 = vmatpush1.bf16.msra.mxu0 %v9589_v1  ;;  %v9958_v54 = vcombine.high %v937_v49, %v945_v50  ;;  %v9957_v62 = vcombine.low %v937_v49, %v945_v50  ;;  %v9720_v0 = vcombine.high %v698_v57, %v706_v58  ;;  %v458_v1 = vld [vmem:[%s12182_s2 + $0xa8] sm:$0xff]  ;;  %v9719_v6 = vcombine.low %v698_v57, %v706_v58 }
 0x202   : > { %3855 = vmatprep.subr.bf16.mxu0 %v9606_v3  ;;  %v714_v3 = vld [vmem:[%s12182_s2 + $0x8a8] sm:$0xff] }
 0x203   : > { %3895 = vmatpush1.bf16.msra.mxu1 %v9845_v2  ;;  %v466_v2 = vld [vmem:[%s12182_s2 + $0xe8] sm:$0xff] }
 0x204   : > { %3896 = vmatprep.subr.bf16.mxu1 %v9862_v4  ;;  %v722_v4 = vld [vmem:[%s12182_s2 + $0x8e8] sm:$0xff]  ;;  %v9480_v7 = vcombine.high %v458_v1, %v466_v2  ;;  %v9479_v13 = vcombine.low %v458_v1, %v466_v2 }
 0x205   : > { %3856 = vmatpush1.bf16.msra.mxu0 %v9605_v9  ;;  %v9736_v8 = vcombine.high %v714_v3, %v722_v4  ;;  %v474_v9 = vld [vmem:[%s12182_s2 + $0x128] sm:$0xff]  ;;  %v9735_v14 = vcombine.low %v714_v3, %v722_v4 }
 0x206   : > { %3857 = vmatprep.subr.bf16.mxu0 %v9622_v11  ;;  %v730_v11 = vld [vmem:[%s12182_s2 + $0x928] sm:$0xff] }
 0x207   : > { %3897 = vmatpush1.bf16.msra.mxu1 %v9861_v10  ;;  %v482_v10 = vld [vmem:[%s12182_s2 + $0x168] sm:$0xff] }
 0x208   : > { %3898 = vmatprep.subr.bf16.mxu1 %v9878_v12  ;;  %v738_v12 = vld [vmem:[%s12182_s2 + $0x968] sm:$0xff]  ;;  %v9496_v15 = vcombine.high %v474_v9, %v482_v10  ;;  %v9495_v23 = vcombine.low %v474_v9, %v482_v10 }
 0x209   : > { %3858 = vmatpush1.bf16.msra.mxu0 %v9621_v18  ;;  %v9752_v16 = vcombine.high %v730_v11, %v738_v12  ;;  %v490_v18 = vld [vmem:[%s12182_s2 + $0x1a8] sm:$0xff]  ;;  %v9751_v24 = vcombine.low %v730_v11, %v738_v12 }
 0x20a   : > { %3859 = vmatprep.subr.bf16.mxu0 %v9638_v21  ;;  %v746_v21 = vld [vmem:[%s12182_s2 + $0x9a8] sm:$0xff] }
 0x20b   : > { %3899 = vmatpush1.bf16.msra.mxu1 %v9877_v19  ;;  %v498_v19 = vld [vmem:[%s12182_s2 + $0x1e8] sm:$0xff] }
 0x20c   : > { %3900 = vmatprep.subr.bf16.mxu1 %v9894_v22  ;;  %v754_v22 = vld [vmem:[%s12182_s2 + $0x9e8] sm:$0xff]  ;;  %v9512_v25 = vcombine.high %v490_v18, %v498_v19  ;;  %v9511_v31 = vcombine.low %v490_v18, %v498_v19 }
 0x20d   : > { %3860 = vmatpush1.bf16.msra.mxu0 %v9637_v27  ;;  %v9768_v26 = vcombine.high %v746_v21, %v754_v22  ;;  %v506_v27 = vld [vmem:[%s12182_s2 + $0x228] sm:$0xff]  ;;  %v9767_v32 = vcombine.low %v746_v21, %v754_v22 }
 0x20e   : > { %3861 = vmatprep.subr.bf16.mxu0 %v9654_v29  ;;  %v762_v29 = vld [vmem:[%s12182_s2 + $0xa28] sm:$0xff] }
 0x20f   : > { %3901 = vmatpush1.bf16.msra.mxu1 %v9893_v28  ;;  %v514_v28 = vld [vmem:[%s12182_s2 + $0x268] sm:$0xff] }
 0x210   : > { %3902 = vmatprep.subr.bf16.mxu1 %v9910_v30  ;;  %v770_v30 = vld [vmem:[%s12182_s2 + $0xa68] sm:$0xff]  ;;  %v9528_v33 = vcombine.high %v506_v27, %v514_v28  ;;  %v9527_v39 = vcombine.low %v506_v27, %v514_v28 }
 0x211   : > { %3862 = vmatpush1.bf16.msra.mxu0 %v9653_v35  ;;  %v9784_v34 = vcombine.high %v762_v29, %v770_v30  ;;  %v522_v35 = vld [vmem:[%s12182_s2 + $0x2a8] sm:$0xff]  ;;  %v9783_v40 = vcombine.low %v762_v29, %v770_v30 }
 0x212   : > { %3863 = vmatprep.subr.bf16.mxu0 %v9670_v37  ;;  %v778_v37 = vld [vmem:[%s12182_s2 + $0xaa8] sm:$0xff] }
 0x213   : > { %3903 = vmatpush1.bf16.msra.mxu1 %v9909_v36  ;;  %v530_v36 = vld [vmem:[%s12182_s2 + $0x2e8] sm:$0xff] }
 0x214   : > { %3904 = vmatprep.subr.bf16.mxu1 %v9926_v38  ;;  %v786_v38 = vld [vmem:[%s12182_s2 + $0xae8] sm:$0xff]  ;;  %v9544_v41 = vcombine.high %v522_v35, %v530_v36  ;;  %v9543_v47 = vcombine.low %v522_v35, %v530_v36 }
 0x215   : > { %3864 = vmatpush1.bf16.msra.mxu0 %v9669_v43  ;;  %v9800_v42 = vcombine.high %v778_v37, %v786_v38  ;;  %v538_v43 = vld [vmem:[%s12182_s2 + $0x328] sm:$0xff]  ;;  %v9799_v48 = vcombine.low %v778_v37, %v786_v38 }
 0x216   : > { %3865 = vmatprep.subr.bf16.mxu0 %v9686_v45  ;;  %v794_v45 = vld [vmem:[%s12182_s2 + $0xb28] sm:$0xff] }
 0x217   : > { %3905 = vmatpush1.bf16.msra.mxu1 %v9925_v44  ;;  %v546_v44 = vld [vmem:[%s12182_s2 + $0x368] sm:$0xff] }
 0x218   : > { %3906 = vmatprep.subr.bf16.mxu1 %v9942_v46  ;;  %v802_v46 = vld [vmem:[%s12182_s2 + $0xb68] sm:$0xff]  ;;  %v9560_v49 = vcombine.high %v538_v43, %v546_v44  ;;  %v9559_v1 = vcombine.low %v538_v43, %v546_v44 }
 0x219   : > { %3866 = vmatpush1.bf16.msra.mxu0 %v9685_v51  ;;  %v9816_v51 = vcombine.high %v794_v45, %v802_v46  ;;  %v810_v57 = vld [vmem:[%s12182_s2 + $0xba8] sm:$0xff] }
 0x21a   : > { %3867 = vmatprep.subr.bf16.mxu0 %v9702_v53  ;;  %v562_v53 = vld [vmem:[%s12182_s2 + $0x3e8] sm:$0xff] }
 0x21b   : > { %3907 = vmatpush1.bf16.msra.mxu1 %v9941_v52  ;;  %v554_v52 = vld [vmem:[%s12182_s2 + $0x3a8] sm:$0xff] }
 0x21c   : > { %3908 = vmatprep.subr.bf16.mxu1 %v9958_v54  ;;  %v415_v54 = vld [vmem:[#allocation2 + $0x10] sm:$0xff]  ;;  %v818_v58 = vld [vmem:[%s12182_s2 + $0xbe8] sm:$0xff] }
 0x21d   : > { %3868 = vmatpush1.bf16.msra.mxu0 %v9701_v61  ;;  %v9832_v9 = vcombine.high %v810_v57, %v818_v58  ;;  %v570_v10 = vld [vmem:[%s12182_s2 + $0x428] sm:$0xff] }
 0x21e   : > { %3919 = vmatprep.subr.bf16.mxu0 %v9464_v63  ;;  %v578_v11 = vld [vmem:[%s12182_s2 + $0x468] sm:$0xff] }
 0x21f   : > { %3909 = vmatpush1.bf16.msra.mxu1 %v9957_v62  ;;  %v416_v62 = vld [vmem:[#allocation2 + $0x18] sm:$0xff]  ;;  %v9592_v18 = vcombine.high %v570_v10, %v578_v11  ;;  %v586_v21 = vld [vmem:[%s12182_s2 + $0x4a8] sm:$0xff] }
 0x220   : > { %3960 = vmatprep.subr.bf16.mxu1 %v9720_v0  ;;  %3870 = vmatmul.mubr.bf16.vlgmr.msra.gmra.mrb[16].mxu0 %v12282_v17  ;;  %v594_v22 = vld [vmem:[%s12182_s2 + $0x4e8] sm:$0xff] }
 0x221   : > { %3920 = vmatpush1.bf16.msra.mxu0 %v9463_v5  ;;  %3951 = vmatprep.mubr.bf16.mxu0 %v12234_v59  ;;  %v9815_v5 = vcombine.low %v794_v45, %v802_v46  ;;  %v9608_v27 = vcombine.high %v586_v21, %v594_v22  ;;  %v602_v29 = vld [vmem:[%s12182_s2 + $0x528] sm:$0xff] }
 0x222   : > { %3911 = vmatmul.mubr.bf16.vlgmr.msra.gmra.mrb[16].mxu1 %v12286_v20  ;;  %3921 = vmatprep.subr.bf16.mxu0 %v9480_v7  ;;  %v610_v30 = vld [vmem:[%s12182_s2 + $0x568] sm:$0xff] }
 0x223   : > { %3961 = vmatpush1.bf16.msra.mxu1 %v9719_v6  ;;  %3992 = vmatprep.mubr.bf16.mxu1 %v12236_v60  ;;  %v9576_v6 = vcombine.high %v554_v52, %v562_v53  ;;  %v9624_v35 = vcombine.high %v602_v29, %v610_v30  ;;  %v618_v37 = vld [vmem:[%s12182_s2 + $0x5a8] sm:$0xff] }
 0x224   : > { %3962 = vmatprep.subr.bf16.mxu1 %v9736_v8  ;;  %v626_v38 = vld [vmem:[%s12182_s2 + $0x5e8] sm:$0xff] }
 0x225   : > { %3922 = vmatpush1.bf16.msra.mxu0 %v9479_v13  ;;  %v826_v13 = vld [vmem:[%s12182_s2 + $0xc28] sm:$0xff]  ;;  %v9640_v43 = vcombine.high %v618_v37, %v626_v38 }
 0x226   : > { %3923 = vmatprep.subr.bf16.mxu0 %v9496_v15  ;;  %v9575_v15 = vcombine.low %v554_v52, %v562_v53  ;;  %v634_v45 = vld [vmem:[%s12182_s2 + $0x628] sm:$0xff] }
 0x227   : > { %3963 = vmatpush1.bf16.msra.mxu1 %v9735_v14  ;;  %v834_v14 = vld [vmem:[%s12182_s2 + $0xc68] sm:$0xff] }
 0x228   : > { %3964 = vmatprep.subr.bf16.mxu1 %v9752_v16  ;;  %v9831_v16 = vcombine.low %v810_v57, %v818_v58  ;;  %v9848_v19 = vcombine.high %v826_v13, %v834_v14  ;;  %v642_v46 = vld [vmem:[%s12182_s2 + $0x668] sm:$0xff] }
 0x229   : > { %3924 = vmatpush1.bf16.msra.mxu0 %v9495_v23  ;;  %v842_v23 = vld [vmem:[%s12182_s2 + $0xca8] sm:$0xff]  ;;  %v9655_v57 = vcombine.low %v634_v45, %v642_v46 }
 0x22a   : > { %3925 = vmatprep.subr.bf16.mxu0 %v9512_v25  ;;  %v9591_v25 = vcombine.low %v570_v10, %v578_v11  ;;  %v650_v53 = vld [vmem:[%s12182_s2 + $0x6a8] sm:$0xff] }
 0x22b   : > { %3965 = vmatpush1.bf16.msra.mxu1 %v9751_v24  ;;  %v850_v24 = vld [vmem:[%s12182_s2 + $0xce8] sm:$0xff] }
 0x22c   : > { %3966 = vmatprep.subr.bf16.mxu1 %v9768_v26  ;;  %v9847_v26 = vcombine.low %v826_v13, %v834_v14  ;;  %v9864_v28 = vcombine.high %v842_v23, %v850_v24  ;;  %v946_v10 = vld [vmem:[%s12182_s2 + $0xfe8] sm:$0xff] }
 0x22d   : > { %3926 = vmatpush1.bf16.msra.mxu0 %v9511_v31  ;;  %v858_v31 = vld [vmem:[%s12182_s2 + $0xd28] sm:$0xff] }
 0x22e   : > { %3927 = vmatprep.subr.bf16.mxu0 %v9528_v33  ;;  %v9607_v33 = vcombine.low %v586_v21, %v594_v22 }
 0x22f   : > { %3967 = vmatpush1.bf16.msra.mxu1 %v9767_v32  ;;  %v866_v32 = vld [vmem:[%s12182_s2 + $0xd68] sm:$0xff] }
 0x230   : > { %3968 = vmatprep.subr.bf16.mxu1 %v9784_v34  ;;  %v9863_v34 = vcombine.low %v842_v23, %v850_v24  ;;  %v9880_v36 = vcombine.high %v858_v31, %v866_v32 }
 0x231   : > { %3928 = vmatpush1.bf16.msra.mxu0 %v9527_v39  ;;  %v874_v39 = vld [vmem:[%s12182_s2 + $0xda8] sm:$0xff] }
 0x232   : > { %3929 = vmatprep.subr.bf16.mxu0 %v9544_v41  ;;  %v9623_v41 = vcombine.low %v602_v29, %v610_v30 }
 0x233   : > { %3969 = vmatpush1.bf16.msra.mxu1 %v9783_v40  ;;  %v3625_v50 = vpop.f32.mrb[4].mxu0  ;;  %v882_v40 = vld [vmem:[%s12182_s2 + $0xde8] sm:$0xff] }
 0x234   : > { %3970 = vmatprep.subr.bf16.mxu1 %v9800_v42  ;;  %v3627_v56 = vpop.f32.mrb[5].mxu0  ;;  %v9879_v42 = vcombine.low %v858_v31, %v866_v32  ;;  %v9896_v44 = vcombine.high %v874_v39, %v882_v40 }
 0x235   : > { %v3666_v55 = vpop.f32.mrb[4].mxu1  ;;  %v3629_v0 = vpop.f32.mrb[6].mxu0  ;;  %3930 = vmatpush1.bf16.msra.mxu0 %v9543_v47  ;;  %v890_v47 = vld [vmem:[%s12182_s2 + $0xe28] sm:$0xff] }
 0x236   : > { %v3667_v61 = vadd.f32 %v3666_v55, %v3625_v50  ;;  %v3668_v63 = vpop.f32.mrb[5].mxu1  ;;  %v3630_v4 = vpop.f32.mrb[7].mxu0  ;;  %3931 = vmatprep.subr.bf16.mxu0 %v9560_v49  ;;  %v9639_v49 = vcombine.low %v618_v37, %v626_v38  ;;  %v9895_v50 = vcombine.low %v874_v39, %v882_v40  ;;  %v906_v55 = vld [vmem:[%s12182_s2 + $0xea8] sm:$0xff] }
 0x237   : > { %v3669_v2 = vadd.f32 %v3668_v63, %v3627_v56  ;;  %v3670_v3 = vpop.f32.mrb[6].mxu1  ;;  %3971 = vmatpush1.bf16.msra.mxu1 %v9799_v48  ;;  %v898_v48 = vld [vmem:[%s12182_s2 + $0xe68] sm:$0xff] }
 0x238   : > { %v4167_v7 = vadd.f32 %v3667_v61, %v415_v54  ;;  %v3671_v8 = vpop.f32.mrb[7].mxu1  ;;  %3972 = vmatprep.subr.bf16.mxu1 %v9816_v51  ;;  %v9656_v51 = vcombine.high %v634_v45, %v642_v46  ;;  %v9912_v52 = vcombine.high %v890_v47, %v898_v48  ;;  %v658_v54 = vld [vmem:[%s12182_s2 + $0x6e8] sm:$0xff]  ;;  %v9911_v58 = vcombine.low %v890_v47, %v898_v48 }
 0x239   : > { %v4168_v12 = vadd.f32 %v3669_v2, %v416_v62  ;;  %3932 = vmatpush1.bf16.msra.mxu0 %v9559_v1  ;;  %v914_v56 = vld [vmem:[%s12182_s2 + $0xee8] sm:$0xff]  ;;  %v9672_v61 = vcombine.high %v650_v53, %v658_v54  ;;  %v9671_v3 = vcombine.low %v650_v53, %v658_v54 }
 0x23a   : > { %4183 = vst [vmem:[#allocation2 + $0x10] sm:$0xff] %v4167_v7  ;;  %3933 = vmatprep.subr.bf16.mxu0 %v9576_v6  ;;  %v9928_v62 = vcombine.high %v906_v55, %v914_v56  ;;  %v666_v63 = vld [vmem:[%s12182_s2 + $0x728] sm:$0xff]  ;;  %v9927_v4 = vcombine.low %v906_v55, %v914_v56 }
 0x23b   : > { %4184 = vst [vmem:[#allocation2 + $0x18] sm:$0xff] %v4168_v12  ;;  %3973 = vmatpush1.bf16.msra.mxu1 %v9815_v5  ;;  %v674_v0 = vld [vmem:[%s12182_s2 + $0x768] sm:$0xff] }
 0x23c   : > { %3974 = vmatprep.subr.bf16.mxu1 %v9832_v9  ;;  %v922_v1 = vld [vmem:[%s12182_s2 + $0xf28] sm:$0xff]  ;;  %v9688_v5 = vcombine.high %v666_v63, %v674_v0  ;;  %v9687_v11 = vcombine.low %v666_v63, %v674_v0 }
 0x23d   : > { %3934 = vmatpush1.bf16.msra.mxu0 %v9575_v15  ;;  %v930_v2 = vld [vmem:[%s12182_s2 + $0xf68] sm:$0xff]  ;;  %v443_v15 = vld [vmem:[%s12182_s2 + $0x30] sm:$0xff] }
 0x23e   : > { %3935 = vmatprep.subr.bf16.mxu0 %v9592_v18  ;;  %v9944_v6 = vcombine.high %v922_v1, %v930_v2  ;;  %v682_v7 = vld [vmem:[%s12182_s2 + $0x7a8] sm:$0xff]  ;;  %v9943_v12 = vcombine.low %v922_v1, %v930_v2  ;;  %v699_v18 = vld [vmem:[%s12182_s2 + $0x830] sm:$0xff] }
 0x23f   : > { %3975 = vmatpush1.bf16.msra.mxu1 %v9831_v16  ;;  %v690_v8 = vld [vmem:[%s12182_s2 + $0x7e8] sm:$0xff]  ;;  %v451_v16 = vld [vmem:[%s12182_s2 + $0x70] sm:$0xff] }
 0x240   : > { %3976 = vmatprep.subr.bf16.mxu1 %v9848_v19  ;;  %v938_v9 = vld [vmem:[%s12182_s2 + $0xfa8] sm:$0xff]  ;;  %v9704_v13 = vcombine.high %v682_v7, %v690_v8  ;;  %v707_v19 = vld [vmem:[%s12182_s2 + $0x870] sm:$0xff]  ;;  %v9703_v21 = vcombine.low %v682_v7, %v690_v8  ;;  %v9466_v23 = vcombine.high %v443_v15, %v451_v16  ;;  %v9465_v29 = vcombine.low %v443_v15, %v451_v16 }
 0x241   : > { %3936 = vmatpush1.bf16.msra.mxu0 %v9591_v25  ;;  %v9960_v14 = vcombine.high %v938_v9, %v946_v10  ;;  %v9959_v22 = vcombine.low %v938_v9, %v946_v10  ;;  %v9722_v24 = vcombine.high %v699_v18, %v707_v19  ;;  %v459_v25 = vld [vmem:[%s12182_s2 + $0xb0] sm:$0xff]  ;;  %v9721_v30 = vcombine.low %v699_v18, %v707_v19 }
 0x242   : > { %3937 = vmatprep.subr.bf16.mxu0 %v9608_v27  ;;  %v715_v27 = vld [vmem:[%s12182_s2 + $0x8b0] sm:$0xff] }
 0x243   : > { %3977 = vmatpush1.bf16.msra.mxu1 %v9847_v26  ;;  %v467_v26 = vld [vmem:[%s12182_s2 + $0xf0] sm:$0xff] }
 0x244   : > { %3978 = vmatprep.subr.bf16.mxu1 %v9864_v28  ;;  %v723_v28 = vld [vmem:[%s12182_s2 + $0x8f0] sm:$0xff]  ;;  %v9482_v31 = vcombine.high %v459_v25, %v467_v26  ;;  %v9481_v37 = vcombine.low %v459_v25, %v467_v26 }
 0x245   : > { %3938 = vmatpush1.bf16.msra.mxu0 %v9607_v33  ;;  %v9738_v32 = vcombine.high %v715_v27, %v723_v28  ;;  %v475_v33 = vld [vmem:[%s12182_s2 + $0x130] sm:$0xff]  ;;  %v9737_v38 = vcombine.low %v715_v27, %v723_v28 }
 0x246   : > { %3939 = vmatprep.subr.bf16.mxu0 %v9624_v35  ;;  %v731_v35 = vld [vmem:[%s12182_s2 + $0x930] sm:$0xff] }
 0x247   : > { %3979 = vmatpush1.bf16.msra.mxu1 %v9863_v34  ;;  %v483_v34 = vld [vmem:[%s12182_s2 + $0x170] sm:$0xff] }
 0x248   : > { %3980 = vmatprep.subr.bf16.mxu1 %v9880_v36  ;;  %v739_v36 = vld [vmem:[%s12182_s2 + $0x970] sm:$0xff]  ;;  %v9498_v39 = vcombine.high %v475_v33, %v483_v34  ;;  %v9497_v45 = vcombine.low %v475_v33, %v483_v34 }
 0x249   : > { %3940 = vmatpush1.bf16.msra.mxu0 %v9623_v41  ;;  %v9754_v40 = vcombine.high %v731_v35, %v739_v36  ;;  %v491_v41 = vld [vmem:[%s12182_s2 + $0x1b0] sm:$0xff]  ;;  %v9753_v46 = vcombine.low %v731_v35, %v739_v36 }
 0x24a   : > { %3941 = vmatprep.subr.bf16.mxu0 %v9640_v43  ;;  %v747_v43 = vld [vmem:[%s12182_s2 + $0x9b0] sm:$0xff] }
 0x24b   : > { %3981 = vmatpush1.bf16.msra.mxu1 %v9879_v42  ;;  %v499_v42 = vld [vmem:[%s12182_s2 + $0x1f0] sm:$0xff] }
 0x24c   : > { %3982 = vmatprep.subr.bf16.mxu1 %v9896_v44  ;;  %v755_v44 = vld [vmem:[%s12182_s2 + $0x9f0] sm:$0xff]  ;;  %v9514_v47 = vcombine.high %v491_v41, %v499_v42  ;;  %v9513_v53 = vcombine.low %v491_v41, %v499_v42 }
 0x24d   : > { %3942 = vmatpush1.bf16.msra.mxu0 %v9639_v49  ;;  %v9770_v48 = vcombine.high %v747_v43, %v755_v44  ;;  %v507_v49 = vld [vmem:[%s12182_s2 + $0x230] sm:$0xff]  ;;  %v9769_v54 = vcombine.low %v747_v43, %v755_v44 }
 0x24e   : > { %3943 = vmatprep.subr.bf16.mxu0 %v9656_v51  ;;  %v763_v51 = vld [vmem:[%s12182_s2 + $0xa30] sm:$0xff] }
 0x24f   : > { %3983 = vmatpush1.bf16.msra.mxu1 %v9895_v50  ;;  %v515_v50 = vld [vmem:[%s12182_s2 + $0x270] sm:$0xff] }
 0x250   : > { %3984 = vmatprep.subr.bf16.mxu1 %v9912_v52  ;;  %v771_v52 = vld [vmem:[%s12182_s2 + $0xa70] sm:$0xff]  ;;  %v9530_v55 = vcombine.high %v507_v49, %v515_v50  ;;  %v9529_v63 = vcombine.low %v507_v49, %v515_v50 }
 0x251   : > { %3944 = vmatpush1.bf16.msra.mxu0 %v9655_v57  ;;  %v9786_v56 = vcombine.high %v763_v51, %v771_v52  ;;  %v523_v57 = vld [vmem:[%s12182_s2 + $0x2b0] sm:$0xff]  ;;  %v9785_v0 = vcombine.low %v763_v51, %v771_v52 }
 0x252   : > { %3945 = vmatprep.subr.bf16.mxu0 %v9672_v61  ;;  %v779_v61 = vld [vmem:[%s12182_s2 + $0xab0] sm:$0xff] }
 0x253   : > { %3985 = vmatpush1.bf16.msra.mxu1 %v9911_v58  ;;  %v531_v58 = vld [vmem:[%s12182_s2 + $0x2f0] sm:$0xff] }
 0x254   : > { %3986 = vmatprep.subr.bf16.mxu1 %v9928_v62  ;;  %v787_v62 = vld [vmem:[%s12182_s2 + $0xaf0] sm:$0xff]  ;;  %v9546_v1 = vcombine.high %v523_v57, %v531_v58  ;;  %v9545_v7 = vcombine.low %v523_v57, %v531_v58 }
 0x255   : > { %3946 = vmatpush1.bf16.msra.mxu0 %v9671_v3  ;;  %v9802_v2 = vcombine.high %v779_v61, %v787_v62  ;;  %v539_v3 = vld [vmem:[%s12182_s2 + $0x330] sm:$0xff]  ;;  %v9801_v8 = vcombine.low %v779_v61, %v787_v62 }
 0x256   : > { %3947 = vmatprep.subr.bf16.mxu0 %v9688_v5  ;;  %v795_v5 = vld [vmem:[%s12182_s2 + $0xb30] sm:$0xff] }
 0x257   : > { %3987 = vmatpush1.bf16.msra.mxu1 %v9927_v4  ;;  %v547_v4 = vld [vmem:[%s12182_s2 + $0x370] sm:$0xff] }
 0x258   : > { %3988 = vmatprep.subr.bf16.mxu1 %v9944_v6  ;;  %v803_v6 = vld [vmem:[%s12182_s2 + $0xb70] sm:$0xff]  ;;  %v9562_v9 = vcombine.high %v539_v3, %v547_v4  ;;  %v9561_v25 = vcombine.low %v539_v3, %v547_v4 }
 0x259   : > { %3948 = vmatpush1.bf16.msra.mxu0 %v9687_v11  ;;  %v9818_v11 = vcombine.high %v795_v5, %v803_v6  ;;  %v811_v18 = vld [vmem:[%s12182_s2 + $0xbb0] sm:$0xff] }
 0x25a   : > { %3949 = vmatprep.subr.bf16.mxu0 %v9704_v13  ;;  %v563_v13 = vld [vmem:[%s12182_s2 + $0x3f0] sm:$0xff] }
 0x25b   : > { %3989 = vmatpush1.bf16.msra.mxu1 %v9943_v12  ;;  %v555_v12 = vld [vmem:[%s12182_s2 + $0x3b0] sm:$0xff] }
 0x25c   : > { %3990 = vmatprep.subr.bf16.mxu1 %v9960_v14  ;;  %v417_v14 = vld [vmem:[#allocation2 + $0x20] sm:$0xff]  ;;  %v819_v19 = vld [vmem:[%s12182_s2 + $0xbf0] sm:$0xff] }
 0x25d   : > { %3950 = vmatpush1.bf16.msra.mxu0 %v9703_v21  ;;  %v9834_v33 = vcombine.high %v811_v18, %v819_v19  ;;  %v571_v34 = vld [vmem:[%s12182_s2 + $0x430] sm:$0xff] }
 0x25e   : > { %4001 = vmatprep.subr.bf16.mxu0 %v9466_v23  ;;  %v579_v35 = vld [vmem:[%s12182_s2 + $0x470] sm:$0xff] }
 0x25f   : > { %3991 = vmatpush1.bf16.msra.mxu1 %v9959_v22  ;;  %v418_v22 = vld [vmem:[#allocation2 + $0x28] sm:$0xff]  ;;  %v9594_v41 = vcombine.high %v571_v34, %v579_v35  ;;  %v587_v43 = vld [vmem:[%s12182_s2 + $0x4b0] sm:$0xff] }
 0x260   : > { %4042 = vmatprep.subr.bf16.mxu1 %v9722_v24  ;;  %3952 = vmatmul.mubr.bf16.vlgmr.msra.gmra.mrb[20].mxu0 %v12282_v17  ;;  %v595_v44 = vld [vmem:[%s12182_s2 + $0x4f0] sm:$0xff] }
 0x261   : > { %4002 = vmatpush1.bf16.msra.mxu0 %v9465_v29  ;;  %4033 = vmatprep.mubr.bf16.mxu0 %v12234_v59  ;;  %v9817_v29 = vcombine.low %v795_v5, %v803_v6  ;;  %v9610_v49 = vcombine.high %v587_v43, %v595_v44  ;;  %v603_v51 = vld [vmem:[%s12182_s2 + $0x530] sm:$0xff] }
 0x262   : > { %3993 = vmatmul.mubr.bf16.vlgmr.msra.gmra.mrb[20].mxu1 %v12286_v20  ;;  %4003 = vmatprep.subr.bf16.mxu0 %v9482_v31  ;;  %v611_v52 = vld [vmem:[%s12182_s2 + $0x570] sm:$0xff] }
 0x263   : > { %4043 = vmatpush1.bf16.msra.mxu1 %v9721_v30  ;;  %4074 = vmatprep.mubr.bf16.mxu1 %v12236_v60  ;;  %v9578_v30 = vcombine.high %v555_v12, %v563_v13  ;;  %v9626_v57 = vcombine.high %v603_v51, %v611_v52  ;;  %v619_v61 = vld [vmem:[%s12182_s2 + $0x5b0] sm:$0xff] }
 0x264   : > { %4044 = vmatprep.subr.bf16.mxu1 %v9738_v32  ;;  %v627_v62 = vld [vmem:[%s12182_s2 + $0x5f0] sm:$0xff] }
 0x265   : > { %4004 = vmatpush1.bf16.msra.mxu0 %v9481_v37  ;;  %v827_v37 = vld [vmem:[%s12182_s2 + $0xc30] sm:$0xff]  ;;  %v9642_v3 = vcombine.high %v619_v61, %v627_v62 }
 0x266   : > { %4005 = vmatprep.subr.bf16.mxu0 %v9498_v39  ;;  %v9577_v39 = vcombine.low %v555_v12, %v563_v13  ;;  %v635_v5 = vld [vmem:[%s12182_s2 + $0x630] sm:$0xff] }
 0x267   : > { %4045 = vmatpush1.bf16.msra.mxu1 %v9737_v38  ;;  %v835_v38 = vld [vmem:[%s12182_s2 + $0xc70] sm:$0xff] }
 0x268   : > { %4046 = vmatprep.subr.bf16.mxu1 %v9754_v40  ;;  %v9833_v40 = vcombine.low %v811_v18, %v819_v19  ;;  %v9850_v42 = vcombine.high %v827_v37, %v835_v38  ;;  %v643_v6 = vld [vmem:[%s12182_s2 + $0x670] sm:$0xff] }
 0x269   : > { %4006 = vmatpush1.bf16.msra.mxu0 %v9497_v45  ;;  %v843_v45 = vld [vmem:[%s12182_s2 + $0xcb0] sm:$0xff]  ;;  %v9657_v18 = vcombine.low %v635_v5, %v643_v6 }
 0x26a   : > { %4007 = vmatprep.subr.bf16.mxu0 %v9514_v47  ;;  %v9593_v47 = vcombine.low %v571_v34, %v579_v35  ;;  %v651_v13 = vld [vmem:[%s12182_s2 + $0x6b0] sm:$0xff] }
 0x26b   : > { %4047 = vmatpush1.bf16.msra.mxu1 %v9753_v46  ;;  %v851_v46 = vld [vmem:[%s12182_s2 + $0xcf0] sm:$0xff] }
 0x26c   : > { %4048 = vmatprep.subr.bf16.mxu1 %v9770_v48  ;;  %v9849_v48 = vcombine.low %v827_v37, %v835_v38  ;;  %v9866_v50 = vcombine.high %v843_v45, %v851_v46  ;;  %v947_v34 = vld [vmem:[%s12182_s2 + $0xff0] sm:$0xff] }
 0x26d   : > { %4008 = vmatpush1.bf16.msra.mxu0 %v9513_v53  ;;  %v859_v53 = vld [vmem:[%s12182_s2 + $0xd30] sm:$0xff] }
 0x26e   : > { %4009 = vmatprep.subr.bf16.mxu0 %v9530_v55  ;;  %v9609_v55 = vcombine.low %v587_v43, %v595_v44 }
 0x26f   : > { %4049 = vmatpush1.bf16.msra.mxu1 %v9769_v54  ;;  %v867_v54 = vld [vmem:[%s12182_s2 + $0xd70] sm:$0xff] }
 0x270   : > { %4050 = vmatprep.subr.bf16.mxu1 %v9786_v56  ;;  %v9865_v56 = vcombine.low %v843_v45, %v851_v46  ;;  %v9882_v58 = vcombine.high %v859_v53, %v867_v54 }
 0x271   : > { %4010 = vmatpush1.bf16.msra.mxu0 %v9529_v63  ;;  %v875_v63 = vld [vmem:[%s12182_s2 + $0xdb0] sm:$0xff] }
 0x272   : > { %4011 = vmatprep.subr.bf16.mxu0 %v9546_v1  ;;  %v9625_v1 = vcombine.low %v603_v51, %v611_v52 }
 0x273   : > { %4051 = vmatpush1.bf16.msra.mxu1 %v9785_v0  ;;  %v3707_v10 = vpop.f32.mrb[8].mxu0  ;;  %v883_v0 = vld [vmem:[%s12182_s2 + $0xdf0] sm:$0xff] }
 0x274   : > { %4052 = vmatprep.subr.bf16.mxu1 %v9802_v2  ;;  %v3709_v16 = vpop.f32.mrb[9].mxu0  ;;  %v9881_v2 = vcombine.low %v859_v53, %v867_v54  ;;  %v9898_v4 = vcombine.high %v875_v63, %v883_v0 }
 0x275   : > { %v3748_v15 = vpop.f32.mrb[8].mxu1  ;;  %v3711_v24 = vpop.f32.mrb[10].mxu0  ;;  %4012 = vmatpush1.bf16.msra.mxu0 %v9545_v7  ;;  %v891_v7 = vld [vmem:[%s12182_s2 + $0xe30] sm:$0xff] }
 0x276   : > { %v3749_v21 = vadd.f32 %v3748_v15, %v3707_v10  ;;  %v3750_v23 = vpop.f32.mrb[9].mxu1  ;;  %v3712_v28 = vpop.f32.mrb[11].mxu0  ;;  %4013 = vmatprep.subr.bf16.mxu0 %v9562_v9  ;;  %v9641_v9 = vcombine.low %v619_v61, %v627_v62  ;;  %v9897_v10 = vcombine.low %v875_v63, %v883_v0  ;;  %v907_v15 = vld [vmem:[%s12182_s2 + $0xeb0] sm:$0xff] }
 0x277   : > { %v3751_v26 = vadd.f32 %v3750_v23, %v3709_v16  ;;  %v3752_v27 = vpop.f32.mrb[10].mxu1  ;;  %4053 = vmatpush1.bf16.msra.mxu1 %v9801_v8  ;;  %v899_v8 = vld [vmem:[%s12182_s2 + $0xe70] sm:$0xff] }
 0x278   : > { %v4169_v31 = vadd.f32 %v3749_v21, %v417_v14  ;;  %v3753_v32 = vpop.f32.mrb[11].mxu1  ;;  %4054 = vmatprep.subr.bf16.mxu1 %v9818_v11  ;;  %v9658_v11 = vcombine.high %v635_v5, %v643_v6  ;;  %v9914_v12 = vcombine.high %v891_v7, %v899_v8  ;;  %v659_v14 = vld [vmem:[%s12182_s2 + $0x6f0] sm:$0xff]  ;;  %v9913_v19 = vcombine.low %v891_v7, %v899_v8 }
 0x279   : > { %v4170_v36 = vadd.f32 %v3751_v26, %v418_v22  ;;  %4014 = vmatpush1.bf16.msra.mxu0 %v9561_v25  ;;  %v915_v16 = vld [vmem:[%s12182_s2 + $0xef0] sm:$0xff]  ;;  %v9674_v21 = vcombine.high %v651_v13, %v659_v14  ;;  %v9673_v27 = vcombine.low %v651_v13, %v659_v14 }
 0x27a   : > { %4185 = vst [vmem:[#allocation2 + $0x20] sm:$0xff] %v4169_v31  ;;  %4015 = vmatprep.subr.bf16.mxu0 %v9578_v30  ;;  %v9930_v22 = vcombine.high %v907_v15, %v915_v16  ;;  %v667_v23 = vld [vmem:[%s12182_s2 + $0x730] sm:$0xff]  ;;  %v9929_v28 = vcombine.low %v907_v15, %v915_v16  ;;  %v524_v15 = vld [vmem:[%s12182_s2 + $0x2b8] sm:$0xff] }
 0x27b   : > { %4186 = vst [vmem:[#allocation2 + $0x28] sm:$0xff] %v4170_v36  ;;  %4055 = vmatpush1.bf16.msra.mxu1 %v9817_v29  ;;  %v675_v24 = vld [vmem:[%s12182_s2 + $0x770] sm:$0xff]  ;;  %v532_v16 = vld [vmem:[%s12182_s2 + $0x2f8] sm:$0xff] }
 0x27c   : > { %4056 = vmatprep.subr.bf16.mxu1 %v9834_v33  ;;  %v923_v25 = vld [vmem:[%s12182_s2 + $0xf30] sm:$0xff]  ;;  %v9690_v29 = vcombine.high %v667_v23, %v675_v24  ;;  %v9689_v35 = vcombine.low %v667_v23, %v675_v24  ;;  %v9548_v23 = vcombine.high %v524_v15, %v532_v16 }
 0x27d   : > { %4016 = vmatpush1.bf16.msra.mxu0 %v9577_v39  ;;  %v931_v26 = vld [vmem:[%s12182_s2 + $0xf70] sm:$0xff]  ;;  %v444_v39 = vld [vmem:[%s12182_s2 + $0x38] sm:$0xff] }
 0x27e   : > { %4017 = vmatprep.subr.bf16.mxu0 %v9594_v41  ;;  %v9946_v30 = vcombine.high %v923_v25, %v931_v26  ;;  %v683_v31 = vld [vmem:[%s12182_s2 + $0x7b0] sm:$0xff]  ;;  %v9945_v36 = vcombine.low %v923_v25, %v931_v26  ;;  %v700_v41 = vld [vmem:[%s12182_s2 + $0x838] sm:$0xff] }
 0x27f   : > { %4057 = vmatpush1.bf16.msra.mxu1 %v9833_v40  ;;  %v691_v32 = vld [vmem:[%s12182_s2 + $0x7f0] sm:$0xff]  ;;  %v452_v40 = vld [vmem:[%s12182_s2 + $0x78] sm:$0xff] }
 0x280   : > { %4058 = vmatprep.subr.bf16.mxu1 %v9850_v42  ;;  %v939_v33 = vld [vmem:[%s12182_s2 + $0xfb0] sm:$0xff]  ;;  %v9706_v37 = vcombine.high %v683_v31, %v691_v32  ;;  %v708_v42 = vld [vmem:[%s12182_s2 + $0x878] sm:$0xff]  ;;  %v9705_v43 = vcombine.low %v683_v31, %v691_v32  ;;  %v9468_v45 = vcombine.high %v444_v39, %v452_v40  ;;  %v9467_v51 = vcombine.low %v444_v39, %v452_v40 }
 0x281   : > { %4018 = vmatpush1.bf16.msra.mxu0 %v9593_v47  ;;  %v9962_v38 = vcombine.high %v939_v33, %v947_v34  ;;  %v9961_v44 = vcombine.low %v939_v33, %v947_v34  ;;  %v9724_v46 = vcombine.high %v700_v41, %v708_v42  ;;  %v460_v47 = vld [vmem:[%s12182_s2 + $0xb8] sm:$0xff]  ;;  %v9723_v52 = vcombine.low %v700_v41, %v708_v42 }
 0x282   : > { %4019 = vmatprep.subr.bf16.mxu0 %v9610_v49  ;;  %v716_v49 = vld [vmem:[%s12182_s2 + $0x8b8] sm:$0xff] }
 0x283   : > { %4059 = vmatpush1.bf16.msra.mxu1 %v9849_v48  ;;  %v468_v48 = vld [vmem:[%s12182_s2 + $0xf8] sm:$0xff] }
 0x284   : > { %4060 = vmatprep.subr.bf16.mxu1 %v9866_v50  ;;  %v724_v50 = vld [vmem:[%s12182_s2 + $0x8f8] sm:$0xff]  ;;  %v9484_v53 = vcombine.high %v460_v47, %v468_v48  ;;  %v9483_v61 = vcombine.low %v460_v47, %v468_v48 }
 0x285   : > { %4020 = vmatpush1.bf16.msra.mxu0 %v9609_v55  ;;  %v9740_v54 = vcombine.high %v716_v49, %v724_v50  ;;  %v476_v55 = vld [vmem:[%s12182_s2 + $0x138] sm:$0xff]  ;;  %v9739_v62 = vcombine.low %v716_v49, %v724_v50 }
 0x286   : > { %4021 = vmatprep.subr.bf16.mxu0 %v9626_v57  ;;  %v732_v57 = vld [vmem:[%s12182_s2 + $0x938] sm:$0xff] }
 0x287   : > { %4061 = vmatpush1.bf16.msra.mxu1 %v9865_v56  ;;  %v484_v56 = vld [vmem:[%s12182_s2 + $0x178] sm:$0xff] }
 0x288   : > { %4062 = vmatprep.subr.bf16.mxu1 %v9882_v58  ;;  %v740_v58 = vld [vmem:[%s12182_s2 + $0x978] sm:$0xff]  ;;  %v9500_v63 = vcombine.high %v476_v55, %v484_v56  ;;  %v9499_v5 = vcombine.low %v476_v55, %v484_v56 }
 0x289   : > { %4022 = vmatpush1.bf16.msra.mxu0 %v9625_v1  ;;  %v9756_v0 = vcombine.high %v732_v57, %v740_v58  ;;  %v492_v1 = vld [vmem:[%s12182_s2 + $0x1b8] sm:$0xff]  ;;  %v9755_v6 = vcombine.low %v732_v57, %v740_v58 }
 0x28a   : > { %4023 = vmatprep.subr.bf16.mxu0 %v9642_v3  ;;  %v748_v3 = vld [vmem:[%s12182_s2 + $0x9b8] sm:$0xff] }
 0x28b   : > { %4063 = vmatpush1.bf16.msra.mxu1 %v9881_v2  ;;  %v500_v2 = vld [vmem:[%s12182_s2 + $0x1f8] sm:$0xff] }
 0x28c   : > { %4064 = vmatprep.subr.bf16.mxu1 %v9898_v4  ;;  %v756_v4 = vld [vmem:[%s12182_s2 + $0x9f8] sm:$0xff]  ;;  %v9516_v7 = vcombine.high %v492_v1, %v500_v2 }
 0x28d   : > { %4024 = vmatpush1.bf16.msra.mxu0 %v9641_v9  ;;  %v9772_v8 = vcombine.high %v748_v3, %v756_v4  ;;  %v508_v9 = vld [vmem:[%s12182_s2 + $0x238] sm:$0xff] }
 0x28e   : > { %4025 = vmatprep.subr.bf16.mxu0 %v9658_v11  ;;  %v764_v11 = vld [vmem:[%s12182_s2 + $0xa38] sm:$0xff] }
 0x28f   : > { %4065 = vmatpush1.bf16.msra.mxu1 %v9897_v10  ;;  %v516_v10 = vld [vmem:[%s12182_s2 + $0x278] sm:$0xff] }
 0x290   : > { %4066 = vmatprep.subr.bf16.mxu1 %v9914_v12  ;;  %v9515_v12 = vcombine.low %v492_v1, %v500_v2  ;;  %v9532_v13 = vcombine.high %v508_v9, %v516_v10  ;;  %v540_v25 = vld [vmem:[%s12182_s2 + $0x338] sm:$0xff] }
 0x291   : > { %4026 = vmatpush1.bf16.msra.mxu0 %v9657_v18  ;;  %v780_v18 = vld [vmem:[%s12182_s2 + $0xab8] sm:$0xff] }
 0x292   : > { %4027 = vmatprep.subr.bf16.mxu0 %v9674_v21  ;;  %v9531_v21 = vcombine.low %v508_v9, %v516_v10  ;;  %v548_v26 = vld [vmem:[%s12182_s2 + $0x378] sm:$0xff] }
 0x293   : > { %4067 = vmatpush1.bf16.msra.mxu1 %v9913_v19  ;;  %v788_v19 = vld [vmem:[%s12182_s2 + $0xaf8] sm:$0xff]  ;;  %v9564_v31 = vcombine.high %v540_v25, %v548_v26 }
 0x294   : > { %4068 = vmatprep.subr.bf16.mxu1 %v9930_v22  ;;  %v9804_v24 = vcombine.high %v780_v18, %v788_v19  ;;  %v556_v34 = vld [vmem:[%s12182_s2 + $0x3b8] sm:$0xff] }
 0x295   : > { %4028 = vmatpush1.bf16.msra.mxu0 %v9673_v27  ;;  %v796_v27 = vld [vmem:[%s12182_s2 + $0xb38] sm:$0xff] }
 0x296   : > { %4029 = vmatprep.subr.bf16.mxu0 %v9690_v29  ;;  %v9547_v29 = vcombine.low %v524_v15, %v532_v16  ;;  %v812_v39 = vld [vmem:[%s12182_s2 + $0xbb8] sm:$0xff] }
 0x297   : > { %4069 = vmatpush1.bf16.msra.mxu1 %v9929_v28  ;;  %v804_v28 = vld [vmem:[%s12182_s2 + $0xb78] sm:$0xff] }
 0x298   : > { %4070 = vmatprep.subr.bf16.mxu1 %v9946_v30  ;;  %v9803_v30 = vcombine.low %v780_v18, %v788_v19  ;;  %v9820_v33 = vcombine.high %v796_v27, %v804_v28  ;;  %v820_v40 = vld [vmem:[%s12182_s2 + $0xbf8] sm:$0xff]  ;;  %v9819_v49 = vcombine.low %v796_v27, %v804_v28 }
 0x299   : > { %4030 = vmatpush1.bf16.msra.mxu0 %v9689_v35  ;;  %v564_v35 = vld [vmem:[%s12182_s2 + $0x3f8] sm:$0xff] }
 0x29a   : > { %4031 = vmatprep.subr.bf16.mxu0 %v9706_v37  ;;  %v420_v42 = vld [vmem:[#allocation2 + $0x38] sm:$0xff]  ;;  %v9580_v50 = vcombine.high %v556_v34, %v564_v35 }
 0x29b   : > { %4071 = vmatpush1.bf16.msra.mxu1 %v9945_v36  ;;  %v419_v36 = vld [vmem:[#allocation2 + $0x30] sm:$0xff]  ;;  %v580_v55 = vld [vmem:[%s12182_s2 + $0x478] sm:$0xff] }
 0x29c   : > { %4072 = vmatprep.subr.bf16.mxu1 %v9962_v38  ;;  %v828_v57 = vld [vmem:[%s12182_s2 + $0xc38] sm:$0xff] }
 0x29d   : > { %4032 = vmatpush1.bf16.msra.mxu0 %v9705_v43  ;;  %v836_v58 = vld [vmem:[%s12182_s2 + $0xc78] sm:$0xff] }
 0x29e   : > { %4083 = vmatprep.subr.bf16.mxu0 %v9468_v45  ;;  %v9563_v45 = vcombine.low %v540_v25, %v548_v26  ;;  %v588_v1 = vld [vmem:[%s12182_s2 + $0x4b8] sm:$0xff] }
 0x29f   : > { %4073 = vmatpush1.bf16.msra.mxu1 %v9961_v44  ;;  %v596_v2 = vld [vmem:[%s12182_s2 + $0x4f8] sm:$0xff] }
 0x2a0   : > { %4124 = vmatprep.subr.bf16.mxu1 %v9724_v46  ;;  %4034 = vmatmul.mubr.bf16.vlgmr.msra.gmra.mrb[24].mxu0 %v12282_v17  ;;  %v604_v9 = vld [vmem:[%s12182_s2 + $0x538] sm:$0xff] }
 0x2a1   : > { %4084 = vmatpush1.bf16.msra.mxu0 %v9467_v51  ;;  %4115 = vmatprep.mubr.bf16.mxu0 %v12234_v59  ;;  %v772_v59 = vld [vmem:[%s12182_s2 + $0xa78] sm:$0xff] }
 0x2a2   : > { %4075 = vmatmul.mubr.bf16.vlgmr.msra.gmra.mrb[24].mxu1 %v12286_v20  ;;  %4085 = vmatprep.subr.bf16.mxu0 %v9484_v53  ;;  %v9788_v14 = vcombine.high %v764_v11, %v772_v59  ;;  %v9787_v22 = vcombine.low %v764_v11, %v772_v59  ;;  %v9836_v53 = vcombine.high %v812_v39, %v820_v40  ;;  %v612_v10 = vld [vmem:[%s12182_s2 + $0x578] sm:$0xff] }
 0x2a3   : > { %4125 = vmatpush1.bf16.msra.mxu1 %v9723_v52  ;;  %4156 = vmatprep.mubr.bf16.mxu1 %v12236_v60  ;;  %v9771_v60 = vcombine.low %v748_v3, %v756_v4  ;;  %v844_v3 = vld [vmem:[%s12182_s2 + $0xcb8] sm:$0xff] }
 0x2a4   : > { %4126 = vmatprep.subr.bf16.mxu1 %v9740_v54  ;;  %v572_v54 = vld [vmem:[%s12182_s2 + $0x438] sm:$0xff] }
 0x2a5   : > { %4086 = vmatpush1.bf16.msra.mxu0 %v9483_v61  ;;  %v9579_v61 = vcombine.low %v556_v34, %v564_v35  ;;  %v852_v4 = vld [vmem:[%s12182_s2 + $0xcf8] sm:$0xff] }
 0x2a6   : > { %4087 = vmatprep.subr.bf16.mxu0 %v9500_v63  ;;  %v9596_v63 = vcombine.high %v572_v54, %v580_v55  ;;  %v860_v11 = vld [vmem:[%s12182_s2 + $0xd38] sm:$0xff] }
 0x2a7   : > { %4127 = vmatpush1.bf16.msra.mxu1 %v9739_v62  ;;  %v9835_v62 = vcombine.low %v812_v39, %v820_v40  ;;  %v868_v59 = vld [vmem:[%s12182_s2 + $0xd78] sm:$0xff] }
 0x2a8   : > { %4128 = vmatprep.subr.bf16.mxu1 %v9756_v0  ;;  %v9852_v0 = vcombine.high %v828_v57, %v836_v58  ;;  %v620_v15 = vld [vmem:[%s12182_s2 + $0x5b8] sm:$0xff] }
 0x2a9   : > { %4088 = vmatpush1.bf16.msra.mxu0 %v9499_v5  ;;  %v9595_v5 = vcombine.low %v572_v54, %v580_v55  ;;  %v628_v16 = vld [vmem:[%s12182_s2 + $0x5f8] sm:$0xff] }
 0x2aa   : > { %4089 = vmatprep.subr.bf16.mxu0 %v9516_v7  ;;  %v9612_v7 = vcombine.high %v588_v1, %v596_v2  ;;  %v876_v18 = vld [vmem:[%s12182_s2 + $0xdb8] sm:$0xff] }
 0x2ab   : > { %4129 = vmatpush1.bf16.msra.mxu1 %v9755_v6  ;;  %v9851_v6 = vcombine.low %v828_v57, %v836_v58  ;;  %v884_v19 = vld [vmem:[%s12182_s2 + $0xdf8] sm:$0xff] }
 0x2ac   : > { %4130 = vmatprep.subr.bf16.mxu1 %v9772_v8  ;;  %v9868_v8 = vcombine.high %v844_v3, %v852_v4  ;;  %v636_v25 = vld [vmem:[%s12182_s2 + $0x638] sm:$0xff] }
 0x2ad   : > { %4090 = vmatpush1.bf16.msra.mxu0 %v9515_v12  ;;  %v9611_v12 = vcombine.low %v588_v1, %v596_v2  ;;  %v644_v26 = vld [vmem:[%s12182_s2 + $0x678] sm:$0xff]  ;;  %v422_v2 = vld [vmem:[#allocation2 + $0x48] sm:$0xff] }
 0x2ae   : > { %4091 = vmatprep.subr.bf16.mxu0 %v9532_v13  ;;  %v9628_v13 = vcombine.high %v604_v9, %v612_v10  ;;  %v892_v27 = vld [vmem:[%s12182_s2 + $0xe38] sm:$0xff] }
 0x2af   : > { %4131 = vmatpush1.bf16.msra.mxu1 %v9771_v60  ;;  %v9867_v60 = vcombine.low %v844_v3, %v852_v4  ;;  %v900_v28 = vld [vmem:[%s12182_s2 + $0xe78] sm:$0xff] }
 0x2b0   : > { %4132 = vmatprep.subr.bf16.mxu1 %v9788_v14  ;;  %v9884_v14 = vcombine.high %v860_v11, %v868_v59  ;;  %v660_v34 = vld [vmem:[%s12182_s2 + $0x6f8] sm:$0xff] }
 0x2b1   : > { %4092 = vmatpush1.bf16.msra.mxu0 %v9531_v21  ;;  %v9627_v21 = vcombine.low %v604_v9, %v612_v10  ;;  %v908_v35 = vld [vmem:[%s12182_s2 + $0xeb8] sm:$0xff] }
 0x2b2   : > { %4093 = vmatprep.subr.bf16.mxu0 %v9548_v23  ;;  %v9644_v23 = vcombine.high %v620_v15, %v628_v16 }
 0x2b3   : > { %4133 = vmatpush1.bf16.msra.mxu1 %v9787_v22  ;;  %v3789_v32 = vpop.f32.mrb[12].mxu0  ;;  %v9883_v22 = vcombine.low %v860_v11, %v868_v59 }
 0x2b4   : > { %4134 = vmatprep.subr.bf16.mxu1 %v9804_v24  ;;  %v3791_v38 = vpop.f32.mrb[13].mxu0  ;;  %v9900_v24 = vcombine.high %v876_v18, %v884_v19 }
 0x2b5   : > { %v3830_v37 = vpop.f32.mrb[12].mxu1  ;;  %v3793_v44 = vpop.f32.mrb[14].mxu0  ;;  %4094 = vmatpush1.bf16.msra.mxu0 %v9547_v29  ;;  %v9643_v29 = vcombine.low %v620_v15, %v628_v16 }
 0x2b6   : > { %v3831_v41 = vadd.f32 %v3830_v37, %v3789_v32  ;;  %v3832_v43 = vpop.f32.mrb[13].mxu1  ;;  %v3794_v48 = vpop.f32.mrb[15].mxu0  ;;  %4095 = vmatprep.subr.bf16.mxu0 %v9564_v31  ;;  %v9660_v31 = vcombine.high %v636_v25, %v644_v26  ;;  %v9916_v32 = vcombine.high %v892_v27, %v900_v28  ;;  %v9659_v37 = vcombine.low %v636_v25, %v644_v26  ;;  %v932_v44 = vld [vmem:[%s12182_s2 + $0xf78] sm:$0xff] }
 0x2b7   : > { %v3833_v46 = vadd.f32 %v3832_v43, %v3791_v38  ;;  %v3834_v47 = vpop.f32.mrb[14].mxu1  ;;  %4135 = vmatpush1.bf16.msra.mxu1 %v9803_v30  ;;  %v9899_v30 = vcombine.low %v876_v18, %v884_v19  ;;  %v9915_v38 = vcombine.low %v892_v27, %v900_v28  ;;  %v924_v43 = vld [vmem:[%s12182_s2 + $0xf38] sm:$0xff]  ;;  %v426_v28 = vld [vmem:[#allocation2 + $0x68] sm:$0xff] }
 0x2b8   : > { %v4171_v51 = vadd.f32 %v3831_v41, %v419_v36  ;;  %v3835_v52 = vpop.f32.mrb[15].mxu1  ;;  %4136 = vmatprep.subr.bf16.mxu1 %v9820_v33  ;;  %v652_v33 = vld [vmem:[%s12182_s2 + $0x6b8] sm:$0xff]  ;;  %v9948_v48 = vcombine.high %v924_v43, %v932_v44  ;;  %v9947_v54 = vcombine.low %v924_v43, %v932_v44 }
 0x2b9   : > { %v4172_v56 = vadd.f32 %v3833_v46, %v420_v42  ;;  %4096 = vmatpush1.bf16.msra.mxu0 %v9563_v45  ;;  %v916_v36 = vld [vmem:[%s12182_s2 + $0xef8] sm:$0xff]  ;;  %v9676_v39 = vcombine.high %v652_v33, %v660_v34  ;;  %v9675_v45 = vcombine.low %v652_v33, %v660_v34 }
 0x2ba   : > { %4187 = vst [vmem:[#allocation2 + $0x30] sm:$0xff] %v4171_v51  ;;  %4097 = vmatprep.subr.bf16.mxu0 %v9580_v50  ;;  %v9932_v40 = vcombine.high %v908_v35, %v916_v36  ;;  %v668_v41 = vld [vmem:[%s12182_s2 + $0x738] sm:$0xff]  ;;  %v9931_v46 = vcombine.low %v908_v35, %v916_v36 }
 0x2bb   : > { %4188 = vst [vmem:[#allocation2 + $0x38] sm:$0xff] %v4172_v56  ;;  %4137 = vmatpush1.bf16.msra.mxu1 %v9819_v49  ;;  %v676_v42 = vld [vmem:[%s12182_s2 + $0x778] sm:$0xff] }
 0x2bc   : > { %4138 = vmatprep.subr.bf16.mxu1 %v9836_v53  ;;  %v9692_v47 = vcombine.high %v668_v41, %v676_v42  ;;  %v684_v49 = vld [vmem:[%s12182_s2 + $0x7b8] sm:$0xff]  ;;  %v9691_v53 = vcombine.low %v668_v41, %v676_v42 }
 0x2bd   : > { %4098 = vmatpush1.bf16.msra.mxu0 %v9579_v61  ;;  %v692_v50 = vld [vmem:[%s12182_s2 + $0x7f8] sm:$0xff] }
 0x2be   : > { %4099 = vmatprep.subr.bf16.mxu0 %v9596_v63  ;;  %v940_v51 = vld [vmem:[%s12182_s2 + $0xfb8] sm:$0xff]  ;;  %v9708_v55 = vcombine.high %v684_v49, %v692_v50  ;;  %v9707_v57 = vcombine.low %v684_v49, %v692_v50 }
 0x2bf   : > { %4139 = vmatpush1.bf16.msra.mxu1 %v9835_v62  ;;  %v948_v52 = vld [vmem:[%s12182_s2 + $0xff8] sm:$0xff]  ;;  %v421_v62 = vld [vmem:[#allocation2 + $0x40] sm:$0xff] }
 0x2c0   : > { %4140 = vmatprep.subr.bf16.mxu1 %v9852_v0  ;;  %v9964_v56 = vcombine.high %v940_v51, %v948_v52  ;;  %v9963_v58 = vcombine.low %v940_v51, %v948_v52  ;;  %v428_v42 = vld [vmem:[#allocation2 + $0x78] sm:$0xff]  ;;  %v10727_v51 = vld [vmem:[#allocation9 + $0x4] ss:$16 sps:$4 sm:$0xff] (!%p9965_p7)  }
 0x2c1   : > { %4100 = vmatpush1.bf16.msra.mxu0 %v9595_v5  ;;  %v10729_v52 = vld [vmem:[#allocation9 + $0xc] ss:$16 sps:$4 sm:$0xff] (!%p9965_p7)  }
 0x2c2   : > { %4101 = vmatprep.subr.bf16.mxu0 %v9612_v7 }
 0x2c3   : > { %4141 = vmatpush1.bf16.msra.mxu1 %v9851_v6 }
 0x2c4   : > { %4142 = vmatprep.subr.bf16.mxu1 %v9868_v8 }
 0x2c5   : > { %4102 = vmatpush1.bf16.msra.mxu0 %v9611_v12 }
 0x2c6   : > { %4103 = vmatprep.subr.bf16.mxu0 %v9628_v13 }
 0x2c7   : > { %4143 = vmatpush1.bf16.msra.mxu1 %v9867_v60  ;;  %v424_v60 = vld [vmem:[#allocation2 + $0x58] sm:$0xff] }
 0x2c8   : > { %4144 = vmatprep.subr.bf16.mxu1 %v9884_v14 }
 0x2c9   : > { %4104 = vmatpush1.bf16.msra.mxu0 %v9627_v21 }
 0x2ca   : > { %4105 = vmatprep.subr.bf16.mxu0 %v9644_v23 }
 0x2cb   : > { %4145 = vmatpush1.bf16.msra.mxu1 %v9883_v22 }
 0x2cc   : > { %4146 = vmatprep.subr.bf16.mxu1 %v9900_v24  ;;  %v425_v24 = vld [vmem:[#allocation2 + $0x60] sm:$0xff] }
 0x2cd   : > { %4106 = vmatpush1.bf16.msra.mxu0 %v9643_v29 }
 0x2ce   : > { %4107 = vmatprep.subr.bf16.mxu0 %v9660_v31 }
 0x2cf   : > { %4147 = vmatpush1.bf16.msra.mxu1 %v9899_v30 }
 0x2d0   : > { %4148 = vmatprep.subr.bf16.mxu1 %v9916_v32 }
 0x2d1   : > { %4108 = vmatpush1.bf16.msra.mxu0 %v9659_v37 }
 0x2d2   : > { %4109 = vmatprep.subr.bf16.mxu0 %v9676_v39 }
 0x2d3   : > { %4149 = vmatpush1.bf16.msra.mxu1 %v9915_v38  ;;  %v427_v38 = vld [vmem:[#allocation2 + $0x70] sm:$0xff] }
 0x2d4   : > { %4150 = vmatprep.subr.bf16.mxu1 %v9932_v40 }
 0x2d5   : > { %4110 = vmatpush1.bf16.msra.mxu0 %v9675_v45 }
 0x2d6   : > { %4111 = vmatprep.subr.bf16.mxu0 %v9692_v47 }
 0x2d7   : > { %4151 = vmatpush1.bf16.msra.mxu1 %v9931_v46 }
 0x2d8   : > { %4152 = vmatprep.subr.bf16.mxu1 %v9948_v48 }
 0x2d9   : > { %4112 = vmatpush1.bf16.msra.mxu0 %v9691_v53  ;;  %v10731_v53 = vld [vmem:[#allocation9] ss:$16 sps:$4 sm:$0xff] (!%p9965_p7)  }
 0x2da   : > { %4113 = vmatprep.subr.bf16.mxu0 %v9708_v55  ;;  %v10733_v55 = vld [vmem:[#allocation9 + $0x24] ss:$16 sps:$4 sm:$0xff] (!%p9965_p7)  }
 0x2db   : > { %4153 = vmatpush1.bf16.msra.mxu1 %v9947_v54  ;;  %v10732_v54 = vld [vmem:[#allocation9 + $0x8] ss:$16 sps:$4 sm:$0xff] (!%p9965_p7)  }
 0x2dc   : > { %4154 = vmatprep.subr.bf16.mxu1 %v9964_v56  ;;  %v10735_v56 = vld [vmem:[#allocation9 + $0x2c] ss:$16 sps:$4 sm:$0xff] (!%p9965_p7)  }
 0x2dd   : > { %4114 = vmatpush1.bf16.msra.mxu0 %v9707_v57  ;;  %v10737_v57 = vld [vmem:[#allocation9 + $0x20] ss:$16 sps:$4 sm:$0xff] (!%p9965_p7)  }
 0x2de   : > { %8097 = vmatprep.subr.bf16.mxu0 (!%p9965_p7), %v10727_v51 }
 0x2df   : > { %4155 = vmatpush1.bf16.msra.mxu1 %v9963_v58  ;;  %v10738_v58 = vld [vmem:[#allocation9 + $0x28] ss:$16 sps:$4 sm:$0xff] (!%p9965_p7)  }
 0x2e0   : > { %4116 = vmatmul.mubr.bf16.vlgmr.msra.gmra.mrb[28].mxu0 %v12282_v17  ;;  %v423_v17 = vld [vmem:[#allocation2 + $0x50] sm:$0xff]  ;;  %8425 = vmatprep.subr.bf16.mxu1 (!%p9965_p7), %v10729_v52 }
 0x2e1   : > { %8098 = vmatpush1.bf16.msra.mxu0 (!%p9965_p7), %v10731_v53 }
 0x2e2   : > { %4157 = vmatmul.mubr.bf16.vlgmr.msra.gmra.mrb[28].mxu1 %v12286_v20  ;;  %8099 = vmatprep.subr.bf16.mxu0 (!%p9965_p7), %v10733_v55 }
 0x2e3   : > { %8426 = vmatpush1.bf16.msra.mxu1 (!%p9965_p7), %v10732_v54 }
 0x2e4   : > { %8427 = vmatprep.subr.bf16.mxu1 (!%p9965_p7), %v10735_v56 }
 0x2e5   : > { %8100 = vmatpush1.bf16.msra.mxu0 (!%p9965_p7), %v10737_v57 }
 0x2e7   : > { %8428 = vmatpush1.bf16.msra.mxu1 (!%p9965_p7), %v10738_v58 }
 0x2f3   : > { %v3871_v61 = vpop.f32.mrb[16].mxu0 }
 0x2f4   : > { %v3873_v0 = vpop.f32.mrb[17].mxu0 }
 0x2f5   : > { %v3912_v63 = vpop.f32.mrb[16].mxu1  ;;  %v3875_v4 = vpop.f32.mrb[18].mxu0 }
 0x2f6   : > { %v3913_v1 = vadd.f32 %v3912_v63, %v3871_v61  ;;  %v3914_v3 = vpop.f32.mrb[17].mxu1  ;;  %v3876_v7 = vpop.f32.mrb[19].mxu0  ;;  %v10739_v61 = vld [vmem:[#allocation9 + $0x44] ss:$16 sps:$4 sm:$0xff] (!%p9965_p7)   ;;  %v10743_v63 = vld [vmem:[#allocation9 + $0x40] ss:$16 sps:$4 sm:$0xff] (!%p9965_p7)  }
 0x2f7   : > { %v3915_v5 = vadd.f32 %v3914_v3, %v3873_v0  ;;  %v3916_v6 = vpop.f32.mrb[18].mxu1  ;;  %v10744_v0 = vld [vmem:[#allocation9 + $0x48] ss:$16 sps:$4 sm:$0xff] (!%p9965_p7)   ;;  %8101 = vmatprep.subr.bf16.mxu0 (!%p9965_p7), %v10739_v61  ;;  %v10749_v3 = vld [vmem:[#allocation9 + $0x60] ss:$16 sps:$4 sm:$0xff] (!%p9965_p7)  }
 0x2f8   : > { %v4173_v8 = vadd.f32 %v3913_v1, %v421_v62  ;;  %v3917_v9 = vpop.f32.mrb[19].mxu1  ;;  %v10741_v62 = vld [vmem:[#allocation9 + $0x4c] ss:$16 sps:$4 sm:$0xff] (!%p9965_p7)   ;;  %v10745_v1 = vld [vmem:[#allocation9 + $0x64] ss:$16 sps:$4 sm:$0xff] (!%p9965_p7)   ;;  %8102 = vmatpush1.bf16.msra.mxu0 (!%p9965_p7), %v10743_v63 }
 0x2f9   : > { %v4174_v10 = vadd.f32 %v3915_v5, %v422_v2  ;;  %8429 = vmatprep.subr.bf16.mxu1 (!%p9965_p7), %v10741_v62  ;;  %v10747_v2 = vld [vmem:[#allocation9 + $0x6c] ss:$16 sps:$4 sm:$0xff] (!%p9965_p7)   ;;  %v10750_v4 = vld [vmem:[#allocation9 + $0x68] ss:$16 sps:$4 sm:$0xff] (!%p9965_p7)   ;;  %v10751_v5 = vld [vmem:[#allocation9 + $0x84] ss:$16 sps:$4 sm:$0xff] (!%p9965_p7)   ;;  %8103 = vmatprep.subr.bf16.mxu0 (!%p9965_p7), %v10745_v1 }
 0x2fa   : > { %4189 = vst [vmem:[#allocation2 + $0x40] sm:$0xff] %v4173_v8  ;;  %8430 = vmatpush1.bf16.msra.mxu1 (!%p9965_p7), %v10744_v0  ;;  %v10753_v6 = vld [vmem:[#allocation9 + $0x8c] ss:$16 sps:$4 sm:$0xff] (!%p9965_p7)   ;;  %v10755_v7 = vld [vmem:[#allocation9 + $0x80] ss:$16 sps:$4 sm:$0xff] (!%p9965_p7)  }
 0x2fb   : > { %4190 = vst [vmem:[#allocation2 + $0x48] sm:$0xff] %v4174_v10  ;;  %8431 = vmatprep.subr.bf16.mxu1 (!%p9965_p7), %v10747_v2  ;;  %v10756_v8 = vld [vmem:[#allocation9 + $0x88] ss:$16 sps:$4 sm:$0xff] (!%p9965_p7)   ;;  %v10757_v9 = vld [vmem:[#allocation9 + $0xa4] ss:$16 sps:$4 sm:$0xff] (!%p9965_p7)  }
 0x2fc   : > { %8104 = vmatpush1.bf16.msra.mxu0 (!%p9965_p7), %v10749_v3  ;;  %v10759_v10 = vld [vmem:[#allocation9 + $0xac] ss:$16 sps:$4 sm:$0xff] (!%p9965_p7)   ;;  %v10803_v61 = vld [vmem:[#allocation9 + $0x180] ss:$16 sps:$4 sm:$0xff] (!%p9965_p7)   ;;  %v10804_v62 = vld [vmem:[#allocation9 + $0x188] ss:$16 sps:$4 sm:$0xff] (!%p9965_p7)  }
 0x2fd   : > { %8105 = vmatprep.subr.bf16.mxu0 (!%p9965_p7), %v10751_v5  ;;  %v10805_v3 = vld [vmem:[#allocation9 + $0x1a4] ss:$16 sps:$4 sm:$0xff] (!%p9965_p7)  }
 0x2fe   : > { %8432 = vmatpush1.bf16.msra.mxu1 (!%p9965_p7), %v10750_v4 }
 0x2ff   : > { %8433 = vmatprep.subr.bf16.mxu1 (!%p9965_p7), %v10753_v6 }
 0x300   : > { %8106 = vmatpush1.bf16.msra.mxu0 (!%p9965_p7), %v10755_v7 }
 0x301   : > { %8107 = vmatprep.subr.bf16.mxu0 (!%p9965_p7), %v10757_v9 }
 0x302   : > { %8434 = vmatpush1.bf16.msra.mxu1 (!%p9965_p7), %v10756_v8  ;;  %v10807_v8 = vld [vmem:[#allocation9 + $0x1ac] ss:$16 sps:$4 sm:$0xff] (!%p9965_p7)  }
 0x303   : > { %8435 = vmatprep.subr.bf16.mxu1 (!%p9965_p7), %v10759_v10 }
 0x333   : > { %v3953_v11 = vpop.f32.mrb[20].mxu0 }
 0x334   : > { %v3955_v20 = vpop.f32.mrb[21].mxu0 }
 0x335   : > { %v3994_v59 = vpop.f32.mrb[20].mxu1  ;;  %v3957_v14 = vpop.f32.mrb[22].mxu0 }
 0x336   : > { %v3995_v12 = vadd.f32 %v3994_v59, %v3953_v11  ;;  %v3996_v13 = vpop.f32.mrb[21].mxu1  ;;  %v3958_v18 = vpop.f32.mrb[23].mxu0  ;;  %v10761_v11 = vld [vmem:[#allocation9 + $0xa0] ss:$16 sps:$4 sm:$0xff] (!%p9965_p7)   ;;  %v10763_v59 = vld [vmem:[#allocation9 + $0xc4] ss:$16 sps:$4 sm:$0xff] (!%p9965_p7)  }
 0x337   : > { %v3997_v15 = vadd.f32 %v3996_v13, %v3955_v20  ;;  %v3998_v16 = vpop.f32.mrb[22].mxu1  ;;  %v10765_v20 = vld [vmem:[#allocation9 + $0xcc] ss:$16 sps:$4 sm:$0xff] (!%p9965_p7)   ;;  %8108 = vmatpush1.bf16.msra.mxu0 (!%p9965_p7), %v10761_v11  ;;  %v10769_v13 = vld [vmem:[#allocation9 + $0xe4] ss:$16 sps:$4 sm:$0xff] (!%p9965_p7)  }
 0x338   : > { %v4175_v19 = vadd.f32 %v3995_v12, %v423_v17  ;;  %v3999_v21 = vpop.f32.mrb[23].mxu1  ;;  %v10762_v17 = vld [vmem:[#allocation9 + $0xa8] ss:$16 sps:$4 sm:$0xff] (!%p9965_p7)   ;;  %v10767_v12 = vld [vmem:[#allocation9 + $0xc0] ss:$16 sps:$4 sm:$0xff] (!%p9965_p7)   ;;  %8109 = vmatprep.subr.bf16.mxu0 (!%p9965_p7), %v10763_v59 }
 0x339   : > { %v4176_v22 = vadd.f32 %v3997_v15, %v424_v60  ;;  %v10768_v60 = vld [vmem:[#allocation9 + $0xc8] ss:$16 sps:$4 sm:$0xff] (!%p9965_p7)   ;;  %8436 = vmatpush1.bf16.msra.mxu1 (!%p9965_p7), %v10762_v17  ;;  %v10771_v14 = vld [vmem:[#allocation9 + $0xec] ss:$16 sps:$4 sm:$0xff] (!%p9965_p7)   ;;  %v10773_v15 = vld [vmem:[#allocation9 + $0xe0] ss:$16 sps:$4 sm:$0xff] (!%p9965_p7)  }
 0x33a   : > { %4191 = vst [vmem:[#allocation2 + $0x50] sm:$0xff] %v4175_v19  ;;  %8437 = vmatprep.subr.bf16.mxu1 (!%p9965_p7), %v10765_v20  ;;  %v10774_v16 = vld [vmem:[#allocation9 + $0xe8] ss:$16 sps:$4 sm:$0xff] (!%p9965_p7)   ;;  %v10775_v18 = vld [vmem:[#allocation9 + $0x104] ss:$16 sps:$4 sm:$0xff] (!%p9965_p7)  }
 0x33b   : > { %4192 = vst [vmem:[#allocation2 + $0x58] sm:$0xff] %v4176_v22  ;;  %8110 = vmatpush1.bf16.msra.mxu0 (!%p9965_p7), %v10767_v12  ;;  %v10777_v19 = vld [vmem:[#allocation9 + $0x10c] ss:$16 sps:$4 sm:$0xff] (!%p9965_p7)   ;;  %v10779_v21 = vld [vmem:[#allocation9 + $0x100] ss:$16 sps:$4 sm:$0xff] (!%p9965_p7)  }
 0x33c   : > { %8111 = vmatprep.subr.bf16.mxu0 (!%p9965_p7), %v10769_v13  ;;  %v10780_v22 = vld [vmem:[#allocation9 + $0x108] ss:$16 sps:$4 sm:$0xff] (!%p9965_p7)   ;;  %v10809_v59 = vld [vmem:[#allocation9 + $0x1a0] ss:$16 sps:$4 sm:$0xff] (!%p9965_p7)  }
 0x33d   : > { %8438 = vmatpush1.bf16.msra.mxu1 (!%p9965_p7), %v10768_v60 }
 0x33e   : > { %8439 = vmatprep.subr.bf16.mxu1 (!%p9965_p7), %v10771_v14  ;;  %v10810_v14 = vld [vmem:[#allocation9 + $0x1a8] ss:$16 sps:$4 sm:$0xff] (!%p9965_p7)  }
 0x33f   : > { %8112 = vmatpush1.bf16.msra.mxu0 (!%p9965_p7), %v10773_v15 }
 0x340   : > { %8113 = vmatprep.subr.bf16.mxu0 (!%p9965_p7), %v10775_v18 }
 0x341   : > { %8440 = vmatpush1.bf16.msra.mxu1 (!%p9965_p7), %v10774_v16 }
 0x342   : > { %8441 = vmatprep.subr.bf16.mxu1 (!%p9965_p7), %v10777_v19 }
 0x343   : > { %8114 = vmatpush1.bf16.msra.mxu0 (!%p9965_p7), %v10779_v21  ;;  %v10811_v21 = vld [vmem:[#allocation9 + $0x1c4] ss:$16 sps:$4 sm:$0xff] (!%p9965_p7)  }
 0x345   : > { %8442 = vmatpush1.bf16.msra.mxu1 (!%p9965_p7), %v10780_v22 }
 0x373   : > { %v4035_v23 = vpop.f32.mrb[24].mxu0 }
 0x374   : > { %v4037_v26 = vpop.f32.mrb[25].mxu0 }
 0x375   : > { %v4076_v25 = vpop.f32.mrb[24].mxu1  ;;  %v4039_v30 = vpop.f32.mrb[26].mxu0 }
 0x376   : > { %v4077_v27 = vadd.f32 %v4076_v25, %v4035_v23  ;;  %v4078_v29 = vpop.f32.mrb[25].mxu1  ;;  %v4040_v33 = vpop.f32.mrb[27].mxu0  ;;  %v10781_v23 = vld [vmem:[#allocation9 + $0x124] ss:$16 sps:$4 sm:$0xff] (!%p9965_p7)   ;;  %v10785_v25 = vld [vmem:[#allocation9 + $0x120] ss:$16 sps:$4 sm:$0xff] (!%p9965_p7)  }
 0x377   : > { %v4079_v31 = vadd.f32 %v4078_v29, %v4037_v26  ;;  %v4080_v32 = vpop.f32.mrb[26].mxu1  ;;  %v10786_v26 = vld [vmem:[#allocation9 + $0x128] ss:$16 sps:$4 sm:$0xff] (!%p9965_p7)   ;;  %8115 = vmatprep.subr.bf16.mxu0 (!%p9965_p7), %v10781_v23  ;;  %v10791_v29 = vld [vmem:[#allocation9 + $0x140] ss:$16 sps:$4 sm:$0xff] (!%p9965_p7)  }
 0x378   : > { %v4177_v34 = vadd.f32 %v4077_v27, %v425_v24  ;;  %v4081_v35 = vpop.f32.mrb[27].mxu1  ;;  %v10783_v24 = vld [vmem:[#allocation9 + $0x12c] ss:$16 sps:$4 sm:$0xff] (!%p9965_p7)   ;;  %v10787_v27 = vld [vmem:[#allocation9 + $0x144] ss:$16 sps:$4 sm:$0xff] (!%p9965_p7)   ;;  %8116 = vmatpush1.bf16.msra.mxu0 (!%p9965_p7), %v10785_v25 }
 0x379   : > { %v4178_v36 = vadd.f32 %v4079_v31, %v426_v28  ;;  %8443 = vmatprep.subr.bf16.mxu1 (!%p9965_p7), %v10783_v24  ;;  %v10789_v28 = vld [vmem:[#allocation9 + $0x14c] ss:$16 sps:$4 sm:$0xff] (!%p9965_p7)   ;;  %v10792_v30 = vld [vmem:[#allocation9 + $0x148] ss:$16 sps:$4 sm:$0xff] (!%p9965_p7)   ;;  %v10793_v31 = vld [vmem:[#allocation9 + $0x164] ss:$16 sps:$4 sm:$0xff] (!%p9965_p7)   ;;  %8117 = vmatprep.subr.bf16.mxu0 (!%p9965_p7), %v10787_v27 }
 0x37a   : > { %4193 = vst [vmem:[#allocation2 + $0x60] sm:$0xff] %v4177_v34  ;;  %8444 = vmatpush1.bf16.msra.mxu1 (!%p9965_p7), %v10786_v26  ;;  %v10795_v32 = vld [vmem:[#allocation9 + $0x16c] ss:$16 sps:$4 sm:$0xff] (!%p9965_p7)   ;;  %v10797_v33 = vld [vmem:[#allocation9 + $0x160] ss:$16 sps:$4 sm:$0xff] (!%p9965_p7)  }
 0x37b   : > { %4194 = vst [vmem:[#allocation2 + $0x68] sm:$0xff] %v4178_v36  ;;  %8445 = vmatprep.subr.bf16.mxu1 (!%p9965_p7), %v10789_v28  ;;  %v10798_v34 = vld [vmem:[#allocation9 + $0x168] ss:$16 sps:$4 sm:$0xff] (!%p9965_p7)   ;;  %v12759_v35 = vld [vmem:[#allocation2] sm:$0xff] (!%p9965_p7)  ;;  %v10813_v26 = vld [vmem:[#allocation9 + $0x1cc] ss:$16 sps:$4 sm:$0xff] (!%p9965_p7)  }
 0x37c   : > { %v10799_v36 = vld [vmem:[#allocation9 + $0x184] ss:$16 sps:$4 sm:$0xff] (!%p9965_p7)   ;;  %8118 = vmatpush1.bf16.msra.mxu0 (!%p9965_p7), %v10791_v29 }
 0x37d   : > { %8119 = vmatprep.subr.bf16.mxu0 (!%p9965_p7), %v10793_v31 }
 0x37e   : > { %8446 = vmatpush1.bf16.msra.mxu1 (!%p9965_p7), %v10792_v30 }
 0x37f   : > { %8447 = vmatprep.subr.bf16.mxu1 (!%p9965_p7), %v10795_v32 }
 0x380   : > { %8120 = vmatpush1.bf16.msra.mxu0 (!%p9965_p7), %v10797_v33 }
 0x381   : > { %8121 = vmatprep.subr.bf16.mxu0 (!%p9965_p7), %v10799_v36  ;;  %v10815_v36 = vld [vmem:[#allocation9 + $0x1c0] ss:$16 sps:$4 sm:$0xff] (!%p9965_p7)  }
 0x382   : > { %8448 = vmatpush1.bf16.msra.mxu1 (!%p9965_p7), %v10798_v34 }
 0x384   : > { %8122 = vmatpush1.bf16.msra.mxu0 (!%p9965_p7), %v10803_v61 }
 0x385   : > { %8123 = vmatprep.subr.bf16.mxu0 (!%p9965_p7), %v10805_v3 }
 0x388   : > { %8124 = vmatpush1.bf16.msra.mxu0 (!%p9965_p7), %v10809_v59 }
 0x389   : > { %8125 = vmatprep.subr.bf16.mxu0 (!%p9965_p7), %v10811_v21 }
 0x38c   : > { %8126 = vmatpush1.bf16.msra.mxu0 (!%p9965_p7), %v10815_v36 }
 0x3b3   : > { %v4117_v37 = vpop.f32.mrb[28].mxu0 }
 0x3b4   : > { %v4119_v40 = vpop.f32.mrb[29].mxu0 }
 0x3b5   : > { %v4158_v39 = vpop.f32.mrb[28].mxu1  ;;  %v4121_v44 = vpop.f32.mrb[30].mxu0  ;;  %4200 = sbr.rel (%p9965_p7) target bundleno = 1995 (0x7cb), region = 84 }
 0x3b6   : > { %v4159_v41 = vadd.f32 %v4158_v39, %v4117_v37  ;;  %v4160_v43 = vpop.f32.mrb[29].mxu1  ;;  %v4122_v47 = vpop.f32.mrb[31].mxu0  ;;  %v12761_v37 = vld [vmem:[#allocation2 + $0x8] sm:$0xff] (!%p9965_p7)  ;;  %v12765_v39 = vld [vmem:[#allocation2 + $0x18] sm:$0xff] (!%p9965_p7)  ;;  %v12776_v44 = vld [vmem:[#allocation2 + $0x30] sm:$0xff] (!%p9965_p7) }
 0x3b7   : > { %v4161_v45 = vadd.f32 %v4160_v43, %v4119_v40  ;;  %v4162_v46 = vpop.f32.mrb[30].mxu1  ;;  %v4217_v40 = vrot.slane (!%p9965_p7), %v12759_v35, 4  ;;  %v12774_v43 = vld [vmem:[#allocation2 + $0x28] sm:$0xff] (!%p9965_p7)  ;;  %v4235_v47 = vrot.slane (!%p9965_p7), %v12765_v39, 4  ;;  %v4253_v54 = vrot.slane (!%p9965_p7), %v12776_v44, 4 }
 0x3b8   : > { %v4179_v48 = vadd.f32 %v4159_v41, %v427_v38  ;;  %v4163_v49 = vpop.f32.mrb[31].mxu1  ;;  %v12763_v38 = vld [vmem:[#allocation2 + $0x10] sm:$0xff] (!%p9965_p7)  ;;  %v12770_v41 = vmul.f32 (!%p9965_p7), %v12759_v35, %v12759_v35  ;;  %v4247_v53 = vrot.slane (!%p9965_p7), %v12774_v43, 4  ;;  %v4335_v3 = vmul.f32 (!%p9965_p7), %v12774_v43, %v12774_v43 }
 0x3b9   : > { %v4180_v50 = vadd.f32 %v4161_v45, %v428_v42  ;;  %v12772_v42 = vld [vmem:[#allocation2 + $0x20] sm:$0xff] (!%p9965_p7)  ;;  %v4223_v45 = vrot.slane (!%p9965_p7), %v12761_v37, 4  ;;  %v4229_v46 = vrot.slane (!%p9965_p7), %v12763_v38, 4  ;;  %v10801_v49 = vld [vmem:[#allocation9 + $0x18c] ss:$16 sps:$4 sm:$0xff] (!%p9965_p7)   ;;  %v4218_v51 = vadd.f32 (!%p9965_p7), %v4217_v40, %v12759_v35 }
 0x3ba   : > { %4195 = vst [vmem:[#allocation2 + $0x70] sm:$0xff] %v4179_v48  ;;  %v12783_v48 = vmul.f32 (!%p9965_p7), %v12761_v37, %v12761_v37  ;;  %v4241_v52 = vrot.slane (!%p9965_p7), %v12772_v42, 4  ;;  %v4236_v57 = vadd.f32 (!%p9965_p7), %v4235_v47, %v12765_v39  ;;  %v4248_v1 = vadd.f32 (!%p9965_p7), %v4247_v53, %v12774_v43  ;;  %8449 = vmatprep.subr.bf16.mxu1 (!%p9965_p7), %v10801_v49  ;;  %v10816_v40 = vld [vmem:[#allocation9 + $0x1c8] ss:$16 sps:$4 sm:$0xff] (!%p9965_p7)  }
 0x3bb   : > { %4196 = vst [vmem:[#allocation2 + $0x78] sm:$0xff] %v4180_v50  ;;  %v12785_v50 = vld [vmem:[#allocation2 + $0x38] sm:$0xff] (!%p9965_p7)  ;;  %v4224_v55 = vadd.f32 (!%p9965_p7), %v4223_v45, %v12761_v37  ;;  %v4230_v56 = vadd.f32 (!%p9965_p7), %v4229_v46, %v12763_v38  ;;  %v4219_v63 = vrot.slane (!%p9965_p7), %v4218_v51, 2  ;;  %v4254_v2 = vadd.f32 (!%p9965_p7), %v4253_v54, %v12776_v44  ;;  %8450 = vmatpush1.bf16.msra.mxu1 (!%p9965_p7), %v10804_v62 }
 0x3bc   : > { %v4259_v58 = vrot.slane %v12785_v50, 4  ;;  %v4242_v0 = vadd.f32 %v4241_v52, %v12772_v42  ;;  %v4237_v6 = vrot.slane %v4236_v57, 2  ;;  %v4249_v11 = vrot.slane %v4248_v1, 2  ;;  %8451 = vmatprep.subr.bf16.mxu1 %v10807_v8 }
 0x3bd   : > { %v4225_v4 = vrot.slane %v4224_v55, 2  ;;  %v4231_v5 = vrot.slane %v4230_v56, 2  ;;  %v4220_v9 = vadd.f32 %v4219_v63, %v4218_v51  ;;  %v4255_v17 = vrot.slane %v4254_v2, 2  ;;  %v10817_v51 = vld [vmem:[#allocation9 + $0x1e4] ss:$16 sps:$4 sm:$0xff]  }
 0x3be   : > { %v4260_v7 = vadd.f32 %v4259_v58, %v12785_v50  ;;  %v4243_v10 = vrot.slane %v4242_v0, 2  ;;  %v4238_v60 = vadd.f32 %v4237_v6, %v4236_v57  ;;  %v4250_v18 = vadd.f32 %v4249_v11, %v4248_v1  ;;  %v10821_v63 = vld [vmem:[#allocation9 + $0x1e0] ss:$16 sps:$4 sm:$0xff]   ;;  %v10825_v11 = vld [vmem:[#allocation9 + $0x204] ss:$16 sps:$4 sm:$0xff]   ;;  %8127 = vmatprep.subr.bf16.mxu0 %v10817_v51 }
 0x3bf   : > { %v4226_v20 = vadd.f32 %v4225_v4, %v4224_v55  ;;  %v4232_v12 = vadd.f32 %v4231_v5, %v4230_v56  ;;  %v4221_v15 = vrot.slane %v4220_v9, 1  ;;  %v4256_v19 = vadd.f32 %v4255_v17, %v4254_v2  ;;  %8452 = vmatpush1.bf16.msra.mxu1 %v10810_v14  ;;  %v10819_v56 = vld [vmem:[#allocation9 + $0x1ec] ss:$16 sps:$4 sm:$0xff]   ;;  %v10822_v4 = vld [vmem:[#allocation9 + $0x1e8] ss:$16 sps:$4 sm:$0xff]   ;;  %8128 = vmatpush1.bf16.msra.mxu0 %v10821_v63 }
 0x3c0   : > { %v4261_v13 = vrot.slane %v4260_v7, 2  ;;  %v4244_v16 = vadd.f32 %v4243_v10, %v4242_v0  ;;  %v4239_v24 = vrot.slane %v4238_v60, 1  ;;  %v4251_v29 = vrot.slane %v4250_v18, 1  ;;  %8453 = vmatprep.subr.bf16.mxu1 %v10813_v26  ;;  %8138 = vmatprep.subr.bf16.mxu0 %v10825_v11 }
 0x3c1   : > { %v4227_v22 = vrot.slane %v4226_v20, 1  ;;  %v4233_v23 = vrot.slane %v4232_v12, 1  ;;  %v4222_v27 = vadd.f32 %v4221_v15, %v4220_v9  ;;  %v4257_v30 = vrot.slane %v4256_v19, 1 }
 0x3c2   : > { %v4262_v25 = vadd.f32 %v4261_v13, %v4260_v7  ;;  %v4245_v28 = vrot.slane %v4244_v16, 1  ;;  %v4240_v33 = vadd.f32 %v4239_v24, %v4238_v60  ;;  %v4252_v46 = vadd.f32 %v4251_v29, %v4250_v18 }
 0x3c3   : > { %v4228_v31 = vadd.f32 %v4227_v22, %v4226_v20  ;;  %v4234_v32 = vadd.f32 %v4233_v23, %v4232_v12  ;;  %v4258_v47 = vadd.f32 %v4257_v30, %v4256_v19  ;;  %v12799_v49 = vmul.f32 0.125, %v4222_v27  ;;  %8454 = vmatpush1.bf16.msra.mxu1 %v10816_v40 }
 0x3c4   : > { %v4263_v34 = vrot.slane %v4262_v25, 1  ;;  %v4246_v45 = vadd.f32 %v4245_v28, %v4244_v16  ;;  %v12805_v55 = vmul.f32 0.125, %v4240_v33  ;;  %v12809_v58 = vmul.f32 0.125, %v4252_v46  ;;  %8455 = vmatprep.subr.bf16.mxu1 %v10819_v56 }
 0x3c5   : > { %v12801_v53 = vmul.f32 0.125, %v4228_v31  ;;  %v12803_v54 = vmul.f32 0.125, %v4234_v32  ;;  %v12811_v61 = vmul.f32 0.125, %v4258_v47  ;;  %v4332_v62 = vmul.f32 %v12763_v38, %v12763_v38 }
 0x3c6   : > { %v4264_v52 = vadd.f32 %v4263_v34, %v4262_v25  ;;  %v12807_v57 = vmul.f32 0.125, %v4246_v45  ;;  %v4333_v1 = vmul.f32 %v12765_v39, %v12765_v39  ;;  %v4334_v2 = vmul.f32 %v12772_v42, %v12772_v42 }
 0x3c7   : > { %v4336_v5 = vmul.f32 %v12776_v44, %v12776_v44  ;;  %v4337_v6 = vmul.f32 %v12785_v50, %v12785_v50  ;;  %v4346_v38 = vrot.slane %v12770_v41, 4  ;;  %v4352_v7 = vrot.slane %v12783_v48, 4  ;;  %v10828_v50 = vld [vmem:[#allocation9 + $0x20c] ss:$16 sps:$4 sm:$0xff]   ;;  %8456 = vmatpush1.bf16.msra.mxu1 %v10822_v4 }
 0x3c8   : > { %v12815_v0 = vmul.f32 0.125, %v4264_v52  ;;  %v4358_v8 = vrot.slane %v4332_v62, 4  ;;  %v4364_v9 = vrot.slane %v4333_v1, 4  ;;  %v4370_v10 = vrot.slane %v4334_v2, 4  ;;  %8466 = vmatprep.subr.bf16.mxu1 %v10828_v50 }
 0x3c9   : > { %v4376_v42 = vrot.slane %v4335_v3, 4  ;;  %v4347_v43 = vadd.f32 %v4346_v38, %v12770_v41  ;;  %v4353_v44 = vadd.f32 %v4352_v7, %v12783_v48  ;;  %v4382_v17 = vrot.slane %v4336_v5, 4 }
 0x3ca   : > { %v4388_v59 = vrot.slane %v4337_v6, 4  ;;  %v4359_v20 = vadd.f32 %v4358_v8, %v4332_v62  ;;  %v4365_v12 = vadd.f32 %v4364_v9, %v4333_v1  ;;  %v4371_v60 = vadd.f32 %v4370_v10, %v4334_v2 }
 0x3cb   : > { %v4377_v13 = vadd.f32 %v4376_v42, %v4335_v3  ;;  %v4348_v14 = vrot.slane %v4347_v43, 2  ;;  %v4354_v15 = vrot.slane %v4353_v44, 2  ;;  %v4383_v16 = vadd.f32 %v4382_v17, %v4336_v5 }
 0x3cc   : > { %v4389_v18 = vadd.f32 %v4388_v59, %v4337_v6  ;;  %v4360_v19 = vrot.slane %v4359_v20, 2  ;;  %v4366_v21 = vrot.slane %v4365_v12, 2  ;;  %v4372_v22 = vrot.slane %v4371_v60, 2 }
 0x3cd   : > { %v4378_v23 = vrot.slane %v4377_v13, 2  ;;  %v4349_v41 = vadd.f32 %v4348_v14, %v4347_v43  ;;  %v4355_v24 = vadd.f32 %v4354_v15, %v4353_v44  ;;  %v4384_v48 = vrot.slane %v4383_v16, 2 }
 0x3ce   : > { %v4390_v25 = vrot.slane %v4389_v18, 2  ;;  %v4361_v26 = vadd.f32 %v4360_v19, %v4359_v20  ;;  %v4367_v27 = vadd.f32 %v4366_v21, %v4365_v12  ;;  %v4373_v28 = vadd.f32 %v4372_v22, %v4371_v60 }
 0x3cf   : > { %v4379_v29 = vadd.f32 %v4378_v23, %v4377_v13  ;;  %v4350_v30 = vrot.slane %v4349_v41, 1  ;;  %v4356_v31 = vrot.slane %v4355_v24, 1  ;;  %v4385_v32 = vadd.f32 %v4384_v48, %v4383_v16 }
 0x3d0   : > { %v4391_v33 = vadd.f32 %v4390_v25, %v4389_v18  ;;  %v4362_v34 = vrot.slane %v4361_v26, 1  ;;  %v4368_v36 = vrot.slane %v4367_v27, 1  ;;  %v4374_v40 = vrot.slane %v4373_v28, 1 }
 0x3d1   : > { %v4380_v45 = vrot.slane %v4379_v29, 1  ;;  %v4351_v46 = vadd.f32 %v4350_v30, %v4349_v41  ;;  %v4357_v47 = vadd.f32 %v4356_v31, %v4355_v24  ;;  %v4386_v51 = vrot.slane %v4385_v32, 1 }
 0x3d2   : > { %v4392_v52 = vrot.slane %v4391_v33, 1  ;;  %v4363_v56 = vadd.f32 %v4362_v34, %v4361_v26  ;;  %v4369_v62 = vadd.f32 %v4368_v36, %v4367_v27  ;;  %v4375_v63 = vadd.f32 %v4374_v40, %v4373_v28 }
 0x3d3   : > { %v4381_v1 = vadd.f32 %v4380_v45, %v4379_v29  ;;  %v4387_v2 = vadd.f32 %v4386_v51, %v4385_v32  ;;  %v4442_v4 = vmul.f32 0.125, %v4351_v46  ;;  %v4443_v5 = vmul.f32 0.125, %v4357_v47 }
 0x3d4   : > { %v4393_v3 = vadd.f32 %v4392_v52, %v4391_v33  ;;  %v4444_v6 = vmul.f32 0.125, %v4363_v56  ;;  %v4445_v38 = vmul.f32 0.125, %v4369_v62  ;;  %v4446_v7 = vmul.f32 0.125, %v4375_v63 }
 0x3d5   : > { %v4447_v8 = vmul.f32 0.125, %v4381_v1  ;;  %v4448_v9 = vmul.f32 0.125, %v4387_v2  ;;  %v4458_v42 = vmul.f32 %v12799_v49, %v12799_v49  ;;  %v4459_v11 = vmul.f32 %v12801_v53, %v12801_v53 }
 0x3d6   : > { %v4449_v10 = vmul.f32 0.125, %v4393_v3  ;;  %v4460_v43 = vmul.f32 %v12803_v54, %v12803_v54  ;;  %v4461_v44 = vmul.f32 %v12805_v55, %v12805_v55  ;;  %v4462_v17 = vmul.f32 %v12807_v57, %v12807_v57 }
 0x3d7   : > { %v4463_v59 = vmul.f32 %v12809_v58, %v12809_v58  ;;  %v4464_v50 = vmul.f32 %v12811_v61, %v12811_v61  ;;  %v4465_v20 = vmul.f32 %v12815_v0, %v12815_v0  ;;  %v4474_v12 = vsub.f32 %v4442_v4, %v4458_v42 }
 0x3d8   : > { %v4475_v60 = vsub.f32 %v4443_v5, %v4459_v11  ;;  %v4476_v13 = vsub.f32 %v4444_v6, %v4460_v43  ;;  %v4477_v14 = vsub.f32 %v4445_v38, %v4461_v44  ;;  %v4478_v15 = vsub.f32 %v4446_v7, %v4462_v17 }
 0x3d9   : > { %v4479_v16 = vsub.f32 %v4447_v8, %v4463_v59  ;;  %v4480_v18 = vsub.f32 %v4448_v9, %v4464_v50  ;;  %v4481_v19 = vsub.f32 %v4449_v10, %v4465_v20  ;;  %v4490_v21 = vmax.f32 %v4474_v12, 0.0  ;;  %v4506_v59 = vld [vmem:[#allocation8] ss:$2 sm:$0xff] }
 0x3da   : > { %v4491_v22 = vmax.f32 %v4475_v60, 0.0  ;;  %v4492_v23 = vmax.f32 %v4476_v13, 0.0  ;;  %v4493_v41 = vmax.f32 %v4477_v14, 0.0  ;;  %v4494_v24 = vmax.f32 %v4478_v15, 0.0 }
 0x3db   : > { %v4495_v48 = vmax.f32 %v4479_v16, 0.0  ;;  %v4496_v25 = vmax.f32 %v4480_v18, 0.0  ;;  %v4509_v26 = vadd.f32 1e-05, %v4490_v21  ;;  %v4497_v28 = vmax.f32 %v4481_v19, 0.0 }
 0x3dc   : > { %v4510_v27 = vadd.f32 1e-05, %v4491_v22  ;;  %v4511_v29 = vadd.f32 1e-05, %v4492_v23  ;;  %v4512_v30 = vadd.f32 1e-05, %v4493_v41  ;;  %v4564_v40 = vlaneseq }
 0x3dd   : > { %v4513_v31 = vadd.f32 1e-05, %v4494_v24  ;;  %11527 = vrsqrt.f32 %v4509_v26  ;;  %v4514_v32 = vadd.f32 1e-05, %v4495_v48  ;;  %v4515_v33 = vadd.f32 1e-05, %v4496_v25 }
 0x3de   : > { %11529 = vrsqrt.f32 %v4510_v27  ;;  %v11875_v34 = vmov 1966171168   ;;  %v4516_v45 = vadd.f32 1e-05, %v4497_v28  ;;  %v4565_v47 = vshrl.u32 %v4564_v40, 7 }
 0x3df   : > { %11531 = vrsqrt.f32 %v4511_v29  ;;  %v4562_v36 = vunpack.c.l.s4 %v11875_v34 }
 0x3e0   : > { %11533 = vrsqrt.f32 %v4512_v30  ;;  %v12855_v50 = vsub.s32 0, %v4565_v47  ;;  %v12857_v12 = vsub.s32 1, %v4565_v47  ;;  %v12859_v60 = vsub.s32 2, %v4565_v47 }
 0x3e1   : > { %11535 = vrsqrt.f32 %v4513_v31  ;;  %v4563_v46 = vunpack.c.0.s8 %v4562_v36  ;;  %v12861_v13 = vsub.s32 3, %v4565_v47  ;;  %v12863_v14 = vsub.s32 4, %v4565_v47 }
 0x3e2   : > { %11537 = vrsqrt.f32 %v4514_v32  ;;  %v12865_v15 = vsub.s32 5, %v4565_v47  ;;  %v12867_v16 = vsub.s32 6, %v4565_v47  ;;  %v12869_v18 = vsub.s32 7, %v4565_v47 }
 0x3e3   : > { %11539 = vrsqrt.f32 %v4515_v33  ;;  %v12847_v52 = vsub.s32 %v4563_v46, %v4565_v47 }
 0x3e4   : > { %11541 = vrsqrt.f32 %v4516_v45 }
 0x3e7   : > { %v11528_v51 = vpop.eup %11527 }
 0x3e8   : > { %v11530_v56 = vpop.eup %11529 }
 0x3e9   : > { %v11532_v62 = vpop.eup %11531  ;;  %v4557_v63 = vcombine.low %v11528_v51, %v11530_v56  ;;  %v4660_v51 = vld [vmem:[#allocation8 + $0x1] ss:$2 sm:$0xff] }
 0x3ea   : > { %v11534_v1 = vpop.eup %11533 }
 0x3eb   : > { %v11536_v2 = vpop.eup %11535  ;;  %v4558_v3 = vcombine.low %v11532_v62, %v11534_v1  ;;  %v4567_v4 = vrot.slane %v4557_v63, %v12847_v52 }
 0x3ec   : > { %v11538_v5 = vpop.eup %11537 }
 0x3ed   : > { %v11540_v6 = vpop.eup %11539  ;;  %v4559_v38 = vcombine.low %v11536_v2, %v11538_v5  ;;  %v4574_v7 = vrot.slane %v4558_v3, %v12847_v52 }
 0x3ee   : > { %v11542_v8 = vpop.eup %11541 }
 0x3ef   : > { %v4560_v9 = vcombine.low %v11540_v6, %v11542_v8  ;;  %v4581_v10 = vrot.slane %v4559_v38, %v12847_v52  ;;  %v4589_v42 = vcombine.low %v4567_v4, %v4574_v7 }
 0x3f1   : > { %v4588_v11 = vrot.slane %v4560_v9, %v12847_v52  ;;  %v4597_v44 = vrot.slane %v4589_v42, %v12847_v52 }
 0x3f3   : > { %v4590_v43 = vcombine.low %v4581_v10, %v4588_v11  ;;  %v10834_v11 = vld [vmem:[#allocation9 + $0x22c] ss:$16 sps:$4 sm:$0xff]  }
 0x3f5   : > { %v4604_v17 = vrot.slane %v4590_v43, %v12847_v52 }
 0x3f7   : > { %v4605_v20 = vcombine.low %v4597_v44, %v4604_v17  ;;  %v10829_v44 = vld [vmem:[#allocation9 + $0x220] ss:$16 sps:$4 sm:$0xff]   ;;  %v10832_v17 = vld [vmem:[#allocation9 + $0x228] ss:$16 sps:$4 sm:$0xff]  }
 0x3f9   : > { %v4657_v19 = vmul.f32 %v4605_v20, %v4506_v59  ;;  %v10837_v59 = vld [vmem:[#allocation9 + $0x244] ss:$16 sps:$4 sm:$0xff]   ;;  %v10840_v20 = vld [vmem:[#allocation9 + $0x24c] ss:$16 sps:$4 sm:$0xff]  }
 0x3fb   : > { %v4668_v21 = vrot.slane %v4657_v19, %v12855_v50  ;;  %v4672_v22 = vrot.slane %v4657_v19, %v12857_v12  ;;  %v12874_v23 = vrot.slane %v4657_v19, %v12859_v60  ;;  %v4680_v41 = vrot.slane %v4657_v19, %v12861_v13 }
 0x3fc   : > { %v12878_v24 = vrot.slane %v4657_v19, %v12863_v14  ;;  %v12881_v48 = vrot.slane %v4657_v19, %v12865_v15  ;;  %v12884_v25 = vrot.slane %v4657_v19, %v12867_v16  ;;  %v12887_v26 = vrot.slane %v4657_v19, %v12869_v18  ;;  %v10835_v19 = vld [vmem:[#allocation9 + $0x240] ss:$16 sps:$4 sm:$0xff]  }
 0x3fd   : > { %v4745_v27 = vmul.f32 %v4668_v21, %v12799_v49  ;;  %v4746_v28 = vmul.f32 %v4672_v22, %v12801_v53  ;;  %v4747_v29 = vmul.f32 %v12874_v23, %v12803_v54  ;;  %v4748_v30 = vmul.f32 %v4680_v41, %v12805_v55 }
 0x3fe   : > { %v4749_v31 = vmul.f32 %v12878_v24, %v12807_v57  ;;  %v4750_v32 = vmul.f32 %v12881_v48, %v12809_v58  ;;  %v4751_v33 = vmul.f32 %v12884_v25, %v12811_v61  ;;  %v4752_v34 = vmul.f32 %v12887_v26, %v12815_v0 }
 0x3ff   : > { %v4777_v49 = vcombine.low %v4745_v27, %v4746_v28  ;;  %v4778_v36 = vcombine.low %v4747_v29, %v4748_v30  ;;  %v4880_v62 = vmul.f32 %v4672_v22, %v12761_v37  ;;  %v4879_v63 = vmul.f32 %v4668_v21, %v12759_v35  ;;  %v10823_v37 = vld [vmem:[#allocation9 + $0x200] ss:$16 sps:$4 sm:$0xff]   ;;  %v10826_v35 = vld [vmem:[#allocation9 + $0x208] ss:$16 sps:$4 sm:$0xff]   ;;  %v10843_v22 = vld [vmem:[#allocation9 + $0x264] ss:$16 sps:$4 sm:$0xff]  }
 0x400   : > { %v4779_v53 = vcombine.low %v4749_v31, %v4750_v32  ;;  %v4780_v40 = vcombine.low %v4751_v33, %v4752_v34  ;;  %v4882_v1 = vmul.f32 %v4680_v41, %v12765_v39  ;;  %v10831_v39 = vld [vmem:[#allocation9 + $0x224] ss:$16 sps:$4 sm:$0xff]   ;;  %v10838_v21 = vld [vmem:[#allocation9 + $0x248] ss:$16 sps:$4 sm:$0xff]   ;;  %v10846_v41 = vld [vmem:[#allocation9 + $0x26c] ss:$16 sps:$4 sm:$0xff]  }
 0x401   : > { %v4787_v54 = vrot.slane %v4777_v49, %v12847_v52  ;;  %v4794_v55 = vrot.slane %v4778_v36, %v12847_v52  ;;  %v10841_v27 = vld [vmem:[#allocation9 + $0x260] ss:$16 sps:$4 sm:$0xff]   ;;  %v10844_v28 = vld [vmem:[#allocation9 + $0x268] ss:$16 sps:$4 sm:$0xff]   ;;  %v10849_v29 = vld [vmem:[#allocation9 + $0x284] ss:$16 sps:$4 sm:$0xff]  }
 0x402   : > { %v4801_v45 = vrot.slane %v4779_v53, %v12847_v52  ;;  %v4808_v57 = vrot.slane %v4780_v40, %v12847_v52  ;;  %v10852_v30 = vld [vmem:[#allocation9 + $0x28c] ss:$16 sps:$4 sm:$0xff]   ;;  %v10847_v31 = vld [vmem:[#allocation9 + $0x280] ss:$16 sps:$4 sm:$0xff]   ;;  %v10850_v32 = vld [vmem:[#allocation9 + $0x288] ss:$16 sps:$4 sm:$0xff]  }
 0x403   : > { %v4809_v46 = vcombine.low %v4787_v54, %v4794_v55  ;;  %v10855_v33 = vld [vmem:[#allocation9 + $0x2a4] ss:$16 sps:$4 sm:$0xff]   ;;  %v10858_v34 = vld [vmem:[#allocation9 + $0x2ac] ss:$16 sps:$4 sm:$0xff]   ;;  %v10853_v49 = vld [vmem:[#allocation9 + $0x2a0] ss:$16 sps:$4 sm:$0xff]  }
 0x404   : > { %v4810_v58 = vcombine.low %v4801_v45, %v4808_v57  ;;  %v10856_v36 = vld [vmem:[#allocation9 + $0x2a8] ss:$16 sps:$4 sm:$0xff]   ;;  %v10861_v53 = vld [vmem:[#allocation9 + $0x2c4] ss:$16 sps:$4 sm:$0xff]   ;;  %v10864_v40 = vld [vmem:[#allocation9 + $0x2cc] ss:$16 sps:$4 sm:$0xff]  }
 0x405   : > { %v4817_v47 = vrot.slane %v4809_v46, %v12847_v52  ;;  %v10859_v54 = vld [vmem:[#allocation9 + $0x2c0] ss:$16 sps:$4 sm:$0xff]   ;;  %v10862_v55 = vld [vmem:[#allocation9 + $0x2c8] ss:$16 sps:$4 sm:$0xff]   ;;  %v10867_v45 = vld [vmem:[#allocation9 + $0x2e4] ss:$16 sps:$4 sm:$0xff]  }
 0x406   : > { %v4824_v61 = vrot.slane %v4810_v58, %v12847_v52  ;;  %v10870_v57 = vld [vmem:[#allocation9 + $0x2ec] ss:$16 sps:$4 sm:$0xff]   ;;  %v10865_v46 = vld [vmem:[#allocation9 + $0x2e0] ss:$16 sps:$4 sm:$0xff]   ;;  %v10868_v58 = vld [vmem:[#allocation9 + $0x2e8] ss:$16 sps:$4 sm:$0xff]  }
 0x408   : > { %v4825_v0 = vcombine.low %v4817_v47, %v4824_v61  ;;  %v10873_v47 = vld [vmem:[#allocation9 + $0x304] ss:$16 sps:$4 sm:$0xff]   ;;  %v10876_v61 = vld [vmem:[#allocation9 + $0x30c] ss:$16 sps:$4 sm:$0xff]  }
 0x40a   : > { %v12908_v56 = vsub.f32 %v4660_v51, %v4825_v0  ;;  %v10871_v51 = vld [vmem:[#allocation9 + $0x300] ss:$16 sps:$4 sm:$0xff]   ;;  %v10874_v0 = vld [vmem:[#allocation9 + $0x308] ss:$16 sps:$4 sm:$0xff]  }
 0x40c   : > { %v4904_v2 = vrot.slane %v12908_v56, %v12857_v12  ;;  %v4900_v3 = vrot.slane %v12908_v56, %v12855_v50  ;;  %v4912_v4 = vrot.slane %v12908_v56, %v12861_v13 }
 0x40e   : > { %v4978_v5 = vadd.f32 %v4904_v2, %v4880_v62  ;;  %v4977_v6 = vadd.f32 %v4900_v3, %v4879_v63  ;;  %v4980_v38 = vadd.f32 %v4912_v4, %v4882_v1  ;;  %v10879_v62 = vld [vmem:[#allocation9 + $0x324] ss:$16 sps:$4 sm:$0xff]   ;;  %v10882_v63 = vld [vmem:[#allocation9 + $0x32c] ss:$16 sps:$4 sm:$0xff]   ;;  %v10877_v1 = vld [vmem:[#allocation9 + $0x320] ss:$16 sps:$4 sm:$0xff]  }
 0x40f   : > { %v10880_v2 = vld [vmem:[#allocation9 + $0x328] ss:$16 sps:$4 sm:$0xff]   ;;  %v10885_v3 = vld [vmem:[#allocation9 + $0x344] ss:$16 sps:$4 sm:$0xff]   ;;  %v10888_v4 = vld [vmem:[#allocation9 + $0x34c] ss:$16 sps:$4 sm:$0xff]  }
 0x410   : > { %v4994_v7 = vmax.f32 %v4978_v5, 0.0  ;;  %v4993_v8 = vmax.f32 %v4977_v6, 0.0  ;;  %v4996_v9 = vmax.f32 %v4980_v38, 0.0  ;;  %v10883_v5 = vld [vmem:[#allocation9 + $0x340] ss:$16 sps:$4 sm:$0xff]  }
 0x411   : > { %v10886_v6 = vld [vmem:[#allocation9 + $0x348] ss:$16 sps:$4 sm:$0xff]   ;;  %v10891_v38 = vld [vmem:[#allocation9 + $0x364] ss:$16 sps:$4 sm:$0xff]  }
 0x412   : > { %v5010_v10 = vpack.c.bf16 %v4994_v7, %v4994_v7  ;;  %v5009_v42 = vpack.c.bf16 %v4993_v8, %v4993_v8  ;;  %v5012_v43 = vpack.c.bf16 %v4996_v9, %v4996_v9  ;;  %v10894_v7 = vld [vmem:[#allocation9 + $0x36c] ss:$16 sps:$4 sm:$0xff]   ;;  %v10889_v8 = vld [vmem:[#allocation9 + $0x360] ss:$16 sps:$4 sm:$0xff]   ;;  %v10892_v9 = vld [vmem:[#allocation9 + $0x368] ss:$16 sps:$4 sm:$0xff]  }
 0x414   : > { %8129 = vmatprep.mubr.bf16.mxu0 %v5010_v10  ;;  %8457 = vmatprep.mubr.bf16.mxu1 %v5010_v10  ;;  %v10900_v10 = vld [vmem:[#allocation9 + $0x38c] ss:$16 sps:$4 sm:$0xff]  }
 0x415   : > { %8130 = vmatmul.mubr.bf16.vlgmr.msra.gmra.mrb[0].mxu0 %v5009_v42  ;;  %8458 = vmatmul.mubr.bf16.vlgmr.msra.gmra.mrb[0].mxu1 %v5009_v42  ;;  %v10898_v42 = vld [vmem:[#allocation9 + $0x388] ss:$16 sps:$4 sm:$0xff]  }
 0x416   : > { %8139 = vmatpush1.bf16.msra.mxu0 %v10823_v37  ;;  %8467 = vmatpush1.bf16.msra.mxu1 %v10826_v35  ;;  %v10897_v37 = vld [vmem:[#allocation9 + $0x384] ss:$16 sps:$4 sm:$0xff]   ;;  %v10895_v35 = vld [vmem:[#allocation9 + $0x380] ss:$16 sps:$4 sm:$0xff]  }
 0x417   : > { %8140 = vmatprep.subr.bf16.mxu0 %v10831_v39  ;;  %8468 = vmatprep.subr.bf16.mxu1 %v10834_v11  ;;  %v10903_v39 = vld [vmem:[#allocation9 + $0x3a4] ss:$16 sps:$4 sm:$0xff]   ;;  %v10906_v11 = vld [vmem:[#allocation9 + $0x3ac] ss:$16 sps:$4 sm:$0xff]  }
 0x418   : > { %8170 = vmatprep.mubr.bf16.mxu0 %v5012_v43  ;;  %8498 = vmatprep.mubr.bf16.mxu1 %v5012_v43  ;;  %v11567_v43 = vld [vmem:[#allocation2 + $0x10] sm:$0xff] }
 0x41a   : > { %8141 = vmatpush1.bf16.msra.mxu0 %v10829_v44  ;;  %8469 = vmatpush1.bf16.msra.mxu1 %v10832_v17  ;;  %v4881_v44 = vmul.f32 %v11567_v43, %v12874_v23  ;;  %v4908_v17 = vrot.slane %v12908_v56, %v12859_v60  ;;  %v10907_v23 = vld [vmem:[#allocation9 + $0x3c0] ss:$16 sps:$4 sm:$0xff]   ;;  %v12935_v43 = vld [vmem:[#allocation2 + $0x68] sm:$0xff] }
 0x41b   : > { %8142 = vmatprep.subr.bf16.mxu0 %v10837_v59  ;;  %8470 = vmatprep.subr.bf16.mxu1 %v10840_v20  ;;  %v10901_v59 = vld [vmem:[#allocation9 + $0x3a0] ss:$16 sps:$4 sm:$0xff]   ;;  %v10904_v20 = vld [vmem:[#allocation9 + $0x3a8] ss:$16 sps:$4 sm:$0xff]  }
 0x41e   : > { %8143 = vmatpush1.bf16.msra.mxu0 %v10835_v19  ;;  %8471 = vmatpush1.bf16.msra.mxu1 %v10838_v21  ;;  %v10909_v19 = vld [vmem:[#allocation9 + $0x3c4] ss:$16 sps:$4 sm:$0xff]   ;;  %v10912_v21 = vld [vmem:[#allocation9 + $0x3cc] ss:$16 sps:$4 sm:$0xff]  }
 0x41f   : > { %8144 = vmatprep.subr.bf16.mxu0 %v10843_v22  ;;  %8472 = vmatprep.subr.bf16.mxu1 %v10846_v41  ;;  %v11568_v22 = vld [vmem:[#allocation2 + $0x28] sm:$0xff] }
 0x420   : > { %v4884_v41 = vmul.f32 %v11568_v22, %v12881_v48  ;;  %v10921_v48 = vld [vmem:[#allocation9 + $0x404] ss:$16 sps:$4 sm:$0xff]  }
 0x422   : > { %8145 = vmatpush1.bf16.msra.mxu0 %v10841_v27  ;;  %8473 = vmatpush1.bf16.msra.mxu1 %v10844_v28  ;;  %v4920_v27 = vrot.slane %v12908_v56, %v12865_v15  ;;  %v4979_v28 = vadd.f32 %v4908_v17, %v4881_v44  ;;  %v12937_v44 = vld [vmem:[#allocation2 + $0x70] sm:$0xff]  ;;  %v12939_v17 = vld [vmem:[#allocation2 + $0x78] sm:$0xff] }
 0x423   : > { %8146 = vmatprep.subr.bf16.mxu0 %v10849_v29  ;;  %8474 = vmatprep.subr.bf16.mxu1 %v10852_v30  ;;  %v10910_v29 = vld [vmem:[#allocation9 + $0x3c8] ss:$16 sps:$4 sm:$0xff]   ;;  %v10915_v30 = vld [vmem:[#allocation9 + $0x3e4] ss:$16 sps:$4 sm:$0xff]  }
 0x426   : > { %8147 = vmatpush1.bf16.msra.mxu0 %v10847_v31  ;;  %8475 = vmatpush1.bf16.msra.mxu1 %v10850_v32  ;;  %v10918_v31 = vld [vmem:[#allocation9 + $0x3ec] ss:$16 sps:$4 sm:$0xff]   ;;  %v4982_v32 = vadd.f32 %v4920_v27, %v4884_v41  ;;  %v4295_v41 = vrot.slane %v12935_v43, 4  ;;  %v4301_v27 = vrot.slane %v12937_v44, 4 }
 0x427   : > { %8148 = vmatprep.subr.bf16.mxu0 %v10855_v33  ;;  %8476 = vmatprep.subr.bf16.mxu1 %v10858_v34  ;;  %v4995_v33 = vmax.f32 %v4979_v28, 0.0  ;;  %v10913_v34 = vld [vmem:[#allocation9 + $0x3e0] ss:$16 sps:$4 sm:$0xff]   ;;  %v4307_v28 = vrot.slane %v12939_v17, 4 }
 0x42a   : > { %8149 = vmatpush1.bf16.msra.mxu0 %v10853_v49  ;;  %8477 = vmatpush1.bf16.msra.mxu1 %v10856_v36  ;;  %v10916_v49 = vld [vmem:[#allocation9 + $0x3e8] ss:$16 sps:$4 sm:$0xff]   ;;  %v10924_v36 = vld [vmem:[#allocation9 + $0x40c] ss:$16 sps:$4 sm:$0xff]  }
 0x42b   : > { %8150 = vmatprep.subr.bf16.mxu0 %v10861_v53  ;;  %8478 = vmatprep.subr.bf16.mxu1 %v10864_v40  ;;  %v4998_v53 = vmax.f32 %v4982_v32, 0.0  ;;  %v5011_v40 = vpack.c.bf16 %v4995_v33, %v4995_v33 }
 0x42e   : > { %8151 = vmatpush1.bf16.msra.mxu0 %v10859_v54  ;;  %8479 = vmatpush1.bf16.msra.mxu1 %v10862_v55  ;;  %v10919_v54 = vld [vmem:[#allocation9 + $0x400] ss:$16 sps:$4 sm:$0xff]   ;;  %v10922_v55 = vld [vmem:[#allocation9 + $0x408] ss:$16 sps:$4 sm:$0xff]  }
 0x42f   : > { %8152 = vmatprep.subr.bf16.mxu0 %v10867_v45  ;;  %8480 = vmatprep.subr.bf16.mxu1 %v10870_v57  ;;  %v10927_v45 = vld [vmem:[#allocation9 + $0x424] ss:$16 sps:$4 sm:$0xff]   ;;  %v10930_v57 = vld [vmem:[#allocation9 + $0x42c] ss:$16 sps:$4 sm:$0xff]  }
 0x432   : > { %8153 = vmatpush1.bf16.msra.mxu0 %v10865_v46  ;;  %8481 = vmatpush1.bf16.msra.mxu1 %v10868_v58  ;;  %v5014_v46 = vpack.c.bf16 %v4998_v53, %v4998_v53  ;;  %v10925_v58 = vld [vmem:[#allocation9 + $0x420] ss:$16 sps:$4 sm:$0xff]   ;;  %v4302_v53 = vadd.f32 %v4301_v27, %v12937_v44  ;;  %v10958_v27 = vld [vmem:[#allocation9 + $0x4c8] ss:$16 sps:$4 sm:$0xff]  }
 0x433   : > { %8154 = vmatprep.subr.bf16.mxu0 %v10873_v47  ;;  %8482 = vmatprep.subr.bf16.mxu1 %v10876_v61  ;;  %v10928_v47 = vld [vmem:[#allocation9 + $0x428] ss:$16 sps:$4 sm:$0xff]   ;;  %v10933_v61 = vld [vmem:[#allocation9 + $0x444] ss:$16 sps:$4 sm:$0xff]  }
 0x436   : > { %8155 = vmatpush1.bf16.msra.mxu0 %v10871_v51  ;;  %8483 = vmatpush1.bf16.msra.mxu1 %v10874_v0  ;;  %v10936_v51 = vld [vmem:[#allocation9 + $0x44c] ss:$16 sps:$4 sm:$0xff]   ;;  %v10931_v0 = vld [vmem:[#allocation9 + $0x440] ss:$16 sps:$4 sm:$0xff]  }
 0x437   : > { %8156 = vmatprep.subr.bf16.mxu0 %v10879_v62  ;;  %8484 = vmatprep.subr.bf16.mxu1 %v10882_v63  ;;  %v10934_v62 = vld [vmem:[#allocation9 + $0x448] ss:$16 sps:$4 sm:$0xff]   ;;  %v10939_v63 = vld [vmem:[#allocation9 + $0x464] ss:$16 sps:$4 sm:$0xff]  }
 0x43a   : > { %8157 = vmatpush1.bf16.msra.mxu0 %v10877_v1  ;;  %8485 = vmatpush1.bf16.msra.mxu1 %v10880_v2  ;;  %v10942_v1 = vld [vmem:[#allocation9 + $0x46c] ss:$16 sps:$4 sm:$0xff]   ;;  %v4209_v2 = vld [vmem:[#allocation2 + $0x40] sm:$0xff] }
 0x43b   : > { %8158 = vmatprep.subr.bf16.mxu0 %v10885_v3  ;;  %8486 = vmatprep.subr.bf16.mxu1 %v10888_v4  ;;  %v4210_v3 = vld [vmem:[#allocation2 + $0x48] sm:$0xff]  ;;  %v4211_v4 = vld [vmem:[#allocation2 + $0x50] sm:$0xff] }
 0x43e   : > { %8159 = vmatpush1.bf16.msra.mxu0 %v10883_v5  ;;  %8487 = vmatpush1.bf16.msra.mxu1 %v10886_v6  ;;  %v10937_v5 = vld [vmem:[#allocation9 + $0x460] ss:$16 sps:$4 sm:$0xff]   ;;  %v10940_v6 = vld [vmem:[#allocation9 + $0x468] ss:$16 sps:$4 sm:$0xff]  }
 0x43f   : > { %8160 = vmatprep.subr.bf16.mxu0 %v10891_v38  ;;  %8488 = vmatprep.subr.bf16.mxu1 %v10894_v7  ;;  %v4212_v38 = vld [vmem:[#allocation2 + $0x58] sm:$0xff]  ;;  %v4265_v7 = vrot.slane %v4209_v2, 4 }
 0x442   : > { %8161 = vmatpush1.bf16.msra.mxu0 %v10889_v8  ;;  %8489 = vmatpush1.bf16.msra.mxu1 %v10892_v9  ;;  %v12925_v8 = vmul.f32 %v4209_v2, %v4209_v2  ;;  %v10945_v9 = vld [vmem:[#allocation9 + $0x484] ss:$16 sps:$4 sm:$0xff]  }
 0x443   : > { %8162 = vmatprep.subr.bf16.mxu0 %v10897_v37  ;;  %8490 = vmatprep.subr.bf16.mxu1 %v10900_v10  ;;  %v10948_v37 = vld [vmem:[#allocation9 + $0x48c] ss:$16 sps:$4 sm:$0xff]   ;;  %v12927_v10 = vld [vmem:[#allocation2 + $0x60] sm:$0xff] }
 0x446   : > { %8163 = vmatpush1.bf16.msra.mxu0 %v10895_v35  ;;  %8491 = vmatpush1.bf16.msra.mxu1 %v10898_v42  ;;  %v4271_v35 = vrot.slane %v4210_v3, 4  ;;  %v12929_v42 = vmul.f32 %v4210_v3, %v4210_v3 }
 0x447   : > { %8164 = vmatprep.subr.bf16.mxu0 %v10903_v39  ;;  %8492 = vmatprep.subr.bf16.mxu1 %v10906_v11  ;;  %v12931_v39 = vmul.f32 %v4211_v4, %v4211_v4  ;;  %v12933_v11 = vmul.f32 %v4212_v38, %v4212_v38 }
 0x448   : > { %v4272_v22 = vadd.f32 %v4271_v35, %v4210_v3  ;;  %v10957_v3 = vld [vmem:[#allocation9 + $0x4c4] ss:$16 sps:$4 sm:$0xff]  }
 0x44a   : > { %8165 = vmatpush1.bf16.msra.mxu0 %v10901_v59  ;;  %8493 = vmatpush1.bf16.msra.mxu1 %v10904_v20  ;;  %v4266_v59 = vadd.f32 %v4265_v7, %v4209_v2  ;;  %v4277_v20 = vrot.slane %v4211_v4, 4 }
 0x44b   : > { %8166 = vmatprep.subr.bf16.mxu0 %v10909_v19  ;;  %8494 = vmatprep.subr.bf16.mxu1 %v10912_v21  ;;  %v4283_v19 = vrot.slane %v4212_v38, 4  ;;  %v4289_v21 = vrot.slane %v12927_v10, 4 }
 0x44d   : > { %v4284_v32 = vadd.f32 %v4283_v19, %v4212_v38  ;;  %v4290_v33 = vadd.f32 %v4289_v21, %v12927_v10 }
 0x44e   : > { %8167 = vmatpush1.bf16.msra.mxu0 %v10907_v23  ;;  %8495 = vmatpush1.bf16.msra.mxu1 %v10910_v29  ;;  %v10943_v23 = vld [vmem:[#allocation9 + $0x480] ss:$16 sps:$4 sm:$0xff]   ;;  %v10946_v29 = vld [vmem:[#allocation9 + $0x488] ss:$16 sps:$4 sm:$0xff]  }
 0x44f   : > { %8168 = vmatprep.subr.bf16.mxu0 %v10915_v30  ;;  %8496 = vmatprep.subr.bf16.mxu1 %v10918_v31  ;;  %v4267_v30 = vrot.slane %v4266_v59, 2  ;;  %v4278_v31 = vadd.f32 %v4277_v20, %v4211_v4  ;;  %v10960_v4 = vld [vmem:[#allocation9 + $0x4cc] ss:$16 sps:$4 sm:$0xff]  }
 0x452   : > { %8169 = vmatpush1.bf16.msra.mxu0 %v10913_v34  ;;  %8497 = vmatpush1.bf16.msra.mxu1 %v10916_v49  ;;  %v10951_v34 = vld [vmem:[#allocation9 + $0x4a4] ss:$16 sps:$4 sm:$0xff]   ;;  %v10954_v49 = vld [vmem:[#allocation9 + $0x4ac] ss:$16 sps:$4 sm:$0xff]  }
 0x453   : > { %8179 = vmatprep.subr.bf16.mxu0 %v10921_v48  ;;  %8507 = vmatprep.subr.bf16.mxu1 %v10924_v36  ;;  %v4273_v48 = vrot.slane %v4272_v22, 2  ;;  %v4296_v36 = vadd.f32 %v4295_v41, %v12935_v43  ;;  %v10955_v41 = vld [vmem:[#allocation9 + $0x4c0] ss:$16 sps:$4 sm:$0xff]  }
 0x455   : > { %8171 = vmatmul.mubr.bf16.vlgmr.msra.gmra.mrb[0].mxu0 %v5011_v40  ;;  %8499 = vmatmul.mubr.bf16.vlgmr.msra.gmra.mrb[0].mxu1 %v5011_v40  ;;  %v4308_v40 = vadd.f32 %v4307_v28, %v12939_v17 }
 0x456   : > { %8180 = vmatpush1.bf16.msra.mxu0 %v10919_v54  ;;  %8508 = vmatpush1.bf16.msra.mxu1 %v10922_v55  ;;  %v4268_v54 = vadd.f32 %v4267_v30, %v4266_v59  ;;  %v4279_v55 = vrot.slane %v4278_v31, 2 }
 0x457   : > { %8181 = vmatprep.subr.bf16.mxu0 %v10927_v45  ;;  %8509 = vmatprep.subr.bf16.mxu1 %v10930_v57  ;;  %v4285_v45 = vrot.slane %v4284_v32, 2  ;;  %v4291_v57 = vrot.slane %v4290_v33, 2 }
 0x458   : > { %8211 = vmatprep.mubr.bf16.mxu0 %v5014_v46  ;;  %8539 = vmatprep.mubr.bf16.mxu1 %v5014_v46  ;;  %v4274_v46 = vadd.f32 %v4273_v48, %v4272_v22 }
 0x459   : > { %v4292_v2 = vadd.f32 %v4291_v57, %v4290_v33 }
 0x45a   : > { %8182 = vmatpush1.bf16.msra.mxu0 %v10925_v58  ;;  %8510 = vmatpush1.bf16.msra.mxu1 %v10928_v47  ;;  %v4297_v58 = vrot.slane %v4296_v36, 2  ;;  %v4303_v47 = vrot.slane %v4302_v53, 2 }
 0x45b   : > { %8183 = vmatprep.subr.bf16.mxu0 %v10933_v61  ;;  %8511 = vmatprep.subr.bf16.mxu1 %v10936_v51  ;;  %v4309_v61 = vrot.slane %v4308_v40, 2  ;;  %v10949_v51 = vld [vmem:[#allocation9 + $0x4a0] ss:$16 sps:$4 sm:$0xff]   ;;  %v4293_v59 = vrot.slane %v4292_v2, 1 }
 0x45c   : > { %v4304_v38 = vadd.f32 %v4303_v47, %v4302_v53  ;;  %v10964_v47 = vld [vmem:[#allocation9 + $0x4e8] ss:$16 sps:$4 sm:$0xff]  }
 0x45d   : > { %v4310_v7 = vadd.f32 %v4309_v61, %v4308_v40  ;;  %v4344_v61 = vmul.f32 %v12937_v44, %v12937_v44 }
 0x45e   : > { %8184 = vmatpush1.bf16.msra.mxu0 %v10931_v0  ;;  %8512 = vmatpush1.bf16.msra.mxu1 %v10934_v62  ;;  %v10952_v0 = vld [vmem:[#allocation9 + $0x4a8] ss:$16 sps:$4 sm:$0xff]   ;;  %v4269_v62 = vrot.slane %v4268_v54, 1  ;;  %v4305_v21 = vrot.slane %v4304_v38, 1 }
 0x45f   : > { %8185 = vmatprep.subr.bf16.mxu0 %v10939_v63  ;;  %8513 = vmatprep.subr.bf16.mxu1 %v10942_v1  ;;  %v4280_v63 = vadd.f32 %v4279_v55, %v4278_v31  ;;  %v4286_v1 = vadd.f32 %v4285_v45, %v4284_v32  ;;  %v4311_v22 = vrot.slane %v4310_v7, 1  ;;  %v10963_v31 = vld [vmem:[#allocation9 + $0x4e4] ss:$16 sps:$4 sm:$0xff]   ;;  %v10966_v32 = vld [vmem:[#allocation9 + $0x4ec] ss:$16 sps:$4 sm:$0xff]  }
 0x461   : > { %v4287_v35 = vrot.slane %v4286_v1, 1 }
 0x462   : > { %8186 = vmatpush1.bf16.msra.mxu0 %v10937_v5  ;;  %8514 = vmatpush1.bf16.msra.mxu1 %v10940_v6  ;;  %v4275_v5 = vrot.slane %v4274_v46, 1  ;;  %v4298_v6 = vadd.f32 %v4297_v58, %v4296_v36  ;;  %v10961_v58 = vld [vmem:[#allocation9 + $0x4e0] ss:$16 sps:$4 sm:$0xff]  }
 0x463   : > { %8187 = vmatprep.subr.bf16.mxu0 %v10945_v9  ;;  %8515 = vmatprep.subr.bf16.mxu1 %v10948_v37  ;;  %v4270_v9 = vadd.f32 %v4269_v62, %v4268_v54  ;;  %v4281_v37 = vrot.slane %v4280_v63, 1  ;;  %v4342_v54 = vmul.f32 %v12927_v10, %v12927_v10  ;;  %v4394_v10 = vrot.slane %v12925_v8, 4  ;;  %v10969_v62 = vld [vmem:[#allocation9 + $0x504] ss:$16 sps:$4 sm:$0xff]  }
 0x464   : > { %v4276_v20 = vadd.f32 %v4275_v5, %v4274_v46  ;;  %v4299_v19 = vrot.slane %v4298_v6, 1  ;;  %v4343_v46 = vmul.f32 %v12935_v43, %v12935_v43  ;;  %v4406_v43 = vrot.slane %v12931_v39, 4 }
 0x465   : > { %v4282_v28 = vadd.f32 %v4281_v37, %v4280_v63  ;;  %v12949_v30 = vmul.f32 0.125, %v4270_v9  ;;  %v10972_v63 = vld [vmem:[#allocation9 + $0x50c] ss:$16 sps:$4 sm:$0xff]   ;;  %v10967_v37 = vld [vmem:[#allocation9 + $0x500] ss:$16 sps:$4 sm:$0xff]  }
 0x466   : > { %8188 = vmatpush1.bf16.msra.mxu0 %v10943_v23  ;;  %8516 = vmatpush1.bf16.msra.mxu1 %v10946_v29  ;;  %v4288_v23 = vadd.f32 %v4287_v35, %v4286_v1  ;;  %v4294_v29 = vadd.f32 %v4293_v59, %v4292_v2  ;;  %v4300_v33 = vadd.f32 %v4299_v19, %v4298_v6  ;;  %v12951_v48 = vmul.f32 0.125, %v4276_v20  ;;  %v10970_v35 = vld [vmem:[#allocation9 + $0x508] ss:$16 sps:$4 sm:$0xff]  }
 0x467   : > { %8189 = vmatprep.subr.bf16.mxu0 %v10951_v34  ;;  %8517 = vmatprep.subr.bf16.mxu1 %v10954_v49  ;;  %v4306_v34 = vadd.f32 %v4305_v21, %v4304_v38  ;;  %v4312_v49 = vadd.f32 %v4311_v22, %v4310_v7  ;;  %v12953_v36 = vmul.f32 0.125, %v4282_v28  ;;  %v4412_v1 = vrot.slane %v12933_v11, 4 }
 0x468   : > { %v12955_v53 = vmul.f32 0.125, %v4288_v23  ;;  %v12957_v40 = vmul.f32 0.125, %v4294_v29  ;;  %v12961_v55 = vmul.f32 0.125, %v4300_v33  ;;  %v12979_v2 = vmul.f32 %v12949_v30, %v12949_v30 }
 0x469   : > { %v12963_v45 = vmul.f32 0.125, %v4306_v34  ;;  %v12965_v57 = vmul.f32 0.125, %v4312_v49  ;;  %v12983_v44 = vmul.f32 %v12951_v48, %v12951_v48  ;;  %v4424_v5 = vrot.slane %v4343_v46, 4  ;;  %v10973_v49 = vld [vmem:[#allocation9 + $0x520] ss:$16 sps:$4 sm:$0xff]  }
 0x46a   : > { %8190 = vmatpush1.bf16.msra.mxu0 %v10949_v51  ;;  %8518 = vmatpush1.bf16.msra.mxu1 %v10952_v0  ;;  %v4345_v51 = vmul.f32 %v12939_v17, %v12939_v17  ;;  %v4400_v0 = vrot.slane %v12929_v42, 4  ;;  %v4395_v17 = vadd.f32 %v4394_v10, %v12925_v8  ;;  %v4407_v6 = vadd.f32 %v4406_v43, %v12931_v39  ;;  %v10975_v8 = vld [vmem:[#allocation9 + $0x524] ss:$16 sps:$4 sm:$0xff]  }
 0x46b   : > { %8191 = vmatprep.subr.bf16.mxu0 %v10957_v3  ;;  %8519 = vmatprep.subr.bf16.mxu1 %v10960_v4  ;;  %v4418_v4 = vrot.slane %v4342_v54, 4  ;;  %v4413_v38 = vadd.f32 %v4412_v1, %v12933_v11  ;;  %v4430_v7 = vrot.slane %v4344_v61, 4  ;;  %v4425_v21 = vadd.f32 %v4424_v5, %v4343_v46 }
 0x46c   : > { %v4401_v3 = vadd.f32 %v4400_v0, %v12929_v42  ;;  %v4436_v9 = vrot.slane %v4345_v51, 4  ;;  %v4396_v59 = vrot.slane %v4395_v17, 2  ;;  %v10978_v42 = vld [vmem:[#allocation9 + $0x52c] ss:$16 sps:$4 sm:$0xff]   ;;  %v4408_v22 = vrot.slane %v4407_v6, 2 }
 0x46d   : > { %v4419_v19 = vadd.f32 %v4418_v4, %v4342_v54  ;;  %v4426_v29 = vrot.slane %v4425_v21, 2  ;;  %v10976_v54 = vld [vmem:[#allocation9 + $0x528] ss:$16 sps:$4 sm:$0xff]  }
 0x46e   : > { %8192 = vmatpush1.bf16.msra.mxu0 %v10955_v41  ;;  %8520 = vmatpush1.bf16.msra.mxu1 %v10958_v27  ;;  %v4402_v20 = vrot.slane %v4401_v3, 2  ;;  %v4414_v41 = vrot.slane %v4413_v38, 2  ;;  %v4431_v27 = vadd.f32 %v4430_v7, %v4344_v61  ;;  %v4437_v39 = vadd.f32 %v4436_v9, %v4345_v51  ;;  %v10981_v61 = vld [vmem:[#allocation9 + $0x544] ss:$16 sps:$4 sm:$0xff]   ;;  %v10984_v51 = vld [vmem:[#allocation9 + $0x54c] ss:$16 sps:$4 sm:$0xff]  }
 0x46f   : > { %8193 = vmatprep.subr.bf16.mxu0 %v10963_v31  ;;  %8521 = vmatprep.subr.bf16.mxu1 %v10966_v32  ;;  %v4397_v28 = vadd.f32 %v4396_v59, %v4395_v17  ;;  %v4420_v23 = vrot.slane %v4419_v19, 2  ;;  %v4409_v31 = vadd.f32 %v4408_v22, %v4407_v6  ;;  %v4427_v10 = vadd.f32 %v4426_v29, %v4425_v21  ;;  %v10979_v9 = vld [vmem:[#allocation9 + $0x540] ss:$16 sps:$4 sm:$0xff]   ;;  %v10987_v21 = vld [vmem:[#allocation9 + $0x564] ss:$16 sps:$4 sm:$0xff]  }
 0x470   : > { %v4403_v11 = vadd.f32 %v4402_v20, %v4401_v3  ;;  %v4415_v32 = vadd.f32 %v4414_v41, %v4413_v38  ;;  %v4432_v33 = vrot.slane %v4431_v27, 2  ;;  %v4438_v34 = vrot.slane %v4437_v39, 2 }
 0x471   : > { %v4398_v46 = vrot.slane %v4397_v28, 1  ;;  %v4410_v0 = vrot.slane %v4409_v31, 1  ;;  %v4428_v4 = vrot.slane %v4427_v10, 1 }
 0x472   : > { %8194 = vmatpush1.bf16.msra.mxu0 %v10961_v58  ;;  %8522 = vmatpush1.bf16.msra.mxu1 %v10964_v47  ;;  %v4404_v58 = vrot.slane %v4403_v11, 1  ;;  %v4421_v47 = vadd.f32 %v4420_v23, %v4419_v19  ;;  %v4439_v43 = vadd.f32 %v4438_v34, %v4437_v39  ;;  %v4469_v23 = vmul.f32 %v12955_v53, %v12955_v53  ;;  %v10985_v34 = vld [vmem:[#allocation9 + $0x560] ss:$16 sps:$4 sm:$0xff]  }
 0x473   : > { %8195 = vmatprep.subr.bf16.mxu0 %v10969_v62  ;;  %8523 = vmatprep.subr.bf16.mxu1 %v10972_v63  ;;  %v4416_v62 = vrot.slane %v4415_v32, 1  ;;  %v4433_v63 = vadd.f32 %v4432_v33, %v4431_v27  ;;  %v4399_v1 = vadd.f32 %v4398_v46, %v4397_v28  ;;  %v4411_v5 = vadd.f32 %v4410_v0, %v4409_v31 }
 0x474   : > { %v4405_v17 = vadd.f32 %v4404_v58, %v4403_v11  ;;  %v4422_v3 = vrot.slane %v4421_v47, 1  ;;  %v4440_v7 = vrot.slane %v4439_v43, 1  ;;  %v4429_v59 = vadd.f32 %v4428_v4, %v4427_v10  ;;  %v10996_v10 = vld [vmem:[#allocation9 + $0x58c] ss:$16 sps:$4 sm:$0xff]  }
 0x475   : > { %v4417_v6 = vadd.f32 %v4416_v62, %v4415_v32  ;;  %v4434_v38 = vrot.slane %v4433_v63, 1  ;;  %v4450_v20 = vmul.f32 0.125, %v4399_v1  ;;  %v4452_v41 = vmul.f32 0.125, %v4411_v5 }
 0x476   : > { %8196 = vmatpush1.bf16.msra.mxu0 %v10967_v37  ;;  %8524 = vmatpush1.bf16.msra.mxu1 %v10970_v35  ;;  %v10982_v37 = vld [vmem:[#allocation9 + $0x548] ss:$16 sps:$4 sm:$0xff]   ;;  %v4423_v35 = vadd.f32 %v4422_v3, %v4421_v47  ;;  %v4451_v19 = vmul.f32 0.125, %v4405_v17  ;;  %v4441_v22 = vadd.f32 %v4440_v7, %v4439_v43  ;;  %v4455_v28 = vmul.f32 0.125, %v4429_v59  ;;  %v10993_v47 = vld [vmem:[#allocation9 + $0x584] ss:$16 sps:$4 sm:$0xff]  }
 0x477   : > { %8197 = vmatprep.subr.bf16.mxu0 %v10975_v8  ;;  %8525 = vmatprep.subr.bf16.mxu1 %v10978_v42  ;;  %v10990_v8 = vld [vmem:[#allocation9 + $0x56c] ss:$16 sps:$4 sm:$0xff]   ;;  %v4435_v42 = vadd.f32 %v4434_v38, %v4433_v63  ;;  %v4453_v27 = vmul.f32 0.125, %v4417_v6  ;;  %v4468_v11 = vmul.f32 %v12953_v36, %v12953_v36  ;;  %v4470_v32 = vmul.f32 %v12957_v40, %v12957_v40  ;;  %v10991_v6 = vld [vmem:[#allocation9 + $0x580] ss:$16 sps:$4 sm:$0xff]  }
 0x478   : > { %v4454_v39 = vmul.f32 0.125, %v4423_v35  ;;  %v4457_v31 = vmul.f32 0.125, %v4441_v22  ;;  %v4471_v33 = vmul.f32 %v12961_v55, %v12961_v55  ;;  %v4473_v46 = vmul.f32 %v12965_v57, %v12965_v57  ;;  %v10999_v7 = vld [vmem:[#allocation9 + $0x5a4] ss:$16 sps:$4 sm:$0xff]  }
 0x479   : > { %v4456_v29 = vmul.f32 0.125, %v4435_v42  ;;  %v4482_v58 = vsub.f32 %v4450_v20, %v12979_v2  ;;  %v4485_v0 = vsub.f32 %v4453_v27, %v4469_v23  ;;  %v10994_v2 = vld [vmem:[#allocation9 + $0x588] ss:$16 sps:$4 sm:$0xff]  }
 0x47a   : > { %8198 = vmatpush1.bf16.msra.mxu0 %v10973_v49  ;;  %8526 = vmatpush1.bf16.msra.mxu1 %v10976_v54  ;;  %v10988_v49 = vld [vmem:[#allocation9 + $0x568] ss:$16 sps:$4 sm:$0xff]   ;;  %v4472_v54 = vmul.f32 %v12963_v45, %v12963_v45  ;;  %v4486_v62 = vsub.f32 %v4454_v39, %v4470_v32  ;;  %v4487_v63 = vsub.f32 %v4455_v28, %v4471_v33  ;;  %v11005_v28 = vld [vmem:[#allocation9 + $0x5c4] ss:$16 sps:$4 sm:$0xff]  }
 0x47b   : > { %8199 = vmatprep.subr.bf16.mxu0 %v10981_v61  ;;  %8527 = vmatprep.subr.bf16.mxu1 %v10984_v51  ;;  %v4483_v61 = vsub.f32 %v4451_v19, %v12983_v44  ;;  %v4484_v51 = vsub.f32 %v4452_v41, %v4468_v11  ;;  %v4489_v1 = vsub.f32 %v4457_v31, %v4473_v46  ;;  %v4498_v17 = vmax.f32 %v4482_v58, 0.0  ;;  %v11569_v19 = vld [vmem:[#allocation2 + $0x20] sm:$0xff]  ;;  %v11000_v27 = vld [vmem:[#allocation9 + $0x5a8] ss:$16 sps:$4 sm:$0xff]   ;;  %v11008_v11 = vld [vmem:[#allocation9 + $0x5cc] ss:$16 sps:$4 sm:$0xff]  }
 0x47c   : > { %v4488_v43 = vsub.f32 %v4456_v29, %v4472_v54  ;;  %v4501_v5 = vmax.f32 %v4485_v0, 0.0  ;;  %v4502_v38 = vmax.f32 %v4486_v62, 0.0  ;;  %v4503_v44 = vmax.f32 %v4487_v63, 0.0  ;;  %v10997_v41 = vld [vmem:[#allocation9 + $0x5a0] ss:$16 sps:$4 sm:$0xff]   ;;  %v11570_v29 = vld [vmem:[#allocation2 + $0x38] sm:$0xff] }
 0x47d   : > { %v4499_v3 = vmax.f32 %v4483_v61, 0.0  ;;  %v4500_v4 = vmax.f32 %v4484_v51, 0.0  ;;  %v4517_v35 = vadd.f32 1e-05, %v4498_v17  ;;  %v4505_v42 = vmax.f32 %v4489_v1, 0.0 }
 0x47e   : > { %8200 = vmatpush1.bf16.msra.mxu0 %v10979_v9  ;;  %8528 = vmatpush1.bf16.msra.mxu1 %v10982_v37  ;;  %v11002_v9 = vld [vmem:[#allocation9 + $0x5ac] ss:$16 sps:$4 sm:$0xff]   ;;  %v4504_v37 = vmax.f32 %v4488_v43, 0.0  ;;  %v4520_v22 = vadd.f32 1e-05, %v4501_v5  ;;  %v4928_v31 = vrot.slane %v12908_v56, %v12869_v18 }
 0x47f   : > { %8201 = vmatprep.subr.bf16.mxu0 %v10987_v21  ;;  %8529 = vmatprep.subr.bf16.mxu1 %v10990_v8  ;;  %v4518_v59 = vadd.f32 1e-05, %v4499_v3  ;;  %v4519_v20 = vadd.f32 1e-05, %v4500_v4  ;;  %v4883_v21 = vmul.f32 %v11569_v19, %v12878_v24  ;;  %v4916_v8 = vrot.slane %v12908_v56, %v12863_v14  ;;  %v11006_v54 = vld [vmem:[#allocation9 + $0x5c8] ss:$16 sps:$4 sm:$0xff]  }
 0x480   : > { %v4521_v39 = vadd.f32 1e-05, %v4502_v38  ;;  %11543 = vrsqrt.f32 %v4517_v35  ;;  %v4522_v23 = vadd.f32 1e-05, %v4503_v44  ;;  %v4886_v24 = vmul.f32 %v11570_v29, %v12887_v26  ;;  %v11011_v46 = vld [vmem:[#allocation9 + $0x5e4] ss:$16 sps:$4 sm:$0xff]  }
 0x481   : > { %11545 = vrsqrt.f32 %v4518_v59  ;;  %v4523_v32 = vadd.f32 1e-05, %v4504_v37  ;;  %v4981_v33 = vadd.f32 %v4916_v8, %v4883_v21  ;;  %v11014_v58 = vld [vmem:[#allocation9 + $0x5ec] ss:$16 sps:$4 sm:$0xff]   ;;  %v11012_v61 = vld [vmem:[#allocation9 + $0x5e8] ss:$16 sps:$4 sm:$0xff]  }
 0x482   : > { %8202 = vmatpush1.bf16.msra.mxu0 %v10985_v34  ;;  %8530 = vmatpush1.bf16.msra.mxu1 %v10988_v49  ;;  %11547 = vrsqrt.f32 %v4519_v20  ;;  %v4524_v34 = vadd.f32 1e-05, %v4505_v42  ;;  %v11003_v49 = vld [vmem:[#allocation9 + $0x5c0] ss:$16 sps:$4 sm:$0xff]   ;;  %v11017_v51 = vld [vmem:[#allocation9 + $0x604] ss:$16 sps:$4 sm:$0xff]  }
 0x483   : > { %8203 = vmatprep.subr.bf16.mxu0 %v10993_v47  ;;  %8531 = vmatprep.subr.bf16.mxu1 %v10996_v10  ;;  %11549 = vrsqrt.f32 %v4520_v22  ;;  %v4984_v47 = vadd.f32 %v4928_v31, %v4886_v24  ;;  %v4997_v26 = vmax.f32 %v4981_v33, 0.0  ;;  %v11009_v10 = vld [vmem:[#allocation9 + $0x5e0] ss:$16 sps:$4 sm:$0xff]   ;;  %v11020_v0 = vld [vmem:[#allocation9 + $0x60c] ss:$16 sps:$4 sm:$0xff]  }
 0x484   : > { %11551 = vrsqrt.f32 %v4521_v39  ;;  %v11015_v3 = vld [vmem:[#allocation9 + $0x600] ss:$16 sps:$4 sm:$0xff]   ;;  %v11018_v4 = vld [vmem:[#allocation9 + $0x608] ss:$16 sps:$4 sm:$0xff]   ;;  %v11026_v38 = vld [vmem:[#allocation9 + $0x62c] ss:$16 sps:$4 sm:$0xff]  }
 0x485   : > { %11553 = vrsqrt.f32 %v4522_v23  ;;  %v5000_v63 = vmax.f32 %v4984_v47, 0.0  ;;  %v5013_v1 = vpack.c.bf16 %v4997_v26, %v4997_v26  ;;  %v11021_v20 = vld [vmem:[#allocation9 + $0x620] ss:$16 sps:$4 sm:$0xff]   ;;  %v11024_v19 = vld [vmem:[#allocation9 + $0x628] ss:$16 sps:$4 sm:$0xff]  }
 0x486   : > { %8204 = vmatpush1.bf16.msra.mxu0 %v10991_v6  ;;  %8532 = vmatpush1.bf16.msra.mxu1 %v10994_v2  ;;  %11555 = vrsqrt.f32 %v4523_v32  ;;  %v11023_v2 = vld [vmem:[#allocation9 + $0x624] ss:$16 sps:$4 sm:$0xff]   ;;  %v11030_v23 = vld [vmem:[#allocation9 + $0x648] ss:$16 sps:$4 sm:$0xff]   ;;  %v11038_v31 = vld [vmem:[#allocation9 + $0x66c] ss:$16 sps:$4 sm:$0xff]  }
 0x487   : > { %8205 = vmatprep.subr.bf16.mxu0 %v10999_v7  ;;  %8533 = vmatprep.subr.bf16.mxu1 %v11002_v9  ;;  %11557 = vrsqrt.f32 %v4524_v34  ;;  %v5016_v9 = vpack.c.bf16 %v5000_v63, %v5000_v63  ;;  %v11029_v22 = vld [vmem:[#allocation9 + $0x644] ss:$16 sps:$4 sm:$0xff]   ;;  %v11033_v32 = vld [vmem:[#allocation9 + $0x660] ss:$16 sps:$4 sm:$0xff]  }
 0x488   : > { %v11035_v24 = vld [vmem:[#allocation9 + $0x664] ss:$16 sps:$4 sm:$0xff]  }
 0x489   : > { %v4508_v47 = vld [vmem:[#allocation8 + $0x10] ss:$2 sm:$0xff] }
 0x48a   : > { %8206 = vmatpush1.bf16.msra.mxu0 %v10997_v41  ;;  %8534 = vmatpush1.bf16.msra.mxu1 %v11000_v27  ;;  %v11544_v62 = vpop.eup %11543  ;;  %v11032_v41 = vld [vmem:[#allocation9 + $0x64c] ss:$16 sps:$4 sm:$0xff]  }
 0x48b   : > { %8207 = vmatprep.subr.bf16.mxu0 %v11005_v28  ;;  %8535 = vmatprep.subr.bf16.mxu1 %v11008_v11  ;;  %v11546_v43 = vpop.eup %11545  ;;  %v11027_v11 = vld [vmem:[#allocation9 + $0x640] ss:$16 sps:$4 sm:$0xff]  }
 0x48c   : > { %v11548_v17 = vpop.eup %11547  ;;  %v4606_v5 = vcombine.low %v11544_v62, %v11546_v43  ;;  %v11050_v62 = vld [vmem:[#allocation9 + $0x6ac] ss:$16 sps:$4 sm:$0xff]  }
 0x48d   : > { %v11550_v6 = vpop.eup %11549 }
 0x48e   : > { %8208 = vmatpush1.bf16.msra.mxu0 %v11003_v49  ;;  %8536 = vmatpush1.bf16.msra.mxu1 %v11006_v54  ;;  %v11552_v7 = vpop.eup %11551  ;;  %v4607_v44 = vcombine.low %v11548_v17, %v11550_v6  ;;  %v4616_v37 = vrot.slane %v4606_v5, %v12847_v52  ;;  %v11036_v49 = vld [vmem:[#allocation9 + $0x668] ss:$16 sps:$4 sm:$0xff]   ;;  %v11041_v54 = vld [vmem:[#allocation9 + $0x684] ss:$16 sps:$4 sm:$0xff]  }
 0x48f   : > { %8209 = vmatprep.subr.bf16.mxu0 %v11011_v46  ;;  %8537 = vmatprep.subr.bf16.mxu1 %v11014_v58  ;;  %v11554_v35 = vpop.eup %11553  ;;  %v11044_v58 = vld [vmem:[#allocation9 + $0x68c] ss:$16 sps:$4 sm:$0xff]   ;;  %v11048_v17 = vld [vmem:[#allocation9 + $0x6a8] ss:$16 sps:$4 sm:$0xff]   ;;  %v11053_v6 = vld [vmem:[#allocation9 + $0x6c4] ss:$16 sps:$4 sm:$0xff]  }
 0x490   : > { %v11556_v59 = vpop.eup %11555  ;;  %v4608_v21 = vcombine.low %v11552_v7, %v11554_v35  ;;  %v4623_v8 = vrot.slane %v4607_v44, %v12847_v52  ;;  %v11051_v35 = vld [vmem:[#allocation9 + $0x6c0] ss:$16 sps:$4 sm:$0xff]  }
 0x491   : > { %v11558_v42 = vpop.eup %11557 }
 0x492   : > { %8210 = vmatpush1.bf16.msra.mxu0 %v11009_v10  ;;  %8538 = vmatpush1.bf16.msra.mxu1 %v11012_v61  ;;  %v4609_v27 = vcombine.low %v11556_v59, %v11558_v42  ;;  %v4630_v39 = vrot.slane %v4608_v21, %v12847_v52  ;;  %v4638_v28 = vcombine.low %v4616_v37, %v4623_v8  ;;  %v11039_v10 = vld [vmem:[#allocation9 + $0x680] ss:$16 sps:$4 sm:$0xff]   ;;  %v11042_v61 = vld [vmem:[#allocation9 + $0x688] ss:$16 sps:$4 sm:$0xff]   ;;  %v11059_v8 = vld [vmem:[#allocation9 + $0x6e4] ss:$16 sps:$4 sm:$0xff]  }
 0x493   : > { %8220 = vmatprep.subr.bf16.mxu0 %v11017_v51  ;;  %8548 = vmatprep.subr.bf16.mxu1 %v11020_v0  ;;  %v11047_v0 = vld [vmem:[#allocation9 + $0x6a4] ss:$16 sps:$4 sm:$0xff]   ;;  %v11054_v59 = vld [vmem:[#allocation9 + $0x6c8] ss:$16 sps:$4 sm:$0xff]  }
 0x494   : > { %v4637_v29 = vrot.slane %v4609_v27, %v12847_v52  ;;  %v4646_v34 = vrot.slane %v4638_v28, %v12847_v52  ;;  %v11068_v27 = vld [vmem:[#allocation9 + $0x70c] ss:$16 sps:$4 sm:$0xff]  }
 0x495   : > { %8212 = vmatmul.mubr.bf16.vlgmr.msra.gmra.mrb[0].mxu0 %v5013_v1  ;;  %8540 = vmatmul.mubr.bf16.vlgmr.msra.gmra.mrb[0].mxu1 %v5013_v1  ;;  %v11045_v1 = vld [vmem:[#allocation9 + $0x6a0] ss:$16 sps:$4 sm:$0xff]  }
 0x496   : > { %8221 = vmatpush1.bf16.msra.mxu0 %v11015_v3  ;;  %8549 = vmatpush1.bf16.msra.mxu1 %v11018_v4  ;;  %v4639_v33 = vcombine.low %v4630_v39, %v4637_v29  ;;  %v11074_v29 = vld [vmem:[#allocation9 + $0x72c] ss:$16 sps:$4 sm:$0xff]  }
 0x497   : > { %8222 = vmatprep.subr.bf16.mxu0 %v11023_v2  ;;  %8550 = vmatprep.subr.bf16.mxu1 %v11026_v38  ;;  %v11056_v2 = vld [vmem:[#allocation9 + $0x6cc] ss:$16 sps:$4 sm:$0xff]  }
 0x498   : > { %8252 = vmatprep.mubr.bf16.mxu0 %v5016_v9  ;;  %8580 = vmatprep.mubr.bf16.mxu1 %v5016_v9  ;;  %v4653_v46 = vrot.slane %v4639_v33, %v12847_v52  ;;  %v11069_v33 = vld [vmem:[#allocation9 + $0x720] ss:$16 sps:$4 sm:$0xff]  }
 0x49a   : > { %8223 = vmatpush1.bf16.msra.mxu0 %v11021_v20  ;;  %8551 = vmatpush1.bf16.msra.mxu1 %v11024_v19  ;;  %v4654_v26 = vcombine.low %v4646_v34, %v4653_v46  ;;  %v11072_v34 = vld [vmem:[#allocation9 + $0x728] ss:$16 sps:$4 sm:$0xff]  }
 0x49b   : > { %8224 = vmatprep.subr.bf16.mxu0 %v11029_v22  ;;  %8552 = vmatprep.subr.bf16.mxu1 %v11032_v41 }
 0x49c   : > { %v4658_v51 = vmul.f32 %v4654_v26, %v4508_v47  ;;  %v11075_v47 = vld [vmem:[#allocation9 + $0x740] ss:$16 sps:$4 sm:$0xff]   ;;  %v11078_v26 = vld [vmem:[#allocation9 + $0x748] ss:$16 sps:$4 sm:$0xff]  }
 0x49e   : > { %8225 = vmatpush1.bf16.msra.mxu0 %v11027_v11  ;;  %8553 = vmatpush1.bf16.msra.mxu1 %v11030_v23  ;;  %v13016_v63 = vrot.slane %v4658_v51, %v12855_v50  ;;  %v13019_v43 = vrot.slane %v4658_v51, %v12857_v12  ;;  %v13022_v3 = vrot.slane %v4658_v51, %v12859_v60  ;;  %v11066_v23 = vld [vmem:[#allocation9 + $0x708] ss:$16 sps:$4 sm:$0xff]  }
 0x49f   : > { %8226 = vmatprep.subr.bf16.mxu0 %v11035_v24  ;;  %8554 = vmatprep.subr.bf16.mxu1 %v11038_v31  ;;  %v13025_v4 = vrot.slane %v4658_v51, %v12861_v13  ;;  %v13028_v5 = vrot.slane %v4658_v51, %v12863_v14  ;;  %v13031_v38 = vrot.slane %v4658_v51, %v12865_v15 }
 0x4a0   : > { %v13034_v7 = vrot.slane %v4658_v51, %v12867_v16  ;;  %v13037_v9 = vrot.slane %v4658_v51, %v12869_v18  ;;  %v4753_v44 = vmul.f32 %v13016_v63, %v12949_v30  ;;  %v4754_v37 = vmul.f32 %v13019_v43, %v12951_v48  ;;  %v11062_v30 = vld [vmem:[#allocation9 + $0x6ec] ss:$16 sps:$4 sm:$0xff]  }
 0x4a1   : > { %v4755_v20 = vmul.f32 %v13022_v3, %v12953_v36  ;;  %v4756_v19 = vmul.f32 %v13025_v4, %v12955_v53  ;;  %v4757_v21 = vmul.f32 %v13028_v5, %v12957_v40  ;;  %v4758_v48 = vmul.f32 %v13031_v38, %v12961_v55  ;;  %v11057_v36 = vld [vmem:[#allocation9 + $0x6e0] ss:$16 sps:$4 sm:$0xff]   ;;  %v11060_v53 = vld [vmem:[#allocation9 + $0x6e8] ss:$16 sps:$4 sm:$0xff]   ;;  %v11065_v40 = vld [vmem:[#allocation9 + $0x704] ss:$16 sps:$4 sm:$0xff]  }
 0x4a2   : > { %8227 = vmatpush1.bf16.msra.mxu0 %v11033_v32  ;;  %8555 = vmatpush1.bf16.msra.mxu1 %v11036_v49  ;;  %v4759_v42 = vmul.f32 %v13034_v7, %v12963_v45  ;;  %v4760_v22 = vmul.f32 %v13037_v9, %v12965_v57  ;;  %v4826_v41 = vcombine.low %v4753_v44, %v4754_v37  ;;  %v11063_v55 = vld [vmem:[#allocation9 + $0x700] ss:$16 sps:$4 sm:$0xff]   ;;  %v11071_v57 = vld [vmem:[#allocation9 + $0x724] ss:$16 sps:$4 sm:$0xff]  }
 0x4a3   : > { %8228 = vmatprep.subr.bf16.mxu0 %v11041_v54  ;;  %8556 = vmatprep.subr.bf16.mxu1 %v11044_v58  ;;  %v4827_v39 = vcombine.low %v4755_v20, %v4756_v19  ;;  %v4828_v28 = vcombine.low %v4757_v21, %v4758_v48  ;;  %v11077_v49 = vld [vmem:[#allocation9 + $0x744] ss:$16 sps:$4 sm:$0xff]   ;;  %v11080_v54 = vld [vmem:[#allocation9 + $0x74c] ss:$16 sps:$4 sm:$0xff]   ;;  %v11087_v37 = vld [vmem:[#allocation9 + $0x780] ss:$16 sps:$4 sm:$0xff]  }
 0x4a4   : > { %v4829_v11 = vcombine.low %v4759_v42, %v4760_v22  ;;  %v4836_v45 = vrot.slane %v4826_v41, %v12847_v52  ;;  %v11098_v20 = vld [vmem:[#allocation9 + $0x7ac] ss:$16 sps:$4 sm:$0xff]   ;;  %v11571_v21 = vld [vmem:[#allocation2 + $0x30] sm:$0xff]  ;;  %v11096_v42 = vld [vmem:[#allocation9 + $0x7a8] ss:$16 sps:$4 sm:$0xff]  }
 0x4a5   : > { %v4843_v24 = vrot.slane %v4827_v39, %v12847_v52  ;;  %v4850_v31 = vrot.slane %v4828_v28, %v12847_v52  ;;  %v11093_v48 = vld [vmem:[#allocation9 + $0x7a0] ss:$16 sps:$4 sm:$0xff]   ;;  %v11101_v22 = vld [vmem:[#allocation9 + $0x7c4] ss:$16 sps:$4 sm:$0xff]   ;;  %v11102_v39 = vld [vmem:[#allocation9 + $0x7c8] ss:$16 sps:$4 sm:$0xff]  }
 0x4a6   : > { %8229 = vmatpush1.bf16.msra.mxu0 %v11039_v10  ;;  %8557 = vmatpush1.bf16.msra.mxu1 %v11042_v61  ;;  %v4857_v32 = vrot.slane %v4829_v11, %v12847_v52  ;;  %v11083_v10 = vld [vmem:[#allocation9 + $0x764] ss:$16 sps:$4 sm:$0xff]   ;;  %v11086_v61 = vld [vmem:[#allocation9 + $0x76c] ss:$16 sps:$4 sm:$0xff]  }
 0x4a7   : > { %8230 = vmatprep.subr.bf16.mxu0 %v11047_v0  ;;  %8558 = vmatprep.subr.bf16.mxu1 %v11050_v62  ;;  %v4858_v46 = vcombine.low %v4836_v45, %v4843_v24  ;;  %v11081_v62 = vld [vmem:[#allocation9 + $0x760] ss:$16 sps:$4 sm:$0xff]   ;;  %v11110_v28 = vld [vmem:[#allocation9 + $0x7ec] ss:$16 sps:$4 sm:$0xff]   ;;  %v11108_v45 = vld [vmem:[#allocation9 + $0x7e8] ss:$16 sps:$4 sm:$0xff]  }
 0x4a8   : > { %v4859_v58 = vcombine.low %v4850_v31, %v4857_v32  ;;  %v11111_v31 = vld [vmem:[#allocation9 + $0x800] ss:$16 sps:$4 sm:$0xff]   ;;  %v11114_v32 = vld [vmem:[#allocation9 + $0x808] ss:$16 sps:$4 sm:$0xff]  }
 0x4a9   : > { %v4866_v51 = vrot.slane %v4858_v46, %v12847_v52  ;;  %v11120_v46 = vld [vmem:[#allocation9 + $0x828] ss:$16 sps:$4 sm:$0xff]  }
 0x4aa   : > { %8231 = vmatpush1.bf16.msra.mxu0 %v11045_v1  ;;  %8559 = vmatpush1.bf16.msra.mxu1 %v11048_v17  ;;  %v4873_v0 = vrot.slane %v4859_v58, %v12847_v52  ;;  %v11084_v1 = vld [vmem:[#allocation9 + $0x768] ss:$16 sps:$4 sm:$0xff]   ;;  %v11089_v17 = vld [vmem:[#allocation9 + $0x784] ss:$16 sps:$4 sm:$0xff]  }
 0x4ab   : > { %8232 = vmatprep.subr.bf16.mxu0 %v11053_v6  ;;  %8560 = vmatprep.subr.bf16.mxu1 %v11056_v2  ;;  %v11092_v6 = vld [vmem:[#allocation9 + $0x78c] ss:$16 sps:$4 sm:$0xff]   ;;  %v11125_v58 = vld [vmem:[#allocation9 + $0x844] ss:$16 sps:$4 sm:$0xff]  }
 0x4ac   : > { %v4662_v2 = vld [vmem:[#allocation8 + $0x11] ss:$2 sm:$0xff]  ;;  %v4874_v44 = vcombine.low %v4866_v51, %v4873_v0 }
 0x4ad   : > { %v11134_v51 = vld [vmem:[#allocation9 + $0x86c] ss:$16 sps:$4 sm:$0xff]   ;;  %v11129_v0 = vld [vmem:[#allocation9 + $0x860] ss:$16 sps:$4 sm:$0xff]  }
 0x4ae   : > { %8233 = vmatpush1.bf16.msra.mxu0 %v11051_v35  ;;  %8561 = vmatpush1.bf16.msra.mxu1 %v11054_v59  ;;  %v11090_v35 = vld [vmem:[#allocation9 + $0x788] ss:$16 sps:$4 sm:$0xff]   ;;  %v11095_v59 = vld [vmem:[#allocation9 + $0x7a4] ss:$16 sps:$4 sm:$0xff]   ;;  %v13061_v19 = vsub.f32 %v4662_v2, %v4874_v44 }
 0x4af   : > { %8234 = vmatprep.subr.bf16.mxu0 %v11059_v8  ;;  %8562 = vmatprep.subr.bf16.mxu1 %v11062_v30  ;;  %v4885_v8 = vmul.f32 %v11571_v21, %v12884_v25  ;;  %v4924_v30 = vrot.slane %v12908_v56, %v12867_v16  ;;  %v11099_v25 = vld [vmem:[#allocation9 + $0x7c0] ss:$16 sps:$4 sm:$0xff]   ;;  %v11107_v56 = vld [vmem:[#allocation9 + $0x7e4] ss:$16 sps:$4 sm:$0xff]   ;;  %v11138_v2 = vld [vmem:[#allocation9 + $0x888] ss:$16 sps:$4 sm:$0xff]  }
 0x4b0   : > { %v11143_v44 = vld [vmem:[#allocation9 + $0x8a4] ss:$16 sps:$4 sm:$0xff]   ;;  %v11152_v21 = vld [vmem:[#allocation9 + $0x8cc] ss:$16 sps:$4 sm:$0xff]  }
 0x4b2   : > { %8235 = vmatpush1.bf16.msra.mxu0 %v11057_v36  ;;  %8563 = vmatpush1.bf16.msra.mxu1 %v11060_v53  ;;  %v11104_v36 = vld [vmem:[#allocation9 + $0x7cc] ss:$16 sps:$4 sm:$0xff]  }
 0x4b3   : > { %8236 = vmatprep.subr.bf16.mxu0 %v11065_v40  ;;  %8564 = vmatprep.subr.bf16.mxu1 %v11068_v27  ;;  %v11572_v53 = vld [vmem:[#allocation2 + $0x48] sm:$0xff]  ;;  %v4936_v40 = vrot.slane %v13061_v19, %v12857_v12  ;;  %v4983_v27 = vadd.f32 %v4924_v30, %v4885_v8  ;;  %v11147_v8 = vld [vmem:[#allocation9 + $0x8c0] ss:$16 sps:$4 sm:$0xff]  }
 0x4b4   : > { %v4888_v41 = vmul.f32 %v11572_v53, %v13019_v43  ;;  %v11116_v43 = vld [vmem:[#allocation9 + $0x80c] ss:$16 sps:$4 sm:$0xff]   ;;  %v11150_v30 = vld [vmem:[#allocation9 + $0x8c8] ss:$16 sps:$4 sm:$0xff]   ;;  %v11161_v53 = vld [vmem:[#allocation9 + $0x904] ss:$16 sps:$4 sm:$0xff]  }
 0x4b6   : > { %8237 = vmatpush1.bf16.msra.mxu0 %v11063_v55  ;;  %8565 = vmatpush1.bf16.msra.mxu1 %v11066_v23  ;;  %v4986_v11 = vadd.f32 %v4936_v40, %v4888_v41  ;;  %v11105_v55 = vld [vmem:[#allocation9 + $0x7e0] ss:$16 sps:$4 sm:$0xff]   ;;  %v4999_v23 = vmax.f32 %v4983_v27, 0.0  ;;  %v11164_v41 = vld [vmem:[#allocation9 + $0x90c] ss:$16 sps:$4 sm:$0xff]  }
 0x4b7   : > { %8238 = vmatprep.subr.bf16.mxu0 %v11071_v57  ;;  %8566 = vmatprep.subr.bf16.mxu1 %v11074_v29  ;;  %v11113_v57 = vld [vmem:[#allocation9 + $0x804] ss:$16 sps:$4 sm:$0xff]   ;;  %v11159_v40 = vld [vmem:[#allocation9 + $0x900] ss:$16 sps:$4 sm:$0xff]   ;;  %v11162_v27 = vld [vmem:[#allocation9 + $0x908] ss:$16 sps:$4 sm:$0xff]  }
 0x4b8   : > { %v5002_v29 = vmax.f32 %v4986_v11, 0.0  ;;  %v5015_v24 = vpack.c.bf16 %v4999_v23, %v4999_v23  ;;  %v11173_v11 = vld [vmem:[#allocation9 + $0x944] ss:$16 sps:$4 sm:$0xff]   ;;  %v11171_v23 = vld [vmem:[#allocation9 + $0x940] ss:$16 sps:$4 sm:$0xff]  }
 0x4ba   : > { %8239 = vmatpush1.bf16.msra.mxu0 %v11069_v33  ;;  %8567 = vmatpush1.bf16.msra.mxu1 %v11072_v34  ;;  %v11119_v33 = vld [vmem:[#allocation9 + $0x824] ss:$16 sps:$4 sm:$0xff]   ;;  %v11122_v34 = vld [vmem:[#allocation9 + $0x82c] ss:$16 sps:$4 sm:$0xff]  }
 0x4bb   : > { %8240 = vmatprep.subr.bf16.mxu0 %v11077_v49  ;;  %8568 = vmatprep.subr.bf16.mxu1 %v11080_v54  ;;  %v5018_v49 = vpack.c.bf16 %v5002_v29, %v5002_v29  ;;  %v11117_v54 = vld [vmem:[#allocation9 + $0x820] ss:$16 sps:$4 sm:$0xff]  }
 0x4bc   : > { %v11177_v29 = vld [vmem:[#allocation9 + $0x960] ss:$16 sps:$4 sm:$0xff]  }
 0x4be   : > { %8241 = vmatpush1.bf16.msra.mxu0 %v11075_v47  ;;  %8569 = vmatpush1.bf16.msra.mxu1 %v11078_v26  ;;  %v11128_v47 = vld [vmem:[#allocation9 + $0x84c] ss:$16 sps:$4 sm:$0xff]   ;;  %v11123_v26 = vld [vmem:[#allocation9 + $0x840] ss:$16 sps:$4 sm:$0xff]  }
 0x4bf   : > { %8242 = vmatprep.subr.bf16.mxu0 %v11083_v10  ;;  %8570 = vmatprep.subr.bf16.mxu1 %v11086_v61  ;;  %v11126_v10 = vld [vmem:[#allocation9 + $0x848] ss:$16 sps:$4 sm:$0xff]   ;;  %v11131_v61 = vld [vmem:[#allocation9 + $0x864] ss:$16 sps:$4 sm:$0xff]  }
 0x4c2   : > { %8243 = vmatpush1.bf16.msra.mxu0 %v11081_v62  ;;  %8571 = vmatpush1.bf16.msra.mxu1 %v11084_v1  ;;  %v11132_v62 = vld [vmem:[#allocation9 + $0x868] ss:$16 sps:$4 sm:$0xff]   ;;  %v11137_v1 = vld [vmem:[#allocation9 + $0x884] ss:$16 sps:$4 sm:$0xff]  }
 0x4c3   : > { %8244 = vmatprep.subr.bf16.mxu0 %v11089_v17  ;;  %8572 = vmatprep.subr.bf16.mxu1 %v11092_v6  ;;  %v11140_v17 = vld [vmem:[#allocation9 + $0x88c] ss:$16 sps:$4 sm:$0xff]   ;;  %v11135_v6 = vld [vmem:[#allocation9 + $0x880] ss:$16 sps:$4 sm:$0xff]  }
 0x4c6   : > { %8245 = vmatpush1.bf16.msra.mxu0 %v11087_v37  ;;  %8573 = vmatpush1.bf16.msra.mxu1 %v11090_v35  ;;  %v11146_v37 = vld [vmem:[#allocation9 + $0x8ac] ss:$16 sps:$4 sm:$0xff]   ;;  %v11141_v35 = vld [vmem:[#allocation9 + $0x8a0] ss:$16 sps:$4 sm:$0xff]  }
 0x4c7   : > { %8246 = vmatprep.subr.bf16.mxu0 %v11095_v59  ;;  %8574 = vmatprep.subr.bf16.mxu1 %v11098_v20  ;;  %v11144_v59 = vld [vmem:[#allocation9 + $0x8a8] ss:$16 sps:$4 sm:$0xff]   ;;  %v11149_v20 = vld [vmem:[#allocation9 + $0x8c4] ss:$16 sps:$4 sm:$0xff]  }
 0x4ca   : > { %8247 = vmatpush1.bf16.msra.mxu0 %v11093_v48  ;;  %8575 = vmatpush1.bf16.msra.mxu1 %v11096_v42  ;;  %v11155_v48 = vld [vmem:[#allocation9 + $0x8e4] ss:$16 sps:$4 sm:$0xff]   ;;  %v11158_v42 = vld [vmem:[#allocation9 + $0x8ec] ss:$16 sps:$4 sm:$0xff]  }
 0x4cb   : > { %8248 = vmatprep.subr.bf16.mxu0 %v11101_v22  ;;  %8576 = vmatprep.subr.bf16.mxu1 %v11104_v36  ;;  %v11153_v22 = vld [vmem:[#allocation9 + $0x8e0] ss:$16 sps:$4 sm:$0xff]   ;;  %v11156_v36 = vld [vmem:[#allocation9 + $0x8e8] ss:$16 sps:$4 sm:$0xff]  }
 0x4ce   : > { %8249 = vmatpush1.bf16.msra.mxu0 %v11099_v25  ;;  %8577 = vmatpush1.bf16.msra.mxu1 %v11102_v39  ;;  %v11167_v25 = vld [vmem:[#allocation9 + $0x924] ss:$16 sps:$4 sm:$0xff]   ;;  %v11170_v39 = vld [vmem:[#allocation9 + $0x92c] ss:$16 sps:$4 sm:$0xff]  }
 0x4cf   : > { %8250 = vmatprep.subr.bf16.mxu0 %v11107_v56  ;;  %8578 = vmatprep.subr.bf16.mxu1 %v11110_v28  ;;  %v11165_v56 = vld [vmem:[#allocation9 + $0x920] ss:$16 sps:$4 sm:$0xff]   ;;  %v11168_v28 = vld [vmem:[#allocation9 + $0x928] ss:$16 sps:$4 sm:$0xff]  }
 0x4d2   : > { %8251 = vmatpush1.bf16.msra.mxu0 %v11105_v55  ;;  %8579 = vmatpush1.bf16.msra.mxu1 %v11108_v45  ;;  %v11176_v55 = vld [vmem:[#allocation9 + $0x94c] ss:$16 sps:$4 sm:$0xff]   ;;  %v11174_v45 = vld [vmem:[#allocation9 + $0x948] ss:$16 sps:$4 sm:$0xff]  }
 0x4d3   : > { %8261 = vmatprep.subr.bf16.mxu0 %v11113_v57  ;;  %8589 = vmatprep.subr.bf16.mxu1 %v11116_v43  ;;  %v11179_v57 = vld [vmem:[#allocation9 + $0x964] ss:$16 sps:$4 sm:$0xff]   ;;  %v11182_v43 = vld [vmem:[#allocation9 + $0x96c] ss:$16 sps:$4 sm:$0xff]  }
 0x4d5   : > { %8253 = vmatmul.mubr.bf16.vlgmr.msra.gmra.mrb[0].mxu0 %v5015_v24  ;;  %8581 = vmatmul.mubr.bf16.vlgmr.msra.gmra.mrb[0].mxu1 %v5015_v24  ;;  %v11180_v24 = vld [vmem:[#allocation9 + $0x968] ss:$16 sps:$4 sm:$0xff]  }
 0x4d6   : > { %8262 = vmatpush1.bf16.msra.mxu0 %v11111_v31  ;;  %8590 = vmatpush1.bf16.msra.mxu1 %v11114_v32  ;;  %v11185_v31 = vld [vmem:[#allocation9 + $0x984] ss:$16 sps:$4 sm:$0xff]   ;;  %v11188_v32 = vld [vmem:[#allocation9 + $0x98c] ss:$16 sps:$4 sm:$0xff]  }
 0x4d7   : > { %8263 = vmatprep.subr.bf16.mxu0 %v11119_v33  ;;  %8591 = vmatprep.subr.bf16.mxu1 %v11122_v34  ;;  %v11183_v33 = vld [vmem:[#allocation9 + $0x980] ss:$16 sps:$4 sm:$0xff]   ;;  %v11186_v34 = vld [vmem:[#allocation9 + $0x988] ss:$16 sps:$4 sm:$0xff]  }
 0x4d8   : > { %8293 = vmatprep.mubr.bf16.mxu0 %v5018_v49  ;;  %8621 = vmatprep.mubr.bf16.mxu1 %v5018_v49  ;;  %v11191_v49 = vld [vmem:[#allocation9 + $0x9a4] ss:$16 sps:$4 sm:$0xff]  }
 0x4da   : > { %8264 = vmatpush1.bf16.msra.mxu0 %v11117_v54  ;;  %8592 = vmatpush1.bf16.msra.mxu1 %v11120_v46  ;;  %v11194_v54 = vld [vmem:[#allocation9 + $0x9ac] ss:$16 sps:$4 sm:$0xff]   ;;  %v11573_v46 = vld [vmem:[#allocation2 + $0x40] sm:$0xff] }
 0x4db   : > { %8265 = vmatprep.subr.bf16.mxu0 %v11125_v58  ;;  %8593 = vmatprep.subr.bf16.mxu1 %v11128_v47  ;;  %v4887_v58 = vmul.f32 %v11573_v46, %v13016_v63  ;;  %v4932_v47 = vrot.slane %v13061_v19, %v12855_v50  ;;  %v11195_v63 = vld [vmem:[#allocation9 + $0x9c0] ss:$16 sps:$4 sm:$0xff]   ;;  %v11246_v46 = vld [vmem:[#allocation9 + $0xac8] ss:$16 sps:$4 sm:$0xff]  }
 0x4de   : > { %8266 = vmatpush1.bf16.msra.mxu0 %v11123_v26  ;;  %8594 = vmatpush1.bf16.msra.mxu1 %v11126_v10  ;;  %v11189_v26 = vld [vmem:[#allocation9 + $0x9a0] ss:$16 sps:$4 sm:$0xff]   ;;  %v11192_v10 = vld [vmem:[#allocation9 + $0x9a8] ss:$16 sps:$4 sm:$0xff]  }
 0x4df   : > { %8267 = vmatprep.subr.bf16.mxu0 %v11131_v61  ;;  %8595 = vmatprep.subr.bf16.mxu1 %v11134_v51  ;;  %v11197_v61 = vld [vmem:[#allocation9 + $0x9c4] ss:$16 sps:$4 sm:$0xff]   ;;  %v11200_v51 = vld [vmem:[#allocation9 + $0x9cc] ss:$16 sps:$4 sm:$0xff]  }
 0x4e2   : > { %8268 = vmatpush1.bf16.msra.mxu0 %v11129_v0  ;;  %8596 = vmatpush1.bf16.msra.mxu1 %v11132_v62  ;;  %v11574_v0 = vld [vmem:[#allocation2 + $0x58] sm:$0xff] }
 0x4e3   : > { %8269 = vmatprep.subr.bf16.mxu0 %v11137_v1  ;;  %8597 = vmatprep.subr.bf16.mxu1 %v11140_v17  ;;  %v4890_v62 = vmul.f32 %v11574_v0, %v13025_v4  ;;  %v4944_v1 = vrot.slane %v13061_v19, %v12861_v13  ;;  %v4985_v17 = vadd.f32 %v4932_v47, %v4887_v58  ;;  %v11209_v4 = vld [vmem:[#allocation9 + $0xa04] ss:$16 sps:$4 sm:$0xff]   ;;  %v11254_v47 = vld [vmem:[#allocation9 + $0xaec] ss:$16 sps:$4 sm:$0xff]   ;;  %v11255_v0 = vld [vmem:[#allocation9 + $0xb00] ss:$16 sps:$4 sm:$0xff]  }
 0x4e4   : > { %v11251_v58 = vld [vmem:[#allocation9 + $0xae4] ss:$16 sps:$4 sm:$0xff]  }
 0x4e6   : > { %8270 = vmatpush1.bf16.msra.mxu0 %v11135_v6  ;;  %8598 = vmatpush1.bf16.msra.mxu1 %v11138_v2  ;;  %v11198_v6 = vld [vmem:[#allocation9 + $0x9c8] ss:$16 sps:$4 sm:$0xff]   ;;  %v11203_v2 = vld [vmem:[#allocation9 + $0x9e4] ss:$16 sps:$4 sm:$0xff]  }
 0x4e7   : > { %8271 = vmatprep.subr.bf16.mxu0 %v11143_v44  ;;  %8599 = vmatprep.subr.bf16.mxu1 %v11146_v37  ;;  %v11206_v44 = vld [vmem:[#allocation9 + $0x9ec] ss:$16 sps:$4 sm:$0xff]   ;;  %v4988_v37 = vadd.f32 %v4944_v1, %v4890_v62  ;;  %v11258_v62 = vld [vmem:[#allocation9 + $0xb08] ss:$16 sps:$4 sm:$0xff]   ;;  %v11263_v1 = vld [vmem:[#allocation9 + $0xb24] ss:$16 sps:$4 sm:$0xff]  }
 0x4ea   : > { %8272 = vmatpush1.bf16.msra.mxu0 %v11141_v35  ;;  %8600 = vmatpush1.bf16.msra.mxu1 %v11144_v59  ;;  %v5001_v35 = vmax.f32 %v4985_v17, 0.0  ;;  %v11201_v59 = vld [vmem:[#allocation9 + $0x9e0] ss:$16 sps:$4 sm:$0xff]   ;;  %v11266_v17 = vld [vmem:[#allocation9 + $0xb2c] ss:$16 sps:$4 sm:$0xff]  }
 0x4eb   : > { %8273 = vmatprep.subr.bf16.mxu0 %v11149_v20  ;;  %8601 = vmatprep.subr.bf16.mxu1 %v11152_v21  ;;  %v11204_v20 = vld [vmem:[#allocation9 + $0x9e8] ss:$16 sps:$4 sm:$0xff]   ;;  %v11212_v21 = vld [vmem:[#allocation9 + $0xa0c] ss:$16 sps:$4 sm:$0xff]  }
 0x4ee   : > { %8274 = vmatpush1.bf16.msra.mxu0 %v11147_v8  ;;  %8602 = vmatpush1.bf16.msra.mxu1 %v11150_v30  ;;  %v5004_v8 = vmax.f32 %v4988_v37, 0.0  ;;  %v5017_v30 = vpack.c.bf16 %v5001_v35, %v5001_v35  ;;  %v11267_v37 = vld [vmem:[#allocation9 + $0xb40] ss:$16 sps:$4 sm:$0xff]   ;;  %v11270_v35 = vld [vmem:[#allocation9 + $0xb48] ss:$16 sps:$4 sm:$0xff]  }
 0x4ef   : > { %8275 = vmatprep.subr.bf16.mxu0 %v11155_v48  ;;  %8603 = vmatprep.subr.bf16.mxu1 %v11158_v42  ;;  %v11207_v48 = vld [vmem:[#allocation9 + $0xa00] ss:$16 sps:$4 sm:$0xff]   ;;  %v11210_v42 = vld [vmem:[#allocation9 + $0xa08] ss:$16 sps:$4 sm:$0xff]  }
 0x4f2   : > { %8276 = vmatpush1.bf16.msra.mxu0 %v11153_v22  ;;  %8604 = vmatpush1.bf16.msra.mxu1 %v11156_v36  ;;  %v11215_v22 = vld [vmem:[#allocation9 + $0xa24] ss:$16 sps:$4 sm:$0xff]   ;;  %v11218_v36 = vld [vmem:[#allocation9 + $0xa2c] ss:$16 sps:$4 sm:$0xff]  }
 0x4f3   : > { %8277 = vmatprep.subr.bf16.mxu0 %v11161_v53  ;;  %8605 = vmatprep.subr.bf16.mxu1 %v11164_v41  ;;  %v5020_v53 = vpack.c.bf16 %v5004_v8, %v5004_v8  ;;  %v11213_v41 = vld [vmem:[#allocation9 + $0xa20] ss:$16 sps:$4 sm:$0xff]   ;;  %v11281_v8 = vld [vmem:[#allocation9 + $0xb84] ss:$16 sps:$4 sm:$0xff]  }
 0x4f6   : > { %8278 = vmatpush1.bf16.msra.mxu0 %v11159_v40  ;;  %8606 = vmatpush1.bf16.msra.mxu1 %v11162_v27  ;;  %v11216_v40 = vld [vmem:[#allocation9 + $0xa28] ss:$16 sps:$4 sm:$0xff]   ;;  %v11221_v27 = vld [vmem:[#allocation9 + $0xa44] ss:$16 sps:$4 sm:$0xff]  }
 0x4f7   : > { %8279 = vmatprep.subr.bf16.mxu0 %v11167_v25  ;;  %8607 = vmatprep.subr.bf16.mxu1 %v11170_v39  ;;  %v11224_v25 = vld [vmem:[#allocation9 + $0xa4c] ss:$16 sps:$4 sm:$0xff]   ;;  %v11219_v39 = vld [vmem:[#allocation9 + $0xa40] ss:$16 sps:$4 sm:$0xff]  }
 0x4fa   : > { %8280 = vmatpush1.bf16.msra.mxu0 %v11165_v56  ;;  %8608 = vmatpush1.bf16.msra.mxu1 %v11168_v28  ;;  %v11222_v56 = vld [vmem:[#allocation9 + $0xa48] ss:$16 sps:$4 sm:$0xff]   ;;  %v11227_v28 = vld [vmem:[#allocation9 + $0xa64] ss:$16 sps:$4 sm:$0xff]  }
 0x4fb   : > { %8281 = vmatprep.subr.bf16.mxu0 %v11173_v11  ;;  %8609 = vmatprep.subr.bf16.mxu1 %v11176_v55  ;;  %v11230_v11 = vld [vmem:[#allocation9 + $0xa6c] ss:$16 sps:$4 sm:$0xff]   ;;  %v11225_v55 = vld [vmem:[#allocation9 + $0xa60] ss:$16 sps:$4 sm:$0xff]  }
 0x4fe   : > { %8282 = vmatpush1.bf16.msra.mxu0 %v11171_v23  ;;  %8610 = vmatpush1.bf16.msra.mxu1 %v11174_v45  ;;  %v11228_v23 = vld [vmem:[#allocation9 + $0xa68] ss:$16 sps:$4 sm:$0xff]   ;;  %v11233_v45 = vld [vmem:[#allocation9 + $0xa84] ss:$16 sps:$4 sm:$0xff]  }
 0x4ff   : > { %8283 = vmatprep.subr.bf16.mxu0 %v11179_v57  ;;  %8611 = vmatprep.subr.bf16.mxu1 %v11182_v43  ;;  %v11236_v57 = vld [vmem:[#allocation9 + $0xa8c] ss:$16 sps:$4 sm:$0xff]   ;;  %v11231_v43 = vld [vmem:[#allocation9 + $0xa80] ss:$16 sps:$4 sm:$0xff]  }
 0x502   : > { %8284 = vmatpush1.bf16.msra.mxu0 %v11177_v29  ;;  %8612 = vmatpush1.bf16.msra.mxu1 %v11180_v24  ;;  %v11234_v29 = vld [vmem:[#allocation9 + $0xa88] ss:$16 sps:$4 sm:$0xff]   ;;  %v11239_v24 = vld [vmem:[#allocation9 + $0xaa4] ss:$16 sps:$4 sm:$0xff]  }
 0x503   : > { %8285 = vmatprep.subr.bf16.mxu0 %v11185_v31  ;;  %8613 = vmatprep.subr.bf16.mxu1 %v11188_v32  ;;  %v11242_v31 = vld [vmem:[#allocation9 + $0xaac] ss:$16 sps:$4 sm:$0xff]   ;;  %v11237_v32 = vld [vmem:[#allocation9 + $0xaa0] ss:$16 sps:$4 sm:$0xff]  }
 0x506   : > { %8286 = vmatpush1.bf16.msra.mxu0 %v11183_v33  ;;  %8614 = vmatpush1.bf16.msra.mxu1 %v11186_v34  ;;  %v11240_v33 = vld [vmem:[#allocation9 + $0xaa8] ss:$16 sps:$4 sm:$0xff]   ;;  %v11245_v34 = vld [vmem:[#allocation9 + $0xac4] ss:$16 sps:$4 sm:$0xff]  }
 0x507   : > { %8287 = vmatprep.subr.bf16.mxu0 %v11191_v49  ;;  %8615 = vmatprep.subr.bf16.mxu1 %v11194_v54  ;;  %v11248_v49 = vld [vmem:[#allocation9 + $0xacc] ss:$16 sps:$4 sm:$0xff]   ;;  %v11243_v54 = vld [vmem:[#allocation9 + $0xac0] ss:$16 sps:$4 sm:$0xff]  }
 0x50a   : > { %8288 = vmatpush1.bf16.msra.mxu0 %v11189_v26  ;;  %8616 = vmatpush1.bf16.msra.mxu1 %v11192_v10  ;;  %v11249_v26 = vld [vmem:[#allocation9 + $0xae0] ss:$16 sps:$4 sm:$0xff]   ;;  %v11252_v10 = vld [vmem:[#allocation9 + $0xae8] ss:$16 sps:$4 sm:$0xff]  }
 0x50b   : > { %8289 = vmatprep.subr.bf16.mxu0 %v11197_v61  ;;  %8617 = vmatprep.subr.bf16.mxu1 %v11200_v51  ;;  %v11257_v61 = vld [vmem:[#allocation9 + $0xb04] ss:$16 sps:$4 sm:$0xff]   ;;  %v11260_v51 = vld [vmem:[#allocation9 + $0xb0c] ss:$16 sps:$4 sm:$0xff]  }
 0x50e   : > { %8290 = vmatpush1.bf16.msra.mxu0 %v11195_v63  ;;  %8618 = vmatpush1.bf16.msra.mxu1 %v11198_v6  ;;  %v11261_v63 = vld [vmem:[#allocation9 + $0xb20] ss:$16 sps:$4 sm:$0xff]   ;;  %v11264_v6 = vld [vmem:[#allocation9 + $0xb28] ss:$16 sps:$4 sm:$0xff]  }
 0x50f   : > { %8291 = vmatprep.subr.bf16.mxu0 %v11203_v2  ;;  %8619 = vmatprep.subr.bf16.mxu1 %v11206_v44  ;;  %v11269_v2 = vld [vmem:[#allocation9 + $0xb44] ss:$16 sps:$4 sm:$0xff]   ;;  %v11272_v44 = vld [vmem:[#allocation9 + $0xb4c] ss:$16 sps:$4 sm:$0xff]  }
 0x512   : > { %8292 = vmatpush1.bf16.msra.mxu0 %v11201_v59  ;;  %8620 = vmatpush1.bf16.msra.mxu1 %v11204_v20  ;;  %v11275_v59 = vld [vmem:[#allocation9 + $0xb64] ss:$16 sps:$4 sm:$0xff]   ;;  %v11278_v20 = vld [vmem:[#allocation9 + $0xb6c] ss:$16 sps:$4 sm:$0xff]  }
 0x513   : > { %8302 = vmatprep.subr.bf16.mxu0 %v11209_v4  ;;  %8630 = vmatprep.subr.bf16.mxu1 %v11212_v21  ;;  %v11273_v4 = vld [vmem:[#allocation9 + $0xb60] ss:$16 sps:$4 sm:$0xff]   ;;  %v11276_v21 = vld [vmem:[#allocation9 + $0xb68] ss:$16 sps:$4 sm:$0xff]  }
 0x515   : > { %8294 = vmatmul.mubr.bf16.vlgmr.msra.gmra.mrb[0].mxu0 %v5017_v30  ;;  %8622 = vmatmul.mubr.bf16.vlgmr.msra.gmra.mrb[0].mxu1 %v5017_v30  ;;  %v11284_v30 = vld [vmem:[#allocation9 + $0xb8c] ss:$16 sps:$4 sm:$0xff]  }
 0x516   : > { %8303 = vmatpush1.bf16.msra.mxu0 %v11207_v48  ;;  %8631 = vmatpush1.bf16.msra.mxu1 %v11210_v42  ;;  %v11279_v48 = vld [vmem:[#allocation9 + $0xb80] ss:$16 sps:$4 sm:$0xff]   ;;  %v11282_v42 = vld [vmem:[#allocation9 + $0xb88] ss:$16 sps:$4 sm:$0xff]  }
 0x517   : > { %8304 = vmatprep.subr.bf16.mxu0 %v11215_v22  ;;  %8632 = vmatprep.subr.bf16.mxu1 %v11218_v36  ;;  %v11287_v22 = vld [vmem:[#allocation9 + $0xba4] ss:$16 sps:$4 sm:$0xff]   ;;  %v11290_v36 = vld [vmem:[#allocation9 + $0xbac] ss:$16 sps:$4 sm:$0xff]  }
 0x518   : > { %8334 = vmatprep.mubr.bf16.mxu0 %v5020_v53  ;;  %8662 = vmatprep.mubr.bf16.mxu1 %v5020_v53  ;;  %v11575_v53 = vld [vmem:[#allocation2 + $0x50] sm:$0xff] }
 0x51a   : > { %8305 = vmatpush1.bf16.msra.mxu0 %v11213_v41  ;;  %8633 = vmatpush1.bf16.msra.mxu1 %v11216_v40  ;;  %v4889_v41 = vmul.f32 %v11575_v53, %v13022_v3  ;;  %v4940_v40 = vrot.slane %v13061_v19, %v12859_v60  ;;  %v11291_v3 = vld [vmem:[#allocation9 + $0xbc0] ss:$16 sps:$4 sm:$0xff]  }
 0x51b   : > { %8306 = vmatprep.subr.bf16.mxu0 %v11221_v27  ;;  %8634 = vmatprep.subr.bf16.mxu1 %v11224_v25  ;;  %v11285_v27 = vld [vmem:[#allocation9 + $0xba0] ss:$16 sps:$4 sm:$0xff]   ;;  %v11288_v25 = vld [vmem:[#allocation9 + $0xba8] ss:$16 sps:$4 sm:$0xff]  }
 0x51c   : > { %v11345_v53 = vld [vmem:[#allocation9 + $0xce0] ss:$16 sps:$4 sm:$0xff]  }
 0x51e   : > { %8307 = vmatpush1.bf16.msra.mxu0 %v11219_v39  ;;  %8635 = vmatpush1.bf16.msra.mxu1 %v11222_v56  ;;  %v11293_v39 = vld [vmem:[#allocation9 + $0xbc4] ss:$16 sps:$4 sm:$0xff]   ;;  %v11296_v56 = vld [vmem:[#allocation9 + $0xbcc] ss:$16 sps:$4 sm:$0xff]  }
 0x51f   : > { %8308 = vmatprep.subr.bf16.mxu0 %v11227_v28  ;;  %8636 = vmatprep.subr.bf16.mxu1 %v11230_v11  ;;  %v11576_v28 = vld [vmem:[#allocation2 + $0x68] sm:$0xff] }
 0x520   : > { %v4892_v11 = vmul.f32 %v11576_v28, %v13031_v38  ;;  %v11305_v38 = vld [vmem:[#allocation9 + $0xc04] ss:$16 sps:$4 sm:$0xff]   ;;  %v11362_v28 = vld [vmem:[#allocation9 + $0xd2c] ss:$16 sps:$4 sm:$0xff]  }
 0x522   : > { %8309 = vmatpush1.bf16.msra.mxu0 %v11225_v55  ;;  %8637 = vmatpush1.bf16.msra.mxu1 %v11228_v23  ;;  %v4952_v55 = vrot.slane %v13061_v19, %v12865_v15  ;;  %v4987_v23 = vadd.f32 %v4940_v40, %v4889_v41  ;;  %v11348_v41 = vld [vmem:[#allocation9 + $0xce8] ss:$16 sps:$4 sm:$0xff]   ;;  %v11353_v40 = vld [vmem:[#allocation9 + $0xd04] ss:$16 sps:$4 sm:$0xff]  }
 0x523   : > { %8310 = vmatprep.subr.bf16.mxu0 %v11233_v45  ;;  %8638 = vmatprep.subr.bf16.mxu1 %v11236_v57  ;;  %v11294_v45 = vld [vmem:[#allocation9 + $0xbc8] ss:$16 sps:$4 sm:$0xff]   ;;  %v11299_v57 = vld [vmem:[#allocation9 + $0xbe4] ss:$16 sps:$4 sm:$0xff]  }
 0x526   : > { %8311 = vmatpush1.bf16.msra.mxu0 %v11231_v43  ;;  %8639 = vmatpush1.bf16.msra.mxu1 %v11234_v29  ;;  %v11302_v43 = vld [vmem:[#allocation9 + $0xbec] ss:$16 sps:$4 sm:$0xff]   ;;  %v4990_v29 = vadd.f32 %v4952_v55, %v4892_v11  ;;  %v11357_v11 = vld [vmem:[#allocation9 + $0xd20] ss:$16 sps:$4 sm:$0xff]   ;;  %v11360_v55 = vld [vmem:[#allocation9 + $0xd28] ss:$16 sps:$4 sm:$0xff]  }
 0x527   : > { %8312 = vmatprep.subr.bf16.mxu0 %v11239_v24  ;;  %8640 = vmatprep.subr.bf16.mxu1 %v11242_v31  ;;  %v5003_v24 = vmax.f32 %v4987_v23, 0.0  ;;  %v11297_v31 = vld [vmem:[#allocation9 + $0xbe0] ss:$16 sps:$4 sm:$0xff]   ;;  %v11365_v23 = vld [vmem:[#allocation9 + $0xd44] ss:$16 sps:$4 sm:$0xff]  }
 0x528   : > { %v5006_v15 = vmax.f32 %v4990_v29, 0.0  ;;  %v11374_v29 = vld [vmem:[#allocation9 + $0xd6c] ss:$16 sps:$4 sm:$0xff]  }
 0x52a   : > { %8313 = vmatpush1.bf16.msra.mxu0 %v11237_v32  ;;  %8641 = vmatpush1.bf16.msra.mxu1 %v11240_v33  ;;  %v11300_v32 = vld [vmem:[#allocation9 + $0xbe8] ss:$16 sps:$4 sm:$0xff]   ;;  %v11308_v33 = vld [vmem:[#allocation9 + $0xc0c] ss:$16 sps:$4 sm:$0xff]  }
 0x52b   : > { %8314 = vmatprep.subr.bf16.mxu0 %v11245_v34  ;;  %8642 = vmatprep.subr.bf16.mxu1 %v11248_v49  ;;  %v5019_v34 = vpack.c.bf16 %v5003_v24, %v5003_v24  ;;  %v11303_v49 = vld [vmem:[#allocation9 + $0xc00] ss:$16 sps:$4 sm:$0xff]  }
 0x52c   : > { %v11369_v24 = vld [vmem:[#allocation9 + $0xd60] ss:$16 sps:$4 sm:$0xff]  }
 0x52e   : > { %8315 = vmatpush1.bf16.msra.mxu0 %v11243_v54  ;;  %8643 = vmatpush1.bf16.msra.mxu1 %v11246_v46  ;;  %v11306_v54 = vld [vmem:[#allocation9 + $0xc08] ss:$16 sps:$4 sm:$0xff]   ;;  %v11311_v46 = vld [vmem:[#allocation9 + $0xc24] ss:$16 sps:$4 sm:$0xff]  }
 0x52f   : > { %8316 = vmatprep.subr.bf16.mxu0 %v11251_v58  ;;  %8644 = vmatprep.subr.bf16.mxu1 %v11254_v47  ;;  %v11314_v58 = vld [vmem:[#allocation9 + $0xc2c] ss:$16 sps:$4 sm:$0xff]   ;;  %v5022_v47 = vpack.c.bf16 %v5006_v15, %v5006_v15  ;;  %v11378_v15 = vld [vmem:[#allocation9 + $0xd88] ss:$16 sps:$4 sm:$0xff]  }
 0x532   : > { %8317 = vmatpush1.bf16.msra.mxu0 %v11249_v26  ;;  %8645 = vmatpush1.bf16.msra.mxu1 %v11252_v10  ;;  %v11309_v26 = vld [vmem:[#allocation9 + $0xc20] ss:$16 sps:$4 sm:$0xff]   ;;  %v11312_v10 = vld [vmem:[#allocation9 + $0xc28] ss:$16 sps:$4 sm:$0xff]  }
 0x533   : > { %8318 = vmatprep.subr.bf16.mxu0 %v11257_v61  ;;  %8646 = vmatprep.subr.bf16.mxu1 %v11260_v51  ;;  %v11317_v61 = vld [vmem:[#allocation9 + $0xc44] ss:$16 sps:$4 sm:$0xff]   ;;  %v11320_v51 = vld [vmem:[#allocation9 + $0xc4c] ss:$16 sps:$4 sm:$0xff]  }
 0x536   : > { %8319 = vmatpush1.bf16.msra.mxu0 %v11255_v0  ;;  %8647 = vmatpush1.bf16.msra.mxu1 %v11258_v62  ;;  %v11315_v0 = vld [vmem:[#allocation9 + $0xc40] ss:$16 sps:$4 sm:$0xff]   ;;  %v11318_v62 = vld [vmem:[#allocation9 + $0xc48] ss:$16 sps:$4 sm:$0xff]  }
 0x537   : > { %8320 = vmatprep.subr.bf16.mxu0 %v11263_v1  ;;  %8648 = vmatprep.subr.bf16.mxu1 %v11266_v17  ;;  %v11323_v1 = vld [vmem:[#allocation9 + $0xc64] ss:$16 sps:$4 sm:$0xff]   ;;  %v11326_v17 = vld [vmem:[#allocation9 + $0xc6c] ss:$16 sps:$4 sm:$0xff]  }
 0x53a   : > { %8321 = vmatpush1.bf16.msra.mxu0 %v11261_v63  ;;  %8649 = vmatpush1.bf16.msra.mxu1 %v11264_v6  ;;  %v11321_v63 = vld [vmem:[#allocation9 + $0xc60] ss:$16 sps:$4 sm:$0xff]   ;;  %v11324_v6 = vld [vmem:[#allocation9 + $0xc68] ss:$16 sps:$4 sm:$0xff]  }
 0x53b   : > { %8322 = vmatprep.subr.bf16.mxu0 %v11269_v2  ;;  %8650 = vmatprep.subr.bf16.mxu1 %v11272_v44  ;;  %v11329_v2 = vld [vmem:[#allocation9 + $0xc84] ss:$16 sps:$4 sm:$0xff]   ;;  %v11332_v44 = vld [vmem:[#allocation9 + $0xc8c] ss:$16 sps:$4 sm:$0xff]  }
 0x53e   : > { %8323 = vmatpush1.bf16.msra.mxu0 %v11267_v37  ;;  %8651 = vmatpush1.bf16.msra.mxu1 %v11270_v35  ;;  %v11327_v37 = vld [vmem:[#allocation9 + $0xc80] ss:$16 sps:$4 sm:$0xff]   ;;  %v11330_v35 = vld [vmem:[#allocation9 + $0xc88] ss:$16 sps:$4 sm:$0xff]  }
 0x53f   : > { %8324 = vmatprep.subr.bf16.mxu0 %v11275_v59  ;;  %8652 = vmatprep.subr.bf16.mxu1 %v11278_v20  ;;  %v11335_v59 = vld [vmem:[#allocation9 + $0xca4] ss:$16 sps:$4 sm:$0xff]   ;;  %v11338_v20 = vld [vmem:[#allocation9 + $0xcac] ss:$16 sps:$4 sm:$0xff]  }
 0x542   : > { %8325 = vmatpush1.bf16.msra.mxu0 %v11273_v4  ;;  %8653 = vmatpush1.bf16.msra.mxu1 %v11276_v21  ;;  %v11333_v4 = vld [vmem:[#allocation9 + $0xca0] ss:$16 sps:$4 sm:$0xff]   ;;  %v11336_v21 = vld [vmem:[#allocation9 + $0xca8] ss:$16 sps:$4 sm:$0xff]  }
 0x543   : > { %8326 = vmatprep.subr.bf16.mxu0 %v11281_v8  ;;  %8654 = vmatprep.subr.bf16.mxu1 %v11284_v30  ;;  %v11341_v8 = vld [vmem:[#allocation9 + $0xcc4] ss:$16 sps:$4 sm:$0xff]   ;;  %v11344_v30 = vld [vmem:[#allocation9 + $0xccc] ss:$16 sps:$4 sm:$0xff]  }
 0x546   : > { %8327 = vmatpush1.bf16.msra.mxu0 %v11279_v48  ;;  %8655 = vmatpush1.bf16.msra.mxu1 %v11282_v42  ;;  %v11339_v48 = vld [vmem:[#allocation9 + $0xcc0] ss:$16 sps:$4 sm:$0xff]   ;;  %v11342_v42 = vld [vmem:[#allocation9 + $0xcc8] ss:$16 sps:$4 sm:$0xff]  }
 0x547   : > { %8328 = vmatprep.subr.bf16.mxu0 %v11287_v22  ;;  %8656 = vmatprep.subr.bf16.mxu1 %v11290_v36  ;;  %v11347_v22 = vld [vmem:[#allocation9 + $0xce4] ss:$16 sps:$4 sm:$0xff]   ;;  %v11350_v36 = vld [vmem:[#allocation9 + $0xcec] ss:$16 sps:$4 sm:$0xff]  }
 0x54a   : > { %8329 = vmatpush1.bf16.msra.mxu0 %v11285_v27  ;;  %8657 = vmatpush1.bf16.msra.mxu1 %v11288_v25  ;;  %v11356_v27 = vld [vmem:[#allocation9 + $0xd0c] ss:$16 sps:$4 sm:$0xff]   ;;  %v11351_v25 = vld [vmem:[#allocation9 + $0xd00] ss:$16 sps:$4 sm:$0xff]  }
 0x54b   : > { %8330 = vmatprep.subr.bf16.mxu0 %v11293_v39  ;;  %8658 = vmatprep.subr.bf16.mxu1 %v11296_v56  ;;  %v11354_v39 = vld [vmem:[#allocation9 + $0xd08] ss:$16 sps:$4 sm:$0xff]   ;;  %v11359_v56 = vld [vmem:[#allocation9 + $0xd24] ss:$16 sps:$4 sm:$0xff]  }
 0x54e   : > { %8331 = vmatpush1.bf16.msra.mxu0 %v11291_v3  ;;  %8659 = vmatpush1.bf16.msra.mxu1 %v11294_v45  ;;  %v11368_v3 = vld [vmem:[#allocation9 + $0xd4c] ss:$16 sps:$4 sm:$0xff]   ;;  %v11363_v45 = vld [vmem:[#allocation9 + $0xd40] ss:$16 sps:$4 sm:$0xff]  }
 0x54f   : > { %8332 = vmatprep.subr.bf16.mxu0 %v11299_v57  ;;  %8660 = vmatprep.subr.bf16.mxu1 %v11302_v43  ;;  %v11366_v57 = vld [vmem:[#allocation9 + $0xd48] ss:$16 sps:$4 sm:$0xff]   ;;  %v11371_v43 = vld [vmem:[#allocation9 + $0xd64] ss:$16 sps:$4 sm:$0xff]  }
 0x552   : > { %8333 = vmatpush1.bf16.msra.mxu0 %v11297_v31  ;;  %8661 = vmatpush1.bf16.msra.mxu1 %v11300_v32  ;;  %v11372_v31 = vld [vmem:[#allocation9 + $0xd68] ss:$16 sps:$4 sm:$0xff]   ;;  %v11377_v32 = vld [vmem:[#allocation9 + $0xd84] ss:$16 sps:$4 sm:$0xff]  }
 0x553   : > { %8343 = vmatprep.subr.bf16.mxu0 %v11305_v38  ;;  %8671 = vmatprep.subr.bf16.mxu1 %v11308_v33  ;;  %v11380_v38 = vld [vmem:[#allocation9 + $0xd8c] ss:$16 sps:$4 sm:$0xff]   ;;  %v11375_v33 = vld [vmem:[#allocation9 + $0xd80] ss:$16 sps:$4 sm:$0xff]  }
 0x555   : > { %8335 = vmatmul.mubr.bf16.vlgmr.msra.gmra.mrb[0].mxu0 %v5019_v34  ;;  %8663 = vmatmul.mubr.bf16.vlgmr.msra.gmra.mrb[0].mxu1 %v5019_v34  ;;  %v11383_v34 = vld [vmem:[#allocation9 + $0xda4] ss:$16 sps:$4 sm:$0xff]  }
 0x556   : > { %8344 = vmatpush1.bf16.msra.mxu0 %v11303_v49  ;;  %8672 = vmatpush1.bf16.msra.mxu1 %v11306_v54  ;;  %v11386_v49 = vld [vmem:[#allocation9 + $0xdac] ss:$16 sps:$4 sm:$0xff]   ;;  %v11577_v54 = vld [vmem:[#allocation2 + $0x60] sm:$0xff] }
 0x557   : > { %8345 = vmatprep.subr.bf16.mxu0 %v11311_v46  ;;  %8673 = vmatprep.subr.bf16.mxu1 %v11314_v58  ;;  %v4891_v46 = vmul.f32 %v11577_v54, %v13028_v5  ;;  %v4948_v58 = vrot.slane %v13061_v19, %v12863_v14  ;;  %v11387_v5 = vld [vmem:[#allocation9 + $0xdc0] ss:$16 sps:$4 sm:$0xff]   ;;  %v11395_v14 = vld [vmem:[#allocation9 + $0xde4] ss:$16 sps:$4 sm:$0xff]  }
 0x558   : > { %8375 = vmatprep.mubr.bf16.mxu0 %v5022_v47  ;;  %8703 = vmatprep.mubr.bf16.mxu1 %v5022_v47  ;;  %v11381_v47 = vld [vmem:[#allocation9 + $0xda0] ss:$16 sps:$4 sm:$0xff]  }
 0x559   : > { %v11447_v54 = vld [vmem:[#allocation9 + $0xf00] ss:$16 sps:$4 sm:$0xff]  }
 0x55a   : > { %8346 = vmatpush1.bf16.msra.mxu0 %v11309_v26  ;;  %8674 = vmatpush1.bf16.msra.mxu1 %v11312_v10  ;;  %v11384_v26 = vld [vmem:[#allocation9 + $0xda8] ss:$16 sps:$4 sm:$0xff]   ;;  %v11389_v10 = vld [vmem:[#allocation9 + $0xdc4] ss:$16 sps:$4 sm:$0xff]  }
 0x55b   : > { %8347 = vmatprep.subr.bf16.mxu0 %v11317_v61  ;;  %8675 = vmatprep.subr.bf16.mxu1 %v11320_v51  ;;  %v11392_v61 = vld [vmem:[#allocation9 + $0xdcc] ss:$16 sps:$4 sm:$0xff]  }
 0x55c   : > { %v11578_v51 = vld [vmem:[#allocation2 + $0x78] sm:$0xff] }
 0x55e   : > { %8348 = vmatpush1.bf16.msra.mxu0 %v11315_v0  ;;  %8676 = vmatpush1.bf16.msra.mxu1 %v11318_v62  ;;  %v4894_v0 = vmul.f32 %v11578_v51, %v13037_v9  ;;  %v4960_v62 = vrot.slane %v13061_v19, %v12869_v18  ;;  %v11401_v9 = vld [vmem:[#allocation9 + $0xe04] ss:$16 sps:$4 sm:$0xff]   ;;  %v11464_v51 = vld [vmem:[#allocation9 + $0xf4c] ss:$16 sps:$4 sm:$0xff]  }
 0x55f   : > { %8349 = vmatprep.subr.bf16.mxu0 %v11323_v1  ;;  %8677 = vmatprep.subr.bf16.mxu1 %v11326_v17  ;;  %v4989_v1 = vadd.f32 %v4948_v58, %v4891_v46  ;;  %v11390_v17 = vld [vmem:[#allocation9 + $0xdc8] ss:$16 sps:$4 sm:$0xff]   ;;  %v11455_v58 = vld [vmem:[#allocation9 + $0xf24] ss:$16 sps:$4 sm:$0xff]  }
 0x560   : > { %v11450_v46 = vld [vmem:[#allocation9 + $0xf08] ss:$16 sps:$4 sm:$0xff]  }
 0x562   : > { %8350 = vmatpush1.bf16.msra.mxu0 %v11321_v63  ;;  %8678 = vmatpush1.bf16.msra.mxu1 %v11324_v6  ;;  %v11398_v63 = vld [vmem:[#allocation9 + $0xdec] ss:$16 sps:$4 sm:$0xff]   ;;  %v4992_v6 = vadd.f32 %v4960_v62, %v4894_v0  ;;  %v11459_v0 = vld [vmem:[#allocation9 + $0xf40] ss:$16 sps:$4 sm:$0xff]   ;;  %v11462_v62 = vld [vmem:[#allocation9 + $0xf48] ss:$16 sps:$4 sm:$0xff]  }
 0x563   : > { %8351 = vmatprep.subr.bf16.mxu0 %v11329_v2  ;;  %8679 = vmatprep.subr.bf16.mxu1 %v11332_v44  ;;  %v5005_v2 = vmax.f32 %v4989_v1, 0.0  ;;  %v11393_v44 = vld [vmem:[#allocation9 + $0xde0] ss:$16 sps:$4 sm:$0xff]   ;;  %v11467_v1 = vld [vmem:[#allocation9 + $0xf64] ss:$16 sps:$4 sm:$0xff]  }
 0x564   : > { %v5008_v18 = vmax.f32 %v4992_v6, 0.0  ;;  %v11476_v6 = vld [vmem:[#allocation9 + $0xf8c] ss:$16 sps:$4 sm:$0xff]  }
 0x566   : > { %8352 = vmatpush1.bf16.msra.mxu0 %v11327_v37  ;;  %8680 = vmatpush1.bf16.msra.mxu1 %v11330_v35  ;;  %v11396_v37 = vld [vmem:[#allocation9 + $0xde8] ss:$16 sps:$4 sm:$0xff]   ;;  %v11404_v35 = vld [vmem:[#allocation9 + $0xe0c] ss:$16 sps:$4 sm:$0xff]  }
 0x567   : > { %8353 = vmatprep.subr.bf16.mxu0 %v11335_v59  ;;  %8681 = vmatprep.subr.bf16.mxu1 %v11338_v20  ;;  %v5021_v59 = vpack.c.bf16 %v5005_v2, %v5005_v2  ;;  %v11399_v20 = vld [vmem:[#allocation9 + $0xe00] ss:$16 sps:$4 sm:$0xff]  }
 0x568   : > { %v11471_v2 = vld [vmem:[#allocation9 + $0xf80] ss:$16 sps:$4 sm:$0xff]  }
 0x56a   : > { %8354 = vmatpush1.bf16.msra.mxu0 %v11333_v4  ;;  %8682 = vmatpush1.bf16.msra.mxu1 %v11336_v21  ;;  %v11402_v4 = vld [vmem:[#allocation9 + $0xe08] ss:$16 sps:$4 sm:$0xff]   ;;  %v11407_v21 = vld [vmem:[#allocation9 + $0xe24] ss:$16 sps:$4 sm:$0xff]  }
 0x56b   : > { %8355 = vmatprep.subr.bf16.mxu0 %v11341_v8  ;;  %8683 = vmatprep.subr.bf16.mxu1 %v11344_v30  ;;  %v11410_v8 = vld [vmem:[#allocation9 + $0xe2c] ss:$16 sps:$4 sm:$0xff]   ;;  %v5024_v30 = vpack.c.bf16 %v5008_v18, %v5008_v18 }
 0x56e   : > { %8356 = vmatpush1.bf16.msra.mxu0 %v11339_v48  ;;  %8684 = vmatpush1.bf16.msra.mxu1 %v11342_v42  ;;  %v11405_v48 = vld [vmem:[#allocation9 + $0xe20] ss:$16 sps:$4 sm:$0xff]   ;;  %v11408_v42 = vld [vmem:[#allocation9 + $0xe28] ss:$16 sps:$4 sm:$0xff]  }
 0x56f   : > { %8357 = vmatprep.subr.bf16.mxu0 %v11347_v22  ;;  %8685 = vmatprep.subr.bf16.mxu1 %v11350_v36  ;;  %v11413_v22 = vld [vmem:[#allocation9 + $0xe44] ss:$16 sps:$4 sm:$0xff]   ;;  %v11416_v36 = vld [vmem:[#allocation9 + $0xe4c] ss:$16 sps:$4 sm:$0xff]  }
 0x572   : > { %8358 = vmatpush1.bf16.msra.mxu0 %v11345_v53  ;;  %8686 = vmatpush1.bf16.msra.mxu1 %v11348_v41  ;;  %v11411_v53 = vld [vmem:[#allocation9 + $0xe40] ss:$16 sps:$4 sm:$0xff]   ;;  %v11414_v41 = vld [vmem:[#allocation9 + $0xe48] ss:$16 sps:$4 sm:$0xff]  }
 0x573   : > { %8359 = vmatprep.subr.bf16.mxu0 %v11353_v40  ;;  %8687 = vmatprep.subr.bf16.mxu1 %v11356_v27  ;;  %v11419_v40 = vld [vmem:[#allocation9 + $0xe64] ss:$16 sps:$4 sm:$0xff]   ;;  %v11422_v27 = vld [vmem:[#allocation9 + $0xe6c] ss:$16 sps:$4 sm:$0xff]  }
 0x576   : > { %8360 = vmatpush1.bf16.msra.mxu0 %v11351_v25  ;;  %8688 = vmatpush1.bf16.msra.mxu1 %v11354_v39  ;;  %v11417_v25 = vld [vmem:[#allocation9 + $0xe60] ss:$16 sps:$4 sm:$0xff]   ;;  %v11420_v39 = vld [vmem:[#allocation9 + $0xe68] ss:$16 sps:$4 sm:$0xff]  }
 0x577   : > { %8361 = vmatprep.subr.bf16.mxu0 %v11359_v56  ;;  %8689 = vmatprep.subr.bf16.mxu1 %v11362_v28  ;;  %v11425_v56 = vld [vmem:[#allocation9 + $0xe84] ss:$16 sps:$4 sm:$0xff]   ;;  %v11428_v28 = vld [vmem:[#allocation9 + $0xe8c] ss:$16 sps:$4 sm:$0xff]  }
 0x57a   : > { %8362 = vmatpush1.bf16.msra.mxu0 %v11357_v11  ;;  %8690 = vmatpush1.bf16.msra.mxu1 %v11360_v55  ;;  %v11423_v11 = vld [vmem:[#allocation9 + $0xe80] ss:$16 sps:$4 sm:$0xff]   ;;  %v11426_v55 = vld [vmem:[#allocation9 + $0xe88] ss:$16 sps:$4 sm:$0xff]  }
 0x57b   : > { %8363 = vmatprep.subr.bf16.mxu0 %v11365_v23  ;;  %8691 = vmatprep.subr.bf16.mxu1 %v11368_v3  ;;  %v11431_v23 = vld [vmem:[#allocation9 + $0xea4] ss:$16 sps:$4 sm:$0xff]   ;;  %v11434_v3 = vld [vmem:[#allocation9 + $0xeac] ss:$16 sps:$4 sm:$0xff]  }
 0x57e   : > { %8364 = vmatpush1.bf16.msra.mxu0 %v11363_v45  ;;  %8692 = vmatpush1.bf16.msra.mxu1 %v11366_v57  ;;  %v11429_v45 = vld [vmem:[#allocation9 + $0xea0] ss:$16 sps:$4 sm:$0xff]   ;;  %v11432_v57 = vld [vmem:[#allocation9 + $0xea8] ss:$16 sps:$4 sm:$0xff]  }
 0x57f   : > { %8365 = vmatprep.subr.bf16.mxu0 %v11371_v43  ;;  %8693 = vmatprep.subr.bf16.mxu1 %v11374_v29  ;;  %v11437_v43 = vld [vmem:[#allocation9 + $0xec4] ss:$16 sps:$4 sm:$0xff]   ;;  %v11440_v29 = vld [vmem:[#allocation9 + $0xecc] ss:$16 sps:$4 sm:$0xff]  }
 0x582   : > { %8366 = vmatpush1.bf16.msra.mxu0 %v11369_v24  ;;  %8694 = vmatpush1.bf16.msra.mxu1 %v11372_v31  ;;  %v11435_v24 = vld [vmem:[#allocation9 + $0xec0] ss:$16 sps:$4 sm:$0xff]   ;;  %v11438_v31 = vld [vmem:[#allocation9 + $0xec8] ss:$16 sps:$4 sm:$0xff]  }
 0x583   : > { %8367 = vmatprep.subr.bf16.mxu0 %v11377_v32  ;;  %8695 = vmatprep.subr.bf16.mxu1 %v11380_v38  ;;  %v11443_v32 = vld [vmem:[#allocation9 + $0xee4] ss:$16 sps:$4 sm:$0xff]   ;;  %v11446_v38 = vld [vmem:[#allocation9 + $0xeec] ss:$16 sps:$4 sm:$0xff]  }
 0x586   : > { %8368 = vmatpush1.bf16.msra.mxu0 %v11375_v33  ;;  %8696 = vmatpush1.bf16.msra.mxu1 %v11378_v15  ;;  %v11441_v33 = vld [vmem:[#allocation9 + $0xee0] ss:$16 sps:$4 sm:$0xff]   ;;  %v11444_v15 = vld [vmem:[#allocation9 + $0xee8] ss:$16 sps:$4 sm:$0xff]  }
 0x587   : > { %8369 = vmatprep.subr.bf16.mxu0 %v11383_v34  ;;  %8697 = vmatprep.subr.bf16.mxu1 %v11386_v49  ;;  %v11449_v34 = vld [vmem:[#allocation9 + $0xf04] ss:$16 sps:$4 sm:$0xff]   ;;  %v11452_v49 = vld [vmem:[#allocation9 + $0xf0c] ss:$16 sps:$4 sm:$0xff]  }
 0x58a   : > { %8370 = vmatpush1.bf16.msra.mxu0 %v11381_v47  ;;  %8698 = vmatpush1.bf16.msra.mxu1 %v11384_v26  ;;  %v11458_v47 = vld [vmem:[#allocation9 + $0xf2c] ss:$16 sps:$4 sm:$0xff]   ;;  %v11453_v26 = vld [vmem:[#allocation9 + $0xf20] ss:$16 sps:$4 sm:$0xff]  }
 0x58b   : > { %8371 = vmatprep.subr.bf16.mxu0 %v11389_v10  ;;  %8699 = vmatprep.subr.bf16.mxu1 %v11392_v61  ;;  %v11456_v10 = vld [vmem:[#allocation9 + $0xf28] ss:$16 sps:$4 sm:$0xff]   ;;  %v11461_v61 = vld [vmem:[#allocation9 + $0xf44] ss:$16 sps:$4 sm:$0xff]  }
 0x58e   : > { %8372 = vmatpush1.bf16.msra.mxu0 %v11387_v5  ;;  %8700 = vmatpush1.bf16.msra.mxu1 %v11390_v17  ;;  %v11470_v5 = vld [vmem:[#allocation9 + $0xf6c] ss:$16 sps:$4 sm:$0xff]   ;;  %v11465_v17 = vld [vmem:[#allocation9 + $0xf60] ss:$16 sps:$4 sm:$0xff]  }
 0x58f   : > { %8373 = vmatprep.subr.bf16.mxu0 %v11395_v14  ;;  %8701 = vmatprep.subr.bf16.mxu1 %v11398_v63  ;;  %v11468_v14 = vld [vmem:[#allocation9 + $0xf68] ss:$16 sps:$4 sm:$0xff]   ;;  %v11473_v63 = vld [vmem:[#allocation9 + $0xf84] ss:$16 sps:$4 sm:$0xff]  }
 0x592   : > { %8374 = vmatpush1.bf16.msra.mxu0 %v11393_v44  ;;  %8702 = vmatpush1.bf16.msra.mxu1 %v11396_v37  ;;  %v11474_v44 = vld [vmem:[#allocation9 + $0xf88] ss:$16 sps:$4 sm:$0xff]   ;;  %v11479_v37 = vld [vmem:[#allocation9 + $0xfa4] ss:$16 sps:$4 sm:$0xff]  }
 0x593   : > { %8384 = vmatprep.subr.bf16.mxu0 %v11401_v9  ;;  %8712 = vmatprep.subr.bf16.mxu1 %v11404_v35  ;;  %v11482_v9 = vld [vmem:[#allocation9 + $0xfac] ss:$16 sps:$4 sm:$0xff]   ;;  %v11579_v35 = vld [vmem:[#allocation2 + $0x70] sm:$0xff] }
 0x594   : > { %v4893_v18 = vmul.f32 %v11579_v35, %v13034_v7  ;;  %v11494_v7 = vld [vmem:[#allocation9 + $0xfec] ss:$16 sps:$4 sm:$0xff]  }
 0x595   : > { %8376 = vmatmul.mubr.bf16.vlgmr.msra.gmra.mrb[0].mxu0 %v5021_v59  ;;  %8704 = vmatmul.mubr.bf16.vlgmr.msra.gmra.mrb[0].mxu1 %v5021_v59  ;;  %v4956_v59 = vrot.slane %v13061_v19, %v12867_v16  ;;  %v11489_v16 = vld [vmem:[#allocation9 + $0xfe0] ss:$16 sps:$4 sm:$0xff]   ;;  %v11492_v19 = vld [vmem:[#allocation9 + $0xfe8] ss:$16 sps:$4 sm:$0xff]  }
 0x596   : > { %8385 = vmatpush1.bf16.msra.mxu0 %v11399_v20  ;;  %8713 = vmatpush1.bf16.msra.mxu1 %v11402_v4  ;;  %v11477_v20 = vld [vmem:[#allocation9 + $0xfa0] ss:$16 sps:$4 sm:$0xff]   ;;  %v11480_v4 = vld [vmem:[#allocation9 + $0xfa8] ss:$16 sps:$4 sm:$0xff]  }
 0x597   : > { %8386 = vmatprep.subr.bf16.mxu0 %v11407_v21  ;;  %8714 = vmatprep.subr.bf16.mxu1 %v11410_v8  ;;  %v11485_v21 = vld [vmem:[#allocation9 + $0xfc4] ss:$16 sps:$4 sm:$0xff]   ;;  %v11488_v8 = vld [vmem:[#allocation9 + $0xfcc] ss:$16 sps:$4 sm:$0xff]  }
 0x598   : > { %8416 = vmatprep.mubr.bf16.mxu0 %v5024_v30  ;;  %8744 = vmatprep.mubr.bf16.mxu1 %v5024_v30  ;;  %v4991_v30 = vadd.f32 %v4956_v59, %v4893_v18 }
 0x59a   : > { %8387 = vmatpush1.bf16.msra.mxu0 %v11405_v48  ;;  %8715 = vmatpush1.bf16.msra.mxu1 %v11408_v42  ;;  %v11483_v48 = vld [vmem:[#allocation9 + $0xfc0] ss:$16 sps:$4 sm:$0xff]   ;;  %v11486_v42 = vld [vmem:[#allocation9 + $0xfc8] ss:$16 sps:$4 sm:$0xff]  }
 0x59b   : > { %8388 = vmatprep.subr.bf16.mxu0 %v11413_v22  ;;  %8716 = vmatprep.subr.bf16.mxu1 %v11416_v36  ;;  %v11491_v22 = vld [vmem:[#allocation9 + $0xfe4] ss:$16 sps:$4 sm:$0xff]   ;;  %v5007_v36 = vmax.f32 %v4991_v30, 0.0 }
 0x59e   : > { %8389 = vmatpush1.bf16.msra.mxu0 %v11411_v53  ;;  %8717 = vmatpush1.bf16.msra.mxu1 %v11414_v41  ;;  %v5023_v53 = vpack.c.bf16 %v5007_v36, %v5007_v36  ;;  %v11495_v41 = vld [vmem:[#allocation12 + $0x40] sm:$0xff]  }
 0x59f   : > { %8390 = vmatprep.subr.bf16.mxu0 %v11419_v40  ;;  %8718 = vmatprep.subr.bf16.mxu1 %v11422_v27  ;;  %v11496_v40 = vld [vmem:[#allocation12 + $0xc0] sm:$0xff]  }
 0x5a0   : > { %v11497_v27 = vld [vmem:[#allocation12] sm:$0xff]  }
 0x5a2   : > { %8391 = vmatpush1.bf16.msra.mxu0 %v11417_v25  ;;  %8719 = vmatpush1.bf16.msra.mxu1 %v11420_v39  ;;  %v11498_v25 = vld [vmem:[#allocation12 + $0x80] sm:$0xff]   ;;  %v11499_v39 = vld [vmem:[#allocation12 + $0x48] sm:$0xff]  }
 0x5a3   : > { %8392 = vmatprep.subr.bf16.mxu0 %v11425_v56  ;;  %8720 = vmatprep.subr.bf16.mxu1 %v11428_v28  ;;  %v11500_v56 = vld [vmem:[#allocation12 + $0xc8] sm:$0xff]  }
 0x5a4   : > { %v11501_v28 = vld [vmem:[#allocation12 + $0x8] sm:$0xff]  }
 0x5a6   : > { %8393 = vmatpush1.bf16.msra.mxu0 %v11423_v11  ;;  %8721 = vmatpush1.bf16.msra.mxu1 %v11426_v55  ;;  %v11502_v11 = vld [vmem:[#allocation12 + $0x88] sm:$0xff]   ;;  %v11503_v55 = vld [vmem:[#allocation12 + $0x50] sm:$0xff]  }
 0x5a7   : > { %8394 = vmatprep.subr.bf16.mxu0 %v11431_v23  ;;  %8722 = vmatprep.subr.bf16.mxu1 %v11434_v3  ;;  %v11504_v23 = vld [vmem:[#allocation12 + $0xd0] sm:$0xff]  }
 0x5a8   : > { %v11505_v3 = vld [vmem:[#allocation12 + $0x10] sm:$0xff]  }
 0x5aa   : > { %8395 = vmatpush1.bf16.msra.mxu0 %v11429_v45  ;;  %8723 = vmatpush1.bf16.msra.mxu1 %v11432_v57  ;;  %v11506_v45 = vld [vmem:[#allocation12 + $0x90] sm:$0xff]   ;;  %v11507_v57 = vld [vmem:[#allocation12 + $0x58] sm:$0xff]  }
 0x5ab   : > { %8396 = vmatprep.subr.bf16.mxu0 %v11437_v43  ;;  %8724 = vmatprep.subr.bf16.mxu1 %v11440_v29  ;;  %v11508_v43 = vld [vmem:[#allocation12 + $0xd8] sm:$0xff]  }
 0x5ac   : > { %v11509_v29 = vld [vmem:[#allocation12 + $0x18] sm:$0xff]  }
 0x5ae   : > { %8397 = vmatpush1.bf16.msra.mxu0 %v11435_v24  ;;  %8725 = vmatpush1.bf16.msra.mxu1 %v11438_v31  ;;  %v11510_v24 = vld [vmem:[#allocation12 + $0x98] sm:$0xff]   ;;  %v11511_v31 = vld [vmem:[#allocation12 + $0x60] sm:$0xff]  }
 0x5af   : > { %8398 = vmatprep.subr.bf16.mxu0 %v11443_v32  ;;  %8726 = vmatprep.subr.bf16.mxu1 %v11446_v38  ;;  %v11512_v32 = vld [vmem:[#allocation12 + $0xe0] sm:$0xff]  }
 0x5b0   : > { %v11513_v38 = vld [vmem:[#allocation12 + $0x20] sm:$0xff]  }
 0x5b2   : > { %8399 = vmatpush1.bf16.msra.mxu0 %v11441_v33  ;;  %8727 = vmatpush1.bf16.msra.mxu1 %v11444_v15  ;;  %v11514_v33 = vld [vmem:[#allocation12 + $0xa0] sm:$0xff]   ;;  %v11515_v15 = vld [vmem:[#allocation12 + $0x68] sm:$0xff]  }
 0x5b3   : > { %8400 = vmatprep.subr.bf16.mxu0 %v11449_v34  ;;  %8728 = vmatprep.subr.bf16.mxu1 %v11452_v49  ;;  %v11516_v34 = vld [vmem:[#allocation12 + $0xe8] sm:$0xff]  }
 0x5b4   : > { %v11517_v49 = vld [vmem:[#allocation12 + $0x28] sm:$0xff]  }
 0x5b6   : > { %8401 = vmatpush1.bf16.msra.mxu0 %v11447_v54  ;;  %8729 = vmatpush1.bf16.msra.mxu1 %v11450_v46  ;;  %v11518_v54 = vld [vmem:[#allocation12 + $0xa8] sm:$0xff]   ;;  %v11519_v46 = vld [vmem:[#allocation12 + $0x70] sm:$0xff]  }
 0x5b7   : > { %8402 = vmatprep.subr.bf16.mxu0 %v11455_v58  ;;  %8730 = vmatprep.subr.bf16.mxu1 %v11458_v47  ;;  %v11520_v58 = vld [vmem:[#allocation12 + $0xf0] sm:$0xff]  }
 0x5b8   : > { %v11521_v47 = vld [vmem:[#allocation12 + $0x30] sm:$0xff]  }
 0x5ba   : > { %8403 = vmatpush1.bf16.msra.mxu0 %v11453_v26  ;;  %8731 = vmatpush1.bf16.msra.mxu1 %v11456_v10  ;;  %v11522_v26 = vld [vmem:[#allocation12 + $0xb0] sm:$0xff]   ;;  %v11523_v10 = vld [vmem:[#allocation12 + $0x78] sm:$0xff]  }
 0x5bb   : > { %8404 = vmatprep.subr.bf16.mxu0 %v11461_v61  ;;  %8732 = vmatprep.subr.bf16.mxu1 %v11464_v51  ;;  %v11524_v61 = vld [vmem:[#allocation12 + $0xf8] sm:$0xff]  }
 0x5bc   : > { %v11525_v51 = vld [vmem:[#allocation12 + $0x38] sm:$0xff]  }
 0x5be   : > { %8405 = vmatpush1.bf16.msra.mxu0 %v11459_v0  ;;  %8733 = vmatpush1.bf16.msra.mxu1 %v11462_v62  ;;  %v11526_v0 = vld [vmem:[#allocation12 + $0xb8] sm:$0xff]  }
 0x5bf   : > { %8406 = vmatprep.subr.bf16.mxu0 %v11467_v1  ;;  %8734 = vmatprep.subr.bf16.mxu1 %v11470_v5 }
 0x5c2   : > { %8407 = vmatpush1.bf16.msra.mxu0 %v11465_v17  ;;  %8735 = vmatpush1.bf16.msra.mxu1 %v11468_v14 }
 0x5c3   : > { %8408 = vmatprep.subr.bf16.mxu0 %v11473_v63  ;;  %8736 = vmatprep.subr.bf16.mxu1 %v11476_v6 }
 0x5c6   : > { %8409 = vmatpush1.bf16.msra.mxu0 %v11471_v2  ;;  %8737 = vmatpush1.bf16.msra.mxu1 %v11474_v44 }
 0x5c7   : > { %8410 = vmatprep.subr.bf16.mxu0 %v11479_v37  ;;  %8738 = vmatprep.subr.bf16.mxu1 %v11482_v9 }
 0x5ca   : > { %8411 = vmatpush1.bf16.msra.mxu0 %v11477_v20  ;;  %8739 = vmatpush1.bf16.msra.mxu1 %v11480_v4 }
 0x5cb   : > { %8412 = vmatprep.subr.bf16.mxu0 %v11485_v21  ;;  %8740 = vmatprep.subr.bf16.mxu1 %v11488_v8 }
 0x5ce   : > { %8413 = vmatpush1.bf16.msra.mxu0 %v11483_v48  ;;  %8741 = vmatpush1.bf16.msra.mxu1 %v11486_v42 }
 0x5cf   : > { %8414 = vmatprep.subr.bf16.mxu0 %v11491_v22  ;;  %8742 = vmatprep.subr.bf16.mxu1 %v11494_v7 }
 0x5d2   : > { %8415 = vmatpush1.bf16.msra.mxu0 %v11489_v16  ;;  %8743 = vmatpush1.bf16.msra.mxu1 %v11492_v19 }
 0x5d3   : > { %10518 = vmatprep.subr.bf16.mxu0 %v11495_v41  ;;  %10540 = vmatprep.subr.bf16.mxu1 %v11496_v40 }
 0x5d5   : > { %8417 = vmatmul.mubr.bf16.vlgmr.msra.gmra.mrb[0].mxu0 %v5023_v53  ;;  %8745 = vmatmul.mubr.bf16.vlgmr.msra.gmra.mrb[0].mxu1 %v5023_v53 }
 0x5d6   : > { %10519 = vmatpush3.bf16.msra.mxu0 %v11497_v27  ;;  %10541 = vmatpush3.bf16.msra.mxu1 %v11498_v25 }
 0x5d7   : > { %10520 = vmatprep.subr.bf16.mxu0 %v11499_v39  ;;  %10542 = vmatprep.subr.bf16.mxu1 %v11500_v56 }
 0x5da   : > { %10521 = vmatpush3.bf16.msra.mxu0 %v11501_v28  ;;  %10543 = vmatpush3.bf16.msra.mxu1 %v11502_v11 }
 0x5db   : > { %10522 = vmatprep.subr.bf16.mxu0 %v11503_v55  ;;  %10544 = vmatprep.subr.bf16.mxu1 %v11504_v23 }
 0x5de   : > { %10523 = vmatpush3.bf16.msra.mxu0 %v11505_v3  ;;  %10545 = vmatpush3.bf16.msra.mxu1 %v11506_v45 }
 0x5df   : > { %10524 = vmatprep.subr.bf16.mxu0 %v11507_v57  ;;  %10546 = vmatprep.subr.bf16.mxu1 %v11508_v43 }
 0x5e2   : > { %10525 = vmatpush3.bf16.msra.mxu0 %v11509_v29  ;;  %10547 = vmatpush3.bf16.msra.mxu1 %v11510_v24 }
 0x5e3   : > { %10526 = vmatprep.subr.bf16.mxu0 %v11511_v31  ;;  %10548 = vmatprep.subr.bf16.mxu1 %v11512_v32 }
 0x5e6   : > { %10527 = vmatpush3.bf16.msra.mxu0 %v11513_v38  ;;  %10549 = vmatpush3.bf16.msra.mxu1 %v11514_v33 }
 0x5e7   : > { %10528 = vmatprep.subr.bf16.mxu0 %v11515_v15  ;;  %10550 = vmatprep.subr.bf16.mxu1 %v11516_v34 }
 0x5ea   : > { %10529 = vmatpush3.bf16.msra.mxu0 %v11517_v49  ;;  %10551 = vmatpush3.bf16.msra.mxu1 %v11518_v54 }
 0x5eb   : > { %10530 = vmatprep.subr.bf16.mxu0 %v11519_v46  ;;  %10552 = vmatprep.subr.bf16.mxu1 %v11520_v58 }
 0x5ee   : > { %10531 = vmatpush3.bf16.msra.mxu0 %v11521_v47  ;;  %10553 = vmatpush3.bf16.msra.mxu1 %v11522_v26 }
 0x5ef   : > { %10532 = vmatprep.subr.bf16.mxu0 %v11523_v10  ;;  %10554 = vmatprep.subr.bf16.mxu1 %v11524_v61 }
 0x5f2   : > { %10533 = vmatpush3.bf16.msra.mxu0 %v11525_v51  ;;  %10555 = vmatpush3.bf16.msra.mxu1 %v11526_v0 }
 0x6a8   : > { %v13090_v62 = vpop.f32.mrb[0].mxu0  ;;  %v13092_v1 = vpop.f32.mrb[0].mxu1 }
 0x6a9   : > { %v8753_v5 = vrot.slane %v13090_v62, 4  ;;  %v8781_v17 = vmul.f32 %v13090_v62, %v13090_v62  ;;  %v8765_v14 = vrot.slane %v13092_v1, 4  ;;  %v8783_v63 = vmul.f32 %v13092_v1, %v13092_v1  ;;  %v13100_v6 = vpop.f32.mrb[1].mxu0  ;;  %v13102_v2 = vpop.f32.mrb[1].mxu1 }
 0x6aa   : > { %v8759_v44 = vrot.slane %v13100_v6, 4  ;;  %v8782_v37 = vmul.f32 %v13100_v6, %v13100_v6  ;;  %v8771_v9 = vrot.slane %v13102_v2, 4  ;;  %v8784_v35 = vmul.f32 %v13102_v2, %v13102_v2  ;;  %v8422_v18 = vpop.f32.mrb[2].mxu0  ;;  %v8750_v59 = vpop.f32.mrb[2].mxu1 }
 0x6ab   : > { %v8754_v20 = vadd.f32 %v8753_v5, %v13090_v62  ;;  %v8785_v4 = vrot.slane %v8781_v17, 4  ;;  %v8766_v21 = vadd.f32 %v8765_v14, %v13092_v1  ;;  %v8797_v8 = vrot.slane %v8783_v63, 4  ;;  %v8423_v30 = vpop.f32.mrb[3].mxu0  ;;  %v8751_v48 = vpop.f32.mrb[3].mxu1 }
 0x6ac   : > { %v8760_v42 = vadd.f32 %v8759_v44, %v13100_v6  ;;  %v8791_v22 = vrot.slane %v8782_v37, 4  ;;  %v8772_v7 = vadd.f32 %v8771_v9, %v13102_v2  ;;  %v8803_v36 = vrot.slane %v8784_v35, 4 }
 0x6ad   : > { %v8755_v16 = vrot.slane %v8754_v20, 2  ;;  %v8786_v19 = vadd.f32 %v8785_v4, %v8781_v17  ;;  %v8767_v53 = vrot.slane %v8766_v21, 2  ;;  %v8798_v41 = vadd.f32 %v8797_v8, %v8783_v63 }
 0x6ae   : > { %v8761_v40 = vrot.slane %v8760_v42, 2  ;;  %v8792_v27 = vadd.f32 %v8791_v22, %v8782_v37  ;;  %v8773_v25 = vrot.slane %v8772_v7, 2  ;;  %v8804_v39 = vadd.f32 %v8803_v36, %v8784_v35 }
 0x6af   : > { %v8756_v56 = vadd.f32 %v8755_v16, %v8754_v20  ;;  %v8787_v28 = vrot.slane %v8786_v19, 2  ;;  %v8768_v11 = vadd.f32 %v8767_v53, %v8766_v21  ;;  %v8799_v55 = vrot.slane %v8798_v41, 2 }
 0x6b0   : > { %v8762_v23 = vadd.f32 %v8761_v40, %v8760_v42  ;;  %v8793_v3 = vrot.slane %v8792_v27, 2  ;;  %v8774_v45 = vadd.f32 %v8773_v25, %v8772_v7  ;;  %v8805_v57 = vrot.slane %v8804_v39, 2 }
 0x6b1   : > { %v8757_v43 = vrot.slane %v8756_v56, 1  ;;  %v8788_v29 = vadd.f32 %v8787_v28, %v8786_v19  ;;  %v8769_v24 = vrot.slane %v8768_v11, 1  ;;  %v8800_v31 = vadd.f32 %v8799_v55, %v8798_v41 }
 0x6b2   : > { %v8763_v32 = vrot.slane %v8762_v23, 1  ;;  %v8794_v38 = vadd.f32 %v8793_v3, %v8792_v27  ;;  %v8775_v33 = vrot.slane %v8774_v45, 1  ;;  %v8806_v15 = vadd.f32 %v8805_v57, %v8804_v39 }
 0x6b3   : > { %v8758_v34 = vadd.f32 %v8757_v43, %v8756_v56  ;;  %v8789_v49 = vrot.slane %v8788_v29, 1  ;;  %v8770_v54 = vadd.f32 %v8769_v24, %v8768_v11  ;;  %v8801_v46 = vrot.slane %v8800_v31, 1 }
 0x6b4   : > { %v8764_v58 = vadd.f32 %v8763_v32, %v8762_v23  ;;  %v8795_v47 = vrot.slane %v8794_v38, 1  ;;  %v8776_v26 = vadd.f32 %v8775_v33, %v8774_v45  ;;  %v8807_v10 = vrot.slane %v8806_v15, 1  ;;  %v8825_v45 = vld [vmem:[#allocation11] ss:$2 sm:$0xf] }
 0x6b5   : > { %v8777_v61 = vmul.f32 0.125, %v8758_v34  ;;  %v8790_v51 = vadd.f32 %v8789_v49, %v8788_v29  ;;  %v8779_v0 = vmul.f32 0.125, %v8770_v54  ;;  %v8802_v5 = vadd.f32 %v8801_v46, %v8800_v31 }
 0x6b6   : > { %v8778_v17 = vmul.f32 0.125, %v8764_v58  ;;  %v8796_v14 = vadd.f32 %v8795_v47, %v8794_v38  ;;  %v8780_v63 = vmul.f32 0.125, %v8776_v26  ;;  %v8808_v44 = vadd.f32 %v8807_v10, %v8806_v15 }
 0x6b7   : > { %v8809_v37 = vmul.f32 0.125, %v8790_v51  ;;  %v8813_v9 = vmul.f32 %v8777_v61, %v8777_v61  ;;  %v8811_v35 = vmul.f32 0.125, %v8802_v5  ;;  %v8815_v18 = vmul.f32 %v8779_v0, %v8779_v0 }
 0x6b8   : > { %v8810_v59 = vmul.f32 0.125, %v8796_v14  ;;  %v8814_v20 = vmul.f32 %v8778_v17, %v8778_v17  ;;  %v8812_v4 = vmul.f32 0.125, %v8808_v44  ;;  %v8816_v21 = vmul.f32 %v8780_v63, %v8780_v63  ;;  %v8865_v14 = vld [vmem:[#allocation11 + $0x1] ss:$2 sm:$0xf] }
 0x6b9   : > { %v8817_v8 = vsub.f32 %v8809_v37, %v8813_v9  ;;  %v8819_v30 = vsub.f32 %v8811_v35, %v8815_v18 }
 0x6ba   : > { %v8818_v48 = vsub.f32 %v8810_v59, %v8814_v20  ;;  %v8820_v42 = vsub.f32 %v8812_v4, %v8816_v21 }
 0x6bb   : > { %v8821_v22 = vmax.f32 %v8817_v8, 0.0  ;;  %v8823_v7 = vmax.f32 %v8819_v30, 0.0 }
 0x6bc   : > { %v8822_v36 = vmax.f32 %v8818_v48, 0.0  ;;  %v8824_v16 = vmax.f32 %v8820_v42, 0.0 }
 0x6bd   : > { %v8826_v19 = vadd.f32 1e-05, %v8821_v22  ;;  %v8828_v53 = vadd.f32 1e-05, %v8823_v7 }
 0x6be   : > { %v8827_v41 = vadd.f32 1e-05, %v8822_v36  ;;  %v8829_v40 = vadd.f32 1e-05, %v8824_v16 }
 0x6bf   : > { %11559 = vrsqrt.f32 %v8826_v19 }
 0x6c0   : > { %11561 = vrsqrt.f32 %v8828_v53 }
 0x6c1   : > { %11563 = vrsqrt.f32 %v8827_v41 }
 0x6c2   : > { %11565 = vrsqrt.f32 %v8829_v40 }
 0x6c9   : > { %v11560_v27 = vpop.eup %11559 }
 0x6ca   : > { %v11562_v25 = vpop.eup %11561 }
 0x6cb   : > { %v11564_v39 = vpop.eup %11563 }
 0x6cc   : > { %v11566_v56 = vpop.eup %11565  ;;  %v8838_v28 = vcombine.low %v11560_v27, %v11564_v39 }
 0x6cd   : > { %v8839_v11 = vcombine.low %v11562_v25, %v11566_v56 }
 0x6ce   : > { %v8846_v55 = vrot.slane %v8838_v28, %v12847_v52 }
 0x6cf   : > { %v8853_v23 = vrot.slane %v8839_v11, %v12847_v52 }
 0x6d1   : > { %v8854_v3 = vcombine.low %v8846_v55, %v8853_v23 }
 0x6d3   : > { %v8861_v57 = vrot.slane %v8854_v3, %v12847_v52 }
 0x6d5   : > { %v8863_v43 = vmul.f32 %v8861_v57, %v8825_v45 }
 0x6d7   : > { %v8878_v29 = vrot.slane %v8863_v43, %v12859_v60  ;;  %v8882_v24 = vrot.slane %v8863_v43, %v12861_v13  ;;  %v8870_v31 = vrot.slane %v8863_v43, %v12855_v50  ;;  %v8874_v32 = vrot.slane %v8863_v43, %v12857_v12 }
 0x6d9   : > { %v8889_v38 = vmul.f32 %v8878_v29, %v8779_v0  ;;  %v8890_v33 = vmul.f32 %v8882_v24, %v8780_v63  ;;  %v8924_v15 = vmul.f32 %v8882_v24, %v13102_v2  ;;  %v8887_v34 = vmul.f32 %v8870_v31, %v8777_v61 }
 0x6da   : > { %v8888_v49 = vmul.f32 %v8874_v32, %v8778_v17  ;;  %v8922_v54 = vmul.f32 %v8874_v32, %v13100_v6  ;;  %v8921_v46 = vmul.f32 %v8870_v31, %v13090_v62  ;;  %v8923_v58 = vmul.f32 %v8878_v29, %v13092_v1 }
 0x6db   : > { %v8896_v47 = vcombine.low %v8889_v38, %v8890_v33 }
 0x6dc   : > { %v8895_v26 = vcombine.low %v8887_v34, %v8888_v49 }
 0x6dd   : > { %v8910_v10 = vrot.slane %v8896_v47, %v12847_v52 }
 0x6de   : > { %v8903_v51 = vrot.slane %v8895_v26, %v12847_v52 }
 0x6e0   : > { %v8911_v5 = vcombine.low %v8903_v51, %v8910_v10 }
 0x6e2   : > { %v8918_v0 = vrot.slane %v8911_v5, %v12847_v52 }
 0x6e4   : > { %v8920_v63 = vsub.f32 %v8865_v14, %v8918_v0 }
 0x6e6   : > { %v8933_v2 = vrot.slane %v8920_v63, %v12857_v12  ;;  %v8941_v61 = vrot.slane %v8920_v63, %v12861_v13  ;;  %v8929_v6 = vrot.slane %v8920_v63, %v12855_v50  ;;  %v8937_v62 = vrot.slane %v8920_v63, %v12859_v60  ;;  %v10478_v13 = vld [vmem:[#allocation14] ss:$0 sm:$0xff] }
 0x6e8   : > { %v8947_v1 = vadd.f32 %v8933_v2, %v8922_v54  ;;  %v8949_v17 = vadd.f32 %v8941_v61, %v8924_v15  ;;  %v8946_v44 = vadd.f32 %v8929_v6, %v8921_v46  ;;  %v8948_v37 = vadd.f32 %v8937_v62, %v8923_v58 }
 0x6ea   : > { %v8951_v9 = vmax.f32 %v8947_v1, 0.0  ;;  %v8953_v35 = vmax.f32 %v8949_v17, 0.0  ;;  %v8950_v18 = vmax.f32 %v8946_v44, 0.0  ;;  %v8952_v59 = vmax.f32 %v8948_v37, 0.0 }
 0x6ec   : > { %v8955_v20 = vpack.c.bf16 %v8951_v9, %v8951_v9  ;;  %v8957_v4 = vpack.c.bf16 %v8953_v35, %v8953_v35  ;;  %v8954_v52 = vpack.c.bf16 %v8950_v18, %v8950_v18  ;;  %v8956_v21 = vpack.c.bf16 %v8952_v59, %v8952_v59 }
 0x6ee   : > { %9253 = vmatprep.mubr.bf16.mxu0 %v8955_v20  ;;  %9293 = vmatprep.mubr.bf16.mxu1 %v8957_v4 }
 0x6ef   : > { %9254 = vmatmul.mubr.bf16.vlgmr.msra.gmra.mrb[4].mxu0 %v8954_v52  ;;  %9294 = vmatmul.mubr.bf16.vlgmr.msra.gmra.mrb[4].mxu1 %v8956_v21 }
 0x7c2   : > { %v10534_v12 = vpop.f32.mrb[4].mxu0  ;;  %v10556_v50 = vpop.f32.mrb[4].mxu1 }
 0x7c3   : > { %v10535_v60 = vpop.f32.mrb[5].mxu0  ;;  %v10557_v8 = vpop.f32.mrb[5].mxu1 }
 0x7c4   : > { %v10536_v30 = vadd.f32 %v10535_v60, %v10534_v12  ;;  %v10558_v48 = vadd.f32 %v10557_v8, %v10556_v50  ;;  %v10537_v42 = vpop.f32.mrb[6].mxu0  ;;  %v10559_v22 = vpop.f32.mrb[6].mxu1 }
 0x7c5   : > { %v10538_v7 = vpop.f32.mrb[7].mxu0  ;;  %v10560_v36 = vpop.f32.mrb[7].mxu1 }
 0x7c6   : > { %v9256_v16 = vadd.f32 %v10536_v30, %v10478_v13 }
 0x7c8   : > { %v9296_v19 = vadd.f32 %v10558_v48, %v9256_v16 }
 0x7ca   : > { %9301 = vst [vmem:[#allocation15] sm:$0xff] %v9296_v19 }
 0x7cb PF: > { %p10680_p2 = scmp.eq.s32.totalorder %s11938_s30, 1  ;;  %s11876_s8 = smov [#allocation15]  }
 0x7cc   : > { %s9309_s20 = sshll.u32 %s11876_s8, 4  ;;  %s9310_s20 = int_to_ptr.vmem [resolvable:$true] %s9309_s20 }
 0x7cd   : > { %s11780_s12 = scalar_lea.vmem %s9310_s20, 128  ;;  %p11787_p11 = scmp.lt.s32.totalorder %s9310_s20, %s9310_s20 }
 0x7ce   : > { %p11781_p9 = scmp.ne.s32.totalorder %s9310_s20, %s11780_s12  ;;  %p11788_p13 = scmp.lt.s32.totalorder %s11780_s12, %s11780_s12 }
 0x7d0   : > { %p11782_p1 = pnand %p11781_p9, %p10680_p2  ;;  %p11789_p6 = por %p11788_p13, %p11787_p11 }
 0x7d2   : > { %p11783_p4 = pneg %p11782_p1 }
 0x7d4   : > { %p11790_p3 = pnand %p11789_p6, %p11783_p4 }
 0x7d6   : > { %11793 = shalt.err (!%p11790_p3)
}
 0x7d7   : > { %s11794_s17 = scalar_lea.hbm %s13175_s7, 128 }
 0x7d8   : > { %p11795_p12 = scmp.ne.s32.totalorder %s13175_s7, %s11794_s17  ;;  %p11800_p8 = scmp.lt.u32.totalorder %s11794_s17, %s13175_s7 }
 0x7da   : > { %p11796_p0 = pnand %p11795_p12, %p10680_p2 }
 0x7dc   : > { %p11797_p5 = pneg %p11796_p0 }
 0x7de   : > { %p11802_p10 = pnand %p11800_p8, %p11797_p5 }
 0x7e0   : > { %11805 = shalt.err (!%p11802_p10)
}
 0x7e1   : > { %10643 = dma.vmem_to_hbm [thread:$0]  (%p10680_p2), %s9310_s20, 128, %s13175_s7, [#allocation5]  }
 0x7e2   : > { %11843 = dma.done.wait (%p10680_p2), [#allocation5], 128  }
 0x7e3   : > { %11845 = vsyncadd (%p10680_p2), [#allocation5], 4294967168 }
 0x7e4 PF: > { %p23_p7 = scmp.ge.s32.totalorder %s12069_s19, 4   ;;  %s13194_s24 = smov %s11852_s25 }
 0x7e5   : > { %s13195_s25 = smov %s11856_s26  ;;  %s13196_s26 = smov %s12080_s29 }
 0x7e6   : > { %s13197_s27 = smov %s12069_s19  ;;  %25 = sbr.rel (!%p23_p7) target bundleno = 10 (0xa), region = 130 }
 0x7ed   :  { %9322 = vsyncpa [#allocation4], 1 }
 0x7ee   :  { %9324 = vsyncpa [#allocation4 + $0x1], 1 }
 0x7ef   :  { %9325 = vsyncpa [#allocation7], 1 }
 0x7f0   :  { %9327 = vsyncpa [#allocation7 + $0x1], 1 }
 0x7f1   :  { %9328 = vsyncpa [#allocation10], 1 }
 0x7f2   :  { %9329 = vsyncpa [#allocation13], 1 }
 0x7f3   :  { %9330 = vsyncpa [#allocation5], 1 }
 0x7f4   :  { %9332 = vsyncpa [#allocation5 + $0x1], 1 }

</bundles_post_ra>
